<compile_context>
chip_gen: v7x
topology: tpu7x:2x2x1
jax: 0.10.0
libtpu: 0.0.40
codegen_flags: <defaults>
</compile_context>

<pallas_src>
import math
from functools import partial

import numpy as np
import jax
import jax.numpy as jnp
from jax import lax
from jax.experimental import pallas as pl
from jax.experimental.pallas import tpu as pltpu

LANE = 128


def _round_up(n, m):
    return ((n + m - 1) // m) * m


def _guard(W):
    # rows of zero padding above/below the flattened plane; >= W+1 and 8-aligned
    return _round_up(W + 1, 8)


def _pad_last(a, n):
    pad = n - a.shape[-1]
    if pad == 0:
        return a
    widths = [(0, 0)] * (a.ndim - 1) + [(0, pad)]
    return jnp.pad(a, widths)


def _chunk_rows(H, W):
    # pixels per conv chunk: a whole number of image rows (so the column-wrap mask
    # repeats identically per chunk), targeting <=128 rows so the per-chunk f32
    # accumulator stays small (perf feedback: avoid a vreg-busting (HW, Cout) acc).
    k = max(1, 128 // W)
    while H % k:
        k -= 1
    return k * W


def _vmem_limit_bytes():
    # generation-aware VMEM budget (v7x has 64 MiB/TC, v5e/v6e have 128 MiB)
    cap = 64 * 1024 * 1024
    try:
        info = pltpu.get_tpu_info()
        cap = int(getattr(info, "vmem_capacity_bytes", cap)) or cap
    except Exception:
        pass
    return max(32 * 1024 * 1024, min(cap * 3 // 4, 96 * 1024 * 1024))


def _compiler_params():
    return pltpu.CompilerParams(
        dimension_semantics=("parallel",),       # batch steps are independent
        vmem_limit_bytes=_vmem_limit_bytes(),
    )


# --------------------------------------------------------------------------
# Kernel 1: all eight AffineBlock MLPs (Linear -> ReLU -> Linear) in ONE launch
# --------------------------------------------------------------------------

def _mlps_kernel(e_ref, w1_ref, b1_ref, w2_ref, b2_ref, o_ref):
    e = e_ref[...]                                      # (B, d_in)
    for m in range(w1_ref.shape[0]):                    # static unroll over the 8 MLPs
        h = jnp.dot(e, w1_ref[m], preferred_element_type=jnp.float32) + b1_ref[m]
        h = jnp.maximum(h, 0.0)
        o_ref[m] = jnp.dot(h, w2_ref[m], preferred_element_type=jnp.float32) + b2_ref[m]


def fused_mlps(sent, p, c_pad):
    # order: s1, t1, s2, t2, s3, t3, s4, t4  (scale = *_g, shift = *_b)
    keys = ['fb1_g', 'fb1_b', 'fb2_g', 'fb2_b', 'fb3_g', 'fb3_b', 'fb4_g', 'fb4_b']
    w1s = jnp.stack([p[k][0] for k in keys])                        # (8, d_in, d_hid)
    b1s = jnp.stack([p[k][1] for k in keys])                        # (8, 1, d_hid)
    w2s = jnp.stack([_pad_last(p[k][2], c_pad) for k in keys])      # (8, d_hid, c_pad)
    b2s = jnp.stack([_pad_last(p[k][3], c_pad) for k in keys])      # (8, 1, c_pad)
    B = sent.shape[0]
    return pl.pallas_call(
        _mlps_kernel,
        out_shape=jax.ShapeDtypeStruct((8, B, c_pad), jnp.float32),
    )(sent, w1s, b1s, w2s, b2s)


# --------------------------------------------------------------------------
# Kernel 2: fused df_block_1 + df_block_2 + shortcut + gamma residual (per batch)
# --------------------------------------------------------------------------

def _modulate(x, s1, t1, s2, t2):
    # (scale*x + shift) -> lrelu(0.2) -> (scale*. + shift) -> lrelu(0.2)   (VPU work)
    h = s1 * x + t1
    h = jnp.where(h > 0, h, 0.2 * h)
    h = s2 * h + t2
    return jnp.where(h > 0, h, 0.2 * h)


def _zero_guards(pad_ref, guard, HW):
    # Only the guard rows need zeroing; interior rows are fully overwritten.
    cin = pad_ref.shape[-1]
    z = jnp.zeros((guard, cin), jnp.float32)
    pad_ref[0:guard, :] = z
    pad_ref[guard + HW:guard + HW + guard, :] = z


def _conv3x3_from_pad(pad_ref, w_ref, b, H, W, emit):
    """3x3 'SAME' conv over the modulated plane already stored in pad_ref's interior.

    pad_ref : (HW + 2*guard, Cin) f32 scratch; guard rows zero, interior rows hold
              the activations.
    emit(r0, val) : consume one (rch, Cout) f32 output chunk starting at pixel r0
                    (the chunk is written to a ref before the next chunk starts).

    The conv is 9 accumulated (rch, Cin)@(Cin, Cout) bf16 MXU matmuls (f32 accum)
    over shifted views of pad_ref; horizontal wrap is masked.
    """
    HW = H * W
    guard = _guard(W)
    cout = w_ref.shape[-1]
    rch = _chunk_rows(H, W)

    # column-wrap masks at (rch, 1); jnp.where broadcasts them over channels.
    col = lax.broadcasted_iota(jnp.int32, (rch, 1), 0) % W
    mask_l = col >= 1            # reading one pixel to the left stays in the row
    mask_r = col <= W - 2        # reading one pixel to the right stays in the row

    for r0 in range(0, HW, rch):                      # static chunk loop
        acc = jnp.zeros((rch, cout), jnp.float32)
        for ky in range(3):
            for kx in range(3):
                off = (ky - 1) * W + (kx - 1)
                sh = pad_ref[guard + r0 + off:guard + r0 + off + rch, :]
                if kx == 0:
                    sh = jnp.where(mask_l, sh, 0.0)
                elif kx == 2:
                    sh = jnp.where(mask_r, sh, 0.0)
                acc = acc + jnp.dot(sh.astype(jnp.bfloat16), w_ref[ky * 3 + kx],
                                    preferred_element_type=jnp.float32)
        emit(r0, acc + b)


def _resblock_kernel(H, W, has_sc,
                     x_ref, st_ref, w1_ref, b1_ref, w2_ref, b2_ref,
                     wsc_ref, bsc_ref, gamma_ref,
                     o_ref, pad1_ref, pad2_ref):
    HW = H * W
    guard = _guard(W)
    c1p = x_ref.shape[-1]
    c2p = o_ref.shape[-1]

    # packed per-sample scale/shift vectors: rows = (s1, t1, s2, t2, s3, t3, s4, t4)
    st = st_ref[0]                                            # (8, cmax)
    s1, t1, s2, t2 = (st[i:i + 1, :c1p] for i in range(4))
    s3, t3, s4, t4 = (st[i:i + 1, :c2p] for i in range(4, 8))

    # ---- stage 1: modulate x and lay it into the zero-guarded conv scratch ----
    _zero_guards(pad1_ref, guard, HW)
    _zero_guards(pad2_ref, guard, HW)
    pad1_ref[guard:guard + HW, :] = _modulate(x_ref[0], s1, t1, s2, t2)

    # ---- conv1, fused with stage-2 modulation, streamed chunkwise into pad2 ----
    def emit1(r0, conv1_chunk):
        n = conv1_chunk.shape[0]
        pad2_ref[guard + r0:guard + r0 + n, :] = _modulate(conv1_chunk, s3, t3, s4, t4)

    _conv3x3_from_pad(pad1_ref, w1_ref, b1_ref[...], H, W, emit1)

    # ---- shortcut (1x1 conv as a channel matmul, or identity with no matmul) ----
    if has_sc:
        sc = jnp.dot(x_ref[0].astype(jnp.bfloat16), wsc_ref[...],
                     preferred_element_type=jnp.float32) + bsc_ref[...]
    else:
        sc = x_ref[0]            # identity shortcut: c1p == c2p, skip the matmul
    g = gamma_ref[0, 0]

    # ---- conv2 + gamma-scaled residual combine, streamed chunkwise to the output ----
    def emit2(r0, conv2_chunk):
        n = conv2_chunk.shape[0]
        out_chunk = sc[r0:r0 + n, :] + g * conv2_chunk
        o_ref[:, r0:r0 + n, :] = out_chunk[None]

    _conv3x3_from_pad(pad2_ref, w2_ref, b2_ref[...], H, W, emit2)


def resblock_fused(x, st, w1, b1, w2, b2, w_sc, b_sc, gamma, H, W, has_sc):
    B, HW, c1p = x.shape
    c2p = w1.shape[-1]
    cmax = st.shape[-1]
    guard = _guard(W)
    return pl.pallas_call(
        partial(_resblock_kernel, H, W, has_sc),
        out_shape=jax.ShapeDtypeStruct((B, HW, c2p), jnp.float32),
        grid=(B,),
        in_specs=[
            pl.BlockSpec((1, HW, c1p), lambda b: (b, 0, 0)),        # x (channels-last)
            pl.BlockSpec((1, 8, cmax), lambda b: (b, 0, 0)),        # packed scale/shift
            pl.BlockSpec((9, c1p, c2p), lambda b: (0, 0, 0)),       # conv1 taps (bf16)
            pl.BlockSpec((1, c2p), lambda b: (0, 0)),               # conv1 bias
            pl.BlockSpec((9, c2p, c2p), lambda b: (0, 0, 0)),       # conv2 taps (bf16)
            pl.BlockSpec((1, c2p), lambda b: (0, 0)),               # conv2 bias
            pl.BlockSpec((c1p, c2p), lambda b: (0, 0)),             # shortcut weight (bf16)
            pl.BlockSpec((1, c2p), lambda b: (0, 0)),               # shortcut bias
            pl.BlockSpec(memory_space=pltpu.MemorySpace.SMEM),      # gamma scalar
        ],
        out_specs=pl.BlockSpec((1, HW, c2p), lambda b: (b, 0, 0)),
        scratch_shapes=[pltpu.VMEM((HW + 2 * guard, c1p), jnp.float32),
                        pltpu.VMEM((HW + 2 * guard, c2p), jnp.float32)],
        compiler_params=_compiler_params(),
    )(x, st, w1, b1, w2, b2, w_sc, b_sc, gamma)


# ----------------------------- wrapper -----------------------------

@jax.jit
def residual_block_g(x_nchw, sent, p):
    B, C1, H, W = x_nchw.shape
    HW = H * W
    C2 = p['conv1_w'].shape[-1]
    c1p = _round_up(C1, LANE)
    c2p = _round_up(C2, LANE)
    cmax = max(c1p, c2p)
    has_sc = 'sc_w' in p

    # NCHW -> (B, H*W, C), channels zero-padded to the lane width (lane-dense stores,
    # 128-aligned MXU K/N).  Padded channels stay exactly zero through the whole block.
    x = jnp.transpose(x_nchw, (0, 2, 3, 1)).reshape(B, HW, C1)
    x = _pad_last(x, c1p)

    # all 8 gamma/beta MLPs in one kernel launch, packed as one (B, 8, cmax) tensor
    st = fused_mlps(sent, p, cmax)                               # (8, B, cmax)
    st = jnp.transpose(st, (1, 0, 2))                            # (B, 8, cmax)

    # conv weights as 9 taps (ky*3+kx, Cin, Cout), channel-padded with zeros, bf16 for MXU
    w1 = _pad_last(jnp.pad(p['conv1_w'].reshape(9, C1, C2),
                           ((0, 0), (0, c1p - C1), (0, 0))), c2p).astype(jnp.bfloat16)
    b1 = _pad_last(p['conv1_b'], c2p)
    w2 = _pad_last(jnp.pad(p['conv2_w'].reshape(9, C2, C2),
                           ((0, 0), (0, c2p - C2), (0, 0))), c2p).astype(jnp.bfloat16)
    b2 = _pad_last(p['conv2_b'], c2p)

    if has_sc:
        w_sc = _pad_last(jnp.pad(p['sc_w'], ((0, c1p - C1), (0, 0))), c2p).astype(jnp.bfloat16)
        b_sc = _pad_last(p['sc_b'], c2p)
    else:
        # identity shortcut: the kernel adds x directly; these are unused placeholders
        w_sc = jnp.zeros((c1p, c2p), jnp.bfloat16)
        b_sc = jnp.zeros((1, c2p), jnp.float32)

    # Note: full H*W plane per batch block; very large feature maps would be tiled
    # along rows (with a 1-row halo per conv stage) to respect per-generation VMEM.
    out = resblock_fused(x, st, w1, b1, w2, b2, w_sc, b_sc, p['gamma'],
                         H, W, has_sc)                            # (B, HW, c2p)

    out = out.reshape(B, H, W, c2p)[..., :C2]
    return jnp.transpose(out, (0, 3, 1, 2))


# ----------------------------- parameters -----------------------------

def make_params(key, c1, c2, d_in, d_hid):
    keys = iter(jax.random.split(key, 32))

    def xavier(shape):  # (fan_in, fan_out) layout, y = x @ W + b
        fan_in, fan_out = shape
        std = math.sqrt(2.0 / (fan_in + fan_out))
        return std * jax.random.normal(next(keys), shape, jnp.float32)

    def mlp_params(dout):
        return (xavier((d_in, d_hid)), jnp.zeros((1, d_hid), jnp.float32),
                xavier((d_hid, dout)), jnp.zeros((1, dout), jnp.float32))

    p = {}
    p['fb1_g'] = mlp_params(c1); p['fb1_b'] = mlp_params(c1)
    p['fb2_g'] = mlp_params(c1); p['fb2_b'] = mlp_params(c1)
    p['fb3_g'] = mlp_params(c2); p['fb3_b'] = mlp_params(c2)
    p['fb4_g'] = mlp_params(c2); p['fb4_b'] = mlp_params(c2)
    p['conv1_w'] = 0.1 * jax.random.normal(next(keys), (3, 3, c1, c2), jnp.float32)  # HWIO
    p['conv1_b'] = 0.1 * jax.random.normal(next(keys), (1, c2), jnp.float32)
    p['conv2_w'] = 0.1 * jax.random.normal(next(keys), (3, 3, c2, c2), jnp.float32)
    p['conv2_b'] = 0.1 * jax.random.normal(next(keys), (1, c2), jnp.float32)
    if c1 != c2:
        p['sc_w'] = 0.1 * jax.random.normal(next(keys), (c1, c2), jnp.float32)  # 1x1 conv
        p['sc_b'] = 0.1 * jax.random.normal(next(keys), (1, c2), jnp.float32)
    # PyTorch initializes gamma to 0; use a nonzero value here so the residual
    # path is actually exercised by the correctness check (production init = 0).
    p['gamma'] = jnp.full((1, 1), 0.3, jnp.float32)
    return p


# ----------------------------- pure-JAX reference -----------------------------

def reference(x_nchw, sent, p):
    hi = lax.Precision.HIGHEST

    def mlp_ref(e, w1, b1, w2, b2):
        h = jnp.maximum(jnp.dot(e, w1, precision=hi) + b1, 0.0)
        return jnp.dot(h, w2, precision=hi) + b2

    def affine(h, s, t):
        return s[:, None, None, :] * h + t[:, None, None, :]

    def lrelu(h):
        return jnp.where(h > 0, h, 0.2 * h)

    def conv(h, w, b):
        y = lax.conv_general_dilated(h, w, (1, 1), 'SAME',
                                     dimension_numbers=('NHWC', 'HWIO', 'NHWC'),
                                     precision=hi)
        return y + b.reshape(1, 1, 1, -1)

    x = jnp.transpose(x_nchw, (0, 2, 3, 1))  # NHWC
    h = lrelu(affine(x, mlp_ref(sent, *p['fb1_g']), mlp_ref(sent, *p['fb1_b'])))
    h = lrelu(affine(h, mlp_ref(sent, *p['fb2_g']), mlp_ref(sent, *p['fb2_b'])))
    h = conv(h, p['conv1_w'], p['conv1_b'])
    h = lrelu(affine(h, mlp_ref(sent, *p['fb3_g']), mlp_ref(sent, *p['fb3_b'])))
    h = lrelu(affine(h, mlp_ref(sent, *p['fb4_g']), mlp_ref(sent, *p['fb4_b'])))
    h = conv(h, p['conv2_w'], p['conv2_b'])
    if 'sc_w' in p:
        sc = jnp.einsum('bhwc,cd->bhwd', x, p['sc_w'], precision=hi) + p['sc_b'].reshape(1, 1, 1, -1)
    else:
        sc = x
    out = sc + p['gamma'][0, 0] * h
    return jnp.transpose(out, (0, 3, 1, 2))


# ----------------------------- main -----------------------------

if __name__ == "__main__":
    B, C1, C2, H, W = 2, 4, 8, 16, 16   # df_1_c_out=4, df_2_c_out=8 -> scale_conv present
    D_IN, D_HID = 32, 32                # sentence-embed dim (df_1_c_in) / affine_h_d

    key = jax.random.PRNGKey(0)
    kx, ks, kp = jax.random.split(key, 3)
    x = jax.random.normal(kx, (B, C1, H, W), jnp.float32)          # NCHW, like PyTorch
    sentence_embed = jax.random.normal(ks, (B, D_IN), jnp.float32)
    params = make_params(kp, C1, C2, D_IN, D_HID)

    out = jax.block_until_ready(residual_block_g(x, sentence_embed, params))
    ref = jax.block_until_ready(reference(x, sentence_embed, params))

    assert out.shape == (B, C2, H, W), out.shape
    np.testing.assert_allclose(np.asarray(out), np.asarray(ref), atol=2e-2, rtol=2e-2)
    print("KERNEL_OK")
</pallas_src>

<mosaic_0001>
module attributes {stable_mosaic.version = 11 : i64} {
  func.func @_mlps_kernel(%arg0: memref<2x32xf32, #tpu.memory_space<vmem>>, %arg1: memref<8x32x32xf32, #tpu.memory_space<vmem>>, %arg2: memref<8x1x32xf32, #tpu.memory_space<vmem>>, %arg3: memref<8x32x128xf32, #tpu.memory_space<vmem>>, %arg4: memref<8x1x128xf32, #tpu.memory_space<vmem>>, %arg5: memref<8x2x128xf32, #tpu.memory_space<vmem>>) attributes {dimension_semantics = [], scalar_prefetch = 0 : i64, scratch_operands = 0 : i64, tpu.core_type = #tpu.core_type<tc>} {
    %c0 = arith.constant 0 : index
    %c0_0 = arith.constant 0 : index
    %0 = vector.load %arg0[%c0, %c0_0] : memref<2x32xf32, #tpu.memory_space<vmem>>, vector<2x32xf32>
    %c0_1 = arith.constant 0 : index
    %c0_2 = arith.constant 0 : index
    %c0_3 = arith.constant 0 : index
    %1 = vector.load %arg1[%c0_1, %c0_2, %c0_3] : memref<8x32x32xf32, #tpu.memory_space<vmem>>, vector<1x32x32xf32>
    %2 = vector.shape_cast %1 : vector<1x32x32xf32> to vector<32x32xf32>
    %cst = arith.constant dense<0.000000e+00> : vector<2x32xf32>
    %3 = tpu.matmul %0, %2, %cst {dimension_numbers = #tpu.dot_dimension_numbers<[1], [0], [0], [1], [0, 0, 1, 1], [], []>} : vector<2x32xf32>, vector<32x32xf32>, vector<2x32xf32> -> vector<2x32xf32>
    %c0_4 = arith.constant 0 : index
    %c0_5 = arith.constant 0 : index
    %c0_6 = arith.constant 0 : index
    %4 = vector.load %arg2[%c0_4, %c0_5, %c0_6] : memref<8x1x32xf32, #tpu.memory_space<vmem>>, vector<1x1x32xf32>
    %5 = vector.shape_cast %4 : vector<1x1x32xf32> to vector<1x32xf32>
    %6 = vector.broadcast %5 : vector<1x32xf32> to vector<2x32xf32>
    %7 = arith.addf %3, %6 : vector<2x32xf32>
    %cst_7 = arith.constant 0.000000e+00 : f32
    %8 = vector.broadcast %cst_7 : f32 to vector<2x32xf32>
    %9 = arith.maximumf %7, %8 : vector<2x32xf32>
    %c0_8 = arith.constant 0 : index
    %c0_9 = arith.constant 0 : index
    %c0_10 = arith.constant 0 : index
    %10 = vector.load %arg3[%c0_8, %c0_9, %c0_10] : memref<8x32x128xf32, #tpu.memory_space<vmem>>, vector<1x32x128xf32>
    %11 = vector.shape_cast %10 : vector<1x32x128xf32> to vector<32x128xf32>
    %cst_11 = arith.constant dense<0.000000e+00> : vector<2x128xf32>
    %12 = tpu.matmul %9, %11, %cst_11 {dimension_numbers = #tpu.dot_dimension_numbers<[1], [0], [0], [1], [0, 0, 1, 1], [], []>} : vector<2x32xf32>, vector<32x128xf32>, vector<2x128xf32> -> vector<2x128xf32>
    %c0_12 = arith.constant 0 : index
    %c0_13 = arith.constant 0 : index
    %c0_14 = arith.constant 0 : index
    %13 = vector.load %arg4[%c0_12, %c0_13, %c0_14] : memref<8x1x128xf32, #tpu.memory_space<vmem>>, vector<1x1x128xf32>
    %14 = vector.shape_cast %13 : vector<1x1x128xf32> to vector<1x128xf32>
    %15 = vector.broadcast %14 : vector<1x128xf32> to vector<2x128xf32>
    %16 = arith.addf %12, %15 : vector<2x128xf32>
    %c0_15 = arith.constant 0 : index
    %c0_16 = arith.constant 0 : index
    %c0_17 = arith.constant 0 : index
    %17 = vector.load %arg5[%c0_15, %c0_16, %c0_17] : memref<8x2x128xf32, #tpu.memory_space<vmem>>, vector<1x2x128xf32>
    %18 = vector.shape_cast %17 : vector<1x2x128xf32> to vector<2x128xf32>
    %19 = vector.shape_cast %16 : vector<2x128xf32> to vector<1x2x128xf32>
    tpu.vector_store %arg5[%c0_15, %c0_16, %c0_17], %19 {strides = array<i32>} : memref<8x2x128xf32, #tpu.memory_space<vmem>>, vector<1x2x128xf32>,
    %c1 = arith.constant 1 : index
    %c0_18 = arith.constant 0 : index
    %c0_19 = arith.constant 0 : index
    %20 = vector.load %arg1[%c1, %c0_18, %c0_19] : memref<8x32x32xf32, #tpu.memory_space<vmem>>, vector<1x32x32xf32>
    %21 = vector.shape_cast %20 : vector<1x32x32xf32> to vector<32x32xf32>
    %cst_20 = arith.constant dense<0.000000e+00> : vector<2x32xf32>
    %22 = tpu.matmul %0, %21, %cst_20 {dimension_numbers = #tpu.dot_dimension_numbers<[1], [0], [0], [1], [0, 0, 1, 1], [], []>} : vector<2x32xf32>, vector<32x32xf32>, vector<2x32xf32> -> vector<2x32xf32>
    %c1_21 = arith.constant 1 : index
    %c0_22 = arith.constant 0 : index
    %c0_23 = arith.constant 0 : index
    %23 = vector.load %arg2[%c1_21, %c0_22, %c0_23] : memref<8x1x32xf32, #tpu.memory_space<vmem>>, vector<1x1x32xf32>
    %24 = vector.shape_cast %23 : vector<1x1x32xf32> to vector<1x32xf32>
    %25 = vector.broadcast %24 : vector<1x32xf32> to vector<2x32xf32>
    %26 = arith.addf %22, %25 : vector<2x32xf32>
    %cst_24 = arith.constant 0.000000e+00 : f32
    %27 = vector.broadcast %cst_24 : f32 to vector<2x32xf32>
    %28 = arith.maximumf %26, %27 : vector<2x32xf32>
    %c1_25 = arith.constant 1 : index
    %c0_26 = arith.constant 0 : index
    %c0_27 = arith.constant 0 : index
    %29 = vector.load %arg3[%c1_25, %c0_26, %c0_27] : memref<8x32x128xf32, #tpu.memory_space<vmem>>, vector<1x32x128xf32>
    %30 = vector.shape_cast %29 : vector<1x32x128xf32> to vector<32x128xf32>
    %cst_28 = arith.constant dense<0.000000e+00> : vector<2x128xf32>
    %31 = tpu.matmul %28, %30, %cst_28 {dimension_numbers = #tpu.dot_dimension_numbers<[1], [0], [0], [1], [0, 0, 1, 1], [], []>} : vector<2x32xf32>, vector<32x128xf32>, vector<2x128xf32> -> vector<2x128xf32>
    %c1_29 = arith.constant 1 : index
    %c0_30 = arith.constant 0 : index
    %c0_31 = arith.constant 0 : index
    %32 = vector.load %arg4[%c1_29, %c0_30, %c0_31] : memref<8x1x128xf32, #tpu.memory_space<vmem>>, vector<1x1x128xf32>
    %33 = vector.shape_cast %32 : vector<1x1x128xf32> to vector<1x128xf32>
    %34 = vector.broadcast %33 : vector<1x128xf32> to vector<2x128xf32>
    %35 = arith.addf %31, %34 : vector<2x128xf32>
    %c1_32 = arith.constant 1 : index
    %c0_33 = arith.constant 0 : index
    %c0_34 = arith.constant 0 : index
    %36 = vector.load %arg5[%c1_32, %c0_33, %c0_34] : memref<8x2x128xf32, #tpu.memory_space<vmem>>, vector<1x2x128xf32>
    %37 = vector.shape_cast %36 : vector<1x2x128xf32> to vector<2x128xf32>
    %38 = vector.shape_cast %35 : vector<2x128xf32> to vector<1x2x128xf32>
    tpu.vector_store %arg5[%c1_32, %c0_33, %c0_34], %38 {strides = array<i32>} : memref<8x2x128xf32, #tpu.memory_space<vmem>>, vector<1x2x128xf32>,
    %c2 = arith.constant 2 : index
    %c0_35 = arith.constant 0 : index
    %c0_36 = arith.constant 0 : index
    %39 = vector.load %arg1[%c2, %c0_35, %c0_36] : memref<8x32x32xf32, #tpu.memory_space<vmem>>, vector<1x32x32xf32>
    %40 = vector.shape_cast %39 : vector<1x32x32xf32> to vector<32x32xf32>
    %cst_37 = arith.constant dense<0.000000e+00> : vector<2x32xf32>
    %41 = tpu.matmul %0, %40, %cst_37 {dimension_numbers = #tpu.dot_dimension_numbers<[1], [0], [0], [1], [0, 0, 1, 1], [], []>} : vector<2x32xf32>, vector<32x32xf32>, vector<2x32xf32> -> vector<2x32xf32>
    %c2_38 = arith.constant 2 : index
    %c0_39 = arith.constant 0 : index
    %c0_40 = arith.constant 0 : index
    %42 = vector.load %arg2[%c2_38, %c0_39, %c0_40] : memref<8x1x32xf32, #tpu.memory_space<vmem>>, vector<1x1x32xf32>
    %43 = vector.shape_cast %42 : vector<1x1x32xf32> to vector<1x32xf32>
    %44 = vector.broadcast %43 : vector<1x32xf32> to vector<2x32xf32>
    %45 = arith.addf %41, %44 : vector<2x32xf32>
    %cst_41 = arith.constant 0.000000e+00 : f32
    %46 = vector.broadcast %cst_41 : f32 to vector<2x32xf32>
    %47 = arith.maximumf %45, %46 : vector<2x32xf32>
    %c2_42 = arith.constant 2 : index
    %c0_43 = arith.constant 0 : index
    %c0_44 = arith.constant 0 : index
    %48 = vector.load %arg3[%c2_42, %c0_43, %c0_44] : memref<8x32x128xf32, #tpu.memory_space<vmem>>, vector<1x32x128xf32>
    %49 = vector.shape_cast %48 : vector<1x32x128xf32> to vector<32x128xf32>
    %cst_45 = arith.constant dense<0.000000e+00> : vector<2x128xf32>
    %50 = tpu.matmul %47, %49, %cst_45 {dimension_numbers = #tpu.dot_dimension_numbers<[1], [0], [0], [1], [0, 0, 1, 1], [], []>} : vector<2x32xf32>, vector<32x128xf32>, vector<2x128xf32> -> vector<2x128xf32>
    %c2_46 = arith.constant 2 : index
    %c0_47 = arith.constant 0 : index
    %c0_48 = arith.constant 0 : index
    %51 = vector.load %arg4[%c2_46, %c0_47, %c0_48] : memref<8x1x128xf32, #tpu.memory_space<vmem>>, vector<1x1x128xf32>
    %52 = vector.shape_cast %51 : vector<1x1x128xf32> to vector<1x128xf32>
    %53 = vector.broadcast %52 : vector<1x128xf32> to vector<2x128xf32>
    %54 = arith.addf %50, %53 : vector<2x128xf32>
    %c2_49 = arith.constant 2 : index
    %c0_50 = arith.constant 0 : index
    %c0_51 = arith.constant 0 : index
    %55 = vector.load %arg5[%c2_49, %c0_50, %c0_51] : memref<8x2x128xf32, #tpu.memory_space<vmem>>, vector<1x2x128xf32>
    %56 = vector.shape_cast %55 : vector<1x2x128xf32> to vector<2x128xf32>
    %57 = vector.shape_cast %54 : vector<2x128xf32> to vector<1x2x128xf32>
    tpu.vector_store %arg5[%c2_49, %c0_50, %c0_51], %57 {strides = array<i32>} : memref<8x2x128xf32, #tpu.memory_space<vmem>>, vector<1x2x128xf32>,
    %c3 = arith.constant 3 : index
    %c0_52 = arith.constant 0 : index
    %c0_53 = arith.constant 0 : index
    %58 = vector.load %arg1[%c3, %c0_52, %c0_53] : memref<8x32x32xf32, #tpu.memory_space<vmem>>, vector<1x32x32xf32>
    %59 = vector.shape_cast %58 : vector<1x32x32xf32> to vector<32x32xf32>
    %cst_54 = arith.constant dense<0.000000e+00> : vector<2x32xf32>
    %60 = tpu.matmul %0, %59, %cst_54 {dimension_numbers = #tpu.dot_dimension_numbers<[1], [0], [0], [1], [0, 0, 1, 1], [], []>} : vector<2x32xf32>, vector<32x32xf32>, vector<2x32xf32> -> vector<2x32xf32>
    %c3_55 = arith.constant 3 : index
    %c0_56 = arith.constant 0 : index
    %c0_57 = arith.constant 0 : index
    %61 = vector.load %arg2[%c3_55, %c0_56, %c0_57] : memref<8x1x32xf32, #tpu.memory_space<vmem>>, vector<1x1x32xf32>
    %62 = vector.shape_cast %61 : vector<1x1x32xf32> to vector<1x32xf32>
    %63 = vector.broadcast %62 : vector<1x32xf32> to vector<2x32xf32>
    %64 = arith.addf %60, %63 : vector<2x32xf32>
    %cst_58 = arith.constant 0.000000e+00 : f32
    %65 = vector.broadcast %cst_58 : f32 to vector<2x32xf32>
    %66 = arith.maximumf %64, %65 : vector<2x32xf32>
    %c3_59 = arith.constant 3 : index
    %c0_60 = arith.constant 0 : index
    %c0_61 = arith.constant 0 : index
    %67 = vector.load %arg3[%c3_59, %c0_60, %c0_61] : memref<8x32x128xf32, #tpu.memory_space<vmem>>, vector<1x32x128xf32>
    %68 = vector.shape_cast %67 : vector<1x32x128xf32> to vector<32x128xf32>
    %cst_62 = arith.constant dense<0.000000e+00> : vector<2x128xf32>
    %69 = tpu.matmul %66, %68, %cst_62 {dimension_numbers = #tpu.dot_dimension_numbers<[1], [0], [0], [1], [0, 0, 1, 1], [], []>} : vector<2x32xf32>, vector<32x128xf32>, vector<2x128xf32> -> vector<2x128xf32>
    %c3_63 = arith.constant 3 : index
    %c0_64 = arith.constant 0 : index
    %c0_65 = arith.constant 0 : index
    %70 = vector.load %arg4[%c3_63, %c0_64, %c0_65] : memref<8x1x128xf32, #tpu.memory_space<vmem>>, vector<1x1x128xf32>
    %71 = vector.shape_cast %70 : vector<1x1x128xf32> to vector<1x128xf32>
    %72 = vector.broadcast %71 : vector<1x128xf32> to vector<2x128xf32>
    %73 = arith.addf %69, %72 : vector<2x128xf32>
    %c3_66 = arith.constant 3 : index
    %c0_67 = arith.constant 0 : index
    %c0_68 = arith.constant 0 : index
    %74 = vector.load %arg5[%c3_66, %c0_67, %c0_68] : memref<8x2x128xf32, #tpu.memory_space<vmem>>, vector<1x2x128xf32>
    %75 = vector.shape_cast %74 : vector<1x2x128xf32> to vector<2x128xf32>
    %76 = vector.shape_cast %73 : vector<2x128xf32> to vector<1x2x128xf32>
    tpu.vector_store %arg5[%c3_66, %c0_67, %c0_68], %76 {strides = array<i32>} : memref<8x2x128xf32, #tpu.memory_space<vmem>>, vector<1x2x128xf32>,
    %c4 = arith.constant 4 : index
    %c0_69 = arith.constant 0 : index
    %c0_70 = arith.constant 0 : index
    %77 = vector.load %arg1[%c4, %c0_69, %c0_70] : memref<8x32x32xf32, #tpu.memory_space<vmem>>, vector<1x32x32xf32>
    %78 = vector.shape_cast %77 : vector<1x32x32xf32> to vector<32x32xf32>
    %cst_71 = arith.constant dense<0.000000e+00> : vector<2x32xf32>
    %79 = tpu.matmul %0, %78, %cst_71 {dimension_numbers = #tpu.dot_dimension_numbers<[1], [0], [0], [1], [0, 0, 1, 1], [], []>} : vector<2x32xf32>, vector<32x32xf32>, vector<2x32xf32> -> vector<2x32xf32>
    %c4_72 = arith.constant 4 : index
    %c0_73 = arith.constant 0 : index
    %c0_74 = arith.constant 0 : index
    %80 = vector.load %arg2[%c4_72, %c0_73, %c0_74] : memref<8x1x32xf32, #tpu.memory_space<vmem>>, vector<1x1x32xf32>
    %81 = vector.shape_cast %80 : vector<1x1x32xf32> to vector<1x32xf32>
    %82 = vector.broadcast %81 : vector<1x32xf32> to vector<2x32xf32>
    %83 = arith.addf %79, %82 : vector<2x32xf32>
    %cst_75 = arith.constant 0.000000e+00 : f32
    %84 = vector.broadcast %cst_75 : f32 to vector<2x32xf32>
    %85 = arith.maximumf %83, %84 : vector<2x32xf32>
    %c4_76 = arith.constant 4 : index
    %c0_77 = arith.constant 0 : index
    %c0_78 = arith.constant 0 : index
    %86 = vector.load %arg3[%c4_76, %c0_77, %c0_78] : memref<8x32x128xf32, #tpu.memory_space<vmem>>, vector<1x32x128xf32>
    %87 = vector.shape_cast %86 : vector<1x32x128xf32> to vector<32x128xf32>
    %cst_79 = arith.constant dense<0.000000e+00> : vector<2x128xf32>
    %88 = tpu.matmul %85, %87, %cst_79 {dimension_numbers = #tpu.dot_dimension_numbers<[1], [0], [0], [1], [0, 0, 1, 1], [], []>} : vector<2x32xf32>, vector<32x128xf32>, vector<2x128xf32> -> vector<2x128xf32>
    %c4_80 = arith.constant 4 : index
    %c0_81 = arith.constant 0 : index
    %c0_82 = arith.constant 0 : index
    %89 = vector.load %arg4[%c4_80, %c0_81, %c0_82] : memref<8x1x128xf32, #tpu.memory_space<vmem>>, vector<1x1x128xf32>
    %90 = vector.shape_cast %89 : vector<1x1x128xf32> to vector<1x128xf32>
    %91 = vector.broadcast %90 : vector<1x128xf32> to vector<2x128xf32>
    %92 = arith.addf %88, %91 : vector<2x128xf32>
    %c4_83 = arith.constant 4 : index
    %c0_84 = arith.constant 0 : index
    %c0_85 = arith.constant 0 : index
    %93 = vector.load %arg5[%c4_83, %c0_84, %c0_85] : memref<8x2x128xf32, #tpu.memory_space<vmem>>, vector<1x2x128xf32>
    %94 = vector.shape_cast %93 : vector<1x2x128xf32> to vector<2x128xf32>
    %95 = vector.shape_cast %92 : vector<2x128xf32> to vector<1x2x128xf32>
    tpu.vector_store %arg5[%c4_83, %c0_84, %c0_85], %95 {strides = array<i32>} : memref<8x2x128xf32, #tpu.memory_space<vmem>>, vector<1x2x128xf32>,
    %c5 = arith.constant 5 : index
    %c0_86 = arith.constant 0 : index
    %c0_87 = arith.constant 0 : index
    %96 = vector.load %arg1[%c5, %c0_86, %c0_87] : memref<8x32x32xf32, #tpu.memory_space<vmem>>, vector<1x32x32xf32>
    %97 = vector.shape_cast %96 : vector<1x32x32xf32> to vector<32x32xf32>
    %cst_88 = arith.constant dense<0.000000e+00> : vector<2x32xf32>
    %98 = tpu.matmul %0, %97, %cst_88 {dimension_numbers = #tpu.dot_dimension_numbers<[1], [0], [0], [1], [0, 0, 1, 1], [], []>} : vector<2x32xf32>, vector<32x32xf32>, vector<2x32xf32> -> vector<2x32xf32>
    %c5_89 = arith.constant 5 : index
    %c0_90 = arith.constant 0 : index
    %c0_91 = arith.constant 0 : index
    %99 = vector.load %arg2[%c5_89, %c0_90, %c0_91] : memref<8x1x32xf32, #tpu.memory_space<vmem>>, vector<1x1x32xf32>
    %100 = vector.shape_cast %99 : vector<1x1x32xf32> to vector<1x32xf32>
    %101 = vector.broadcast %100 : vector<1x32xf32> to vector<2x32xf32>
    %102 = arith.addf %98, %101 : vector<2x32xf32>
    %cst_92 = arith.constant 0.000000e+00 : f32
    %103 = vector.broadcast %cst_92 : f32 to vector<2x32xf32>
    %104 = arith.maximumf %102, %103 : vector<2x32xf32>
    %c5_93 = arith.constant 5 : index
    %c0_94 = arith.constant 0 : index
    %c0_95 = arith.constant 0 : index
    %105 = vector.load %arg3[%c5_93, %c0_94, %c0_95] : memref<8x32x128xf32, #tpu.memory_space<vmem>>, vector<1x32x128xf32>
    %106 = vector.shape_cast %105 : vector<1x32x128xf32> to vector<32x128xf32>
    %cst_96 = arith.constant dense<0.000000e+00> : vector<2x128xf32>
    %107 = tpu.matmul %104, %106, %cst_96 {dimension_numbers = #tpu.dot_dimension_numbers<[1], [0], [0], [1], [0, 0, 1, 1], [], []>} : vector<2x32xf32>, vector<32x128xf32>, vector<2x128xf32> -> vector<2x128xf32>
    %c5_97 = arith.constant 5 : index
    %c0_98 = arith.constant 0 : index
    %c0_99 = arith.constant 0 : index
    %108 = vector.load %arg4[%c5_97, %c0_98, %c0_99] : memref<8x1x128xf32, #tpu.memory_space<vmem>>, vector<1x1x128xf32>
    %109 = vector.shape_cast %108 : vector<1x1x128xf32> to vector<1x128xf32>
    %110 = vector.broadcast %109 : vector<1x128xf32> to vector<2x128xf32>
    %111 = arith.addf %107, %110 : vector<2x128xf32>
    %c5_100 = arith.constant 5 : index
    %c0_101 = arith.constant 0 : index
    %c0_102 = arith.constant 0 : index
    %112 = vector.load %arg5[%c5_100, %c0_101, %c0_102] : memref<8x2x128xf32, #tpu.memory_space<vmem>>, vector<1x2x128xf32>
    %113 = vector.shape_cast %112 : vector<1x2x128xf32> to vector<2x128xf32>
    %114 = vector.shape_cast %111 : vector<2x128xf32> to vector<1x2x128xf32>
    tpu.vector_store %arg5[%c5_100, %c0_101, %c0_102], %114 {strides = array<i32>} : memref<8x2x128xf32, #tpu.memory_space<vmem>>, vector<1x2x128xf32>,
    %c6 = arith.constant 6 : index
    %c0_103 = arith.constant 0 : index
    %c0_104 = arith.constant 0 : index
    %115 = vector.load %arg1[%c6, %c0_103, %c0_104] : memref<8x32x32xf32, #tpu.memory_space<vmem>>, vector<1x32x32xf32>
    %116 = vector.shape_cast %115 : vector<1x32x32xf32> to vector<32x32xf32>
    %cst_105 = arith.constant dense<0.000000e+00> : vector<2x32xf32>
    %117 = tpu.matmul %0, %116, %cst_105 {dimension_numbers = #tpu.dot_dimension_numbers<[1], [0], [0], [1], [0, 0, 1, 1], [], []>} : vector<2x32xf32>, vector<32x32xf32>, vector<2x32xf32> -> vector<2x32xf32>
    %c6_106 = arith.constant 6 : index
    %c0_107 = arith.constant 0 : index
    %c0_108 = arith.constant 0 : index
    %118 = vector.load %arg2[%c6_106, %c0_107, %c0_108] : memref<8x1x32xf32, #tpu.memory_space<vmem>>, vector<1x1x32xf32>
    %119 = vector.shape_cast %118 : vector<1x1x32xf32> to vector<1x32xf32>
    %120 = vector.broadcast %119 : vector<1x32xf32> to vector<2x32xf32>
    %121 = arith.addf %117, %120 : vector<2x32xf32>
    %cst_109 = arith.constant 0.000000e+00 : f32
    %122 = vector.broadcast %cst_109 : f32 to vector<2x32xf32>
    %123 = arith.maximumf %121, %122 : vector<2x32xf32>
    %c6_110 = arith.constant 6 : index
    %c0_111 = arith.constant 0 : index
    %c0_112 = arith.constant 0 : index
    %124 = vector.load %arg3[%c6_110, %c0_111, %c0_112] : memref<8x32x128xf32, #tpu.memory_space<vmem>>, vector<1x32x128xf32>
    %125 = vector.shape_cast %124 : vector<1x32x128xf32> to vector<32x128xf32>
    %cst_113 = arith.constant dense<0.000000e+00> : vector<2x128xf32>
    %126 = tpu.matmul %123, %125, %cst_113 {dimension_numbers = #tpu.dot_dimension_numbers<[1], [0], [0], [1], [0, 0, 1, 1], [], []>} : vector<2x32xf32>, vector<32x128xf32>, vector<2x128xf32> -> vector<2x128xf32>
    %c6_114 = arith.constant 6 : index
    %c0_115 = arith.constant 0 : index
    %c0_116 = arith.constant 0 : index
    %127 = vector.load %arg4[%c6_114, %c0_115, %c0_116] : memref<8x1x128xf32, #tpu.memory_space<vmem>>, vector<1x1x128xf32>
    %128 = vector.shape_cast %127 : vector<1x1x128xf32> to vector<1x128xf32>
    %129 = vector.broadcast %128 : vector<1x128xf32> to vector<2x128xf32>
    %130 = arith.addf %126, %129 : vector<2x128xf32>
    %c6_117 = arith.constant 6 : index
    %c0_118 = arith.constant 0 : index
    %c0_119 = arith.constant 0 : index
    %131 = vector.load %arg5[%c6_117, %c0_118, %c0_119] : memref<8x2x128xf32, #tpu.memory_space<vmem>>, vector<1x2x128xf32>
    %132 = vector.shape_cast %131 : vector<1x2x128xf32> to vector<2x128xf32>
    %133 = vector.shape_cast %130 : vector<2x128xf32> to vector<1x2x128xf32>
    tpu.vector_store %arg5[%c6_117, %c0_118, %c0_119], %133 {strides = array<i32>} : memref<8x2x128xf32, #tpu.memory_space<vmem>>, vector<1x2x128xf32>,
    %c7 = arith.constant 7 : index
    %c0_120 = arith.constant 0 : index
    %c0_121 = arith.constant 0 : index
    %134 = vector.load %arg1[%c7, %c0_120, %c0_121] : memref<8x32x32xf32, #tpu.memory_space<vmem>>, vector<1x32x32xf32>
    %135 = vector.shape_cast %134 : vector<1x32x32xf32> to vector<32x32xf32>
    %cst_122 = arith.constant dense<0.000000e+00> : vector<2x32xf32>
    %136 = tpu.matmul %0, %135, %cst_122 {dimension_numbers = #tpu.dot_dimension_numbers<[1], [0], [0], [1], [0, 0, 1, 1], [], []>} : vector<2x32xf32>, vector<32x32xf32>, vector<2x32xf32> -> vector<2x32xf32>
    %c7_123 = arith.constant 7 : index
    %c0_124 = arith.constant 0 : index
    %c0_125 = arith.constant 0 : index
    %137 = vector.load %arg2[%c7_123, %c0_124, %c0_125] : memref<8x1x32xf32, #tpu.memory_space<vmem>>, vector<1x1x32xf32>
    %138 = vector.shape_cast %137 : vector<1x1x32xf32> to vector<1x32xf32>
    %139 = vector.broadcast %138 : vector<1x32xf32> to vector<2x32xf32>
    %140 = arith.addf %136, %139 : vector<2x32xf32>
    %cst_126 = arith.constant 0.000000e+00 : f32
    %141 = vector.broadcast %cst_126 : f32 to vector<2x32xf32>
    %142 = arith.maximumf %140, %141 : vector<2x32xf32>
    %c7_127 = arith.constant 7 : index
    %c0_128 = arith.constant 0 : index
    %c0_129 = arith.constant 0 : index
    %143 = vector.load %arg3[%c7_127, %c0_128, %c0_129] : memref<8x32x128xf32, #tpu.memory_space<vmem>>, vector<1x32x128xf32>
    %144 = vector.shape_cast %143 : vector<1x32x128xf32> to vector<32x128xf32>
    %cst_130 = arith.constant dense<0.000000e+00> : vector<2x128xf32>
    %145 = tpu.matmul %142, %144, %cst_130 {dimension_numbers = #tpu.dot_dimension_numbers<[1], [0], [0], [1], [0, 0, 1, 1], [], []>} : vector<2x32xf32>, vector<32x128xf32>, vector<2x128xf32> -> vector<2x128xf32>
    %c7_131 = arith.constant 7 : index
    %c0_132 = arith.constant 0 : index
    %c0_133 = arith.constant 0 : index
    %146 = vector.load %arg4[%c7_131, %c0_132, %c0_133] : memref<8x1x128xf32, #tpu.memory_space<vmem>>, vector<1x1x128xf32>
    %147 = vector.shape_cast %146 : vector<1x1x128xf32> to vector<1x128xf32>
    %148 = vector.broadcast %147 : vector<1x128xf32> to vector<2x128xf32>
    %149 = arith.addf %145, %148 : vector<2x128xf32>
    %c7_134 = arith.constant 7 : index
    %c0_135 = arith.constant 0 : index
    %c0_136 = arith.constant 0 : index
    %150 = vector.load %arg5[%c7_134, %c0_135, %c0_136] : memref<8x2x128xf32, #tpu.memory_space<vmem>>, vector<1x2x128xf32>
    %151 = vector.shape_cast %150 : vector<1x2x128xf32> to vector<2x128xf32>
    %152 = vector.shape_cast %149 : vector<2x128xf32> to vector<1x2x128xf32>
    tpu.vector_store %arg5[%c7_134, %c0_135, %c0_136], %152 {strides = array<i32>} : memref<8x2x128xf32, #tpu.memory_space<vmem>>, vector<1x2x128xf32>,
    return
  }
}

module attributes {stable_mosaic.version = 11 : i64} {
  func.func @_resblock_kernel(%arg0: i32, %arg1: memref<1x256x128xf32, #tpu.memory_space<vmem>>, %arg2: memref<1x8x128xf32, #tpu.memory_space<vmem>>, %arg3: memref<9x128x128xbf16, #tpu.memory_space<vmem>>, %arg4: memref<1x128xf32, #tpu.memory_space<vmem>>, %arg5: memref<9x128x128xbf16, #tpu.memory_space<vmem>>, %arg6: memref<1x128xf32, #tpu.memory_space<vmem>>, %arg7: memref<128x128xbf16, #tpu.memory_space<vmem>>, %arg8: memref<1x128xf32, #tpu.memory_space<vmem>>, %arg9: memref<1x1xf32, #tpu.memory_space<smem>>, %arg10: memref<1x256x128xf32, #tpu.memory_space<vmem>>, %arg11: memref<304x128xf32, #tpu.memory_space<vmem>>, %arg12: memref<304x128xf32, #tpu.memory_space<vmem>>) attributes {dimension_semantics = [#tpu.dimension_semantics<parallel>], iteration_bounds = array<i64: 2>, scalar_prefetch = 0 : i64, scratch_operands = 2 : i64, tpu.core_type = #tpu.core_type<tc>, window_params = [{transform_indices = @transform_0, window_bounds = array<i64: 1, 256, 128>}, {transform_indices = @transform_1, window_bounds = array<i64: 1, 8, 128>}, {pipeline_mode = #tpu.pipeline_mode<synchronous>, transform_indices = @transform_2, window_bounds = array<i64: 9, 128, 128>}, {pipeline_mode = #tpu.pipeline_mode<synchronous>, transform_indices = @transform_3, window_bounds = array<i64: 1, 128>}, {pipeline_mode = #tpu.pipeline_mode<synchronous>, transform_indices = @transform_4, window_bounds = array<i64: 9, 128, 128>}, {pipeline_mode = #tpu.pipeline_mode<synchronous>, transform_indices = @transform_5, window_bounds = array<i64: 1, 128>}, {pipeline_mode = #tpu.pipeline_mode<synchronous>, transform_indices = @transform_6, window_bounds = array<i64: 128, 128>}, {pipeline_mode = #tpu.pipeline_mode<synchronous>, transform_indices = @transform_7, window_bounds = array<i64: 1, 128>}, {transform_indices = @transform_8, window_bounds = array<i64: 1, 1>}, {transform_indices = @transform_9, window_bounds = array<i64: 1, 256, 128>}]} {
    %c0 = arith.constant 0 : index
    %c0_0 = arith.constant 0 : index
    %c0_1 = arith.constant 0 : index
    %0 = vector.load %arg2[%c0, %c0_0, %c0_1] : memref<1x8x128xf32, #tpu.memory_space<vmem>>, vector<1x8x128xf32>
    %1 = vector.shape_cast %0 : vector<1x8x128xf32> to vector<8x128xf32>
    %2 = vector.extract_strided_slice %1 {offsets = [0, 0], sizes = [1, 128], strides = [1, 1]} : vector<8x128xf32> to vector<1x128xf32>
    %3 = vector.extract_strided_slice %1 {offsets = [1, 0], sizes = [1, 128], strides = [1, 1]} : vector<8x128xf32> to vector<1x128xf32>
    %4 = vector.extract_strided_slice %1 {offsets = [2, 0], sizes = [1, 128], strides = [1, 1]} : vector<8x128xf32> to vector<1x128xf32>
    %5 = vector.extract_strided_slice %1 {offsets = [3, 0], sizes = [1, 128], strides = [1, 1]} : vector<8x128xf32> to vector<1x128xf32>
    %6 = vector.extract_strided_slice %1 {offsets = [4, 0], sizes = [1, 128], strides = [1, 1]} : vector<8x128xf32> to vector<1x128xf32>
    %7 = vector.extract_strided_slice %1 {offsets = [5, 0], sizes = [1, 128], strides = [1, 1]} : vector<8x128xf32> to vector<1x128xf32>
    %8 = vector.extract_strided_slice %1 {offsets = [6, 0], sizes = [1, 128], strides = [1, 1]} : vector<8x128xf32> to vector<1x128xf32>
    %9 = vector.extract_strided_slice %1 {offsets = [7, 0], sizes = [1, 128], strides = [1, 1]} : vector<8x128xf32> to vector<1x128xf32>
    %cst = arith.constant 0.000000e+00 : f32
    %10 = vector.broadcast %cst : f32 to vector<24x128xf32>
    %c0_2 = arith.constant 0 : index
    %c0_3 = arith.constant 0 : index
    %11 = vector.load %arg11[%c0_2, %c0_3] : memref<304x128xf32, #tpu.memory_space<vmem>>, vector<24x128xf32>
    tpu.vector_store %arg11[%c0_2, %c0_3], %10 {strides = array<i32>} : memref<304x128xf32, #tpu.memory_space<vmem>>, vector<24x128xf32>,
    %c280 = arith.constant 280 : index
    %c0_4 = arith.constant 0 : index
    %12 = vector.load %arg11[%c280, %c0_4] : memref<304x128xf32, #tpu.memory_space<vmem>>, vector<24x128xf32>
    tpu.vector_store %arg11[%c280, %c0_4], %10 {strides = array<i32>} : memref<304x128xf32, #tpu.memory_space<vmem>>, vector<24x128xf32>,
    %cst_5 = arith.constant 0.000000e+00 : f32
    %13 = vector.broadcast %cst_5 : f32 to vector<24x128xf32>
    %c0_6 = arith.constant 0 : index
    %c0_7 = arith.constant 0 : index
    %14 = vector.load %arg12[%c0_6, %c0_7] : memref<304x128xf32, #tpu.memory_space<vmem>>, vector<24x128xf32>
    tpu.vector_store %arg12[%c0_6, %c0_7], %13 {strides = array<i32>} : memref<304x128xf32, #tpu.memory_space<vmem>>, vector<24x128xf32>,
    %c280_8 = arith.constant 280 : index
    %c0_9 = arith.constant 0 : index
    %15 = vector.load %arg12[%c280_8, %c0_9] : memref<304x128xf32, #tpu.memory_space<vmem>>, vector<24x128xf32>
    tpu.vector_store %arg12[%c280_8, %c0_9], %13 {strides = array<i32>} : memref<304x128xf32, #tpu.memory_space<vmem>>, vector<24x128xf32>,
    %c0_10 = arith.constant 0 : index
    %c0_11 = arith.constant 0 : index
    %c0_12 = arith.constant 0 : index
    %16 = vector.load %arg1[%c0_10, %c0_11, %c0_12] : memref<1x256x128xf32, #tpu.memory_space<vmem>>, vector<1x256x128xf32>
    %17 = vector.shape_cast %16 : vector<1x256x128xf32> to vector<256x128xf32>
    %18 = vector.broadcast %2 : vector<1x128xf32> to vector<256x128xf32>
    %19 = arith.mulf %18, %17 : vector<256x128xf32>
    %20 = vector.broadcast %3 : vector<1x128xf32> to vector<256x128xf32>
    %21 = arith.addf %19, %20 : vector<256x128xf32>
    %cst_13 = arith.constant 0.000000e+00 : f32
    %22 = vector.broadcast %cst_13 : f32 to vector<256x128xf32>
    %23 = arith.cmpf ogt, %21, %22 : vector<256x128xf32>
    %cst_14 = arith.constant 2.000000e-01 : f32
    %24 = vector.broadcast %cst_14 : f32 to vector<256x128xf32>
    %25 = arith.mulf %24, %21 : vector<256x128xf32>
    %26 = arith.select %23, %21, %25 : vector<256x128xi1>, vector<256x128xf32>
    %27 = vector.broadcast %4 : vector<1x128xf32> to vector<256x128xf32>
    %28 = arith.mulf %27, %26 : vector<256x128xf32>
    %29 = vector.broadcast %5 : vector<1x128xf32> to vector<256x128xf32>
    %30 = arith.addf %28, %29 : vector<256x128xf32>
    %cst_15 = arith.constant 0.000000e+00 : f32
    %31 = vector.broadcast %cst_15 : f32 to vector<256x128xf32>
    %32 = arith.cmpf ogt, %30, %31 : vector<256x128xf32>
    %cst_16 = arith.constant 2.000000e-01 : f32
    %33 = vector.broadcast %cst_16 : f32 to vector<256x128xf32>
    %34 = arith.mulf %33, %30 : vector<256x128xf32>
    %35 = arith.select %32, %30, %34 : vector<256x128xi1>, vector<256x128xf32>
    %c24 = arith.constant 24 : index
    %c0_17 = arith.constant 0 : index
    %36 = vector.load %arg11[%c24, %c0_17] : memref<304x128xf32, #tpu.memory_space<vmem>>, vector<256x128xf32>
    tpu.vector_store %arg11[%c24, %c0_17], %35 {strides = array<i32>} : memref<304x128xf32, #tpu.memory_space<vmem>>, vector<256x128xf32>,
    %c0_18 = arith.constant 0 : index
    %c0_19 = arith.constant 0 : index
    %37 = vector.load %arg4[%c0_18, %c0_19] : memref<1x128xf32, #tpu.memory_space<vmem>>, vector<1x128xf32>
    %38 = tpu.iota {dimensions = array<i32: 0>} : vector<128x1xi32>
    %c16_i32 = arith.constant 16 : i32
    %c0_i32 = arith.constant 0 : i32
    %39 = arith.cmpi eq, %c16_i32, %c0_i32 : i32
    %c1_i32 = arith.constant 1 : i32
    %40 = arith.select %39, %c1_i32, %c16_i32 : i32
    %41 = vector.broadcast %40 : i32 to vector<128x1xi32>
    %42 = arith.remsi %38, %41 : vector<128x1xi32>
    %c0_i32_20 = arith.constant 0 : i32
    %43 = vector.broadcast %c0_i32_20 : i32 to vector<128x1xi32>
    %44 = arith.cmpi ne, %42, %43 : vector<128x1xi32>
    %c0_i32_21 = arith.constant 0 : i32
    %45 = vector.broadcast %c0_i32_21 : i32 to vector<128x1xi32>
    %46 = arith.cmpi slt, %42, %45 : vector<128x1xi32>
    %c0_i32_22 = arith.constant 0 : i32
    %47 = arith.cmpi slt, %40, %c0_i32_22 : i32
    %48 = vector.broadcast %47 : i1 to vector<128x1xi1>
    %49 = vector.broadcast %48 : vector<128x1xi1> to vector<128x1xi1>
    %50 = arith.xori %46, %49 : vector<128x1xi1>
    %51 = arith.andi %50, %44 : vector<128x1xi1>
    %52 = vector.broadcast %40 : i32 to vector<128x1xi32>
    %53 = arith.addi %42, %52 : vector<128x1xi32>
    %54 = arith.select %51, %53, %42 : vector<128x1xi1>, vector<128x1xi32>
    %c1_i32_23 = arith.constant 1 : i32
    %55 = vector.broadcast %c1_i32_23 : i32 to vector<128x1xi32>
    %56 = arith.cmpi sge, %54, %55 : vector<128x1xi32>
    %c14_i32 = arith.constant 14 : i32
    %57 = vector.broadcast %c14_i32 : i32 to vector<128x1xi32>
    %58 = arith.cmpi sle, %54, %57 : vector<128x1xi32>
    %cst_24 = arith.constant 0.000000e+00 : f32
    %59 = vector.broadcast %cst_24 : f32 to vector<128x128xf32>
    %c7 = arith.constant 7 : index
    %c0_25 = arith.constant 0 : index
    %60 = vector.load %arg11[%c7, %c0_25] : memref<304x128xf32, #tpu.memory_space<vmem>>, vector<128x128xf32>
    %cst_26 = arith.constant 0.000000e+00 : f32
    %61 = vector.shape_cast %56 : vector<128x1xi1> to vector<128x1xi1>
    %62 = vector.broadcast %61 : vector<128x1xi1> to vector<128x128xi1>
    %63 = vector.broadcast %cst_26 : f32 to vector<128x128xf32>
    %64 = arith.select %62, %60, %63 : vector<128x128xi1>, vector<128x128xf32>
    %65 = arith.truncf %64 : vector<128x128xf32> to vector<128x128xbf16>
    %c0_27 = arith.constant 0 : index
    %c0_28 = arith.constant 0 : index
    %c0_29 = arith.constant 0 : index
    %66 = vector.load %arg3[%c0_27, %c0_28, %c0_29] : memref<9x128x128xbf16, #tpu.memory_space<vmem>>, vector<1x128x128xbf16>
    %67 = vector.shape_cast %66 : vector<1x128x128xbf16> to vector<128x128xbf16>
    %cst_30 = arith.constant dense<0.000000e+00> : vector<128x128xf32>
    %68 = tpu.matmul %65, %67, %cst_30 {dimension_numbers = #tpu.dot_dimension_numbers<[1], [0], [0], [1], [0, 0, 1, 1], [], []>} : vector<128x128xbf16>, vector<128x128xbf16>, vector<128x128xf32> -> vector<128x128xf32>
    %69 = arith.addf %59, %68 : vector<128x128xf32>
    %c8 = arith.constant 8 : index
    %c0_31 = arith.constant 0 : index
    %70 = vector.load %arg11[%c8, %c0_31] : memref<304x128xf32, #tpu.memory_space<vmem>>, vector<128x128xf32>
    %71 = arith.truncf %70 : vector<128x128xf32> to vector<128x128xbf16>
    %c1 = arith.constant 1 : index
    %c0_32 = arith.constant 0 : index
    %c0_33 = arith.constant 0 : index
    %72 = vector.load %arg3[%c1, %c0_32, %c0_33] : memref<9x128x128xbf16, #tpu.memory_space<vmem>>, vector<1x128x128xbf16>
    %73 = vector.shape_cast %72 : vector<1x128x128xbf16> to vector<128x128xbf16>
    %cst_34 = arith.constant dense<0.000000e+00> : vector<128x128xf32>
    %74 = tpu.matmul %71, %73, %cst_34 {dimension_numbers = #tpu.dot_dimension_numbers<[1], [0], [0], [1], [0, 0, 1, 1], [], []>} : vector<128x128xbf16>, vector<128x128xbf16>, vector<128x128xf32> -> vector<128x128xf32>
    %75 = arith.addf %69, %74 : vector<128x128xf32>
    %c9 = arith.constant 9 : index
    %c0_35 = arith.constant 0 : index
    %76 = vector.load %arg11[%c9, %c0_35] : memref<304x128xf32, #tpu.memory_space<vmem>>, vector<128x128xf32>
    %cst_36 = arith.constant 0.000000e+00 : f32
    %77 = vector.shape_cast %58 : vector<128x1xi1> to vector<128x1xi1>
    %78 = vector.broadcast %77 : vector<128x1xi1> to vector<128x128xi1>
    %79 = vector.broadcast %cst_36 : f32 to vector<128x128xf32>
    %80 = arith.select %78, %76, %79 : vector<128x128xi1>, vector<128x128xf32>
    %81 = arith.truncf %80 : vector<128x128xf32> to vector<128x128xbf16>
    %c2 = arith.constant 2 : index
    %c0_37 = arith.constant 0 : index
    %c0_38 = arith.constant 0 : index
    %82 = vector.load %arg3[%c2, %c0_37, %c0_38] : memref<9x128x128xbf16, #tpu.memory_space<vmem>>, vector<1x128x128xbf16>
    %83 = vector.shape_cast %82 : vector<1x128x128xbf16> to vector<128x128xbf16>
    %cst_39 = arith.constant dense<0.000000e+00> : vector<128x128xf32>
    %84 = tpu.matmul %81, %83, %cst_39 {dimension_numbers = #tpu.dot_dimension_numbers<[1], [0], [0], [1], [0, 0, 1, 1], [], []>} : vector<128x128xbf16>, vector<128x128xbf16>, vector<128x128xf32> -> vector<128x128xf32>
    %85 = arith.addf %75, %84 : vector<128x128xf32>
    %c23 = arith.constant 23 : index
    %c0_40 = arith.constant 0 : index
    %86 = vector.load %arg11[%c23, %c0_40] : memref<304x128xf32, #tpu.memory_space<vmem>>, vector<128x128xf32>
    %cst_41 = arith.constant 0.000000e+00 : f32
    %87 = vector.shape_cast %56 : vector<128x1xi1> to vector<128x1xi1>
    %88 = vector.broadcast %87 : vector<128x1xi1> to vector<128x128xi1>
    %89 = vector.broadcast %cst_41 : f32 to vector<128x128xf32>
    %90 = arith.select %88, %86, %89 : vector<128x128xi1>, vector<128x128xf32>
    %91 = arith.truncf %90 : vector<128x128xf32> to vector<128x128xbf16>
    %c3 = arith.constant 3 : index
    %c0_42 = arith.constant 0 : index
    %c0_43 = arith.constant 0 : index
    %92 = vector.load %arg3[%c3, %c0_42, %c0_43] : memref<9x128x128xbf16, #tpu.memory_space<vmem>>, vector<1x128x128xbf16>
    %93 = vector.shape_cast %92 : vector<1x128x128xbf16> to vector<128x128xbf16>
    %cst_44 = arith.constant dense<0.000000e+00> : vector<128x128xf32>
    %94 = tpu.matmul %91, %93, %cst_44 {dimension_numbers = #tpu.dot_dimension_numbers<[1], [0], [0], [1], [0, 0, 1, 1], [], []>} : vector<128x128xbf16>, vector<128x128xbf16>, vector<128x128xf32> -> vector<128x128xf32>
    %95 = arith.addf %85, %94 : vector<128x128xf32>
    %c24_45 = arith.constant 24 : index
    %c0_46 = arith.constant 0 : index
    %96 = vector.load %arg11[%c24_45, %c0_46] : memref<304x128xf32, #tpu.memory_space<vmem>>, vector<128x128xf32>
    %97 = arith.truncf %96 : vector<128x128xf32> to vector<128x128xbf16>
    %c4 = arith.constant 4 : index
    %c0_47 = arith.constant 0 : index
    %c0_48 = arith.constant 0 : index
    %98 = vector.load %arg3[%c4, %c0_47, %c0_48] : memref<9x128x128xbf16, #tpu.memory_space<vmem>>, vector<1x128x128xbf16>
    %99 = vector.shape_cast %98 : vector<1x128x128xbf16> to vector<128x128xbf16>
    %cst_49 = arith.constant dense<0.000000e+00> : vector<128x128xf32>
    %100 = tpu.matmul %97, %99, %cst_49 {dimension_numbers = #tpu.dot_dimension_numbers<[1], [0], [0], [1], [0, 0, 1, 1], [], []>} : vector<128x128xbf16>, vector<128x128xbf16>, vector<128x128xf32> -> vector<128x128xf32>
    %101 = arith.addf %95, %100 : vector<128x128xf32>
    %c25 = arith.constant 25 : index
    %c0_50 = arith.constant 0 : index
    %102 = vector.load %arg11[%c25, %c0_50] : memref<304x128xf32, #tpu.memory_space<vmem>>, vector<128x128xf32>
    %cst_51 = arith.constant 0.000000e+00 : f32
    %103 = vector.shape_cast %58 : vector<128x1xi1> to vector<128x1xi1>
    %104 = vector.broadcast %103 : vector<128x1xi1> to vector<128x128xi1>
    %105 = vector.broadcast %cst_51 : f32 to vector<128x128xf32>
    %106 = arith.select %104, %102, %105 : vector<128x128xi1>, vector<128x128xf32>
    %107 = arith.truncf %106 : vector<128x128xf32> to vector<128x128xbf16>
    %c5 = arith.constant 5 : index
    %c0_52 = arith.constant 0 : index
    %c0_53 = arith.constant 0 : index
    %108 = vector.load %arg3[%c5, %c0_52, %c0_53] : memref<9x128x128xbf16, #tpu.memory_space<vmem>>, vector<1x128x128xbf16>
    %109 = vector.shape_cast %108 : vector<1x128x128xbf16> to vector<128x128xbf16>
    %cst_54 = arith.constant dense<0.000000e+00> : vector<128x128xf32>
    %110 = tpu.matmul %107, %109, %cst_54 {dimension_numbers = #tpu.dot_dimension_numbers<[1], [0], [0], [1], [0, 0, 1, 1], [], []>} : vector<128x128xbf16>, vector<128x128xbf16>, vector<128x128xf32> -> vector<128x128xf32>
    %111 = arith.addf %101, %110 : vector<128x128xf32>
    %c39 = arith.constant 39 : index
    %c0_55 = arith.constant 0 : index
    %112 = vector.load %arg11[%c39, %c0_55] : memref<304x128xf32, #tpu.memory_space<vmem>>, vector<128x128xf32>
    %cst_56 = arith.constant 0.000000e+00 : f32
    %113 = vector.shape_cast %56 : vector<128x1xi1> to vector<128x1xi1>
    %114 = vector.broadcast %113 : vector<128x1xi1> to vector<128x128xi1>
    %115 = vector.broadcast %cst_56 : f32 to vector<128x128xf32>
    %116 = arith.select %114, %112, %115 : vector<128x128xi1>, vector<128x128xf32>
    %117 = arith.truncf %116 : vector<128x128xf32> to vector<128x128xbf16>
    %c6 = arith.constant 6 : index
    %c0_57 = arith.constant 0 : index
    %c0_58 = arith.constant 0 : index
    %118 = vector.load %arg3[%c6, %c0_57, %c0_58] : memref<9x128x128xbf16, #tpu.memory_space<vmem>>, vector<1x128x128xbf16>
    %119 = vector.shape_cast %118 : vector<1x128x128xbf16> to vector<128x128xbf16>
    %cst_59 = arith.constant dense<0.000000e+00> : vector<128x128xf32>
    %120 = tpu.matmul %117, %119, %cst_59 {dimension_numbers = #tpu.dot_dimension_numbers<[1], [0], [0], [1], [0, 0, 1, 1], [], []>} : vector<128x128xbf16>, vector<128x128xbf16>, vector<128x128xf32> -> vector<128x128xf32>
    %121 = arith.addf %111, %120 : vector<128x128xf32>
    %c40 = arith.constant 40 : index
    %c0_60 = arith.constant 0 : index
    %122 = vector.load %arg11[%c40, %c0_60] : memref<304x128xf32, #tpu.memory_space<vmem>>, vector<128x128xf32>
    %123 = arith.truncf %122 : vector<128x128xf32> to vector<128x128xbf16>
    %c7_61 = arith.constant 7 : index
    %c0_62 = arith.constant 0 : index
    %c0_63 = arith.constant 0 : index
    %124 = vector.load %arg3[%c7_61, %c0_62, %c0_63] : memref<9x128x128xbf16, #tpu.memory_space<vmem>>, vector<1x128x128xbf16>
    %125 = vector.shape_cast %124 : vector<1x128x128xbf16> to vector<128x128xbf16>
    %cst_64 = arith.constant dense<0.000000e+00> : vector<128x128xf32>
    %126 = tpu.matmul %123, %125, %cst_64 {dimension_numbers = #tpu.dot_dimension_numbers<[1], [0], [0], [1], [0, 0, 1, 1], [], []>} : vector<128x128xbf16>, vector<128x128xbf16>, vector<128x128xf32> -> vector<128x128xf32>
    %127 = arith.addf %121, %126 : vector<128x128xf32>
    %c41 = arith.constant 41 : index
    %c0_65 = arith.constant 0 : index
    %128 = vector.load %arg11[%c41, %c0_65] : memref<304x128xf32, #tpu.memory_space<vmem>>, vector<128x128xf32>
    %cst_66 = arith.constant 0.000000e+00 : f32
    %129 = vector.shape_cast %58 : vector<128x1xi1> to vector<128x1xi1>
    %130 = vector.broadcast %129 : vector<128x1xi1> to vector<128x128xi1>
    %131 = vector.broadcast %cst_66 : f32 to vector<128x128xf32>
    %132 = arith.select %130, %128, %131 : vector<128x128xi1>, vector<128x128xf32>
    %133 = arith.truncf %132 : vector<128x128xf32> to vector<128x128xbf16>
    %c8_67 = arith.constant 8 : index
    %c0_68 = arith.constant 0 : index
    %c0_69 = arith.constant 0 : index
    %134 = vector.load %arg3[%c8_67, %c0_68, %c0_69] : memref<9x128x128xbf16, #tpu.memory_space<vmem>>, vector<1x128x128xbf16>
    %135 = vector.shape_cast %134 : vector<1x128x128xbf16> to vector<128x128xbf16>
    %cst_70 = arith.constant dense<0.000000e+00> : vector<128x128xf32>
    %136 = tpu.matmul %133, %135, %cst_70 {dimension_numbers = #tpu.dot_dimension_numbers<[1], [0], [0], [1], [0, 0, 1, 1], [], []>} : vector<128x128xbf16>, vector<128x128xbf16>, vector<128x128xf32> -> vector<128x128xf32>
    %137 = arith.addf %127, %136 : vector<128x128xf32>
    %138 = vector.broadcast %37 : vector<1x128xf32> to vector<128x128xf32>
    %139 = arith.addf %137, %138 : vector<128x128xf32>
    %140 = vector.broadcast %6 : vector<1x128xf32> to vector<128x128xf32>
    %141 = arith.mulf %140, %139 : vector<128x128xf32>
    %142 = vector.broadcast %7 : vector<1x128xf32> to vector<128x128xf32>
    %143 = arith.addf %141, %142 : vector<128x128xf32>
    %cst_71 = arith.constant 0.000000e+00 : f32
    %144 = vector.broadcast %cst_71 : f32 to vector<128x128xf32>
    %145 = arith.cmpf ogt, %143, %144 : vector<128x128xf32>
    %cst_72 = arith.constant 2.000000e-01 : f32
    %146 = vector.broadcast %cst_72 : f32 to vector<128x128xf32>
    %147 = arith.mulf %146, %143 : vector<128x128xf32>
    %148 = arith.select %145, %143, %147 : vector<128x128xi1>, vector<128x128xf32>
    %149 = vector.broadcast %8 : vector<1x128xf32> to vector<128x128xf32>
    %150 = arith.mulf %149, %148 : vector<128x128xf32>
    %151 = vector.broadcast %9 : vector<1x128xf32> to vector<128x128xf32>
    %152 = arith.addf %150, %151 : vector<128x128xf32>
    %cst_73 = arith.constant 0.000000e+00 : f32
    %153 = vector.broadcast %cst_73 : f32 to vector<128x128xf32>
    %154 = arith.cmpf ogt, %152, %153 : vector<128x128xf32>
    %cst_74 = arith.constant 2.000000e-01 : f32
    %155 = vector.broadcast %cst_74 : f32 to vector<128x128xf32>
    %156 = arith.mulf %155, %152 : vector<128x128xf32>
    %157 = arith.select %154, %152, %156 : vector<128x128xi1>, vector<128x128xf32>
    %c24_75 = arith.constant 24 : index
    %c0_76 = arith.constant 0 : index
    %158 = vector.load %arg12[%c24_75, %c0_76] : memref<304x128xf32, #tpu.memory_space<vmem>>, vector<128x128xf32>
    tpu.vector_store %arg12[%c24_75, %c0_76], %157 {strides = array<i32>} : memref<304x128xf32, #tpu.memory_space<vmem>>, vector<128x128xf32>,
    %cst_77 = arith.constant 0.000000e+00 : f32
    %159 = vector.broadcast %cst_77 : f32 to vector<128x128xf32>
    %c135 = arith.constant 135 : index
    %c0_78 = arith.constant 0 : index
    %160 = vector.load %arg11[%c135, %c0_78] : memref<304x128xf32, #tpu.memory_space<vmem>>, vector<128x128xf32>
    %cst_79 = arith.constant 0.000000e+00 : f32
    %161 = vector.shape_cast %56 : vector<128x1xi1> to vector<128x1xi1>
    %162 = vector.broadcast %161 : vector<128x1xi1> to vector<128x128xi1>
    %163 = vector.broadcast %cst_79 : f32 to vector<128x128xf32>
    %164 = arith.select %162, %160, %163 : vector<128x128xi1>, vector<128x128xf32>
    %165 = arith.truncf %164 : vector<128x128xf32> to vector<128x128xbf16>
    %c0_80 = arith.constant 0 : index
    %c0_81 = arith.constant 0 : index
    %c0_82 = arith.constant 0 : index
    %166 = vector.load %arg3[%c0_80, %c0_81, %c0_82] : memref<9x128x128xbf16, #tpu.memory_space<vmem>>, vector<1x128x128xbf16>
    %167 = vector.shape_cast %166 : vector<1x128x128xbf16> to vector<128x128xbf16>
    %cst_83 = arith.constant dense<0.000000e+00> : vector<128x128xf32>
    %168 = tpu.matmul %165, %167, %cst_83 {dimension_numbers = #tpu.dot_dimension_numbers<[1], [0], [0], [1], [0, 0, 1, 1], [], []>} : vector<128x128xbf16>, vector<128x128xbf16>, vector<128x128xf32> -> vector<128x128xf32>
    %169 = arith.addf %159, %168 : vector<128x128xf32>
    %c136 = arith.constant 136 : index
    %c0_84 = arith.constant 0 : index
    %170 = vector.load %arg11[%c136, %c0_84] : memref<304x128xf32, #tpu.memory_space<vmem>>, vector<128x128xf32>
    %171 = arith.truncf %170 : vector<128x128xf32> to vector<128x128xbf16>
    %c1_85 = arith.constant 1 : index
    %c0_86 = arith.constant 0 : index
    %c0_87 = arith.constant 0 : index
    %172 = vector.load %arg3[%c1_85, %c0_86, %c0_87] : memref<9x128x128xbf16, #tpu.memory_space<vmem>>, vector<1x128x128xbf16>
    %173 = vector.shape_cast %172 : vector<1x128x128xbf16> to vector<128x128xbf16>
    %cst_88 = arith.constant dense<0.000000e+00> : vector<128x128xf32>
    %174 = tpu.matmul %171, %173, %cst_88 {dimension_numbers = #tpu.dot_dimension_numbers<[1], [0], [0], [1], [0, 0, 1, 1], [], []>} : vector<128x128xbf16>, vector<128x128xbf16>, vector<128x128xf32> -> vector<128x128xf32>
    %175 = arith.addf %169, %174 : vector<128x128xf32>
    %c137 = arith.constant 137 : index
    %c0_89 = arith.constant 0 : index
    %176 = vector.load %arg11[%c137, %c0_89] : memref<304x128xf32, #tpu.memory_space<vmem>>, vector<128x128xf32>
    %cst_90 = arith.constant 0.000000e+00 : f32
    %177 = vector.shape_cast %58 : vector<128x1xi1> to vector<128x1xi1>
    %178 = vector.broadcast %177 : vector<128x1xi1> to vector<128x128xi1>
    %179 = vector.broadcast %cst_90 : f32 to vector<128x128xf32>
    %180 = arith.select %178, %176, %179 : vector<128x128xi1>, vector<128x128xf32>
    %181 = arith.truncf %180 : vector<128x128xf32> to vector<128x128xbf16>
    %c2_91 = arith.constant 2 : index
    %c0_92 = arith.constant 0 : index
    %c0_93 = arith.constant 0 : index
    %182 = vector.load %arg3[%c2_91, %c0_92, %c0_93] : memref<9x128x128xbf16, #tpu.memory_space<vmem>>, vector<1x128x128xbf16>
    %183 = vector.shape_cast %182 : vector<1x128x128xbf16> to vector<128x128xbf16>
    %cst_94 = arith.constant dense<0.000000e+00> : vector<128x128xf32>
    %184 = tpu.matmul %181, %183, %cst_94 {dimension_numbers = #tpu.dot_dimension_numbers<[1], [0], [0], [1], [0, 0, 1, 1], [], []>} : vector<128x128xbf16>, vector<128x128xbf16>, vector<128x128xf32> -> vector<128x128xf32>
    %185 = arith.addf %175, %184 : vector<128x128xf32>
    %c151 = arith.constant 151 : index
    %c0_95 = arith.constant 0 : index
    %186 = vector.load %arg11[%c151, %c0_95] : memref<304x128xf32, #tpu.memory_space<vmem>>, vector<128x128xf32>
    %cst_96 = arith.constant 0.000000e+00 : f32
    %187 = vector.shape_cast %56 : vector<128x1xi1> to vector<128x1xi1>
    %188 = vector.broadcast %187 : vector<128x1xi1> to vector<128x128xi1>
    %189 = vector.broadcast %cst_96 : f32 to vector<128x128xf32>
    %190 = arith.select %188, %186, %189 : vector<128x128xi1>, vector<128x128xf32>
    %191 = arith.truncf %190 : vector<128x128xf32> to vector<128x128xbf16>
    %c3_97 = arith.constant 3 : index
    %c0_98 = arith.constant 0 : index
    %c0_99 = arith.constant 0 : index
    %192 = vector.load %arg3[%c3_97, %c0_98, %c0_99] : memref<9x128x128xbf16, #tpu.memory_space<vmem>>, vector<1x128x128xbf16>
    %193 = vector.shape_cast %192 : vector<1x128x128xbf16> to vector<128x128xbf16>
    %cst_100 = arith.constant dense<0.000000e+00> : vector<128x128xf32>
    %194 = tpu.matmul %191, %193, %cst_100 {dimension_numbers = #tpu.dot_dimension_numbers<[1], [0], [0], [1], [0, 0, 1, 1], [], []>} : vector<128x128xbf16>, vector<128x128xbf16>, vector<128x128xf32> -> vector<128x128xf32>
    %195 = arith.addf %185, %194 : vector<128x128xf32>
    %c152 = arith.constant 152 : index
    %c0_101 = arith.constant 0 : index
    %196 = vector.load %arg11[%c152, %c0_101] : memref<304x128xf32, #tpu.memory_space<vmem>>, vector<128x128xf32>
    %197 = arith.truncf %196 : vector<128x128xf32> to vector<128x128xbf16>
    %c4_102 = arith.constant 4 : index
    %c0_103 = arith.constant 0 : index
    %c0_104 = arith.constant 0 : index
    %198 = vector.load %arg3[%c4_102, %c0_103, %c0_104] : memref<9x128x128xbf16, #tpu.memory_space<vmem>>, vector<1x128x128xbf16>
    %199 = vector.shape_cast %198 : vector<1x128x128xbf16> to vector<128x128xbf16>
    %cst_105 = arith.constant dense<0.000000e+00> : vector<128x128xf32>
    %200 = tpu.matmul %197, %199, %cst_105 {dimension_numbers = #tpu.dot_dimension_numbers<[1], [0], [0], [1], [0, 0, 1, 1], [], []>} : vector<128x128xbf16>, vector<128x128xbf16>, vector<128x128xf32> -> vector<128x128xf32>
    %201 = arith.addf %195, %200 : vector<128x128xf32>
    %c153 = arith.constant 153 : index
    %c0_106 = arith.constant 0 : index
    %202 = vector.load %arg11[%c153, %c0_106] : memref<304x128xf32, #tpu.memory_space<vmem>>, vector<128x128xf32>
    %cst_107 = arith.constant 0.000000e+00 : f32
    %203 = vector.shape_cast %58 : vector<128x1xi1> to vector<128x1xi1>
    %204 = vector.broadcast %203 : vector<128x1xi1> to vector<128x128xi1>
    %205 = vector.broadcast %cst_107 : f32 to vector<128x128xf32>
    %206 = arith.select %204, %202, %205 : vector<128x128xi1>, vector<128x128xf32>
    %207 = arith.truncf %206 : vector<128x128xf32> to vector<128x128xbf16>
    %c5_108 = arith.constant 5 : index
    %c0_109 = arith.constant 0 : index
    %c0_110 = arith.constant 0 : index
    %208 = vector.load %arg3[%c5_108, %c0_109, %c0_110] : memref<9x128x128xbf16, #tpu.memory_space<vmem>>, vector<1x128x128xbf16>
    %209 = vector.shape_cast %208 : vector<1x128x128xbf16> to vector<128x128xbf16>
    %cst_111 = arith.constant dense<0.000000e+00> : vector<128x128xf32>
    %210 = tpu.matmul %207, %209, %cst_111 {dimension_numbers = #tpu.dot_dimension_numbers<[1], [0], [0], [1], [0, 0, 1, 1], [], []>} : vector<128x128xbf16>, vector<128x128xbf16>, vector<128x128xf32> -> vector<128x128xf32>
    %211 = arith.addf %201, %210 : vector<128x128xf32>
    %c167 = arith.constant 167 : index
    %c0_112 = arith.constant 0 : index
    %212 = vector.load %arg11[%c167, %c0_112] : memref<304x128xf32, #tpu.memory_space<vmem>>, vector<128x128xf32>
    %cst_113 = arith.constant 0.000000e+00 : f32
    %213 = vector.shape_cast %56 : vector<128x1xi1> to vector<128x1xi1>
    %214 = vector.broadcast %213 : vector<128x1xi1> to vector<128x128xi1>
    %215 = vector.broadcast %cst_113 : f32 to vector<128x128xf32>
    %216 = arith.select %214, %212, %215 : vector<128x128xi1>, vector<128x128xf32>
    %217 = arith.truncf %216 : vector<128x128xf32> to vector<128x128xbf16>
    %c6_114 = arith.constant 6 : index
    %c0_115 = arith.constant 0 : index
    %c0_116 = arith.constant 0 : index
    %218 = vector.load %arg3[%c6_114, %c0_115, %c0_116] : memref<9x128x128xbf16, #tpu.memory_space<vmem>>, vector<1x128x128xbf16>
    %219 = vector.shape_cast %218 : vector<1x128x128xbf16> to vector<128x128xbf16>
    %cst_117 = arith.constant dense<0.000000e+00> : vector<128x128xf32>
    %220 = tpu.matmul %217, %219, %cst_117 {dimension_numbers = #tpu.dot_dimension_numbers<[1], [0], [0], [1], [0, 0, 1, 1], [], []>} : vector<128x128xbf16>, vector<128x128xbf16>, vector<128x128xf32> -> vector<128x128xf32>
    %221 = arith.addf %211, %220 : vector<128x128xf32>
    %c168 = arith.constant 168 : index
    %c0_118 = arith.constant 0 : index
    %222 = vector.load %arg11[%c168, %c0_118] : memref<304x128xf32, #tpu.memory_space<vmem>>, vector<128x128xf32>
    %223 = arith.truncf %222 : vector<128x128xf32> to vector<128x128xbf16>
    %c7_119 = arith.constant 7 : index
    %c0_120 = arith.constant 0 : index
    %c0_121 = arith.constant 0 : index
    %224 = vector.load %arg3[%c7_119, %c0_120, %c0_121] : memref<9x128x128xbf16, #tpu.memory_space<vmem>>, vector<1x128x128xbf16>
    %225 = vector.shape_cast %224 : vector<1x128x128xbf16> to vector<128x128xbf16>
    %cst_122 = arith.constant dense<0.000000e+00> : vector<128x128xf32>
    %226 = tpu.matmul %223, %225, %cst_122 {dimension_numbers = #tpu.dot_dimension_numbers<[1], [0], [0], [1], [0, 0, 1, 1], [], []>} : vector<128x128xbf16>, vector<128x128xbf16>, vector<128x128xf32> -> vector<128x128xf32>
    %227 = arith.addf %221, %226 : vector<128x128xf32>
    %c169 = arith.constant 169 : index
    %c0_123 = arith.constant 0 : index
    %228 = vector.load %arg11[%c169, %c0_123] : memref<304x128xf32, #tpu.memory_space<vmem>>, vector<128x128xf32>
    %cst_124 = arith.constant 0.000000e+00 : f32
    %229 = vector.shape_cast %58 : vector<128x1xi1> to vector<128x1xi1>
    %230 = vector.broadcast %229 : vector<128x1xi1> to vector<128x128xi1>
    %231 = vector.broadcast %cst_124 : f32 to vector<128x128xf32>
    %232 = arith.select %230, %228, %231 : vector<128x128xi1>, vector<128x128xf32>
    %233 = arith.truncf %232 : vector<128x128xf32> to vector<128x128xbf16>
    %c8_125 = arith.constant 8 : index
    %c0_126 = arith.constant 0 : index
    %c0_127 = arith.constant 0 : index
    %234 = vector.load %arg3[%c8_125, %c0_126, %c0_127] : memref<9x128x128xbf16, #tpu.memory_space<vmem>>, vector<1x128x128xbf16>
    %235 = vector.shape_cast %234 : vector<1x128x128xbf16> to vector<128x128xbf16>
    %cst_128 = arith.constant dense<0.000000e+00> : vector<128x128xf32>
    %236 = tpu.matmul %233, %235, %cst_128 {dimension_numbers = #tpu.dot_dimension_numbers<[1], [0], [0], [1], [0, 0, 1, 1], [], []>} : vector<128x128xbf16>, vector<128x128xbf16>, vector<128x128xf32> -> vector<128x128xf32>
    %237 = arith.addf %227, %236 : vector<128x128xf32>
    %238 = vector.broadcast %37 : vector<1x128xf32> to vector<128x128xf32>
    %239 = arith.addf %237, %238 : vector<128x128xf32>
    %240 = vector.broadcast %6 : vector<1x128xf32> to vector<128x128xf32>
    %241 = arith.mulf %240, %239 : vector<128x128xf32>
    %242 = vector.broadcast %7 : vector<1x128xf32> to vector<128x128xf32>
    %243 = arith.addf %241, %242 : vector<128x128xf32>
    %cst_129 = arith.constant 0.000000e+00 : f32
    %244 = vector.broadcast %cst_129 : f32 to vector<128x128xf32>
    %245 = arith.cmpf ogt, %243, %244 : vector<128x128xf32>
    %cst_130 = arith.constant 2.000000e-01 : f32
    %246 = vector.broadcast %cst_130 : f32 to vector<128x128xf32>
    %247 = arith.mulf %246, %243 : vector<128x128xf32>
    %248 = arith.select %245, %243, %247 : vector<128x128xi1>, vector<128x128xf32>
    %249 = vector.broadcast %8 : vector<1x128xf32> to vector<128x128xf32>
    %250 = arith.mulf %249, %248 : vector<128x128xf32>
    %251 = vector.broadcast %9 : vector<1x128xf32> to vector<128x128xf32>
    %252 = arith.addf %250, %251 : vector<128x128xf32>
    %cst_131 = arith.constant 0.000000e+00 : f32
    %253 = vector.broadcast %cst_131 : f32 to vector<128x128xf32>
    %254 = arith.cmpf ogt, %252, %253 : vector<128x128xf32>
    %cst_132 = arith.constant 2.000000e-01 : f32
    %255 = vector.broadcast %cst_132 : f32 to vector<128x128xf32>
    %256 = arith.mulf %255, %252 : vector<128x128xf32>
    %257 = arith.select %254, %252, %256 : vector<128x128xi1>, vector<128x128xf32>
    %c152_133 = arith.constant 152 : index
    %c0_134 = arith.constant 0 : index
    %258 = vector.load %arg12[%c152_133, %c0_134] : memref<304x128xf32, #tpu.memory_space<vmem>>, vector<128x128xf32>
    tpu.vector_store %arg12[%c152_133, %c0_134], %257 {strides = array<i32>} : memref<304x128xf32, #tpu.memory_space<vmem>>, vector<128x128xf32>,
    %c0_135 = arith.constant 0 : index
    %c0_136 = arith.constant 0 : index
    %c0_137 = arith.constant 0 : index
    %259 = vector.load %arg1[%c0_135, %c0_136, %c0_137] : memref<1x256x128xf32, #tpu.memory_space<vmem>>, vector<1x256x128xf32>
    %260 = vector.shape_cast %259 : vector<1x256x128xf32> to vector<256x128xf32>
    %261 = arith.truncf %260 : vector<256x128xf32> to vector<256x128xbf16>
    %c0_138 = arith.constant 0 : index
    %c0_139 = arith.constant 0 : index
    %262 = vector.load %arg7[%c0_138, %c0_139] : memref<128x128xbf16, #tpu.memory_space<vmem>>, vector<128x128xbf16>
    %cst_140 = arith.constant dense<0.000000e+00> : vector<256x128xf32>
    %263 = tpu.matmul %261, %262, %cst_140 {dimension_numbers = #tpu.dot_dimension_numbers<[1], [0], [0], [1], [0, 0, 1, 1], [], []>} : vector<256x128xbf16>, vector<128x128xbf16>, vector<256x128xf32> -> vector<256x128xf32>
    %c0_141 = arith.constant 0 : index
    %c0_142 = arith.constant 0 : index
    %264 = vector.load %arg8[%c0_141, %c0_142] : memref<1x128xf32, #tpu.memory_space<vmem>>, vector<1x128xf32>
    %265 = vector.broadcast %264 : vector<1x128xf32> to vector<256x128xf32>
    %266 = arith.addf %263, %265 : vector<256x128xf32>
    %c0_143 = arith.constant 0 : index
    %c0_144 = arith.constant 0 : index
    %267 = memref.load %arg9[%c0_143, %c0_144] : memref<1x1xf32, #tpu.memory_space<smem>>
    %c0_145 = arith.constant 0 : index
    %c0_146 = arith.constant 0 : index
    %268 = vector.load %arg6[%c0_145, %c0_146] : memref<1x128xf32, #tpu.memory_space<vmem>>, vector<1x128xf32>
    %269 = tpu.iota {dimensions = array<i32: 0>} : vector<128x1xi32>
    %c16_i32_147 = arith.constant 16 : i32
    %c0_i32_148 = arith.constant 0 : i32
    %270 = arith.cmpi eq, %c16_i32_147, %c0_i32_148 : i32
    %c1_i32_149 = arith.constant 1 : i32
    %271 = arith.select %270, %c1_i32_149, %c16_i32_147 : i32
    %272 = vector.broadcast %271 : i32 to vector<128x1xi32>
    %273 = arith.remsi %269, %272 : vector<128x1xi32>
    %c0_i32_150 = arith.constant 0 : i32
    %274 = vector.broadcast %c0_i32_150 : i32 to vector<128x1xi32>
    %275 = arith.cmpi ne, %273, %274 : vector<128x1xi32>
    %c0_i32_151 = arith.constant 0 : i32
    %276 = vector.broadcast %c0_i32_151 : i32 to vector<128x1xi32>
    %277 = arith.cmpi slt, %273, %276 : vector<128x1xi32>
    %c0_i32_152 = arith.constant 0 : i32
    %278 = arith.cmpi slt, %271, %c0_i32_152 : i32
    %279 = vector.broadcast %278 : i1 to vector<128x1xi1>
    %280 = vector.broadcast %279 : vector<128x1xi1> to vector<128x1xi1>
    %281 = arith.xori %277, %280 : vector<128x1xi1>
    %282 = arith.andi %281, %275 : vector<128x1xi1>
    %283 = vector.broadcast %271 : i32 to vector<128x1xi32>
    %284 = arith.addi %273, %283 : vector<128x1xi32>
    %285 = arith.select %282, %284, %273 : vector<128x1xi1>, vector<128x1xi32>
    %c1_i32_153 = arith.constant 1 : i32
    %286 = vector.broadcast %c1_i32_153 : i32 to vector<128x1xi32>
    %287 = arith.cmpi sge, %285, %286 : vector<128x1xi32>
    %c14_i32_154 = arith.constant 14 : i32
    %288 = vector.broadcast %c14_i32_154 : i32 to vector<128x1xi32>
    %289 = arith.cmpi sle, %285, %288 : vector<128x1xi32>
    %cst_155 = arith.constant 0.000000e+00 : f32
    %290 = vector.broadcast %cst_155 : f32 to vector<128x128xf32>
    %c7_156 = arith.constant 7 : index
    %c0_157 = arith.constant 0 : index
    %291 = vector.load %arg12[%c7_156, %c0_157] : memref<304x128xf32, #tpu.memory_space<vmem>>, vector<128x128xf32>
    %cst_158 = arith.constant 0.000000e+00 : f32
    %292 = vector.shape_cast %287 : vector<128x1xi1> to vector<128x1xi1>
    %293 = vector.broadcast %292 : vector<128x1xi1> to vector<128x128xi1>
    %294 = vector.broadcast %cst_158 : f32 to vector<128x128xf32>
    %295 = arith.select %293, %291, %294 : vector<128x128xi1>, vector<128x128xf32>
    %296 = arith.truncf %295 : vector<128x128xf32> to vector<128x128xbf16>
    %c0_159 = arith.constant 0 : index
    %c0_160 = arith.constant 0 : index
    %c0_161 = arith.constant 0 : index
    %297 = vector.load %arg5[%c0_159, %c0_160, %c0_161] : memref<9x128x128xbf16, #tpu.memory_space<vmem>>, vector<1x128x128xbf16>
    %298 = vector.shape_cast %297 : vector<1x128x128xbf16> to vector<128x128xbf16>
    %cst_162 = arith.constant dense<0.000000e+00> : vector<128x128xf32>
    %299 = tpu.matmul %296, %298, %cst_162 {dimension_numbers = #tpu.dot_dimension_numbers<[1], [0], [0], [1], [0, 0, 1, 1], [], []>} : vector<128x128xbf16>, vector<128x128xbf16>, vector<128x128xf32> -> vector<128x128xf32>
    %300 = arith.addf %290, %299 : vector<128x128xf32>
    %c8_163 = arith.constant 8 : index
    %c0_164 = arith.constant 0 : index
    %301 = vector.load %arg12[%c8_163, %c0_164] : memref<304x128xf32, #tpu.memory_space<vmem>>, vector<128x128xf32>
    %302 = arith.truncf %301 : vector<128x128xf32> to vector<128x128xbf16>
    %c1_165 = arith.constant 1 : index
    %c0_166 = arith.constant 0 : index
    %c0_167 = arith.constant 0 : index
    %303 = vector.load %arg5[%c1_165, %c0_166, %c0_167] : memref<9x128x128xbf16, #tpu.memory_space<vmem>>, vector<1x128x128xbf16>
    %304 = vector.shape_cast %303 : vector<1x128x128xbf16> to vector<128x128xbf16>
    %cst_168 = arith.constant dense<0.000000e+00> : vector<128x128xf32>
    %305 = tpu.matmul %302, %304, %cst_168 {dimension_numbers = #tpu.dot_dimension_numbers<[1], [0], [0], [1], [0, 0, 1, 1], [], []>} : vector<128x128xbf16>, vector<128x128xbf16>, vector<128x128xf32> -> vector<128x128xf32>
    %306 = arith.addf %300, %305 : vector<128x128xf32>
    %c9_169 = arith.constant 9 : index
    %c0_170 = arith.constant 0 : index
    %307 = vector.load %arg12[%c9_169, %c0_170] : memref<304x128xf32, #tpu.memory_space<vmem>>, vector<128x128xf32>
    %cst_171 = arith.constant 0.000000e+00 : f32
    %308 = vector.shape_cast %289 : vector<128x1xi1> to vector<128x1xi1>
    %309 = vector.broadcast %308 : vector<128x1xi1> to vector<128x128xi1>
    %310 = vector.broadcast %cst_171 : f32 to vector<128x128xf32>
    %311 = arith.select %309, %307, %310 : vector<128x128xi1>, vector<128x128xf32>
    %312 = arith.truncf %311 : vector<128x128xf32> to vector<128x128xbf16>
    %c2_172 = arith.constant 2 : index
    %c0_173 = arith.constant 0 : index
    %c0_174 = arith.constant 0 : index
    %313 = vector.load %arg5[%c2_172, %c0_173, %c0_174] : memref<9x128x128xbf16, #tpu.memory_space<vmem>>, vector<1x128x128xbf16>
    %314 = vector.shape_cast %313 : vector<1x128x128xbf16> to vector<128x128xbf16>
    %cst_175 = arith.constant dense<0.000000e+00> : vector<128x128xf32>
    %315 = tpu.matmul %312, %314, %cst_175 {dimension_numbers = #tpu.dot_dimension_numbers<[1], [0], [0], [1], [0, 0, 1, 1], [], []>} : vector<128x128xbf16>, vector<128x128xbf16>, vector<128x128xf32> -> vector<128x128xf32>
    %316 = arith.addf %306, %315 : vector<128x128xf32>
    %c23_176 = arith.constant 23 : index
    %c0_177 = arith.constant 0 : index
    %317 = vector.load %arg12[%c23_176, %c0_177] : memref<304x128xf32, #tpu.memory_space<vmem>>, vector<128x128xf32>
    %cst_178 = arith.constant 0.000000e+00 : f32
    %318 = vector.shape_cast %287 : vector<128x1xi1> to vector<128x1xi1>
    %319 = vector.broadcast %318 : vector<128x1xi1> to vector<128x128xi1>
    %320 = vector.broadcast %cst_178 : f32 to vector<128x128xf32>
    %321 = arith.select %319, %317, %320 : vector<128x128xi1>, vector<128x128xf32>
    %322 = arith.truncf %321 : vector<128x128xf32> to vector<128x128xbf16>
    %c3_179 = arith.constant 3 : index
    %c0_180 = arith.constant 0 : index
    %c0_181 = arith.constant 0 : index
    %323 = vector.load %arg5[%c3_179, %c0_180, %c0_181] : memref<9x128x128xbf16, #tpu.memory_space<vmem>>, vector<1x128x128xbf16>
    %324 = vector.shape_cast %323 : vector<1x128x128xbf16> to vector<128x128xbf16>
    %cst_182 = arith.constant dense<0.000000e+00> : vector<128x128xf32>
    %325 = tpu.matmul %322, %324, %cst_182 {dimension_numbers = #tpu.dot_dimension_numbers<[1], [0], [0], [1], [0, 0, 1, 1], [], []>} : vector<128x128xbf16>, vector<128x128xbf16>, vector<128x128xf32> -> vector<128x128xf32>
    %326 = arith.addf %316, %325 : vector<128x128xf32>
    %c24_183 = arith.constant 24 : index
    %c0_184 = arith.constant 0 : index
    %327 = vector.load %arg12[%c24_183, %c0_184] : memref<304x128xf32, #tpu.memory_space<vmem>>, vector<128x128xf32>
    %328 = arith.truncf %327 : vector<128x128xf32> to vector<128x128xbf16>
    %c4_185 = arith.constant 4 : index
    %c0_186 = arith.constant 0 : index
    %c0_187 = arith.constant 0 : index
    %329 = vector.load %arg5[%c4_185, %c0_186, %c0_187] : memref<9x128x128xbf16, #tpu.memory_space<vmem>>, vector<1x128x128xbf16>
    %330 = vector.shape_cast %329 : vector<1x128x128xbf16> to vector<128x128xbf16>
    %cst_188 = arith.constant dense<0.000000e+00> : vector<128x128xf32>
    %331 = tpu.matmul %328, %330, %cst_188 {dimension_numbers = #tpu.dot_dimension_numbers<[1], [0], [0], [1], [0, 0, 1, 1], [], []>} : vector<128x128xbf16>, vector<128x128xbf16>, vector<128x128xf32> -> vector<128x128xf32>
    %332 = arith.addf %326, %331 : vector<128x128xf32>
    %c25_189 = arith.constant 25 : index
    %c0_190 = arith.constant 0 : index
    %333 = vector.load %arg12[%c25_189, %c0_190] : memref<304x128xf32, #tpu.memory_space<vmem>>, vector<128x128xf32>
    %cst_191 = arith.constant 0.000000e+00 : f32
    %334 = vector.shape_cast %289 : vector<128x1xi1> to vector<128x1xi1>
    %335 = vector.broadcast %334 : vector<128x1xi1> to vector<128x128xi1>
    %336 = vector.broadcast %cst_191 : f32 to vector<128x128xf32>
    %337 = arith.select %335, %333, %336 : vector<128x128xi1>, vector<128x128xf32>
    %338 = arith.truncf %337 : vector<128x128xf32> to vector<128x128xbf16>
    %c5_192 = arith.constant 5 : index
    %c0_193 = arith.constant 0 : index
    %c0_194 = arith.constant 0 : index
    %339 = vector.load %arg5[%c5_192, %c0_193, %c0_194] : memref<9x128x128xbf16, #tpu.memory_space<vmem>>, vector<1x128x128xbf16>
    %340 = vector.shape_cast %339 : vector<1x128x128xbf16> to vector<128x128xbf16>
    %cst_195 = arith.constant dense<0.000000e+00> : vector<128x128xf32>
    %341 = tpu.matmul %338, %340, %cst_195 {dimension_numbers = #tpu.dot_dimension_numbers<[1], [0], [0], [1], [0, 0, 1, 1], [], []>} : vector<128x128xbf16>, vector<128x128xbf16>, vector<128x128xf32> -> vector<128x128xf32>
    %342 = arith.addf %332, %341 : vector<128x128xf32>
    %c39_196 = arith.constant 39 : index
    %c0_197 = arith.constant 0 : index
    %343 = vector.load %arg12[%c39_196, %c0_197] : memref<304x128xf32, #tpu.memory_space<vmem>>, vector<128x128xf32>
    %cst_198 = arith.constant 0.000000e+00 : f32
    %344 = vector.shape_cast %287 : vector<128x1xi1> to vector<128x1xi1>
    %345 = vector.broadcast %344 : vector<128x1xi1> to vector<128x128xi1>
    %346 = vector.broadcast %cst_198 : f32 to vector<128x128xf32>
    %347 = arith.select %345, %343, %346 : vector<128x128xi1>, vector<128x128xf32>
    %348 = arith.truncf %347 : vector<128x128xf32> to vector<128x128xbf16>
    %c6_199 = arith.constant 6 : index
    %c0_200 = arith.constant 0 : index
    %c0_201 = arith.constant 0 : index
    %349 = vector.load %arg5[%c6_199, %c0_200, %c0_201] : memref<9x128x128xbf16, #tpu.memory_space<vmem>>, vector<1x128x128xbf16>
    %350 = vector.shape_cast %349 : vector<1x128x128xbf16> to vector<128x128xbf16>
    %cst_202 = arith.constant dense<0.000000e+00> : vector<128x128xf32>
    %351 = tpu.matmul %348, %350, %cst_202 {dimension_numbers = #tpu.dot_dimension_numbers<[1], [0], [0], [1], [0, 0, 1, 1], [], []>} : vector<128x128xbf16>, vector<128x128xbf16>, vector<128x128xf32> -> vector<128x128xf32>
    %352 = arith.addf %342, %351 : vector<128x128xf32>
    %c40_203 = arith.constant 40 : index
    %c0_204 = arith.constant 0 : index
    %353 = vector.load %arg12[%c40_203, %c0_204] : memref<304x128xf32, #tpu.memory_space<vmem>>, vector<128x128xf32>
    %354 = arith.truncf %353 : vector<128x128xf32> to vector<128x128xbf16>
    %c7_205 = arith.constant 7 : index
    %c0_206 = arith.constant 0 : index
    %c0_207 = arith.constant 0 : index
    %355 = vector.load %arg5[%c7_205, %c0_206, %c0_207] : memref<9x128x128xbf16, #tpu.memory_space<vmem>>, vector<1x128x128xbf16>
    %356 = vector.shape_cast %355 : vector<1x128x128xbf16> to vector<128x128xbf16>
    %cst_208 = arith.constant dense<0.000000e+00> : vector<128x128xf32>
    %357 = tpu.matmul %354, %356, %cst_208 {dimension_numbers = #tpu.dot_dimension_numbers<[1], [0], [0], [1], [0, 0, 1, 1], [], []>} : vector<128x128xbf16>, vector<128x128xbf16>, vector<128x128xf32> -> vector<128x128xf32>
    %358 = arith.addf %352, %357 : vector<128x128xf32>
    %c41_209 = arith.constant 41 : index
    %c0_210 = arith.constant 0 : index
    %359 = vector.load %arg12[%c41_209, %c0_210] : memref<304x128xf32, #tpu.memory_space<vmem>>, vector<128x128xf32>
    %cst_211 = arith.constant 0.000000e+00 : f32
    %360 = vector.shape_cast %289 : vector<128x1xi1> to vector<128x1xi1>
    %361 = vector.broadcast %360 : vector<128x1xi1> to vector<128x128xi1>
    %362 = vector.broadcast %cst_211 : f32 to vector<128x128xf32>
    %363 = arith.select %361, %359, %362 : vector<128x128xi1>, vector<128x128xf32>
    %364 = arith.truncf %363 : vector<128x128xf32> to vector<128x128xbf16>
    %c8_212 = arith.constant 8 : index
    %c0_213 = arith.constant 0 : index
    %c0_214 = arith.constant 0 : index
    %365 = vector.load %arg5[%c8_212, %c0_213, %c0_214] : memref<9x128x128xbf16, #tpu.memory_space<vmem>>, vector<1x128x128xbf16>
    %366 = vector.shape_cast %365 : vector<1x128x128xbf16> to vector<128x128xbf16>
    %cst_215 = arith.constant dense<0.000000e+00> : vector<128x128xf32>
    %367 = tpu.matmul %364, %366, %cst_215 {dimension_numbers = #tpu.dot_dimension_numbers<[1], [0], [0], [1], [0, 0, 1, 1], [], []>} : vector<128x128xbf16>, vector<128x128xbf16>, vector<128x128xf32> -> vector<128x128xf32>
    %368 = arith.addf %358, %367 : vector<128x128xf32>
    %369 = vector.broadcast %268 : vector<1x128xf32> to vector<128x128xf32>
    %370 = arith.addf %368, %369 : vector<128x128xf32>
    %371 = vector.extract_strided_slice %266 {offsets = [0, 0], sizes = [128, 128], strides = [1, 1]} : vector<256x128xf32> to vector<128x128xf32>
    %372 = vector.broadcast %267 : f32 to vector<128x128xf32>
    %373 = arith.mulf %372, %370 : vector<128x128xf32>
    %374 = arith.addf %371, %373 : vector<128x128xf32>
    %375 = vector.shape_cast %374 : vector<128x128xf32> to vector<1x128x128xf32>
    %c0_216 = arith.constant 0 : index
    %c0_217 = arith.constant 0 : index
    %c0_218 = arith.constant 0 : index
    %376 = vector.load %arg10[%c0_216, %c0_217, %c0_218] : memref<1x256x128xf32, #tpu.memory_space<vmem>>, vector<1x128x128xf32>
    tpu.vector_store %arg10[%c0_216, %c0_217, %c0_218], %375 {strides = array<i32>} : memref<1x256x128xf32, #tpu.memory_space<vmem>>, vector<1x128x128xf32>,
    %cst_219 = arith.constant 0.000000e+00 : f32
    %377 = vector.broadcast %cst_219 : f32 to vector<128x128xf32>
    %c135_220 = arith.constant 135 : index
    %c0_221 = arith.constant 0 : index
    %378 = vector.load %arg12[%c135_220, %c0_221] : memref<304x128xf32, #tpu.memory_space<vmem>>, vector<128x128xf32>
    %cst_222 = arith.constant 0.000000e+00 : f32
    %379 = vector.shape_cast %287 : vector<128x1xi1> to vector<128x1xi1>
    %380 = vector.broadcast %379 : vector<128x1xi1> to vector<128x128xi1>
    %381 = vector.broadcast %cst_222 : f32 to vector<128x128xf32>
    %382 = arith.select %380, %378, %381 : vector<128x128xi1>, vector<128x128xf32>
    %383 = arith.truncf %382 : vector<128x128xf32> to vector<128x128xbf16>
    %c0_223 = arith.constant 0 : index
    %c0_224 = arith.constant 0 : index
    %c0_225 = arith.constant 0 : index
    %384 = vector.load %arg5[%c0_223, %c0_224, %c0_225] : memref<9x128x128xbf16, #tpu.memory_space<vmem>>, vector<1x128x128xbf16>
    %385 = vector.shape_cast %384 : vector<1x128x128xbf16> to vector<128x128xbf16>
    %cst_226 = arith.constant dense<0.000000e+00> : vector<128x128xf32>
    %386 = tpu.matmul %383, %385, %cst_226 {dimension_numbers = #tpu.dot_dimension_numbers<[1], [0], [0], [1], [0, 0, 1, 1], [], []>} : vector<128x128xbf16>, vector<128x128xbf16>, vector<128x128xf32> -> vector<128x128xf32>
    %387 = arith.addf %377, %386 : vector<128x128xf32>
    %c136_227 = arith.constant 136 : index
    %c0_228 = arith.constant 0 : index
    %388 = vector.load %arg12[%c136_227, %c0_228] : memref<304x128xf32, #tpu.memory_space<vmem>>, vector<128x128xf32>
    %389 = arith.truncf %388 : vector<128x128xf32> to vector<128x128xbf16>
    %c1_229 = arith.constant 1 : index
    %c0_230 = arith.constant 0 : index
    %c0_231 = arith.constant 0 : index
    %390 = vector.load %arg5[%c1_229, %c0_230, %c0_231] : memref<9x128x128xbf16, #tpu.memory_space<vmem>>, vector<1x128x128xbf16>
    %391 = vector.shape_cast %390 : vector<1x128x128xbf16> to vector<128x128xbf16>
    %cst_232 = arith.constant dense<0.000000e+00> : vector<128x128xf32>
    %392 = tpu.matmul %389, %391, %cst_232 {dimension_numbers = #tpu.dot_dimension_numbers<[1], [0], [0], [1], [0, 0, 1, 1], [], []>} : vector<128x128xbf16>, vector<128x128xbf16>, vector<128x128xf32> -> vector<128x128xf32>
    %393 = arith.addf %387, %392 : vector<128x128xf32>
    %c137_233 = arith.constant 137 : index
    %c0_234 = arith.constant 0 : index
    %394 = vector.load %arg12[%c137_233, %c0_234] : memref<304x128xf32, #tpu.memory_space<vmem>>, vector<128x128xf32>
    %cst_235 = arith.constant 0.000000e+00 : f32
    %395 = vector.shape_cast %289 : vector<128x1xi1> to vector<128x1xi1>
    %396 = vector.broadcast %395 : vector<128x1xi1> to vector<128x128xi1>
    %397 = vector.broadcast %cst_235 : f32 to vector<128x128xf32>
    %398 = arith.select %396, %394, %397 : vector<128x128xi1>, vector<128x128xf32>
    %399 = arith.truncf %398 : vector<128x128xf32> to vector<128x128xbf16>
    %c2_236 = arith.constant 2 : index
    %c0_237 = arith.constant 0 : index
    %c0_238 = arith.constant 0 : index
    %400 = vector.load %arg5[%c2_236, %c0_237, %c0_238] : memref<9x128x128xbf16, #tpu.memory_space<vmem>>, vector<1x128x128xbf16>
    %401 = vector.shape_cast %400 : vector<1x128x128xbf16> to vector<128x128xbf16>
    %cst_239 = arith.constant dense<0.000000e+00> : vector<128x128xf32>
    %402 = tpu.matmul %399, %401, %cst_239 {dimension_numbers = #tpu.dot_dimension_numbers<[1], [0], [0], [1], [0, 0, 1, 1], [], []>} : vector<128x128xbf16>, vector<128x128xbf16>, vector<128x128xf32> -> vector<128x128xf32>
    %403 = arith.addf %393, %402 : vector<128x128xf32>
    %c151_240 = arith.constant 151 : index
    %c0_241 = arith.constant 0 : index
    %404 = vector.load %arg12[%c151_240, %c0_241] : memref<304x128xf32, #tpu.memory_space<vmem>>, vector<128x128xf32>
    %cst_242 = arith.constant 0.000000e+00 : f32
    %405 = vector.shape_cast %287 : vector<128x1xi1> to vector<128x1xi1>
    %406 = vector.broadcast %405 : vector<128x1xi1> to vector<128x128xi1>
    %407 = vector.broadcast %cst_242 : f32 to vector<128x128xf32>
    %408 = arith.select %406, %404, %407 : vector<128x128xi1>, vector<128x128xf32>
    %409 = arith.truncf %408 : vector<128x128xf32> to vector<128x128xbf16>
    %c3_243 = arith.constant 3 : index
    %c0_244 = arith.constant 0 : index
    %c0_245 = arith.constant 0 : index
    %410 = vector.load %arg5[%c3_243, %c0_244, %c0_245] : memref<9x128x128xbf16, #tpu.memory_space<vmem>>, vector<1x128x128xbf16>
    %411 = vector.shape_cast %410 : vector<1x128x128xbf16> to vector<128x128xbf16>
    %cst_246 = arith.constant dense<0.000000e+00> : vector<128x128xf32>
    %412 = tpu.matmul %409, %411, %cst_246 {dimension_numbers = #tpu.dot_dimension_numbers<[1], [0], [0], [1], [0, 0, 1, 1], [], []>} : vector<128x128xbf16>, vector<128x128xbf16>, vector<128x128xf32> -> vector<128x128xf32>
    %413 = arith.addf %403, %412 : vector<128x128xf32>
    %c152_247 = arith.constant 152 : index
    %c0_248 = arith.constant 0 : index
    %414 = vector.load %arg12[%c152_247, %c0_248] : memref<304x128xf32, #tpu.memory_space<vmem>>, vector<128x128xf32>
    %415 = arith.truncf %414 : vector<128x128xf32> to vector<128x128xbf16>
    %c4_249 = arith.constant 4 : index
    %c0_250 = arith.constant 0 : index
    %c0_251 = arith.constant 0 : index
    %416 = vector.load %arg5[%c4_249, %c0_250, %c0_251] : memref<9x128x128xbf16, #tpu.memory_space<vmem>>, vector<1x128x128xbf16>
    %417 = vector.shape_cast %416 : vector<1x128x128xbf16> to vector<128x128xbf16>
    %cst_252 = arith.constant dense<0.000000e+00> : vector<128x128xf32>
    %418 = tpu.matmul %415, %417, %cst_252 {dimension_numbers = #tpu.dot_dimension_numbers<[1], [0], [0], [1], [0, 0, 1, 1], [], []>} : vector<128x128xbf16>, vector<128x128xbf16>, vector<128x128xf32> -> vector<128x128xf32>
    %419 = arith.addf %413, %418 : vector<128x128xf32>
    %c153_253 = arith.constant 153 : index
    %c0_254 = arith.constant 0 : index
    %420 = vector.load %arg12[%c153_253, %c0_254] : memref<304x128xf32, #tpu.memory_space<vmem>>, vector<128x128xf32>
    %cst_255 = arith.constant 0.000000e+00 : f32
    %421 = vector.shape_cast %289 : vector<128x1xi1> to vector<128x1xi1>
    %422 = vector.broadcast %421 : vector<128x1xi1> to vector<128x128xi1>
    %423 = vector.broadcast %cst_255 : f32 to vector<128x128xf32>
    %424 = arith.select %422, %420, %423 : vector<128x128xi1>, vector<128x128xf32>
    %425 = arith.truncf %424 : vector<128x128xf32> to vector<128x128xbf16>
    %c5_256 = arith.constant 5 : index
    %c0_257 = arith.constant 0 : index
    %c0_258 = arith.constant 0 : index
    %426 = vector.load %arg5[%c5_256, %c0_257, %c0_258] : memref<9x128x128xbf16, #tpu.memory_space<vmem>>, vector<1x128x128xbf16>
    %427 = vector.shape_cast %426 : vector<1x128x128xbf16> to vector<128x128xbf16>
    %cst_259 = arith.constant dense<0.000000e+00> : vector<128x128xf32>
    %428 = tpu.matmul %425, %427, %cst_259 {dimension_numbers = #tpu.dot_dimension_numbers<[1], [0], [0], [1], [0, 0, 1, 1], [], []>} : vector<128x128xbf16>, vector<128x128xbf16>, vector<128x128xf32> -> vector<128x128xf32>
    %429 = arith.addf %419, %428 : vector<128x128xf32>
    %c167_260 = arith.constant 167 : index
    %c0_261 = arith.constant 0 : index
    %430 = vector.load %arg12[%c167_260, %c0_261] : memref<304x128xf32, #tpu.memory_space<vmem>>, vector<128x128xf32>
    %cst_262 = arith.constant 0.000000e+00 : f32
    %431 = vector.shape_cast %287 : vector<128x1xi1> to vector<128x1xi1>
    %432 = vector.broadcast %431 : vector<128x1xi1> to vector<128x128xi1>
    %433 = vector.broadcast %cst_262 : f32 to vector<128x128xf32>
    %434 = arith.select %432, %430, %433 : vector<128x128xi1>, vector<128x128xf32>
    %435 = arith.truncf %434 : vector<128x128xf32> to vector<128x128xbf16>
    %c6_263 = arith.constant 6 : index
    %c0_264 = arith.constant 0 : index
    %c0_265 = arith.constant 0 : index
    %436 = vector.load %arg5[%c6_263, %c0_264, %c0_265] : memref<9x128x128xbf16, #tpu.memory_space<vmem>>, vector<1x128x128xbf16>
    %437 = vector.shape_cast %436 : vector<1x128x128xbf16> to vector<128x128xbf16>
    %cst_266 = arith.constant dense<0.000000e+00> : vector<128x128xf32>
    %438 = tpu.matmul %435, %437, %cst_266 {dimension_numbers = #tpu.dot_dimension_numbers<[1], [0], [0], [1], [0, 0, 1, 1], [], []>} : vector<128x128xbf16>, vector<128x128xbf16>, vector<128x128xf32> -> vector<128x128xf32>
    %439 = arith.addf %429, %438 : vector<128x128xf32>
    %c168_267 = arith.constant 168 : index
    %c0_268 = arith.constant 0 : index
    %440 = vector.load %arg12[%c168_267, %c0_268] : memref<304x128xf32, #tpu.memory_space<vmem>>, vector<128x128xf32>
    %441 = arith.truncf %440 : vector<128x128xf32> to vector<128x128xbf16>
    %c7_269 = arith.constant 7 : index
    %c0_270 = arith.constant 0 : index
    %c0_271 = arith.constant 0 : index
    %442 = vector.load %arg5[%c7_269, %c0_270, %c0_271] : memref<9x128x128xbf16, #tpu.memory_space<vmem>>, vector<1x128x128xbf16>
    %443 = vector.shape_cast %442 : vector<1x128x128xbf16> to vector<128x128xbf16>
    %cst_272 = arith.constant dense<0.000000e+00> : vector<128x128xf32>
    %444 = tpu.matmul %441, %443, %cst_272 {dimension_numbers = #tpu.dot_dimension_numbers<[1], [0], [0], [1], [0, 0, 1, 1], [], []>} : vector<128x128xbf16>, vector<128x128xbf16>, vector<128x128xf32> -> vector<128x128xf32>
    %445 = arith.addf %439, %444 : vector<128x128xf32>
    %c169_273 = arith.constant 169 : index
    %c0_274 = arith.constant 0 : index
    %446 = vector.load %arg12[%c169_273, %c0_274] : memref<304x128xf32, #tpu.memory_space<vmem>>, vector<128x128xf32>
    %cst_275 = arith.constant 0.000000e+00 : f32
    %447 = vector.shape_cast %289 : vector<128x1xi1> to vector<128x1xi1>
    %448 = vector.broadcast %447 : vector<128x1xi1> to vector<128x128xi1>
    %449 = vector.broadcast %cst_275 : f32 to vector<128x128xf32>
    %450 = arith.select %448, %446, %449 : vector<128x128xi1>, vector<128x128xf32>
    %451 = arith.truncf %450 : vector<128x128xf32> to vector<128x128xbf16>
    %c8_276 = arith.constant 8 : index
    %c0_277 = arith.constant 0 : index
    %c0_278 = arith.constant 0 : index
    %452 = vector.load %arg5[%c8_276, %c0_277, %c0_278] : memref<9x128x128xbf16, #tpu.memory_space<vmem>>, vector<1x128x128xbf16>
    %453 = vector.shape_cast %452 : vector<1x128x128xbf16> to vector<128x128xbf16>
    %cst_279 = arith.constant dense<0.000000e+00> : vector<128x128xf32>
    %454 = tpu.matmul %451, %453, %cst_279 {dimension_numbers = #tpu.dot_dimension_numbers<[1], [0], [0], [1], [0, 0, 1, 1], [], []>} : vector<128x128xbf16>, vector<128x128xbf16>, vector<128x128xf32> -> vector<128x128xf32>
    %455 = arith.addf %445, %454 : vector<128x128xf32>
    %456 = vector.broadcast %268 : vector<1x128xf32> to vector<128x128xf32>
    %457 = arith.addf %455, %456 : vector<128x128xf32>
    %458 = vector.extract_strided_slice %266 {offsets = [128, 0], sizes = [128, 128], strides = [1, 1]} : vector<256x128xf32> to vector<128x128xf32>
    %459 = vector.broadcast %267 : f32 to vector<128x128xf32>
    %460 = arith.mulf %459, %457 : vector<128x128xf32>
    %461 = arith.addf %458, %460 : vector<128x128xf32>
    %462 = vector.shape_cast %461 : vector<128x128xf32> to vector<1x128x128xf32>
    %c0_280 = arith.constant 0 : index
    %c128 = arith.constant 128 : index
    %c0_281 = arith.constant 0 : index
    %463 = vector.load %arg10[%c0_280, %c128, %c0_281] : memref<1x256x128xf32, #tpu.memory_space<vmem>>, vector<1x128x128xf32>
    tpu.vector_store %arg10[%c0_280, %c128, %c0_281], %462 {strides = array<i32>} : memref<1x256x128xf32, #tpu.memory_space<vmem>>, vector<1x128x128xf32>,
    return
  }
  func.func @transform_0(%arg0: i32) -> (i32, i32, i32) {
    %c0_i32 = arith.constant 0 : i32
    %c0_i32_0 = arith.constant 0 : i32
    %c0_i32_1 = arith.constant 0 : i32
    return %arg0, %c0_i32, %c0_i32_0 : i32, i32, i32
  }
  func.func @transform_1(%arg0: i32) -> (i32, i32, i32) {
    %c0_i32 = arith.constant 0 : i32
    %c0_i32_0 = arith.constant 0 : i32
    %c0_i32_1 = arith.constant 0 : i32
    return %arg0, %c0_i32, %c0_i32_0 : i32, i32, i32
  }
  func.func @transform_2(%arg0: i32) -> (i32, i32, i32) {
    %c0_i32 = arith.constant 0 : i32
    %c0_i32_0 = arith.constant 0 : i32
    %c0_i32_1 = arith.constant 0 : i32
    %c0_i32_2 = arith.constant 0 : i32
    return %c0_i32, %c0_i32_0, %c0_i32_1 : i32, i32, i32
  }
  func.func @transform_3(%arg0: i32) -> (i32, i32) {
    %c0_i32 = arith.constant 0 : i32
    %c0_i32_0 = arith.constant 0 : i32
    %c0_i32_1 = arith.constant 0 : i32
    return %c0_i32, %c0_i32_0 : i32, i32
  }
  func.func @transform_4(%arg0: i32) -> (i32, i32, i32) {
    %c0_i32 = arith.constant 0 : i32
    %c0_i32_0 = arith.constant 0 : i32
    %c0_i32_1 = arith.constant 0 : i32
    %c0_i32_2 = arith.constant 0 : i32
    return %c0_i32, %c0_i32_0, %c0_i32_1 : i32, i32, i32
  }
  func.func @transform_5(%arg0: i32) -> (i32, i32) {
    %c0_i32 = arith.constant 0 : i32
    %c0_i32_0 = arith.constant 0 : i32
    %c0_i32_1 = arith.constant 0 : i32
    return %c0_i32, %c0_i32_0 : i32, i32
  }
  func.func @transform_6(%arg0: i32) -> (i32, i32) {
    %c0_i32 = arith.constant 0 : i32
    %c0_i32_0 = arith.constant 0 : i32
    %c0_i32_1 = arith.constant 0 : i32
    return %c0_i32, %c0_i32_0 : i32, i32
  }
  func.func @transform_7(%arg0: i32) -> (i32, i32) {
    %c0_i32 = arith.constant 0 : i32
    %c0_i32_0 = arith.constant 0 : i32
    %c0_i32_1 = arith.constant 0 : i32
    return %c0_i32, %c0_i32_0 : i32, i32
  }
  func.func @transform_8(%arg0: i32) -> (i32, i32) {
    %c0_i32 = arith.constant 0 : i32
    %c0_i32_0 = arith.constant 0 : i32
    %c0_i32_1 = arith.constant 0 : i32
    return %c0_i32, %c0_i32_0 : i32, i32
  }
  func.func @transform_9(%arg0: i32) -> (i32, i32, i32) {
    %c0_i32 = arith.constant 0 : i32
    %c0_i32_0 = arith.constant 0 : i32
    %c0_i32_1 = arith.constant 0 : i32
    return %arg0, %c0_i32, %c0_i32_0 : i32, i32, i32
  }
}

</mosaic_0001>

<bundles_post_ra>
// kernel: residual_block_g.2
= control target key start
LH: loop header
LB: loop body
LE: loop exit
PB: predicated region body
PF: predicated region fallthrough
CT: control target
= control target key end

     0   :  { %v1864_v0 = vmov 0.0|0.0   ;;  %vm1865_vm0 = vmmov 0   ;;  %v1866_v4 = vmov 0.0   ;;  %vm32_vm1 = vcmask 261120   ;;  %s2254_s1 = inlined_call_operand.vmem [shape: f32[8,32,32], index: 1, kind: input, shape index: {}]   ;;  %s2255_s0 = inlined_call_operand.vmem [shape: f32[2,32], index: 0, kind: input, shape index: {}]   ;;  %s2256_s3 = inlined_call_operand.vmem [shape: f32[8,32,128], index: 3, kind: input, shape index: {}]   ;;  %s2257_s2 = inlined_call_operand.vmem [shape: f32[8,1,32], index: 2, kind: input, shape index: {}]   ;;  %s2258_s4 = inlined_call_operand.vmem [shape: f32[8,1,128], index: 4, kind: input, shape index: {}]   ;;  %s2259_s5 = inlined_call_operand.vmem [shape: f32[8,2,128], index: 5, kind: output, shape index: {}]  }
   0x1   :  { %1765 = vmatprep.subr.bf16.mxu0 %v1864_v0  ;;  %v21_v1 = vld [vmem:[%s2254_s1] sm:$0xff]  ;;  %v22_v2 = vld [vmem:[%s2254_s1 + $0x8] sm:$0xff]  ;;  %v23_v3 = vld [vmem:[%s2254_s1 + $0x10] sm:$0xff]  ;;  %1597 = vmatprep.mubr.msk.f32.mxu0 %vm1865_vm0, %v1866_v4 }
   0x2   :  { %v1766_v5 = vpack.c.bf16 %v22_v2, %v21_v1  ;;  %v24_v6 = vld [vmem:[%s2254_s1 + $0x18] sm:$0xff]  ;;  %1771 = vmatprep.subr.bf16.mxu1 %v1864_v0  ;;  %1608 = vmatprep.mubr.msk.f32.mxu1 %vm1865_vm0, %v1866_v4  ;;  %v1404_v8 = vld [vmem:[%s2254_s1 + $0x20] sm:$0xff]  ;;  %v1405_v9 = vld [vmem:[%s2254_s1 + $0x28] sm:$0xff] }
   0x3   :  { %v1769_v7 = vpack.c.bf16 %v24_v6, %v23_v3  ;;  %v1925_v10 = vld [vmem:[%s2255_s0] sm:$0x3]  ;;  %v1778_v11 = vpack.c.bf16 %v1405_v9, %v1404_v8  ;;  %v1406_v12 = vld [vmem:[%s2254_s1 + $0x30] sm:$0xff]  ;;  %v1407_v13 = vld [vmem:[%s2254_s1 + $0x38] sm:$0xff] }
   0x4   :  { %1767 = vmatpush3.bf16.msra.mxu0 %v1766_v5  ;;  %v1781_v14 = vpack.c.bf16 %v1407_v13, %v1406_v12  ;;  %v107_v15 = vld [vmem:[%s2256_s3] sm:$0xff]  ;;  %v108_v16 = vld [vmem:[%s2256_s3 + $0x8] sm:$0xff]  ;;  %v1421_v21 = vld [vmem:[%s2254_s1 + $0x50] sm:$0xff] }
   0x5   :  { %1768 = vmatprep.subr.bf16.mxu0 %v1864_v0  ;;  %v1419_v17 = vld [vmem:[%s2254_s1 + $0x40] sm:$0xff]  ;;  %v1420_v18 = vld [vmem:[%s2254_s1 + $0x48] sm:$0xff]  ;;  %v1772_v19 = vpack.c.bf16 %v108_v16, %v107_v15  ;;  %v1422_v22 = vld [vmem:[%s2254_s1 + $0x58] sm:$0xff] }
   0x6   :  { %v1790_v20 = vpack.c.bf16 %v1420_v18, %v1419_v17  ;;  %v1793_v23 = vpack.c.bf16 %v1422_v22, %v1421_v21  ;;  %v1434_v24 = vld [vmem:[%s2254_s1 + $0x60] sm:$0xff]  ;;  %v1435_v25 = vld [vmem:[%s2254_s1 + $0x68] sm:$0xff]  ;;  %v1436_v27 = vld [vmem:[%s2254_s1 + $0x70] sm:$0xff] }
   0x7   :  { %1773 = vmatpush3.bf16.msra.mxu1 %v1772_v19  ;;  %v1802_v26 = vpack.c.bf16 %v1435_v25, %v1434_v24  ;;  %v1437_v28 = vld [vmem:[%s2254_s1 + $0x78] sm:$0xff]  ;;  %v1449_v30 = vld [vmem:[%s2254_s1 + $0x80] sm:$0xff]  ;;  %v1450_v31 = vld [vmem:[%s2254_s1 + $0x88] sm:$0xff] }
   0x8   :  { %1770 = vmatpush3.bf16.msra.mxu0 %v1769_v7  ;;  %1774 = vmatprep.subr.bf16.mxu1 %v1864_v0  ;;  %v1805_v29 = vpack.c.bf16 %v1437_v28, %v1436_v27  ;;  %v1814_v32 = vpack.c.bf16 %v1450_v31, %v1449_v30  ;;  %v1451_v33 = vld [vmem:[%s2254_s1 + $0x90] sm:$0xff]  ;;  %v1452_v34 = vld [vmem:[%s2254_s1 + $0x98] sm:$0xff]  ;;  %v1464_v36 = vld [vmem:[%s2254_s1 + $0xa0] sm:$0xff] }
   0x9   :  { %1777 = vmatprep.subr.bf16.mxu0 %v1864_v0  ;;  %v1817_v35 = vpack.c.bf16 %v1452_v34, %v1451_v33  ;;  %v1465_v37 = vld [vmem:[%s2254_s1 + $0xa8] sm:$0xff]  ;;  %v1466_v39 = vld [vmem:[%s2254_s1 + $0xb0] sm:$0xff]  ;;  %v1467_v40 = vld [vmem:[%s2254_s1 + $0xb8] sm:$0xff] }
   0xa   :  { %v1826_v38 = vpack.c.bf16 %v1465_v37, %v1464_v36  ;;  %v1829_v41 = vpack.c.bf16 %v1467_v40, %v1466_v39  ;;  %v1479_v42 = vld [vmem:[%s2254_s1 + $0xc0] sm:$0xff]  ;;  %v1480_v43 = vld [vmem:[%s2254_s1 + $0xc8] sm:$0xff]  ;;  %v1481_v45 = vld [vmem:[%s2254_s1 + $0xd0] sm:$0xff] }
   0xb   :  { %1598 = vmatmul.mubr.msk.f32.vlgmr.msra.gmra.mrb[0].mxu0 %vm32_vm1, %v1925_v10  ;;  %v1838_v44 = vpack.c.bf16 %v1480_v43, %v1479_v42  ;;  %v1482_v46 = vld [vmem:[%s2254_s1 + $0xd8] sm:$0xff]  ;;  %v1494_v48 = vld [vmem:[%s2254_s1 + $0xe0] sm:$0xff]  ;;  %v1495_v49 = vld [vmem:[%s2254_s1 + $0xe8] sm:$0xff] }
   0xc   :  { %1779 = vmatpush3.bf16.msra.mxu0 %v1778_v11  ;;  %1619 = vmatprep.mubr.msk.f32.mxu0 %vm1865_vm0, %v1866_v4  ;;  %v1841_v47 = vpack.c.bf16 %v1482_v46, %v1481_v45  ;;  %v1850_v50 = vpack.c.bf16 %v1495_v49, %v1494_v48  ;;  %v1496_v51 = vld [vmem:[%s2254_s1 + $0xf0] sm:$0xff]  ;;  %v1497_v52 = vld [vmem:[%s2254_s1 + $0xf8] sm:$0xff]  ;;  %v1400_v57 = vld [vmem:[%s2257_s2] ss:$0 sm:$0xff] }
   0xd   :  { %1780 = vmatprep.subr.bf16.mxu0 %v1864_v0  ;;  %v1853_v53 = vpack.c.bf16 %v1497_v52, %v1496_v51  ;;  %v109_v54 = vld [vmem:[%s2256_s3 + $0x10] sm:$0xff]  ;;  %v110_v55 = vld [vmem:[%s2256_s3 + $0x18] sm:$0xff]  ;;  %v1411_v58 = vld [vmem:[%s2256_s3 + $0x20] sm:$0xff] }
   0xe   :  { %v1775_v56 = vpack.c.bf16 %v110_v55, %v109_v54  ;;  %v1412_v59 = vld [vmem:[%s2256_s3 + $0x28] sm:$0xff]  ;;  %v1413_v2 = vld [vmem:[%s2256_s3 + $0x30] sm:$0xff]  ;;  %v1414_v3 = vld [vmem:[%s2256_s3 + $0x38] sm:$0xff] }
   0xf   :  { %v1784_v63 = vpack.c.bf16 %v1412_v59, %v1411_v58  ;;  %v1409_v5 = vld [vmem:[%s2257_s2 + $0x1] ss:$0 sm:$0xff]  ;;  %v1787_v6 = vpack.c.bf16 %v1414_v3, %v1413_v2  ;;  %v1427_v8 = vld [vmem:[%s2256_s3 + $0x48] sm:$0xff]  ;;  %v1429_v15 = vld [vmem:[%s2256_s3 + $0x58] sm:$0xff] }
  0x10   :  { %1782 = vmatpush3.bf16.msra.mxu0 %v1781_v14  ;;  %1776 = vmatpush3.bf16.msra.mxu1 %v1775_v56  ;;  %v1426_v7 = vld [vmem:[%s2256_s3 + $0x40] sm:$0xff]  ;;  %v1428_v14 = vld [vmem:[%s2256_s3 + $0x50] sm:$0xff]  ;;  %v1442_v19 = vld [vmem:[%s2256_s3 + $0x68] sm:$0xff] }
  0x11   :  { %1789 = vmatprep.subr.bf16.mxu0 %v1864_v0  ;;  %1783 = vmatprep.subr.bf16.mxu1 %v1864_v0  ;;  %v1796_v12 = vpack.c.bf16 %v1427_v8, %v1426_v7  ;;  %v1424_v16 = vld [vmem:[%s2257_s2 + $0x2] ss:$0 sm:$0xff]  ;;  %v1799_v17 = vpack.c.bf16 %v1429_v15, %v1428_v14  ;;  %v1443_v25 = vld [vmem:[%s2256_s3 + $0x70] sm:$0xff]  ;;  %v1439_v27 = vld [vmem:[%s2257_s2 + $0x3] ss:$0 sm:$0xff] }
  0x12   :  { %v1441_v18 = vld [vmem:[%s2256_s3 + $0x60] sm:$0xff]  ;;  %v1457_v30 = vld [vmem:[%s2256_s3 + $0x88] sm:$0xff]  ;;  %v1458_v36 = vld [vmem:[%s2256_s3 + $0x90] sm:$0xff] }
  0x13   :  { %1620 = vmatmul.mubr.msk.f32.vlgmr.msra.gmra.mrb[2].mxu0 %vm32_vm1, %v1925_v10  ;;  %v1459_v37 = vld [vmem:[%s2256_s3 + $0x98] sm:$0xff]  ;;  %v1471_v40 = vld [vmem:[%s2256_s3 + $0xa0] sm:$0xff]  ;;  %v1487_v52 = vld [vmem:[%s2256_s3 + $0xc8] sm:$0xff] }
  0x14   :  { %1791 = vmatpush3.bf16.msra.mxu0 %v1790_v20  ;;  %1641 = vmatprep.mubr.msk.f32.mxu0 %vm1865_vm0, %v1866_v4  ;;  %v1823_v39 = vpack.c.bf16 %v1459_v37, %v1458_v36  ;;  %v1474_v48 = vld [vmem:[%s2256_s3 + $0xb8] sm:$0xff]  ;;  %v1469_v49 = vld [vmem:[%s2257_s2 + $0x5] ss:$0 sm:$0xff]  ;;  %v1488_v58 = vld [vmem:[%s2256_s3 + $0xd0] sm:$0xff] }
  0x15   :  { %1792 = vmatprep.subr.bf16.mxu0 %v1864_v0  ;;  %v1486_v51 = vld [vmem:[%s2256_s3 + $0xc0] sm:$0xff]  ;;  %v1489_v59 = vld [vmem:[%s2256_s3 + $0xd8] sm:$0xff]  ;;  %v1503_v7 = vld [vmem:[%s2256_s3 + $0xf0] sm:$0xff] }
  0x16   :  { %v1844_v56 = vpack.c.bf16 %v1487_v52, %v1486_v51  ;;  %v1504_v8 = vld [vmem:[%s2256_s3 + $0xf8] sm:$0xff]  ;;  %v1402_v15 = vld [vmem:[%s2258_s4] ss:$0 sm:$0xff]  ;;  %v1491_v37 = vld [vmem:[%s2258_s4 + $0x6] ss:$0 sm:$0xff] }
  0x18   :  { %1794 = vmatpush3.bf16.msra.mxu0 %v1793_v23  ;;  %v1808_v23 = vpack.c.bf16 %v1442_v19, %v1441_v18 }
  0x19   :  { %1801 = vmatprep.subr.bf16.mxu0 %v1864_v0 }
  0x1b   :  { %1642 = vmatmul.mubr.msk.f32.vlgmr.msra.gmra.mrb[4].mxu0 %vm32_vm1, %v1925_v10 }
  0x1c   :  { %1803 = vmatpush3.bf16.msra.mxu0 %v1802_v26  ;;  %1663 = vmatprep.mubr.msk.f32.mxu0 %vm1865_vm0, %v1866_v4  ;;  %v1444_v26 = vld [vmem:[%s2256_s3 + $0x78] sm:$0xff] }
  0x1d   :  { %1804 = vmatprep.subr.bf16.mxu0 %v1864_v0  ;;  %v1811_v28 = vpack.c.bf16 %v1444_v26, %v1443_v25  ;;  %v1446_v25 = vld [vmem:[%s2258_s4 + $0x3] ss:$0 sm:$0xff] }
  0x20   :  { %1806 = vmatpush3.bf16.msra.mxu0 %v1805_v29  ;;  %v1456_v29 = vld [vmem:[%s2256_s3 + $0x80] sm:$0xff] }
  0x21   :  { %1813 = vmatprep.subr.bf16.mxu0 %v1864_v0  ;;  %v1820_v34 = vpack.c.bf16 %v1457_v30, %v1456_v29  ;;  %v1461_v29 = vld [vmem:[%s2258_s4 + $0x4] ss:$0 sm:$0xff] }
  0x23   :  { %1664 = vmatmul.mubr.msk.f32.vlgmr.msra.gmra.mrb[6].mxu0 %vm32_vm1, %v1925_v10 }
  0x24   :  { %1815 = vmatpush3.bf16.msra.mxu0 %v1814_v32  ;;  %1685 = vmatprep.mubr.msk.f32.mxu0 %vm1865_vm0, %v1866_v4 }
  0x25   :  { %1816 = vmatprep.subr.bf16.mxu0 %v1864_v0 }
  0x28   :  { %1818 = vmatpush3.bf16.msra.mxu0 %v1817_v35 }
  0x29   :  { %1825 = vmatprep.subr.bf16.mxu0 %v1864_v0 }
  0x2b   :  { %1686 = vmatmul.mubr.msk.f32.vlgmr.msra.gmra.mrb[8].mxu0 %vm32_vm1, %v1925_v10 }
  0x2c   :  { %1827 = vmatpush3.bf16.msra.mxu0 %v1826_v38  ;;  %1707 = vmatprep.mubr.msk.f32.mxu0 %vm1865_vm0, %v1866_v4  ;;  %v1454_v38 = vld [vmem:[%s2257_s2 + $0x4] ss:$0 sm:$0xff] }
  0x2d   :  { %1828 = vmatprep.subr.bf16.mxu0 %v1864_v0 }
  0x30   :  { %1830 = vmatpush3.bf16.msra.mxu0 %v1829_v41  ;;  %v1472_v41 = vld [vmem:[%s2256_s3 + $0xa8] sm:$0xff] }
  0x31   :  { %1837 = vmatprep.subr.bf16.mxu0 %v1864_v0  ;;  %v1832_v45 = vpack.c.bf16 %v1472_v41, %v1471_v40  ;;  %v1506_v41 = vld [vmem:[%s2258_s4 + $0x7] ss:$0 sm:$0xff] }
  0x33   :  { %1708 = vmatmul.mubr.msk.f32.vlgmr.msra.gmra.mrb[10].mxu0 %vm32_vm1, %v1925_v10 }
  0x34   :  { %1839 = vmatpush3.bf16.msra.mxu0 %v1838_v44  ;;  %1729 = vmatprep.mubr.msk.f32.mxu0 %vm1865_vm0, %v1866_v4 }
  0x35   :  { %1840 = vmatprep.subr.bf16.mxu0 %v1864_v0 }
  0x38   :  { %1842 = vmatpush3.bf16.msra.mxu0 %v1841_v47  ;;  %v1473_v47 = vld [vmem:[%s2256_s3 + $0xb0] sm:$0xff] }
  0x39   :  { %1849 = vmatprep.subr.bf16.mxu0 %v1864_v0 }
  0x3b   :  { %1730 = vmatmul.mubr.msk.f32.vlgmr.msra.gmra.mrb[12].mxu0 %vm32_vm1, %v1925_v10 }
  0x3c   :  { %1851 = vmatpush3.bf16.msra.mxu0 %v1850_v50  ;;  %1751 = vmatprep.mubr.msk.f32.mxu0 %vm1865_vm0, %v1866_v4  ;;  %v1835_v50 = vpack.c.bf16 %v1474_v48, %v1473_v47 }
  0x3d   :  { %1852 = vmatprep.subr.bf16.mxu0 %v1864_v0 }
  0x40   :  { %1854 = vmatpush3.bf16.msra.mxu0 %v1853_v53 }
  0x43   :  { %1752 = vmatmul.mubr.msk.f32.vlgmr.msra.gmra.mrb[14].mxu0 %vm32_vm1, %v1925_v10 }
  0xde   :  { %v102_v60 = vpop.f32.mrb[0].mxu0 }
  0xdf   :  { %v103_v61 = vadd.f32 %v1400_v57, %v102_v60  ;;  %v1599_v62 = vpop.f32.mrb[1].mxu0  ;;  %v1484_v60 = vld [vmem:[%s2257_s2 + $0x6] ss:$0 sm:$0xff] }
  0xe0   :  { %v1501_v62 = vld [vmem:[%s2256_s3 + $0xe0] sm:$0xff] }
  0xe1   :  { %v106_v1 = vmax.f32 %v103_v61, 0.0  ;;  %v1847_v61 = vpack.c.bf16 %v1489_v59, %v1488_v58 }
  0xe3   :  { %1609 = vmatmul.mubr.msk.f32.vlgmr.msra.gmra.mrb[0].mxu1 %vm32_vm1, %v106_v1 }
  0xe4   :  { %1785 = vmatpush3.bf16.msra.mxu1 %v1784_v63  ;;  %1630 = vmatprep.mubr.msk.f32.mxu1 %vm1865_vm0, %v1866_v4  ;;  %v1502_v63 = vld [vmem:[%s2256_s3 + $0xe8] sm:$0xff] }
  0xe5   :  { %1786 = vmatprep.subr.bf16.mxu1 %v1864_v0 }
  0xe6   :  { %v271_v9 = vpop.f32.mrb[2].mxu0 }
  0xe7   :  { %v272_v10 = vadd.f32 %v1409_v5, %v271_v9  ;;  %v1621_v11 = vpop.f32.mrb[3].mxu0  ;;  %v1856_v5 = vpack.c.bf16 %v1502_v63, %v1501_v62  ;;  %v1499_v9 = vld [vmem:[%s2257_s2 + $0x7] ss:$0 sm:$0xff] }
  0xe8   :  { %1788 = vmatpush3.bf16.msra.mxu1 %v1787_v6 }
  0xe9   :  { %v275_v13 = vmax.f32 %v272_v10, 0.0  ;;  %1795 = vmatprep.subr.bf16.mxu1 %v1864_v0  ;;  %v1859_v10 = vpack.c.bf16 %v1504_v8, %v1503_v7 }
  0xeb   :  { %1631 = vmatmul.mubr.msk.f32.vlgmr.msra.gmra.mrb[2].mxu1 %vm32_vm1, %v275_v13 }
  0xec   :  { %1797 = vmatpush3.bf16.msra.mxu1 %v1796_v12  ;;  %1652 = vmatprep.mubr.msk.f32.mxu1 %vm1865_vm0, %v1866_v4 }
  0xed   :  { %1798 = vmatprep.subr.bf16.mxu1 %v1864_v0 }
  0xee   :  { %v443_v20 = vpop.f32.mrb[4].mxu0 }
  0xef   :  { %v444_v21 = vadd.f32 %v1424_v16, %v443_v20  ;;  %v1643_v22 = vpop.f32.mrb[5].mxu0 }
  0xf0   :  { %1800 = vmatpush3.bf16.msra.mxu1 %v1799_v17 }
  0xf1   :  { %v447_v24 = vmax.f32 %v444_v21, 0.0  ;;  %1807 = vmatprep.subr.bf16.mxu1 %v1864_v0  ;;  %v1431_v21 = vld [vmem:[%s2258_s4 + $0x2] ss:$0 sm:$0xff] }
  0xf3   :  { %1653 = vmatmul.mubr.msk.f32.vlgmr.msra.gmra.mrb[4].mxu1 %vm32_vm1, %v447_v24 }
  0xf4   :  { %1809 = vmatpush3.bf16.msra.mxu1 %v1808_v23  ;;  %1674 = vmatprep.mubr.msk.f32.mxu1 %vm1865_vm0, %v1866_v4 }
  0xf5   :  { %1810 = vmatprep.subr.bf16.mxu1 %v1864_v0 }
  0xf6   :  { %v615_v31 = vpop.f32.mrb[6].mxu0 }
  0xf7   :  { %v616_v32 = vadd.f32 %v1439_v27, %v615_v31  ;;  %v1665_v33 = vpop.f32.mrb[7].mxu0 }
  0xf8   :  { %1812 = vmatpush3.bf16.msra.mxu1 %v1811_v28  ;;  %v1476_v33 = vld [vmem:[%s2258_s4 + $0x5] ss:$0 sm:$0xff] }
  0xf9   :  { %v619_v35 = vmax.f32 %v616_v32, 0.0  ;;  %1819 = vmatprep.subr.bf16.mxu1 %v1864_v0 }
  0xfb   :  { %1675 = vmatmul.mubr.msk.f32.vlgmr.msra.gmra.mrb[6].mxu1 %vm32_vm1, %v619_v35 }
  0xfc   :  { %1821 = vmatpush3.bf16.msra.mxu1 %v1820_v34  ;;  %1696 = vmatprep.mubr.msk.f32.mxu1 %vm1865_vm0, %v1866_v4 }
  0xfd   :  { %1822 = vmatprep.subr.bf16.mxu1 %v1864_v0 }
  0xfe   :  { %v787_v42 = vpop.f32.mrb[8].mxu0 }
  0xff   :  { %v788_v43 = vadd.f32 %v1454_v38, %v787_v42  ;;  %v1687_v44 = vpop.f32.mrb[9].mxu0 }
 0x100   :  { %1824 = vmatpush3.bf16.msra.mxu1 %v1823_v39 }
 0x101   :  { %v791_v46 = vmax.f32 %v788_v43, 0.0  ;;  %1831 = vmatprep.subr.bf16.mxu1 %v1864_v0 }
 0x103   :  { %1697 = vmatmul.mubr.msk.f32.vlgmr.msra.gmra.mrb[8].mxu1 %vm32_vm1, %v791_v46 }
 0x104   :  { %1833 = vmatpush3.bf16.msra.mxu1 %v1832_v45  ;;  %1718 = vmatprep.mubr.msk.f32.mxu1 %vm1865_vm0, %v1866_v4 }
 0x105   :  { %1834 = vmatprep.subr.bf16.mxu1 %v1864_v0 }
 0x106   :  { %v959_v53 = vpop.f32.mrb[10].mxu0 }
 0x107   :  { %v960_v54 = vadd.f32 %v1469_v49, %v959_v53  ;;  %v1709_v55 = vpop.f32.mrb[11].mxu0 }
 0x108   :  { %1836 = vmatpush3.bf16.msra.mxu1 %v1835_v50 }
 0x109   :  { %v963_v57 = vmax.f32 %v960_v54, 0.0  ;;  %1843 = vmatprep.subr.bf16.mxu1 %v1864_v0 }
 0x10b   :  { %1719 = vmatmul.mubr.msk.f32.vlgmr.msra.gmra.mrb[10].mxu1 %vm32_vm1, %v963_v57 }
 0x10c   :  { %1845 = vmatpush3.bf16.msra.mxu1 %v1844_v56  ;;  %1740 = vmatprep.mubr.msk.f32.mxu1 %vm1865_vm0, %v1866_v4 }
 0x10d   :  { %1846 = vmatprep.subr.bf16.mxu1 %v1864_v0 }
 0x10e   :  { %v1131_v1 = vpop.f32.mrb[12].mxu0 }
 0x10f   :  { %v1132_v2 = vadd.f32 %v1484_v60, %v1131_v1  ;;  %v1731_v3 = vpop.f32.mrb[13].mxu0 }
 0x110   :  { %1848 = vmatpush3.bf16.msra.mxu1 %v1847_v61 }
 0x111   :  { %v1135_v6 = vmax.f32 %v1132_v2, 0.0  ;;  %1855 = vmatprep.subr.bf16.mxu1 %v1864_v0 }
 0x113   :  { %1741 = vmatmul.mubr.msk.f32.vlgmr.msra.gmra.mrb[12].mxu1 %vm32_vm1, %v1135_v6 }
 0x114   :  { %1857 = vmatpush3.bf16.msra.mxu1 %v1856_v5  ;;  %1762 = vmatprep.mubr.msk.f32.mxu1 %vm1865_vm0, %v1866_v4 }
 0x115   :  { %1858 = vmatprep.subr.bf16.mxu1 %v1864_v0  ;;  %v1416_v0 = vld [vmem:[%s2258_s4 + $0x1] ss:$0 sm:$0xff] }
 0x116   :  { %v1303_v11 = vpop.f32.mrb[14].mxu0 }
 0x117   :  { %v1304_v12 = vadd.f32 %v1499_v9, %v1303_v11  ;;  %v1753_v13 = vpop.f32.mrb[15].mxu0 }
 0x118   :  { %1860 = vmatpush3.bf16.msra.mxu1 %v1859_v10 }
 0x119   :  { %v1307_v14 = vmax.f32 %v1304_v12, 0.0 }
 0x11b   :  { %1763 = vmatmul.mubr.msk.f32.vlgmr.msra.gmra.mrb[14].mxu1 %vm32_vm1, %v1307_v14 }
 0x1b6   :  { %v187_v16 = vpop.f32.mrb[0].mxu1 }
 0x1b7   :  { %v188_v17 = vadd.f32 %v1402_v15, %v187_v16  ;;  %v1610_v18 = vpop.f32.mrb[1].mxu1 }
 0x1b9   :  { %191 = vst [vmem:[%s2259_s5] sm:$0x3] %v188_v17 }
 0x1be   :  { %v358_v4 = vpop.f32.mrb[2].mxu1 }
 0x1bf   :  { %v359_v19 = vadd.f32 %v1416_v0, %v358_v4  ;;  %v1632_v20 = vpop.f32.mrb[3].mxu1 }
 0x1c1   :  { %1418 = vst [vmem:[%s2259_s5 + $0x2] sm:$0x3] %v359_v19 }
 0x1c6   :  { %v530_v22 = vpop.f32.mrb[4].mxu1 }
 0x1c7   :  { %v531_v23 = vadd.f32 %v1431_v21, %v530_v22  ;;  %v1654_v24 = vpop.f32.mrb[5].mxu1 }
 0x1c9   :  { %1433 = vst [vmem:[%s2259_s5 + $0x4] sm:$0x3] %v531_v23 }
 0x1ce   :  { %v702_v26 = vpop.f32.mrb[6].mxu1 }
 0x1cf   :  { %v703_v27 = vadd.f32 %v1446_v25, %v702_v26  ;;  %v1676_v28 = vpop.f32.mrb[7].mxu1 }
 0x1d1   :  { %1448 = vst [vmem:[%s2259_s5 + $0x6] sm:$0x3] %v703_v27 }
 0x1d6   :  { %v874_v30 = vpop.f32.mrb[8].mxu1 }
 0x1d7   :  { %v875_v31 = vadd.f32 %v1461_v29, %v874_v30  ;;  %v1698_v32 = vpop.f32.mrb[9].mxu1 }
 0x1d9   :  { %1463 = vst [vmem:[%s2259_s5 + $0x8] sm:$0x3] %v875_v31 }
 0x1de   :  { %v1046_v34 = vpop.f32.mrb[10].mxu1 }
 0x1df   :  { %v1047_v35 = vadd.f32 %v1476_v33, %v1046_v34  ;;  %v1720_v36 = vpop.f32.mrb[11].mxu1 }
 0x1e1   :  { %1478 = vst [vmem:[%s2259_s5 + $0xa] sm:$0x3] %v1047_v35 }
 0x1e6   :  { %v1218_v38 = vpop.f32.mrb[12].mxu1 }
 0x1e7   :  { %v1219_v39 = vadd.f32 %v1491_v37, %v1218_v38  ;;  %v1742_v40 = vpop.f32.mrb[13].mxu1 }
 0x1e9   :  { %1493 = vst [vmem:[%s2259_s5 + $0xc] sm:$0x3] %v1219_v39 }
 0x1ee   :  { %v1390_v42 = vpop.f32.mrb[14].mxu1 }
 0x1ef   :  { %v1391_v43 = vadd.f32 %v1506_v41, %v1390_v42  ;;  %v1764_v44 = vpop.f32.mrb[15].mxu1 }
 0x1f1   :  { %1508 = vst [vmem:[%s2259_s5 + $0xe] sm:$0x3] %v1391_v43 }

// kernel: residual_block_g.3
= control target key start
LH: loop header
LB: loop body
LE: loop exit
PB: predicated region body
PF: predicated region fallthrough
CT: control target
= control target key end

     0   :  { %s13559_s11 = smov 0   ;;  %s16361_s0 = inlined_call_operand.vmem [shape: f32[2,256,128], index: 0, kind: input, shape index: {}]   ;;  %s16362_s1 = inlined_call_operand.vmem [shape: f32[2,8,128], index: 1, kind: input, shape index: {}]   ;;  %s16363_s2 = inlined_call_operand.vmem [shape: bf16[9,128,128], index: 2, kind: input, shape index: {}]   ;;  %s16364_s3 = inlined_call_operand.vmem [shape: f32[1,128], index: 3, kind: input, shape index: {}]   ;;  %s16365_s4 = inlined_call_operand.vmem [shape: bf16[9,128,128], index: 4, kind: input, shape index: {}]   ;;  %s16366_s5 = inlined_call_operand.vmem [shape: f32[1,128], index: 5, kind: input, shape index: {}]   ;;  %s16367_s6 = inlined_call_operand.vmem [shape: bf16[128,128], index: 6, kind: input, shape index: {}]   ;;  %s16368_s7 = inlined_call_operand.vmem [shape: f32[1,128], index: 7, kind: input, shape index: {}]   ;;  %s16369_s8 = inlined_call_operand.<no memory space> [shape: f32[1,1], index: 8, kind: input, shape index: {}]   ;;  %s16370_s9 = inlined_call_operand.vmem [shape: f32[2,256,128], index: 9, kind: output, shape index: {}]  }
   0x1   :  { %14 = sst [smem:[#allocation4]] %s16369_s8 }
   0x2 LB: > { %s9469_s12 = sadd.s32 4294967295, %s13501_s11   ;;  %p9473_p0 = scmp.ge.s32.totalorder %s13501_s11, 1  ;;  %s13501_s11 = sphi %s13559_s11, %s20_s11  }
   0x3   : > { %p297_p1 = scmp.lt.s32.totalorder %s13501_s11, 3 }
   0x5   : > { %p298_p2 = pnand %p9473_p0, %p297_p1 }
   0x7   : > { %301 = sbr.rel (%p298_p2) target bundleno = 1116 (0x45c), region = 56 }
   0xe   : > { %v13192_v0 = vld [vmem:[%s16363_s2 + $0x40] sm:$0xff]   ;;  %v13503_v2 = vmov 0.0   ;;  %v13194_v3 = vld [vmem:[%s16363_s2 + $0x48] sm:$0xff]   ;;  %v397_v4 = vlaneseq  ;;  %p337_p3 = scmp.lt.s32.totalorder %s9469_s12, 1  ;;  %v13196_v6 = vld [vmem:[%s16363_s2 + $0x50] sm:$0xff]   ;;  %v13504_v8 = vmov 0.0|0.0  }
   0xf   : > { %v13193_v1 = vld [vmem:[%s16363_s2] sm:$0xff]   ;;  %354 = vst [vmem:[#allocation2 + $0x8] sm:$0xff] %v13503_v2  ;;  %355 = vst [vmem:[#allocation2 + $0x10] sm:$0xff] %v13503_v2  ;;  %11470 = vmatprep.subr.bf16.mxu1 %v13192_v0  ;;  %v13195_v5 = vld [vmem:[%s16363_s2 + $0x8] sm:$0xff]   ;;  %11486 = vmatprep.mubr.bf16.mxu1 %v13504_v8  ;;  %vm16375_vm1 = vmmov 1   ;;  %s5511_s27 = sld [smem:[#allocation4]] }
  0x10   : > { %353 = vst [vmem:[#allocation2] sm:$0xff] %v13503_v2  ;;  %356 = vst [vmem:[#allocation2 + $0x118] sm:$0xff] %v13503_v2  ;;  %11502 = vmatprep.subr.bf16.mxu0 %v13193_v1  ;;  %11471 = vmatpush3.bf16.msra.mxu1 %v13192_v0  ;;  %v13197_v7 = vld [vmem:[%s16363_s2 + $0x10] sm:$0xff]   ;;  %v13587_v9 = vshrl.u32 %v397_v4, 7  ;;  %s16522_s12 = smov (!%p337_p3, %s9469_s12), 1  ;;  %v13198_v10 = vld [vmem:[%s16363_s2 + $0x58] sm:$0xff]  }
  0x11   : > { %357 = vst [vmem:[#allocation2 + $0x120] sm:$0xff] %v13503_v2  ;;  %358 = vst [vmem:[#allocation2 + $0x128] sm:$0xff] %v13503_v2  ;;  %11503 = vmatpush3.bf16.msra.mxu0 %v13193_v1  ;;  %11472 = vmatprep.subr.bf16.mxu1 %v13194_v3  ;;  %v13199_v12 = vld [vmem:[%s16363_s2 + $0x18] sm:$0xff]   ;;  %s10868_s28 = sshll.u32 %s16522_s12, 8  ;;  %s9476_s29 = sshll.u32 %s16522_s12, 3  ;;  %v13200_v13 = vld [vmem:[%s16363_s2 + $0x60] sm:$0xff]  }
  0x12   : > { %359 = vst [vmem:[#allocation3] sm:$0xff] %v13503_v2  ;;  %360 = vst [vmem:[#allocation3 + $0x8] sm:$0xff] %v13503_v2  ;;  %11504 = vmatprep.subr.bf16.mxu0 %v13195_v5  ;;  %v787_v11 = vand.u32 15, %v13587_v9  ;;  %v13201_v15 = vld [vmem:[%s16363_s2 + $0x20] sm:$0xff]   ;;  %v399_v16 = vsub.s32 0, %v13587_v9  ;;  %v13202_v17 = vld [vmem:[%s16363_s2 + $0x68] sm:$0xff]   ;;  %s13621_s18 = scalar_lea.vmem %s16361_s0, %s10868_s28  ;;  %s13626_s21 = scalar_lea.vmem %s16362_s1, %s9476_s29 }
  0x13   : > { %361 = vst [vmem:[#allocation3 + $0x10] sm:$0xff] %v13503_v2  ;;  %362 = vst [vmem:[#allocation3 + $0x118] sm:$0xff] %v13503_v2  ;;  %v435_v18 = vsub.s32 1, %v13587_v9  ;;  %v13203_v19 = vld [vmem:[%s16363_s2 + $0x28] sm:$0xff]   ;;  %v769_v23 = vadd.s32 16, %v13587_v9  ;;  %v13641_v24 = vadd.s32 32, %v13587_v9  ;;  %s16220_s15 = scalar_lea.vmem %s16370_s9, %s10868_s28 }
  0x14   : > { %363 = vst [vmem:[#allocation3 + $0x120] sm:$0xff] %v13503_v2  ;;  %364 = vst [vmem:[#allocation3 + $0x128] sm:$0xff] %v13503_v2  ;;  %11473 = vmatpush3.bf16.msra.mxu1 %v13194_v3  ;;  %vm13605_vm0 = vcmp.ge.s32.totalorder %v787_v11, 1  ;;  %v352_v26 = vld [vmem:[%s13626_s21] sm:$0xff]  ;;  %v366_v28 = vld [vmem:[%s13621_s18 + $0x8] sm:$0xff]  ;;  %v567_v32 = vsub.s32 2, %v13587_v9 }
  0x15   : > { %11505 = vmatpush3.bf16.msra.mxu0 %v13195_v5  ;;  %11474 = vmatprep.subr.bf16.mxu1 %v13196_v6  ;;  %vm13635_vm2 = vmpackc.low %vm16375_vm1, %vm13605_vm0  ;;  %v365_v27 = vld [vmem:[%s13621_s18] sm:$0xff]  ;;  %v13204_v29 = vld [vmem:[%s16363_s2 + $0x70] sm:$0xff]   ;;  %v13649_v30 = vrot.slane %v352_v26, %v399_v16  ;;  %v13651_v31 = vrot.slane %v352_v26, %v435_v18  ;;  %v603_v34 = vsub.s32 3, %v13587_v9  ;;  %v801_v37 = vand.u32 15, %v769_v23 }
  0x16   : > { %11506 = vmatprep.subr.bf16.mxu0 %v13197_v7  ;;  %v1008_v21 = vld [vmem:[#allocation2 + $0xf] sm:$0xff]  ;;  %v815_v38 = vand.u32 15, %v13641_v24  ;;  %v13664_v39 = vadd.s32 48, %v13587_v9  ;;  %v13667_v40 = vadd.s32 64, %v13587_v9  ;;  %v368_v44 = vld [vmem:[%s13621_s18 + $0x18] sm:$0xff]  ;;  %v13674_v45 = vadd.s32 80, %v13587_v9 }
  0x17   : > { %v1007_v20 = vld [vmem:[#allocation2 + $0x7] sm:$0xff]  ;;  %v13205_v33 = vld [vmem:[%s16363_s2 + $0x30] sm:$0xff]   ;;  %v401_v35 = vmul.f32 %v13649_v30, %v365_v27  ;;  %v402_v36 = vmul.f32 %v13649_v30, %v366_v28  ;;  %v13677_v46 = vadd.s32 96, %v13587_v9  ;;  %v13206_v47 = vld [vmem:[%s16363_s2 + $0x78] sm:$0xff]   ;;  %v13682_v48 = vrot.slane %v352_v26, %v567_v32 }
  0x18   : > { %11475 = vmatpush3.bf16.msra.mxu1 %v13196_v6  ;;  %v9512_v25 = vpack.c.bf16 %v1008_v21, %v1007_v20  ;;  %v367_v43 = vld [vmem:[%s13621_s18 + $0x10] sm:$0xff]  ;;  %v13684_v49 = vrot.slane %v352_v26, %v603_v34  ;;  %v404_v51 = vmul.f32 %v13649_v30, %v368_v44  ;;  %v369_v52 = vld [vmem:[%s13621_s18 + $0x20] sm:$0xff]  ;;  %v370_v53 = vld [vmem:[%s13621_s18 + $0x28] sm:$0xff]  ;;  %v829_v63 = vand.u32 15, %v13664_v39 }
  0x19   : > { %11507 = vmatpush3.bf16.msra.mxu0 %v13197_v7  ;;  %11476 = vmatprep.subr.bf16.mxu1 %v13198_v10  ;;  %v437_v41 = vadd.f32 %v13651_v31, %v401_v35  ;;  %v438_v42 = vadd.f32 %v13651_v31, %v402_v36  ;;  %v403_v50 = vmul.f32 %v13649_v30, %v367_v43  ;;  %v13207_v56 = vld [vmem:[%s16363_s2 + $0x38] sm:$0xff]   ;;  %v13699_v0 = vadd.s32 112, %v13587_v9  ;;  %v13710_v4 = vld [vmem:[%s16363_s2 + $0x80] sm:$0xff]   ;;  %v13211_v34 = vld [vmem:[%s16363_s2 + $0x48] sm:$0xff]  }
  0x1a   : > { %11508 = vmatprep.subr.bf16.mxu0 %v13199_v12  ;;  %11518 = vmatprep.mubr.msk.bf16.mxu0 %vm13635_vm2, %v9512_v25  ;;  %v440_v58 = vadd.f32 %v13651_v31, %v404_v51  ;;  %v405_v59 = vmul.f32 %v13649_v30, %v369_v52  ;;  %v406_v60 = vmul.f32 %v13649_v30, %v370_v53  ;;  %vm13703_vm7 = vcmp.ge.s32.totalorder %v801_v37, 1  ;;  %v13209_v5 = vld [vmem:[%s16363_s2 + $0x40] sm:$0xff]   ;;  %v372_v18 = vld [vmem:[%s13621_s18 + $0x38] sm:$0xff]  ;;  %v374_v53 = vld [vmem:[%s13621_s18 + $0x48] sm:$0xff] }
  0x1b   : > { %vm469_vm3 = vcmp.gt.f32.partialorder %v437_v41, 0.0  ;;  %vm470_vm4 = vcmp.gt.f32.partialorder %v438_v42, 0.0  ;;  %v501_v54 = vmul.f32 0.2, %v437_v41  ;;  %v502_v55 = vmul.f32 0.2, %v438_v42 }
  0x1c   : > { %11477 = vmatpush3.bf16.msra.mxu1 %v13198_v10  ;;  %v439_v57 = vadd.f32 %v13651_v31, %v403_v50  ;;  %vm472_vm6 = vcmp.gt.f32.partialorder %v440_v58, 0.0  ;;  %v504_v7 = vmul.f32 0.2, %v440_v58  ;;  %v441_v8 = vadd.f32 %v13651_v31, %v405_v59  ;;  %v373_v52 = vld [vmem:[%s13621_s18 + $0x40] sm:$0xff] }
  0x1d   : > { %11509 = vmatpush3.bf16.msra.mxu0 %v13199_v12  ;;  %11478 = vmatprep.subr.bf16.mxu1 %v13200_v13  ;;  %v533_v61 = vsel %vm469_vm3, %v437_v41, %v501_v54  ;;  %v534_v62 = vsel %vm470_vm4, %v438_v42, %v502_v55  ;;  %v442_v10 = vadd.f32 %v13651_v31, %v406_v60  ;;  %v857_v14 = vand.u32 15, %v13674_v45  ;;  %vm13762_vm4 = vmpackc.low %vm16375_vm1, %vm13703_vm7  ;;  %v13218_v45 = vld [vmem:[%s16363_s2 + $0xa8] sm:$0xff]  }
  0x1e   : > { %11510 = vmatprep.subr.bf16.mxu0 %v13201_v15  ;;  %v569_v1 = vmul.f32 %v13682_v48, %v533_v61  ;;  %v570_v2 = vmul.f32 %v13682_v48, %v534_v62  ;;  %vm471_vm5 = vcmp.gt.f32.partialorder %v439_v57, 0.0  ;;  %v503_v6 = vmul.f32 0.2, %v439_v57 }
  0x1f   : > { %v536_v16 = vsel %vm472_vm6, %v440_v58, %v504_v7  ;;  %vm473_vm8 = vcmp.gt.f32.partialorder %v441_v8, 0.0  ;;  %vm474_vm9 = vcmp.gt.f32.partialorder %v442_v10, 0.0  ;;  %v505_v25 = vmul.f32 0.2, %v441_v8  ;;  %v376_v7 = vld [vmem:[%s13621_s18 + $0x58] sm:$0xff] }
  0x20   : > { %11479 = vmatpush3.bf16.msra.mxu1 %v13200_v13  ;;  %v605_v11 = vadd.f32 %v13684_v49, %v569_v1  ;;  %v606_v12 = vadd.f32 %v13684_v49, %v570_v2  ;;  %v843_v13 = vand.u32 15, %v13667_v40  ;;  %v572_v23 = vmul.f32 %v13682_v48, %v536_v16  ;;  %v13210_v1 = vld [vmem:[%s16363_s2 + $0x88] sm:$0xff]  }
  0x21   : > { %11511 = vmatpush3.bf16.msra.mxu0 %v13201_v15  ;;  %11480 = vmatprep.subr.bf16.mxu1 %v13202_v17  ;;  %v535_v15 = vsel %vm471_vm5, %v439_v57, %v503_v6  ;;  %v506_v26 = vmul.f32 0.2, %v442_v10  ;;  %v408_v32 = vmul.f32 %v13649_v30, %v372_v18  ;;  %vm13737_vm12 = vcmp.ge.s32.totalorder %v815_v38, 1  ;;  %v13213_v57 = vld [vmem:[%s16363_s2 + $0x50] sm:$0xff]  }
  0x22   : > { %11512 = vmatprep.subr.bf16.mxu0 %v13203_v19  ;;  %vm637_vm10 = vcmp.gt.f32.partialorder %v605_v11, 0.0  ;;  %vm638_vm11 = vcmp.gt.f32.partialorder %v606_v12, 0.0  ;;  %v670_v20 = vmul.f32 0.2, %v606_v12  ;;  %v571_v21 = vmul.f32 %v13682_v48, %v535_v15  ;;  %v13215_v15 = vld [vmem:[%s16363_s2 + $0x58] sm:$0xff]  }
  0x23   : > { %v608_v36 = vadd.f32 %v13684_v49, %v572_v23  ;;  %v537_v41 = vsel %vm473_vm8, %v441_v8, %v505_v25  ;;  %v538_v42 = vsel %vm474_vm9, %v442_v10, %v506_v26  ;;  %vm13752_vm3 = vcmp.ge.s32.totalorder %v829_v63, 1  ;;  %v375_v63 = vld [vmem:[%s13621_s18 + $0x50] sm:$0xff] }
  0x24   : > { %11481 = vmatpush3.bf16.msra.mxu1 %v13202_v17  ;;  %v371_v17 = vld [vmem:[%s13621_s18 + $0x30] sm:$0xff]  ;;  %v702_v28 = vsel %vm638_vm11, %v606_v12, %v670_v20  ;;  %v607_v35 = vadd.f32 %v13684_v49, %v571_v21  ;;  %v573_v43 = vmul.f32 %v13682_v48, %v537_v41  ;;  %v574_v50 = vmul.f32 %v13682_v48, %v538_v42 }
  0x25   : > { %11513 = vmatpush3.bf16.msra.mxu0 %v13203_v19  ;;  %11482 = vmatprep.subr.bf16.mxu1 %v13204_v29  ;;  %v669_v19 = vmul.f32 0.2, %v605_v11  ;;  %734 = vst [vmem:[#allocation2 + $0x20] sm:$0xff] %v702_v28  ;;  %vm640_vm14 = vcmp.gt.f32.partialorder %v608_v36, 0.0  ;;  %v672_v38 = vmul.f32 0.2, %v608_v36  ;;  %v410_v6 = vmul.f32 %v13649_v30, %v374_v53 }
  0x26   : > { %11514 = vmatprep.subr.bf16.mxu0 %v13205_v33  ;;  %vm639_vm13 = vcmp.gt.f32.partialorder %v607_v35, 0.0  ;;  %v671_v24 = vmul.f32 0.2, %v607_v35  ;;  %v609_v51 = vadd.f32 %v13684_v49, %v573_v43  ;;  %v610_v61 = vadd.f32 %v13684_v49, %v574_v50  ;;  %v378_v50 = vld [vmem:[%s13621_s18 + $0x68] sm:$0xff] }
  0x27   : > { %v701_v27 = vsel %vm637_vm10, %v605_v11, %v669_v19  ;;  %v704_v55 = vsel %vm640_vm14, %v608_v36, %v672_v38  ;;  %v446_v20 = vadd.f32 %v13651_v31, %v410_v6  ;;  %v411_v25 = vmul.f32 %v13649_v30, %v375_v63  ;;  %vm13800_vm10 = vmpackc.low %vm16375_vm1, %vm13737_vm12  ;;  %v13217_v38 = vld [vmem:[%s16363_s2 + $0x60] sm:$0xff]  }
  0x28   : > { %11483 = vmatpush3.bf16.msra.mxu1 %v13204_v29  ;;  %v407_v29 = vmul.f32 %v13649_v30, %v371_v17  ;;  %733 = vst [vmem:[#allocation2 + $0x18] sm:$0xff] %v701_v27  ;;  %v703_v54 = vsel %vm639_vm13, %v607_v35, %v671_v24  ;;  %736 = vst [vmem:[#allocation2 + $0x30] sm:$0xff] %v704_v55  ;;  %vm641_vm5 = vcmp.gt.f32.partialorder %v609_v51, 0.0  ;;  %v673_v62 = vmul.f32 0.2, %v609_v51 }
  0x29   : > { %11515 = vmatpush3.bf16.msra.mxu0 %v13205_v33  ;;  %11484 = vmatprep.subr.bf16.mxu1 %v13206_v47  ;;  %v1112_v33 = vpack.c.bf16 %v702_v28, %v701_v27  ;;  %735 = vst [vmem:[#allocation2 + $0x28] sm:$0xff] %v703_v54  ;;  %v1113_v39 = vpack.c.bf16 %v704_v55, %v703_v54  ;;  %vm642_vm6 = vcmp.gt.f32.partialorder %v610_v61, 0.0  ;;  %v674_v11 = vmul.f32 0.2, %v610_v61  ;;  %v377_v27 = vld [vmem:[%s13621_s18 + $0x60] sm:$0xff] }
  0x2a   : > { %11516 = vmatprep.subr.bf16.mxu0 %v13207_v56  ;;  %v443_v44 = vadd.f32 %v13651_v31, %v407_v29  ;;  %v705_v12 = vsel %vm641_vm5, %v609_v51, %v673_v62  ;;  %v412_v26 = vmul.f32 %v13649_v30, %v376_v7  ;;  %vm13792_vm7 = vcmp.ge.s32.totalorder %v843_v13, 1 }
  0x2b   : > { %737 = vst [vmem:[#allocation2 + $0x38] sm:$0xff] %v705_v12  ;;  %v706_v21 = vsel %vm642_vm6, %v610_v61, %v674_v11  ;;  %vm478_vm9 = vcmp.gt.f32.partialorder %v446_v20, 0.0  ;;  %v447_v40 = vadd.f32 %v13651_v31, %v411_v25  ;;  %v413_v42 = vmul.f32 %v13649_v30, %v377_v27  ;;  %vm13854_vm6 = vmpackc.low %vm16375_vm1, %vm13792_vm7  ;;  %v13863_v27 = vld [vmem:[%s16363_s2 + $0x70] sm:$0xff]  }
  0x2c   : > { %11485 = vmatpush3.bf16.msra.mxu1 %v13206_v47  ;;  %v444_v47 = vadd.f32 %v13651_v31, %v408_v32  ;;  %vm475_vm15 = vcmp.gt.f32.partialorder %v443_v44, 0.0  ;;  %v507_v58 = vmul.f32 0.2, %v443_v44  ;;  %738 = vst [vmem:[#allocation2 + $0x40] sm:$0xff] %v706_v21  ;;  %v1114_v28 = vpack.c.bf16 %v706_v21, %v705_v12 }
  0x2d   : > { %11517 = vmatpush3.bf16.msra.mxu0 %v13207_v56  ;;  %11758 = vmatprep.subr.bf16.mxu1 %v13209_v5  ;;  %v448_v41 = vadd.f32 %v13651_v31, %v412_v26  ;;  %vm479_vm12 = vcmp.gt.f32.partialorder %v447_v40, 0.0  ;;  %v871_v62 = vand.u32 15, %v13677_v46  ;;  %v414_v63 = vmul.f32 %v13649_v30, %v378_v50  ;;  %v13219_v46 = vld [vmem:[%s16363_s2 + $0x68] sm:$0xff]  }
  0x2e   : > { %11534 = vmatprep.subr.bf16.mxu0 %v13710_v4  ;;  %vm476_vm0 = vcmp.gt.f32.partialorder %v444_v47, 0.0  ;;  %v508_v59 = vmul.f32 0.2, %v444_v47  ;;  %v539_v2 = vsel %vm475_vm15, %v443_v44, %v507_v58  ;;  %vm13821_vm15 = vmpackc.low %vm16375_vm1, %vm13752_vm3  ;;  %v511_v58 = vmul.f32 0.2, %v447_v40 }
  0x2f   : > { %11487 = vmatmul.mubr.bf16.vlgmr.msra.gmra.mrb[0].mxu1 %v1112_v33  ;;  %v1009_v8 = vld [vmem:[#allocation2 + $0x17] sm:$0xff]  ;;  %v1010_v10 = vld [vmem:[#allocation2 + $0x1f] sm:$0xff]  ;;  %v575_v16 = vmul.f32 %v13682_v48, %v539_v2  ;;  %vm480_vm14 = vcmp.gt.f32.partialorder %v448_v41, 0.0  ;;  %v13837_v6 = vadd.s32 8, %v13587_v9  ;;  %vm13867_vm7 = vcmp.ge.s32.totalorder %v857_v14, 1 }
  0x30   : > { %11759 = vmatpush3.bf16.msra.mxu1 %v13209_v5  ;;  %v540_v3 = vsel %vm476_vm0, %v444_v47, %v508_v59  ;;  %v409_v5 = vmul.f32 %v13649_v30, %v373_v52  ;;  %11490 = vmatprep.mubr.bf16.mxu1 %v1113_v39  ;;  %v9515_v17 = vpack.c.bf16 %v1010_v10, %v1009_v8  ;;  %v1011_v13 = vld [vmem:[#allocation2 + $0x27] sm:$0xff]  ;;  %v1012_v36 = vld [vmem:[#allocation2 + $0x2f] sm:$0xff]  ;;  %v510_v47 = vmul.f32 0.2, %v446_v20  ;;  %v13214_v39 = vld [vmem:[%s16363_s2 + $0x98] sm:$0xff]  }
  0x31   : > { %11760 = vmatprep.subr.bf16.mxu1 %v13211_v34  ;;  %v576_v18 = vmul.f32 %v13682_v48, %v540_v3  ;;  %v611_v23 = vadd.f32 %v13684_v49, %v575_v16  ;;  %v9518_v43 = vpack.c.bf16 %v1012_v36, %v1011_v13  ;;  %v512_v59 = vmul.f32 0.2, %v448_v41  ;;  %v380_v13 = vld [vmem:[%s13621_s18 + $0x78] sm:$0xff] }
  0x32   : > { %v445_v19 = vadd.f32 %v13651_v31, %v409_v5  ;;  %11519 = vmatmul.mubr.msk.bf16.vlgmr.msra.gmra.mrb[0].mxu0 %vm13762_vm4, %v9515_v17  ;;  %v1013_v53 = vld [vmem:[#allocation2 + $0x37] sm:$0xff]  ;;  %v543_v2 = vsel %vm479_vm12, %v447_v40, %v511_v58  ;;  %v449_v5 = vadd.f32 %v13651_v31, %v413_v42 }
  0x33   : > { %v612_v29 = vadd.f32 %v13684_v49, %v576_v18  ;;  %11535 = vmatpush3.bf16.msra.mxu0 %v13710_v4  ;;  %vm643_vm11 = vcmp.gt.f32.partialorder %v611_v23, 0.0  ;;  %v13212_v4 = vld [vmem:[%s16363_s2 + $0x90] sm:$0xff]   ;;  %11522 = vmatprep.mubr.msk.bf16.mxu0 %vm13800_vm10, %v9518_v43  ;;  %v544_v3 = vsel %vm480_vm14, %v448_v41, %v512_v59  ;;  %v579_v11 = vmul.f32 %v13682_v48, %v543_v2  ;;  %v13216_v18 = vld [vmem:[%s16363_s2 + $0xa0] sm:$0xff]  }
  0x34   : > { %11761 = vmatpush3.bf16.msra.mxu1 %v13211_v34  ;;  %vm477_vm8 = vcmp.gt.f32.partialorder %v445_v19, 0.0  ;;  %v675_v34 = vmul.f32 0.2, %v611_v23  ;;  %v509_v35 = vmul.f32 0.2, %v445_v19  ;;  %11536 = vmatprep.subr.bf16.mxu0 %v13210_v1  ;;  %v580_v12 = vmul.f32 %v13682_v48, %v544_v3  ;;  %v379_v40 = vld [vmem:[%s13621_s18 + $0x70] sm:$0xff] }
  0x35   : > { %11762 = vmatprep.subr.bf16.mxu1 %v13213_v57  ;;  %vm644_vm13 = vcmp.gt.f32.partialorder %v612_v29, 0.0  ;;  %v676_v37 = vmul.f32 0.2, %v612_v29  ;;  %vm481_vm3 = vcmp.gt.f32.partialorder %v449_v5, 0.0  ;;  %v13905_v59 = vld [vmem:[#allocation2 + $0x11] sm:$0xff]  ;;  %v13916_v2 = vld [vmem:[#allocation2 + $0x19] sm:$0xff] }
  0x36   : > { %v707_v44 = vsel %vm643_vm11, %v611_v23, %v675_v34  ;;  %v541_v24 = vsel %vm477_vm8, %v445_v19, %v509_v35  ;;  %v513_v19 = vmul.f32 0.2, %v449_v5  ;;  %v615_v23 = vadd.f32 %v13684_v49, %v579_v11  ;;  %v13918_v3 = vld [vmem:[#allocation2 + $0x21] sm:$0xff] }
  0x37   : > { %11491 = vmatmul.mubr.bf16.gmra.mrb[4].mxu1 %v1114_v28  ;;  %v708_v51 = vsel %vm644_vm13, %v612_v29, %v676_v37  ;;  %739 = vst [vmem:[#allocation2 + $0x48] sm:$0xff] %v707_v44  ;;  %v577_v52 = vmul.f32 %v13682_v48, %v541_v24  ;;  %11537 = vmatpush3.bf16.msra.mxu0 %v13210_v1  ;;  %v1014_v1 = vld [vmem:[#allocation2 + $0x3f] sm:$0xff]  ;;  %v885_v35 = vand.u32 15, %v13699_v0  ;;  %vm13882_vm13 = vcmp.ge.s32.totalorder %v871_v62, 1 }
  0x38   : > { %11763 = vmatpush3.bf16.msra.mxu1 %v13213_v57  ;;  %740 = vst [vmem:[#allocation2 + $0x50] sm:$0xff] %v708_v51  ;;  %v1115_v55 = vpack.c.bf16 %v708_v51, %v707_v44  ;;  %v542_v57 = vsel %vm478_vm9, %v446_v20, %v510_v47  ;;  %11538 = vmatprep.subr.bf16.mxu0 %v13212_v4  ;;  %vm647_vm9 = vcmp.gt.f32.partialorder %v615_v23, 0.0  ;;  %v679_v14 = vmul.f32 0.2, %v615_v23  ;;  %v13893_v51 = vld [vmem:[%s16363_s2 + $0xb0] sm:$0xff]  }
  0x39   : > { %11764 = vmatprep.subr.bf16.mxu1 %v13215_v15  ;;  %v578_v61 = vmul.f32 %v13682_v48, %v542_v57  ;;  %v613_v56 = vadd.f32 %v13684_v49, %v577_v52  ;;  %v9521_v7 = vpack.c.bf16 %v1014_v1, %v1013_v53  ;;  %v616_v25 = vadd.f32 %v13684_v49, %v580_v12  ;;  %v13898_v52 = vld [vmem:[%s16363_s2 + $0x78] sm:$0xff]   ;;  %v13900_v53 = vld [vmem:[#allocation2 + $0x9] sm:$0xff] }
  0x3a   : > { %11494 = vmatprep.mubr.bf16.mxu1 %v1115_v55  ;;  %v545_v34 = vsel %vm481_vm3, %v449_v5, %v513_v19  ;;  %v794_v44 = vand.u32 15, %v13837_v6  ;;  %v415_v47 = vmul.f32 %v13649_v30, %v379_v40  ;;  %v711_v24 = vsel %vm647_vm9, %v615_v23, %v679_v14  ;;  %v381_v5 = vld [vmem:[%s13621_s18 + $0x80] sm:$0xff]  ;;  %vm13966_vm9 = vmpackc.low %vm16375_vm1, %vm13882_vm13  ;;  %v13479_v6 = vld [vmem:[%s16365_s4 + $0x1f8] sm:$0xff]  }
  0x3b   : > { %v614_v8 = vadd.f32 %v13684_v49, %v578_v61  ;;  %vm645_vm0 = vcmp.gt.f32.partialorder %v613_v56, 0.0  ;;  %v677_v10 = vmul.f32 0.2, %v613_v56  ;;  %11539 = vmatpush3.bf16.msra.mxu0 %v13212_v4  ;;  %vm648_vm11 = vcmp.gt.f32.partialorder %v616_v25, 0.0  ;;  %743 = vst [vmem:[#allocation2 + $0x68] sm:$0xff] %v711_v24  ;;  %v13954_v40 = vld [vmem:[%s16363_s2] sm:$0xff]  }
  0x3c   : > { %11765 = vmatpush3.bf16.msra.mxu1 %v13215_v15  ;;  %v450_v15 = vadd.f32 %v13651_v31, %v414_v63  ;;  %11523 = vmatmul.mubr.msk.bf16.gmra.mrb[4].mxu0 %vm13821_vm15, %v9521_v7  ;;  %v680_v37 = vmul.f32 0.2, %v616_v25  ;;  %v581_v42 = vmul.f32 %v13682_v48, %v545_v34  ;;  %v416_v55 = vmul.f32 %v13649_v30, %v380_v13 }
  0x3d   : > { %11766 = vmatprep.subr.bf16.mxu1 %v13217_v38  ;;  %11540 = vmatprep.subr.bf16.mxu0 %v13214_v39  ;;  %vm646_vm5 = vcmp.gt.f32.partialorder %v614_v8, 0.0  ;;  %v678_v16 = vmul.f32 0.2, %v614_v8  ;;  %v709_v17 = vsel %vm645_vm0, %v613_v56, %v677_v10  ;;  %v13909_v61 = vadd.s32 24, %v13587_v9  ;;  %vm13924_vm0 = vmpackc.low %vm16375_vm1, %vm13867_vm7 }
  0x3e   : > { %v1015_v20 = vld [vmem:[#allocation2 + $0x47] sm:$0xff]  ;;  %741 = vst [vmem:[#allocation2 + $0x58] sm:$0xff] %v709_v17  ;;  %vm482_vm8 = vcmp.gt.f32.partialorder %v450_v15, 0.0  ;;  %v514_v26 = vmul.f32 0.2, %v450_v15  ;;  %v617_v50 = vadd.f32 %v13684_v49, %v581_v42  ;;  %vm13911_vm14 = vcmp.ge.s32.totalorder %v885_v35, 1 }
  0x3f   : > { %v1016_v28 = vld [vmem:[#allocation2 + $0x4f] sm:$0xff]  ;;  %v710_v29 = vsel %vm646_vm5, %v614_v8, %v678_v16  ;;  %11541 = vmatpush3.bf16.msra.mxu0 %v13214_v39  ;;  %v451_v39 = vadd.f32 %v13651_v31, %v415_v47  ;;  %v452_v1 = vadd.f32 %v13651_v31, %v416_v55  ;;  %vm13928_vm5 = vcmp.le.s32.totalorder %v794_v44, 14 }
  0x40   : > { %11767 = vmatpush3.bf16.msra.mxu1 %v13217_v38  ;;  %v9524_v36 = vpack.c.bf16 %v1016_v28, %v1015_v20  ;;  %742 = vst [vmem:[#allocation2 + $0x60] sm:$0xff] %v710_v29  ;;  %v1116_v4 = vpack.c.bf16 %v710_v29, %v709_v17  ;;  %11542 = vmatprep.subr.bf16.mxu0 %v13216_v18  ;;  %vm649_vm12 = vcmp.gt.f32.partialorder %v617_v50, 0.0  ;;  %v681_v62 = vmul.f32 0.2, %v617_v50  ;;  %v382_v16 = vld [vmem:[%s13621_s18 + $0x88] sm:$0xff]  ;;  %v13222_v29 = vld [vmem:[%s16363_s2 + $0xb8] sm:$0xff]  }
  0x41   : > { %11768 = vmatprep.subr.bf16.mxu1 %v13219_v46  ;;  %v546_v41 = vsel %vm482_vm8, %v450_v15, %v514_v26  ;;  %v712_v38 = vsel %vm648_vm11, %v616_v25, %v680_v37  ;;  %vm483_vm8 = vcmp.gt.f32.partialorder %v451_v39, 0.0  ;;  %v515_v10 = vmul.f32 0.2, %v451_v39  ;;  %v13936_v17 = vld [vmem:[#allocation2 + $0x29] sm:$0xff]  ;;  %v13940_v25 = vld [vmem:[#allocation2 + $0x31] sm:$0xff] }
  0x42   : > { %11526 = vmatprep.mubr.msk.bf16.mxu0 %vm13854_vm6, %v9524_v36  ;;  %11495 = vmatmul.mubr.bf16.gmra.mrb[8].mxu1 %v1116_v4  ;;  %v582_v43 = vmul.f32 %v13682_v48, %v546_v41  ;;  %744 = vst [vmem:[#allocation2 + $0x70] sm:$0xff] %v712_v38  ;;  %v1117_v57 = vpack.c.bf16 %v712_v38, %v711_v24  ;;  %vm484_vm7 = vcmp.gt.f32.partialorder %v452_v1, 0.0  ;;  %v516_v15 = vmul.f32 0.2, %v452_v1  ;;  %v383_v26 = vld [vmem:[%s13621_s18 + $0x90] sm:$0xff]  ;;  %v13480_v41 = vld [vmem:[%s16365_s4 + $0x200] sm:$0xff]  }
  0x43   : > { %11543 = vmatpush3.bf16.msra.mxu0 %v13216_v18  ;;  %v713_v11 = vsel %vm649_vm12, %v617_v50, %v681_v62  ;;  %v9560_v12 = vpack.c.bf16 %v13905_v59, %v13900_v53  ;;  %v547_v20 = vsel %vm483_vm8, %v451_v39, %v515_v10  ;;  %v772_v23 = vadd.s32 40, %v13587_v9  ;;  %v13998_v62 = vld [vmem:[#allocation2 + $0x41] sm:$0xff] }
  0x44   : > { %11769 = vmatpush3.bf16.msra.mxu1 %v13219_v46  ;;  %v618_v58 = vadd.f32 %v13684_v49, %v582_v43  ;;  %11544 = vmatprep.subr.bf16.mxu0 %v13218_v45  ;;  %745 = vst [vmem:[#allocation2 + $0x78] sm:$0xff] %v713_v11  ;;  %v548_v32 = vsel %vm484_vm7, %v452_v1, %v516_v15  ;;  %v808_v35 = vand.u32 15, %v13909_v61  ;;  %vm14006_vm7 = vmpackc.low %vm16375_vm1, %vm13911_vm14  ;;  %v16433_v63 = vmov 0 }
  0x45   : > { %11770 = vmatprep.subr.bf16.mxu1 %v13863_v27  ;;  %v1017_v56 = vld [vmem:[#allocation2 + $0x57] sm:$0xff]  ;;  %11498 = vmatprep.mubr.bf16.mxu1 %v1117_v57  ;;  %v583_v34 = vmul.f32 %v13682_v48, %v547_v20  ;;  %v584_v13 = vmul.f32 %v13682_v48, %v548_v32  ;;  %v9563_v36 = vpack.c.bf16 %v13918_v3, %v13916_v2  ;;  %v822_v50 = vand.u32 15, %v772_v23  ;;  %vm14021_vm14 = vmpackc.low %vm13928_vm5, %vm16375_vm1  ;;  %v389_v2 = vld [vmem:[%s13621_s18 + $0xc0] sm:$0xff] }
  0x46   : > { %vm650_vm3 = vcmp.gt.f32.partialorder %v618_v58, 0.0  ;;  %v682_v7 = vmul.f32 0.2, %v618_v58  ;;  %v417_v4 = vmul.f32 %v13649_v30, %v381_v5  ;;  %v9566_v43 = vpack.c.bf16 %v13940_v25, %v13936_v17 }
  0x47   : > { %v1018_v46 = vld [vmem:[#allocation2 + $0x5f] sm:$0xff]  ;;  %11545 = vmatpush3.bf16.msra.mxu0 %v13218_v45  ;;  %v418_v45 = vmul.f32 %v13649_v30, %v382_v16  ;;  %v1019_v14 = vld [vmem:[#allocation2 + $0x67] sm:$0xff]  ;;  %v619_v42 = vadd.f32 %v13684_v49, %v583_v34  ;;  %v419_v44 = vmul.f32 %v13649_v30, %v383_v26  ;;  %v620_v0 = vadd.f32 %v13684_v49, %v584_v13 }
  0x48   : > { %11771 = vmatpush3.bf16.msra.mxu1 %v13863_v27  ;;  %v9527_v18 = vpack.c.bf16 %v1018_v46, %v1017_v56  ;;  %v714_v19 = vsel %vm650_vm3, %v618_v58, %v682_v7  ;;  %v384_v27 = vld [vmem:[%s13621_s18 + $0x98] sm:$0xff]  ;;  %11546 = vmatprep.subr.bf16.mxu0 %v13893_v51  ;;  %v453_v38 = vadd.f32 %v13651_v31, %v417_v4  ;;  %vm13981_vm13 = vcmp.le.s32.totalorder %v808_v35, 14  ;;  %v13988_v58 = vld [vmem:[%s16363_s2 + $0xc0] sm:$0xff]  }
  0x49   : > { %11772 = vmatprep.subr.bf16.mxu1 %v13898_v52  ;;  %746 = vst [vmem:[#allocation2 + $0x80] sm:$0xff] %v714_v19  ;;  %v1118_v28 = vpack.c.bf16 %v714_v19, %v713_v11  ;;  %v1020_v37 = vld [vmem:[#allocation2 + $0x6f] sm:$0xff]  ;;  %v420_v47 = vmul.f32 %v13649_v30, %v384_v27  ;;  %vm651_vm11 = vcmp.gt.f32.partialorder %v619_v42, 0.0  ;;  %v683_v55 = vmul.f32 0.2, %v619_v42  ;;  %v13996_v56 = vld [vmem:[#allocation2 + $0x39] sm:$0xff] }
  0x4a   : > { %11527 = vmatmul.mubr.msk.bf16.gmra.mrb[8].mxu0 %vm13924_vm0, %v9527_v18  ;;  %v13975_v24 = vpack.c.bf16 %v1020_v37, %v1019_v14  ;;  %vm652_vm12 = vcmp.gt.f32.partialorder %v620_v0, 0.0  ;;  %v684_v39 = vmul.f32 0.2, %v620_v0  ;;  %vm485_vm3 = vcmp.gt.f32.partialorder %v453_v38, 0.0  ;;  %v385_v46 = vld [vmem:[%s13621_s18 + $0xa0] sm:$0xff]  ;;  %v386_v11 = vld [vmem:[%s13621_s18 + $0xa8] sm:$0xff] }
  0x4b   : > { %11499 = vmatmul.mubr.bf16.gmra.mrb[12].mxu1 %v1118_v28  ;;  %11547 = vmatpush3.bf16.msra.mxu0 %v13893_v51  ;;  %v454_v51 = vadd.f32 %v13651_v31, %v418_v45  ;;  %v517_v61 = vmul.f32 0.2, %v453_v38  ;;  %v1021_v1 = vld [vmem:[#allocation2 + $0x77] sm:$0xff]  ;;  %v715_v5 = vsel %vm651_vm11, %v619_v42, %v683_v55  ;;  %v456_v10 = vadd.f32 %v13651_v31, %v420_v47 }
  0x4c   : > { %11773 = vmatpush3.bf16.msra.mxu1 %v13898_v52  ;;  %11548 = vmatprep.subr.bf16.mxu0 %v13222_v29  ;;  %v455_v52 = vadd.f32 %v13651_v31, %v419_v44  ;;  %v16429_v16 = vmov 0  ;;  %v716_v18 = vsel %vm652_vm12, %v620_v0, %v684_v39  ;;  %747 = vst [vmem:[#allocation2 + $0x88] sm:$0xff] %v715_v5  ;;  %vm14012_vm11 = vcmp.le.s32.totalorder %v822_v50, 14  ;;  %v14050_v55 = vld [vmem:[#allocation2 + $0x51] sm:$0xff]  ;;  %v13227_v39 = vld [vmem:[%s16363_s2 + $0x8] sm:$0xff]  }
  0x4d   : > { %11790 = vmatprep.subr.bf16.mxu1 %v13954_v40  ;;  %11530 = vmatprep.mubr.msk.bf16.mxu0 %vm13966_vm9, %v13975_v24  ;;  %v518_v7 = vmul.f32 0.2, %v454_v51  ;;  %v16430_v16 = vsel %vm14006_vm7, 4294967295, %v16429_v16  ;;  %v549_v19 = vsel %vm485_vm3, %v453_v38, %v517_v61  ;;  %v16434_v63 = vsel %vm14021_vm14, 4294967295, %v16433_v63  ;;  %748 = vst [vmem:[#allocation2 + $0x90] sm:$0xff] %v716_v18 }
  0x4e   : > { %vm487_vm8 = vcmp.gt.f32.partialorder %v455_v52, 0.0  ;;  %v519_v23 = vmul.f32 0.2, %v455_v52  ;;  %v3238_v27 = vpack.c.bf16 %v716_v18, %v715_v5  ;;  %vm16435_vm12 = vcmp.gt.f32.partialorder %v454_v51, 0.0  ;;  %v387_v5 = vld [vmem:[%s13621_s18 + $0xb0] sm:$0xff] }
  0x4f   : > { %11549 = vmatpush3.bf16.msra.mxu0 %v13222_v29  ;;  %v550_v28 = vsel %vm16435_vm12, %v454_v51, %v518_v7  ;;  %v585_v29 = vmul.f32 %v13682_v48, %v549_v19  ;;  %vm488_vm3 = vcmp.gt.f32.partialorder %v456_v10, 0.0  ;;  %v520_v34 = vmul.f32 0.2, %v456_v10 }
  0x50   : > { %v1022_v15 = vld [vmem:[#allocation2 + $0x7f] sm:$0xff]  ;;  %11566 = vmatprep.subr.bf16.mxu0 %v13988_v58  ;;  %v586_v32 = vmul.f32 %v13682_v48, %v550_v28  ;;  %v551_v35 = vsel %vm487_vm8, %v455_v52, %v519_v23  ;;  %11774 = vmatprep.mubr.bf16.mxu1 %v3238_v27  ;;  %v774_v4 = vadd.s32 56, %v13587_v9  ;;  %v9569_v45 = vpack.c.bf16 %v13998_v62, %v13996_v56  ;;  %v13226_v52 = vld [vmem:[%s16363_s2 + $0xc8] sm:$0xff]  }
  0x51   : > { %v14016_v26 = vpack.c.bf16 %v1022_v15, %v1021_v1  ;;  %v621_v8 = vadd.f32 %v13684_v49, %v585_v29  ;;  %v587_v13 = vmul.f32 %v13682_v48, %v551_v35  ;;  %v552_v37 = vsel %vm488_vm3, %v456_v10, %v520_v34  ;;  %vm14063_vm3 = vmpackc.low %vm13981_vm13, %vm16375_vm1  ;;  %v388_v15 = vld [vmem:[%s13621_s18 + $0xb8] sm:$0xff]  ;;  %v14075_v27 = vld [vmem:[#allocation2 + $0x61] sm:$0xff] }
  0x52   : > { %v622_v14 = vadd.f32 %v13684_v49, %v586_v32  ;;  %v421_v42 = vmul.f32 %v13649_v30, %v385_v46  ;;  %v422_v44 = vmul.f32 %v13649_v30, %v386_v11  ;;  %v588_v0 = vmul.f32 %v13682_v48, %v552_v37  ;;  %v14073_v23 = vld [vmem:[#allocation2 + $0x59] sm:$0xff] }
  0x53   : > { %11531 = vmatmul.mubr.msk.bf16.gmra.mrb[12].mxu0 %vm14006_vm7, %v14016_v26  ;;  %vm653_vm5 = vcmp.gt.f32.partialorder %v621_v8, 0.0  ;;  %v685_v47 = vmul.f32 0.2, %v621_v8  ;;  %v623_v38 = vadd.f32 %v13684_v49, %v587_v13  ;;  %v836_v53 = vand.u32 15, %v774_v4  ;;  %v1440_v25 = vld [vmem:[#allocation2 + $0x79] sm:$0xff] }
  0x54   : > { %11550 = vmatprep.mubr.msk.bf16.mxu0 %vm14021_vm14, %v9560_v12  ;;  %vm654_vm8 = vcmp.gt.f32.partialorder %v622_v14, 0.0  ;;  %v686_v50 = vmul.f32 0.2, %v622_v14  ;;  %v457_v59 = vadd.f32 %v13651_v31, %v421_v42  ;;  %v14048_v12 = vld [vmem:[#allocation2 + $0x49] sm:$0xff]  ;;  %v624_v61 = vadd.f32 %v13684_v49, %v588_v0 }
  0x55   : > { %v717_v51 = vsel %vm653_vm5, %v621_v8, %v685_v47  ;;  %vm655_vm12 = vcmp.gt.f32.partialorder %v623_v38, 0.0  ;;  %v687_v1 = vmul.f32 0.2, %v623_v38  ;;  %v16436_v7 = vmov 0  ;;  %v390_v0 = vld [vmem:[%s13621_s18 + $0xc8] sm:$0xff] }
  0x56   : > { %v16437_v7 = vsel %vm14063_vm3, 4294967295, %v16436_v7  ;;  %v718_v10 = vsel %vm654_vm8, %v622_v14, %v686_v50  ;;  %749 = vst [vmem:[#allocation2 + $0x98] sm:$0xff] %v717_v51  ;;  %vm14067_vm5 = vcmp.le.s32.totalorder %v836_v53, 14  ;;  %v458_v11 = vadd.f32 %v13651_v31, %v422_v44  ;;  %vm14086_vm8 = vmpackc.low %vm14012_vm11, %vm16375_vm1 }
  0x57   : > { %vm489_vm14 = vcmp.gt.f32.partialorder %v457_v59, 0.0  ;;  %750 = vst [vmem:[#allocation2 + $0xa0] sm:$0xff] %v718_v10  ;;  %v3239_v18 = vpack.c.bf16 %v718_v10, %v717_v51  ;;  %vm656_vm7 = vcmp.gt.f32.partialorder %v624_v61, 0.0  ;;  %v688_v19 = vmul.f32 0.2, %v624_v61 }
  0x58   : > { %v719_v57 = vsel %vm655_vm12, %v623_v38, %v687_v1  ;;  %vm490_vm13 = vcmp.gt.f32.partialorder %v458_v11, 0.0  ;;  %v521_v28 = vmul.f32 0.2, %v457_v59  ;;  %v522_v29 = vmul.f32 0.2, %v458_v11  ;;  %v13230_v1 = vld [vmem:[%s16363_s2 + $0xd8] sm:$0xff]  }
  0x59   : > { %751 = vst [vmem:[#allocation2 + $0xa8] sm:$0xff] %v719_v57  ;;  %v776_v32 = vadd.s32 72, %v13587_v9  ;;  %11775 = vmatmul.mubr.bf16.vlgmr.msra.gmra.mrb[16].mxu1 %v3239_v18  ;;  %v16440_v34 = vmov 0  ;;  %v720_v35 = vsel %vm656_vm7, %v624_v61, %v688_v19  ;;  %v9572_v8 = vpack.c.bf16 %v14050_v55, %v14048_v12  ;;  %v1439_v18 = vld [vmem:[#allocation2 + $0x71] sm:$0xff]  ;;  %v13234_v12 = vld [vmem:[%s16363_s2 + $0xe8] sm:$0xff]  }
  0x5a   : > { %v16441_v34 = vsel %vm14086_vm8, 4294967295, %v16440_v34  ;;  %v423_v13 = vmul.f32 %v13649_v30, %v387_v5  ;;  %v778_v4 = vadd.s32 88, %v13587_v9  ;;  %11791 = vmatpush3.bf16.msra.mxu1 %v13954_v40  ;;  %752 = vst [vmem:[#allocation2 + $0xb0] sm:$0xff] %v720_v35  ;;  %v3240_v3 = vpack.c.bf16 %v720_v35, %v719_v57  ;;  %v13229_v40 = vld [vmem:[%s16363_s2 + $0x10] sm:$0xff]   ;;  %v13231_v5 = vld [vmem:[%s16363_s2 + $0x18] sm:$0xff]   ;;  %v13235_v55 = vld [vmem:[%s16363_s2 + $0x28] sm:$0xff]  }
  0x5b   : > { %11551 = vmatmul.mubr.msk.bf16.vlgmr.msra.gmra.mrb[0].mxu0 %vm14063_vm3, %v9563_v36  ;;  %v13228_v36 = vld [vmem:[%s16363_s2 + $0xd0] sm:$0xff]   ;;  %v553_v20 = vsel %vm489_vm14, %v457_v59, %v521_v28  ;;  %v554_v14 = vsel %vm490_vm13, %v458_v11, %v522_v29  ;;  %v850_v37 = vand.u32 15, %v776_v32  ;;  %11792 = vmatprep.subr.bf16.mxu1 %v13227_v39  ;;  %v9575_v53 = vpack.c.bf16 %v14075_v27, %v14073_v23  ;;  %vm14132_vm14 = vmpackc.low %vm14067_vm5, %vm16375_vm1 }
  0x5c   : > { %11567 = vmatpush3.bf16.msra.mxu0 %v13988_v58  ;;  %v589_v42 = vmul.f32 %v13682_v48, %v553_v20  ;;  %v590_v44 = vmul.f32 %v13682_v48, %v554_v14  ;;  %v424_v58 = vmul.f32 %v13649_v30, %v388_v15  ;;  %v864_v47 = vand.u32 15, %v778_v4  ;;  %11554 = vmatprep.mubr.msk.bf16.mxu0 %vm14086_vm8, %v9566_v43  ;;  %v1438_v15 = vld [vmem:[#allocation2 + $0x69] sm:$0xff]  ;;  %v13232_v20 = vld [vmem:[%s16363_s2 + $0xe0] sm:$0xff]  }
  0x5d   : > { %11568 = vmatprep.subr.bf16.mxu0 %v13226_v52  ;;  %11778 = vmatprep.mubr.bf16.mxu1 %v3240_v3  ;;  %vm14114_vm7 = vcmp.le.s32.totalorder %v850_v37, 14  ;;  %v459_v50 = vadd.f32 %v13651_v31, %v423_v13  ;;  %v425_v59 = vmul.f32 %v13649_v30, %v389_v2  ;;  %v16446_v43 = vmov 0  ;;  %v391_v29 = vld [vmem:[%s13621_s18 + $0xd0] sm:$0xff] }
  0x5e   : > { %v625_v51 = vadd.f32 %v13684_v49, %v589_v42  ;;  %v626_v61 = vadd.f32 %v13684_v49, %v590_v44  ;;  %v460_v17 = vadd.f32 %v13651_v31, %v424_v58  ;;  %vm14125_vm11 = vcmp.le.s32.totalorder %v864_v47, 14  ;;  %11793 = vmatpush3.bf16.msra.mxu1 %v13227_v39  ;;  %v392_v42 = vld [vmem:[%s13621_s18 + $0xd8] sm:$0xff] }
  0x5f   : > { %v16447_v43 = vsel %vm14132_vm14, 4294967295, %v16446_v43  ;;  %vm491_vm12 = vcmp.gt.f32.partialorder %v459_v50, 0.0  ;;  %v523_v10 = vmul.f32 0.2, %v459_v50  ;;  %v461_v39 = vadd.f32 %v13651_v31, %v425_v59  ;;  %11794 = vmatprep.subr.bf16.mxu1 %v13229_v40 }
  0x60   : > { %11569 = vmatpush3.bf16.msra.mxu0 %v13226_v52  ;;  %v426_v52 = vmul.f32 %v13649_v30, %v390_v0  ;;  %vm657_vm5 = vcmp.gt.f32.partialorder %v625_v51, 0.0  ;;  %vm658_vm13 = vcmp.gt.f32.partialorder %v626_v61, 0.0  ;;  %v689_v46 = vmul.f32 0.2, %v625_v51 }
  0x61   : > { %11570 = vmatprep.subr.bf16.mxu0 %v13228_v36  ;;  %v690_v11 = vmul.f32 0.2, %v626_v61  ;;  %vm492_vm1 = vcmp.gt.f32.partialorder %v460_v17, 0.0  ;;  %v524_v19 = vmul.f32 0.2, %v460_v17  ;;  %v555_v57 = vsel %vm491_vm12, %v459_v50, %v523_v10 }
  0x62   : > { %v462_v28 = vadd.f32 %v13651_v31, %v426_v52  ;;  %v721_v32 = vsel %vm657_vm5, %v625_v51, %v689_v46  ;;  %vm16448_vm8 = vmmov 1   ;;  %v16449_v13 = vmov 0  ;;  %11795 = vmatpush3.bf16.msra.mxu1 %v13229_v40 }
  0x63   : > { %11555 = vmatmul.mubr.msk.bf16.gmra.mrb[4].mxu0 %vm14132_vm14, %v9569_v45  ;;  %v722_v35 = vsel %vm658_vm13, %v626_v61, %v690_v11  ;;  %vm14154_vm3 = vmpackc.low %vm14114_vm7, %vm16448_vm8  ;;  %v591_v4 = vmul.f32 %v13682_v48, %v555_v57  ;;  %vm493_vm12 = vcmp.gt.f32.partialorder %v461_v39, 0.0  ;;  %753 = vst [vmem:[#allocation2 + $0xb8] sm:$0xff] %v721_v32  ;;  %v556_v56 = vsel %vm492_vm1, %v460_v17, %v524_v19  ;;  %v393_v11 = vld [vmem:[%s13621_s18 + $0xe0] sm:$0xff] }
  0x64   : > { %v16450_v13 = vsel %vm14154_vm3, 4294967295, %v16449_v13  ;;  %754 = vst [vmem:[#allocation2 + $0xc0] sm:$0xff] %v722_v35  ;;  %v3241_v2 = vpack.c.bf16 %v722_v35, %v721_v32  ;;  %11571 = vmatpush3.bf16.msra.mxu0 %v13228_v36  ;;  %vm494_vm5 = vcmp.gt.f32.partialorder %v462_v28, 0.0  ;;  %v525_v62 = vmul.f32 0.2, %v461_v39  ;;  %11796 = vmatprep.subr.bf16.mxu1 %v13231_v5  ;;  %v13233_v36 = vld [vmem:[%s16363_s2 + $0x20] sm:$0xff]   ;;  %vm14191_vm7 = vmpackc.low %vm14125_vm11, %vm16448_vm8 }
  0x65   : > { %11572 = vmatprep.subr.bf16.mxu0 %v13230_v1  ;;  %v592_v45 = vmul.f32 %v13682_v48, %v556_v56  ;;  %v627_v3 = vadd.f32 %v13684_v49, %v591_v4  ;;  %v526_v14 = vmul.f32 0.2, %v462_v28  ;;  %v780_v37 = vadd.s32 104, %v13587_v9  ;;  %11558 = vmatprep.mubr.msk.bf16.mxu0 %vm14154_vm3, %v9572_v8  ;;  %v394_v32 = vld [vmem:[%s13621_s18 + $0xe8] sm:$0xff] }
  0x66   : > { %11779 = vmatmul.mubr.bf16.gmra.mrb[20].mxu1 %v3241_v2  ;;  %v557_v44 = vsel %vm493_vm12, %v461_v39, %v525_v62  ;;  %v14176_v40 = vpack.c.bf16 %v1439_v18, %v1438_v15  ;;  %v427_v58 = vmul.f32 %v13649_v30, %v391_v29  ;;  %v782_v47 = vadd.s32 120, %v13587_v9  ;;  %v13236_v29 = vld [vmem:[%s16363_s2 + $0xf0] sm:$0xff]  }
  0x67   : > { %v628_v0 = vadd.f32 %v13684_v49, %v592_v45  ;;  %vm659_vm1 = vcmp.gt.f32.partialorder %v627_v3, 0.0  ;;  %v691_v38 = vmul.f32 0.2, %v627_v3  ;;  %v558_v50 = vsel %vm494_vm5, %v462_v28, %v526_v14  ;;  %11797 = vmatpush3.bf16.msra.mxu1 %v13231_v5  ;;  %v1441_v28 = vld [vmem:[#allocation2 + $0x81] sm:$0xff]  ;;  %v13237_v2 = vld [vmem:[%s16363_s2 + $0x30] sm:$0xff]  }
  0x68   : > { %11573 = vmatpush3.bf16.msra.mxu0 %v13230_v1  ;;  %v16451_v8 = vmov 0  ;;  %v593_v59 = vmul.f32 %v13682_v48, %v557_v44  ;;  %v594_v51 = vmul.f32 %v13682_v48, %v558_v50  ;;  %v878_v61 = vand.u32 15, %v780_v37  ;;  %11798 = vmatprep.subr.bf16.mxu1 %v13233_v36  ;;  %v1677_v44 = vld [vmem:[#allocation2 + $0x1f] sm:$0xff]  ;;  %v13242_v45 = vld [vmem:[%s16363_s2 + $0x108] sm:$0xff]  }
  0x69   : > { %v16452_v8 = vsel %vm14191_vm7, 4294967295, %v16451_v8  ;;  %v428_v17 = vmul.f32 %v13649_v30, %v392_v42  ;;  %vm660_vm13 = vcmp.gt.f32.partialorder %v628_v0, 0.0  ;;  %v692_v10 = vmul.f32 0.2, %v628_v0  ;;  %11574 = vmatprep.subr.bf16.mxu0 %v13232_v20  ;;  %v1676_v42 = vld [vmem:[#allocation2 + $0x17] sm:$0xff] }
  0x6a   : > { %v723_v52 = vsel %vm659_vm1, %v627_v3, %v691_v38  ;;  %v463_v1 = vadd.f32 %v13651_v31, %v427_v58  ;;  %v629_v5 = vadd.f32 %v13684_v49, %v593_v59  ;;  %v630_v39 = vadd.f32 %v13684_v49, %v594_v51 }
  0x6b   : > { %755 = vst [vmem:[#allocation2 + $0xc8] sm:$0xff] %v723_v52  ;;  %vm1004_vm11 = vcmp.le.s32.totalorder %v878_v61, 14  ;;  %v464_v46 = vadd.f32 %v13651_v31, %v428_v17  ;;  %v724_v15 = vsel %vm660_vm13, %v628_v0, %v692_v10  ;;  %11559 = vmatmul.mubr.msk.bf16.gmra.mrb[8].mxu0 %vm14191_vm7, %v9575_v53  ;;  %v16453_v18 = vmov 0  ;;  %11799 = vmatpush3.bf16.msra.mxu1 %v13233_v36  ;;  %v1678_v10 = vld [vmem:[#allocation2 + $0x27] sm:$0xff] }
  0x6c   : > { %vm14209_vm12 = vmpackc.low %vm1004_vm11, %vm16448_vm8  ;;  %vm495_vm5 = vcmp.gt.f32.partialorder %v463_v1, 0.0  ;;  %v527_v19 = vmul.f32 0.2, %v463_v1  ;;  %v892_v57 = vand.u32 15, %v782_v47  ;;  %756 = vst [vmem:[#allocation2 + $0xd0] sm:$0xff] %v724_v15  ;;  %v3242_v35 = vpack.c.bf16 %v724_v15, %v723_v52  ;;  %11575 = vmatpush3.bf16.msra.mxu0 %v13232_v20  ;;  %11800 = vmatprep.subr.bf16.mxu1 %v13235_v55  ;;  %v1679_v52 = vld [vmem:[#allocation2 + $0x2f] sm:$0xff] }
  0x6d   : > { %v16454_v18 = vsel %vm14209_vm12, 4294967295, %v16453_v18  ;;  %vm661_vm1 = vcmp.gt.f32.partialorder %v629_v5, 0.0  ;;  %v693_v23 = vmul.f32 0.2, %v629_v5  ;;  %v694_v27 = vmul.f32 0.2, %v630_v39  ;;  %11576 = vmatprep.subr.bf16.mxu0 %v13234_v12  ;;  %11562 = vmatprep.mubr.msk.bf16.mxu0 %vm14209_vm12, %v14176_v40 }
  0x6e   : > { %vm496_vm11 = vcmp.gt.f32.partialorder %v464_v46, 0.0  ;;  %v528_v53 = vmul.f32 0.2, %v464_v46  ;;  %v559_v4 = vsel %vm495_vm5, %v463_v1, %v527_v19  ;;  %11782 = vmatprep.mubr.bf16.mxu1 %v3242_v35  ;;  %vm14225_vm13 = vcmp.le.s32.totalorder %v892_v57, 14  ;;  %v1681_v57 = vld [vmem:[#allocation2 + $0x3f] sm:$0xff] }
  0x6f   : > { %v725_v56 = vsel %vm661_vm1, %v629_v5, %v693_v23  ;;  %v595_v62 = vmul.f32 %v13682_v48, %v559_v4  ;;  %v14229_v3 = vpack.c.bf16 %v1441_v28, %v1440_v25  ;;  %vm16457_vm7 = vcmp.gt.f32.partialorder %v630_v39, 0.0  ;;  %11801 = vmatpush3.bf16.msra.mxu1 %v13235_v55  ;;  %v13239_v55 = vld [vmem:[%s16363_s2 + $0x38] sm:$0xff]   ;;  %v13240_v5 = vld [vmem:[%s16363_s2 + $0x100] sm:$0xff]  }
  0x70   : > { %v726_v20 = vsel %vm16457_vm7, %v630_v39, %v694_v27  ;;  %757 = vst [vmem:[#allocation2 + $0xd8] sm:$0xff] %v725_v56  ;;  %v560_v14 = vsel %vm496_vm11, %v464_v46, %v528_v53  ;;  %v429_v36 = vmul.f32 %v13649_v30, %v393_v11  ;;  %v430_v37 = vmul.f32 %v13649_v30, %v394_v32  ;;  %vm14239_vm7 = vmpackc.low %vm14225_vm13, %vm16448_vm8  ;;  %v1680_v11 = vld [vmem:[#allocation2 + $0x37] sm:$0xff] }
  0x71   : > { %758 = vst [vmem:[#allocation2 + $0xe0] sm:$0xff] %v726_v20  ;;  %v3243_v58 = vpack.c.bf16 %v726_v20, %v725_v56  ;;  %11577 = vmatpush3.bf16.msra.mxu0 %v13234_v12  ;;  %v596_v47 = vmul.f32 %v13682_v48, %v560_v14  ;;  %v631_v0 = vadd.f32 %v13684_v49, %v595_v62  ;;  %v16458_v38 = vmov 0  ;;  %v13238_v12 = vld [vmem:[%s16363_s2 + $0xf8] sm:$0xff]   ;;  %v3167_v62 = vld [vmem:[#allocation2 + $0x8f] sm:$0xff] }
  0x72   : > { %v16459_v38 = vsel %vm14239_vm7, 4294967295, %v16458_v38  ;;  %11578 = vmatprep.subr.bf16.mxu0 %v13236_v29  ;;  %v465_v50 = vadd.f32 %v13651_v31, %v429_v36  ;;  %v466_v59 = vadd.f32 %v13651_v31, %v430_v37  ;;  %11802 = vmatprep.subr.bf16.mxu1 %v13237_v2  ;;  %v9608_v17 = vpack.c.bf16 %v1677_v44, %v1676_v42  ;;  %v1682_v36 = vld [vmem:[#allocation2 + $0x47] sm:$0xff] }
  0x73   : > { %11783 = vmatmul.mubr.bf16.gmra.mrb[24].mxu1 %v3243_v58  ;;  %v632_v51 = vadd.f32 %v13684_v49, %v596_v47  ;;  %vm663_vm8 = vcmp.gt.f32.partialorder %v631_v0, 0.0  ;;  %v695_v61 = vmul.f32 0.2, %v631_v0  ;;  %11563 = vmatmul.mubr.msk.bf16.gmra.mrb[12].mxu0 %vm14239_vm7, %v14229_v3  ;;  %v14265_v27 = vpack.c.bf16 %v1679_v52, %v1678_v10  ;;  %v1683_v58 = vld [vmem:[#allocation2 + $0x4f] sm:$0xff]  ;;  %v13246_v52 = vld [vmem:[%s16363_s2 + $0x118] sm:$0xff]  }
  0x74   : > { %vm497_vm5 = vcmp.gt.f32.partialorder %v465_v50, 0.0  ;;  %vm498_vm1 = vcmp.gt.f32.partialorder %v466_v59, 0.0  ;;  %v529_v1 = vmul.f32 0.2, %v465_v50  ;;  %v530_v25 = vmul.f32 0.2, %v466_v59  ;;  %11803 = vmatpush3.bf16.msra.mxu1 %v13237_v2  ;;  %11582 = vmatprep.mubr.msk.bf16.mxu0 %vm13635_vm2, %v9608_v17 }
  0x75   : > { %vm664_vm13 = vcmp.gt.f32.partialorder %v632_v51, 0.0  ;;  %v696_v39 = vmul.f32 0.2, %v632_v51  ;;  %v727_v46 = vsel %vm663_vm8, %v631_v0, %v695_v61  ;;  %11579 = vmatpush3.bf16.msra.mxu0 %v13236_v29  ;;  %11804 = vmatprep.subr.bf16.mxu1 %v13239_v55  ;;  %v13241_v29 = vld [vmem:[%s16363_s2 + $0x80] sm:$0xff]   ;;  %v14269_v56 = vpack.c.bf16 %v1681_v57, %v1680_v11  ;;  %v13244_v47 = vld [vmem:[%s16363_s2 + $0x110] sm:$0xff]  }
  0x76   : > { %759 = vst [vmem:[#allocation2 + $0xe8] sm:$0xff] %v727_v46  ;;  %v561_v15 = vsel %vm497_vm5, %v465_v50, %v529_v1  ;;  %v562_v19 = vsel %vm498_vm1, %v466_v59, %v530_v25  ;;  %11580 = vmatprep.subr.bf16.mxu0 %v13238_v12  ;;  %v3166_v2 = vld [vmem:[#allocation2 + $0x87] sm:$0xff]  ;;  %v1684_v0 = vld [vmem:[#allocation2 + $0x57] sm:$0xff]  ;;  %v1685_v59 = vld [vmem:[#allocation2 + $0x5f] sm:$0xff]  ;;  %v14285_v61 = vpack.c.bf16 %v1683_v58, %v1682_v36 }
  0x77   : > { %v728_v28 = vsel %vm664_vm13, %v632_v51, %v696_v39  ;;  %v597_v32 = vmul.f32 %v13682_v48, %v561_v15  ;;  %v598_v35 = vmul.f32 %v13682_v48, %v562_v19  ;;  %v14277_v44 = vpack.c.bf16 %v3167_v62, %v3166_v2  ;;  %v3170_v51 = vld [vmem:[#allocation2 + $0xa7] sm:$0xff]  ;;  %v3171_v17 = vld [vmem:[#allocation2 + $0xaf] sm:$0xff]  ;;  %v3173_v11 = vld [vmem:[#allocation2 + $0xbf] sm:$0xff] }
  0x78   : > { %760 = vst [vmem:[#allocation2 + $0xf0] sm:$0xff] %v728_v28  ;;  %v3244_v23 = vpack.c.bf16 %v728_v28, %v727_v46  ;;  %11805 = vmatpush3.bf16.msra.mxu1 %v13239_v55  ;;  %v3169_v55 = vld [vmem:[#allocation2 + $0x9f] sm:$0xff]  ;;  %v14290_v10 = vpack.c.bf16 %v1685_v59, %v1684_v0  ;;  %v14300_v25 = vpack.c.bf16 %v3171_v17, %v3170_v51  ;;  %v3172_v46 = vld [vmem:[#allocation2 + $0xb7] sm:$0xff]  ;;  %v3174_v19 = vld [vmem:[#allocation2 + $0xc7] sm:$0xff] }
  0x79   : > { %v633_v53 = vadd.f32 %v13684_v49, %v597_v32  ;;  %v634_v4 = vadd.f32 %v13684_v49, %v598_v35  ;;  %11581 = vmatpush3.bf16.msra.mxu0 %v13238_v12  ;;  %11822 = vmatprep.subr.bf16.mxu1 %v13241_v29  ;;  %v3168_v12 = vld [vmem:[#allocation2 + $0x97] sm:$0xff]  ;;  %v13248_v39 = vld [vmem:[%s16363_s2 + $0x120] sm:$0xff]   ;;  %v3175_v57 = vld [vmem:[#allocation2 + $0xcf] sm:$0xff]  ;;  %v14323_v32 = vpack.c.bf16 %v3173_v11, %v3172_v46 }
  0x7a   : > { %11786 = vmatprep.mubr.bf16.mxu1 %v3244_v23  ;;  %11598 = vmatprep.subr.bf16.mxu0 %v13240_v5  ;;  %v14295_v1 = vpack.c.bf16 %v3169_v55, %v3168_v12  ;;  %v13245_v15 = vld [vmem:[%s16363_s2 + $0x90] sm:$0xff]   ;;  %v13250_v28 = vld [vmem:[%s16363_s2 + $0x128] sm:$0xff]   ;;  %v13247_v35 = vld [vmem:[%s16363_s2 + $0x98] sm:$0xff]   ;;  %vm16460_vm5 = vnez %v16430_v16 }
  0x7b   : > { %vm665_vm11 = vcmp.gt.f32.partialorder %v633_v53, 0.0  ;;  %vm666_vm8 = vcmp.gt.f32.partialorder %v634_v4, 0.0  ;;  %v697_v20 = vmul.f32 0.2, %v633_v53  ;;  %v698_v14 = vmul.f32 0.2, %v634_v4 }
  0x7c   : > { %11583 = vmatmul.mubr.msk.bf16.vlgmr.msra.gmra.mrb[0].mxu0 %vm13762_vm4, %v14265_v27  ;;  %v1894_v23 = vld [vmem:[#allocation2 + $0x18] sm:$0xff]  ;;  %v13249_v62 = vld [vmem:[%s16363_s2 + $0xa0] sm:$0xff]   ;;  %v13253_v55 = vld [vmem:[%s16363_s2 + $0xb0] sm:$0xff]  }
  0x7d   : > { %v729_v37 = vsel %vm665_vm11, %v633_v53, %v697_v20  ;;  %v730_v42 = vsel %vm666_vm8, %v634_v4, %v698_v14  ;;  %11599 = vmatpush3.bf16.msra.mxu0 %v13240_v5  ;;  %11586 = vmatprep.mubr.msk.bf16.mxu0 %vm13800_vm10, %v14269_v56  ;;  %v13243_v5 = vld [vmem:[%s16363_s2 + $0x88] sm:$0xff]   ;;  %v1895_v53 = vld [vmem:[#allocation2 + $0x20] sm:$0xff]  ;;  %v13254_v14 = vld [vmem:[%s16363_s2 + $0x138] sm:$0xff]   ;;  %vm16461_vm11 = vnez %v16434_v63  ;;  %vm16462_vm8 = vnez %v16437_v7 }
  0x7e   : > { %761 = vst [vmem:[#allocation2 + $0xf8] sm:$0xff] %v729_v37  ;;  %762 = vst [vmem:[#allocation2 + $0x100] sm:$0xff] %v730_v42  ;;  %v3245_v50 = vpack.c.bf16 %v730_v42, %v729_v37  ;;  %11600 = vmatprep.subr.bf16.mxu0 %v13242_v45  ;;  %v3177_v4 = vld [vmem:[#allocation2 + $0xdf] sm:$0xff]  ;;  %v1910_v2 = vpack.c.bf16 %v1895_v53, %v1894_v23  ;;  %v13251_v37 = vld [vmem:[%s16363_s2 + $0xa8] sm:$0xff]  }
  0x7f   : > { %v3179_v20 = vld [vmem:[#allocation2 + $0xef] sm:$0xff]  ;;  %v13256_v59 = vld [vmem:[%s16363_s2 + $0x140] sm:$0xff]   ;;  %v13255_v23 = vld [vmem:[%s16363_s2 + $0xb8] sm:$0xff]  }
  0x80   : > { %11787 = vmatmul.mubr.bf16.gmra.mrb[28].mxu1 %v3245_v50  ;;  %v395_v42 = vld [vmem:[%s13621_s18 + $0xf0] sm:$0xff] }
  0x81   : > { %11806 = vmatprep.mubr.msk.bf16.mxu1 %vm13635_vm2, %v14277_v44  ;;  %11601 = vmatpush3.bf16.msra.mxu0 %v13242_v45  ;;  %v3178_v45 = vld [vmem:[#allocation2 + $0xe7] sm:$0xff]  ;;  %v431_v0 = vmul.f32 %v13649_v30, %v395_v42  ;;  %v1897_v50 = vld [vmem:[#allocation2 + $0x30] sm:$0xff] }
  0x82   : > { %11602 = vmatprep.subr.bf16.mxu0 %v13244_v47  ;;  %v14360_v58 = vpack.c.bf16 %v3179_v20, %v3178_v45  ;;  %v3552_v51 = vld [vmem:[#allocation2 + $0x89] sm:$0xff]  ;;  %v3553_v17 = vld [vmem:[#allocation2 + $0x91] sm:$0xff]  ;;  %v3555_v45 = vld [vmem:[#allocation2 + $0xa1] sm:$0xff] }
  0x83   : > { %v467_v12 = vadd.f32 %v13651_v31, %v431_v0  ;;  %v14389_v53 = vpack.c.bf16 %v3553_v17, %v3552_v51  ;;  %v1902_v20 = vld [vmem:[#allocation2 + $0x58] sm:$0xff]  ;;  %v13259_v51 = vld [vmem:[%s16363_s2 + $0xc8] sm:$0xff]  }
  0x84   : > { %11587 = vmatmul.mubr.msk.bf16.gmra.mrb[4].mxu0 %vm13821_vm15, %v14285_v61  ;;  %v1904_v17 = vld [vmem:[#allocation2 + $0x68] sm:$0xff] }
  0x85   : > { %11603 = vmatpush3.bf16.msra.mxu0 %v13244_v47  ;;  %11590 = vmatprep.mubr.msk.bf16.mxu0 %vm13854_vm6, %v14290_v10  ;;  %v1896_v47 = vld [vmem:[#allocation2 + $0x28] sm:$0xff]  ;;  %vm499_vm1 = vcmp.gt.f32.partialorder %v467_v12, 0.0  ;;  %v531_v11 = vmul.f32 0.2, %v467_v12 }
  0x86   : > { %11604 = vmatprep.subr.bf16.mxu0 %v13246_v52  ;;  %v14376_v46 = vpack.c.bf16 %v1897_v50, %v1896_v47  ;;  %v3556_v47 = vld [vmem:[#allocation2 + $0xa9] sm:$0xff]  ;;  %v3557_v50 = vld [vmem:[#allocation2 + $0xb1] sm:$0xff] }
  0x88   : > { %11807 = vmatmul.mubr.msk.bf16.vlgmr.msra.gmra.mrb[16].mxu1 %vm13762_vm4, %v14295_v1 }
  0x89   : > { %11823 = vmatpush3.bf16.msra.mxu1 %v13241_v29  ;;  %11810 = vmatprep.mubr.msk.bf16.mxu1 %vm13800_vm10, %v14300_v25  ;;  %v14331_v29 = vpack.c.bf16 %v3175_v57, %v3174_v19  ;;  %v563_v57 = vsel %vm499_vm1, %v467_v12, %v531_v11  ;;  %v13262_v12 = vld [vmem:[%s16363_s2 + $0x158] sm:$0xff]   ;;  %vm16463_vm1 = vnez %v16441_v34 }
  0x8a   : > { %11824 = vmatprep.subr.bf16.mxu1 %v13243_v5  ;;  %11605 = vmatpush3.bf16.msra.mxu0 %v13246_v52  ;;  %v1898_v52 = vld [vmem:[#allocation2 + $0x38] sm:$0xff] }
  0x8b   : > { %11606 = vmatprep.subr.bf16.mxu0 %v13248_v39  ;;  %v3558_v11 = vld [vmem:[#allocation2 + $0xb9] sm:$0xff] }
  0x8c   : > { %11591 = vmatmul.mubr.msk.bf16.gmra.mrb[8].mxu0 %vm13924_vm0, %v13975_v24  ;;  %v13252_v24 = vld [vmem:[%s16363_s2 + $0x130] sm:$0xff]  }
  0x8d   : > { %11825 = vmatpush3.bf16.msra.mxu1 %v13243_v5  ;;  %11594 = vmatprep.mubr.msk.bf16.mxu0 %vm13966_vm9, %v14016_v26  ;;  %v3176_v26 = vld [vmem:[#allocation2 + $0xd7] sm:$0xff]  ;;  %v1899_v5 = vld [vmem:[#allocation2 + $0x40] sm:$0xff] }
  0x8e   : > { %11826 = vmatprep.subr.bf16.mxu1 %v13245_v15  ;;  %11607 = vmatpush3.bf16.msra.mxu0 %v13248_v39  ;;  %v14351_v36 = vpack.c.bf16 %v3177_v4, %v3176_v26  ;;  %v3181_v39 = vld [vmem:[#allocation2 + $0xff] sm:$0xff]  ;;  %v14381_v19 = vpack.c.bf16 %v1899_v5, %v1898_v52  ;;  %v1901_v26 = vld [vmem:[#allocation2 + $0x50] sm:$0xff]  ;;  %v14421_v52 = vpack.c.bf16 %v3557_v50, %v3556_v47  ;;  %v1908_v47 = vld [vmem:[#allocation2 + $0x88] sm:$0xff] }
  0x8f   : > { %11608 = vmatprep.subr.bf16.mxu0 %v13250_v28  ;;  %v13260_v4 = vld [vmem:[%s16363_s2 + $0x150] sm:$0xff]  }
  0x90   : > { %11811 = vmatmul.mubr.msk.bf16.gmra.mrb[20].mxu1 %vm13821_vm15, %v14323_v32  ;;  %v1905_v5 = vld [vmem:[#allocation2 + $0x70] sm:$0xff] }
  0x91   : > { %11827 = vmatpush3.bf16.msra.mxu1 %v13245_v15  ;;  %11814 = vmatprep.mubr.msk.bf16.mxu1 %vm13854_vm6, %v14331_v29  ;;  %v13258_v15 = vld [vmem:[%s16363_s2 + $0x148] sm:$0xff]  }
  0x92   : > { %11828 = vmatprep.subr.bf16.mxu1 %v13247_v35  ;;  %11609 = vmatpush3.bf16.msra.mxu0 %v13250_v28 }
  0x93   : > { %11610 = vmatprep.subr.bf16.mxu0 %v13252_v24 }
  0x94   : > { %11595 = vmatmul.mubr.msk.bf16.gmra.mrb[12].mxu0 %vm16460_vm5, %v14277_v44  ;;  %v3180_v44 = vld [vmem:[#allocation2 + $0xf7] sm:$0xff] }
  0x95   : > { %11829 = vmatpush3.bf16.msra.mxu1 %v13247_v35  ;;  %11614 = vmatprep.mubr.bf16.mxu0 %v1910_v2  ;;  %v14383_v28 = vpack.c.bf16 %v3181_v39, %v3180_v44  ;;  %v599_v35 = vmul.f32 %v13682_v48, %v563_v57  ;;  %v13264_v39 = vld [vmem:[%s16363_s2 + $0x160] sm:$0xff]   ;;  %v1906_v57 = vld [vmem:[#allocation2 + $0x78] sm:$0xff] }
  0x96   : > { %11830 = vmatprep.subr.bf16.mxu1 %v13249_v62  ;;  %11611 = vmatpush3.bf16.msra.mxu0 %v13252_v24  ;;  %v1900_v24 = vld [vmem:[#allocation2 + $0x48] sm:$0xff] }
  0x97   : > { %11612 = vmatprep.subr.bf16.mxu0 %v13254_v14  ;;  %v635_v2 = vadd.f32 %v13684_v49, %v599_v35  ;;  %v14406_v0 = vpack.c.bf16 %v1901_v26, %v1900_v24  ;;  %v1907_v35 = vld [vmem:[#allocation2 + $0x80] sm:$0xff]  ;;  %v13261_v24 = vld [vmem:[%s16363_s2 + $0xd0] sm:$0xff]   ;;  %v14438_v26 = vpack.c.bf16 %v1905_v5, %v1904_v17 }
  0x98   : > { %11815 = vmatmul.mubr.msk.bf16.gmra.mrb[24].mxu1 %vm13924_vm0, %v14351_v36  ;;  %v3562_v17 = vld [vmem:[#allocation2 + $0xd9] sm:$0xff] }
  0x99   : > { %11831 = vmatpush3.bf16.msra.mxu1 %v13249_v62  ;;  %11818 = vmatprep.mubr.msk.bf16.mxu1 %vm13966_vm9, %v14360_v58  ;;  %v3554_v62 = vld [vmem:[#allocation2 + $0x99] sm:$0xff]  ;;  %vm667_vm13 = vcmp.gt.f32.partialorder %v635_v2, 0.0  ;;  %v699_v42 = vmul.f32 0.2, %v635_v2 }
  0x9a   : > { %11832 = vmatprep.subr.bf16.mxu1 %v13251_v37  ;;  %11613 = vmatpush3.bf16.msra.mxu0 %v13254_v14  ;;  %v13257_v14 = vld [vmem:[%s16363_s2 + $0xc0] sm:$0xff]  }
  0x9b   : > { %11630 = vmatprep.subr.bf16.mxu0 %v13256_v59  ;;  %v2096_v5 = vld [vmem:[#allocation2 + $0x19] sm:$0xff] }
  0x9d   : > { %11833 = vmatpush3.bf16.msra.mxu1 %v13251_v37  ;;  %11615 = vmatmul.mubr.bf16.vlgmr.msra.gmra.mrb[0].mxu0 %v14376_v46  ;;  %v1903_v37 = vld [vmem:[#allocation2 + $0x60] sm:$0xff] }
  0x9e   : > { %11834 = vmatprep.subr.bf16.mxu1 %v13253_v55  ;;  %11631 = vmatpush3.bf16.msra.mxu0 %v13256_v59  ;;  %v14408_v59 = vsel %vm667_vm13, %v635_v2, %v699_v42  ;;  %v14413_v44 = vpack.c.bf16 %v1903_v37, %v1902_v20  ;;  %v3560_v2 = vld [vmem:[#allocation2 + $0xc9] sm:$0xff]  ;;  %v14444_v20 = vpack.c.bf16 %v1907_v35, %v1906_v57  ;;  %v13263_v42 = vld [vmem:[%s16363_s2 + $0xd8] sm:$0xff]   ;;  %v13265_v35 = vld [vmem:[%s16363_s2 + $0xe0] sm:$0xff]  }
  0x9f   : > { %11632 = vmatprep.subr.bf16.mxu0 %v13258_v15  ;;  %11618 = vmatprep.mubr.bf16.mxu0 %v14381_v19  ;;  %763 = vst [vmem:[#allocation2 + $0x108] sm:$0xff] %v14408_v59 }
  0xa0   : > { %11819 = vmatmul.mubr.msk.bf16.gmra.mrb[28].mxu1 %vm16460_vm5, %v14383_v28  ;;  %vm16464_vm5 = vnez %v16452_v8 }
  0xa1   : > { %11835 = vmatpush3.bf16.msra.mxu1 %v13253_v55  ;;  %11838 = vmatprep.mubr.msk.bf16.mxu1 %vm16461_vm11, %v14389_v53  ;;  %v14416_v55 = vpack.c.bf16 %v3555_v45, %v3554_v62  ;;  %v3561_v62 = vld [vmem:[#allocation2 + $0xd1] sm:$0xff]  ;;  %v13266_v45 = vld [vmem:[%s16363_s2 + $0x168] sm:$0xff]  }
  0xa2   : > { %11836 = vmatprep.subr.bf16.mxu1 %v13255_v23  ;;  %11633 = vmatpush3.bf16.msra.mxu0 %v13258_v15  ;;  %v3559_v15 = vld [vmem:[#allocation2 + $0xc1] sm:$0xff] }
  0xa3   : > { %11634 = vmatprep.subr.bf16.mxu0 %v13260_v4  ;;  %v14447_v37 = vpack.c.bf16 %v3559_v15, %v3558_v11  ;;  %v2097_v11 = vld [vmem:[#allocation2 + $0x21] sm:$0xff] }
  0xa5   : > { %11837 = vmatpush3.bf16.msra.mxu1 %v13255_v23  ;;  %11619 = vmatmul.mubr.bf16.gmra.mrb[4].mxu0 %v14406_v0  ;;  %v396_v23 = vld [vmem:[%s13621_s18 + $0xf8] sm:$0xff] }
  0xa6   : > { %11854 = vmatprep.subr.bf16.mxu1 %v13257_v14  ;;  %11635 = vmatpush3.bf16.msra.mxu0 %v13260_v4  ;;  %v432_v4 = vmul.f32 %v13649_v30, %v396_v23  ;;  %v14452_v30 = vpack.c.bf16 %v3561_v62, %v3560_v2  ;;  %v3564_v23 = vld [vmem:[#allocation2 + $0xe9] sm:$0xff] }
  0xa7   : > { %11636 = vmatprep.subr.bf16.mxu0 %v13262_v12  ;;  %11622 = vmatprep.mubr.bf16.mxu0 %v14413_v44 }
  0xa8   : > { %11839 = vmatmul.mubr.msk.bf16.vlgmr.msra.gmra.mrb[16].mxu1 %vm16462_vm8, %v14416_v55 }
  0xa9   : > { %11855 = vmatpush3.bf16.msra.mxu1 %v13257_v14  ;;  %11842 = vmatprep.mubr.msk.bf16.mxu1 %vm16463_vm1, %v14421_v52  ;;  %v468_v14 = vadd.f32 %v13651_v31, %v432_v4  ;;  %v13268_v31 = vld [vmem:[%s16363_s2 + $0x170] sm:$0xff]  }
  0xaa   : > { %11856 = vmatprep.subr.bf16.mxu1 %v13259_v51  ;;  %11637 = vmatpush3.bf16.msra.mxu0 %v13262_v12  ;;  %v1909_v12 = vld [vmem:[#allocation2 + $0x90] sm:$0xff] }
  0xab   : > { %11638 = vmatprep.subr.bf16.mxu0 %v13264_v39  ;;  %vm500_vm13 = vcmp.gt.f32.partialorder %v468_v14, 0.0  ;;  %v532_v50 = vmul.f32 0.2, %v468_v14  ;;  %v14466_v57 = vpack.c.bf16 %v1909_v12, %v1908_v47  ;;  %v3565_v4 = vld [vmem:[#allocation2 + $0xf1] sm:$0xff]  ;;  %v2098_v47 = vld [vmem:[#allocation2 + $0x29] sm:$0xff] }
  0xad   : > { %11857 = vmatpush3.bf16.msra.mxu1 %v13259_v51  ;;  %11623 = vmatmul.mubr.bf16.gmra.mrb[8].mxu0 %v14438_v26  ;;  %v564_v51 = vsel %vm500_vm13, %v468_v14, %v532_v50  ;;  %v13267_v14 = vld [vmem:[%s16363_s2 + $0xe8] sm:$0xff]  }
  0xae   : > { %11858 = vmatprep.subr.bf16.mxu1 %v13261_v24  ;;  %11639 = vmatpush3.bf16.msra.mxu0 %v13264_v39  ;;  %v600_v15 = vmul.f32 %v13682_v48, %v564_v51  ;;  %v3563_v39 = vld [vmem:[#allocation2 + $0xe1] sm:$0xff]  ;;  %v13270_v48 = vld [vmem:[%s16363_s2 + $0x178] sm:$0xff]  }
  0xaf   : > { %11640 = vmatprep.subr.bf16.mxu0 %v13266_v45  ;;  %11626 = vmatprep.mubr.bf16.mxu0 %v14444_v20  ;;  %v14475_v62 = vpack.c.bf16 %v3563_v39, %v3562_v17  ;;  %v13272_v17 = vld [vmem:[%s16363_s2 + $0x180] sm:$0xff]   ;;  %v13269_v39 = vld [vmem:[%s16363_s2 + $0xf0] sm:$0xff]  }
  0xb0   : > { %11843 = vmatmul.mubr.msk.bf16.gmra.mrb[20].mxu1 %vm14132_vm14, %v14447_v37  ;;  %v636_v2 = vadd.f32 %v13684_v49, %v600_v15  ;;  %v2099_v49 = vld [vmem:[#allocation2 + $0x31] sm:$0xff]  ;;  %v3566_v51 = vld [vmem:[#allocation2 + $0xf9] sm:$0xff] }
  0xb1   : > { %11859 = vmatpush3.bf16.msra.mxu1 %v13261_v24  ;;  %11846 = vmatprep.mubr.msk.bf16.mxu1 %vm14154_vm3, %v14452_v30  ;;  %v9680_v24 = vpack.c.bf16 %v2097_v11, %v2096_v5  ;;  %v2101_v5 = vld [vmem:[#allocation2 + $0x41] sm:$0xff]  ;;  %v14499_v15 = vpack.c.bf16 %v2099_v49, %v2098_v47  ;;  %v2104_v47 = vld [vmem:[#allocation2 + $0x59] sm:$0xff] }
  0xb2   : > { %11860 = vmatprep.subr.bf16.mxu1 %v13263_v42  ;;  %11641 = vmatpush3.bf16.msra.mxu0 %v13266_v45  ;;  %vm668_vm13 = vcmp.gt.f32.partialorder %v636_v2, 0.0  ;;  %v700_v50 = vmul.f32 0.2, %v636_v2  ;;  %v14480_v45 = vpack.c.bf16 %v3565_v4, %v3564_v23  ;;  %v3567_v11 = vld [vmem:[#allocation2 + $0x101] sm:$0xff] }
  0xb3   : > { %11642 = vmatprep.subr.bf16.mxu0 %v13268_v31  ;;  %v13274_v23 = vld [vmem:[%s16363_s2 + $0x188] sm:$0xff]   ;;  %v14509_v4 = vpack.c.bf16 %v3567_v11, %v3566_v51  ;;  %v13280_v51 = vld [vmem:[%s16363_s2 + $0x1a0] sm:$0xff]   ;;  %v13277_v11 = vld [vmem:[%s16363_s2 + $0x110] sm:$0xff]  }
  0xb4   : > { %v14483_v12 = vsel %vm668_vm13, %v636_v2, %v700_v50  ;;  %v13271_v2 = vld [vmem:[%s16363_s2 + $0xf8] sm:$0xff]   ;;  %v2105_v50 = vld [vmem:[#allocation2 + $0x61] sm:$0xff]  ;;  %vm16465_vm13 = vnez %v16430_v16  ;;  %v13482_v16 = vld [vmem:[%s16365_s4 + $0x210] sm:$0xff]  }
  0xb5   : > { %11861 = vmatpush3.bf16.msra.mxu1 %v13263_v42  ;;  %11627 = vmatmul.mubr.bf16.gmra.mrb[12].mxu0 %v14466_v57  ;;  %764 = vst [vmem:[#allocation2 + $0x110] sm:$0xff] %v14483_v12  ;;  %v4009_v42 = vpack.c.bf16 %v14483_v12, %v14408_v59  ;;  %v13310_v59 = vld [vmem:[%s16363_s2 + $0x218] sm:$0xff]   ;;  %v13307_v12 = vld [vmem:[%s16363_s2 + $0x188] sm:$0xff]  }
  0xb6   : > { %11862 = vmatprep.subr.bf16.mxu1 %v13265_v35  ;;  %11643 = vmatpush3.bf16.msra.mxu0 %v13268_v31  ;;  %v2100_v31 = vld [vmem:[#allocation2 + $0x39] sm:$0xff] }
  0xb7   : > { %11644 = vmatprep.subr.bf16.mxu0 %v13270_v48  ;;  %11646 = vmatprep.mubr.msk.bf16.mxu0 %vm16461_vm11, %v9680_v24  ;;  %v2103_v24 = vld [vmem:[#allocation2 + $0x51] sm:$0xff] }
  0xb8   : > { %11847 = vmatmul.mubr.msk.bf16.gmra.mrb[24].mxu1 %vm16464_vm5, %v14475_v62 }
  0xb9   : > { %11863 = vmatpush3.bf16.msra.mxu1 %v13265_v35  ;;  %11850 = vmatprep.mubr.msk.bf16.mxu1 %vm14209_vm12, %v14480_v45  ;;  %v14507_v35 = vpack.c.bf16 %v2101_v5, %v2100_v31  ;;  %v13278_v31 = vld [vmem:[%s16363_s2 + $0x198] sm:$0xff]   ;;  %v14537_v5 = vpack.c.bf16 %v2105_v50, %v2104_v47  ;;  %v13292_v47 = vld [vmem:[%s16363_s2 + $0x1d0] sm:$0xff]  }
  0xba   : > { %11864 = vmatprep.subr.bf16.mxu1 %v13267_v14  ;;  %11645 = vmatpush3.bf16.msra.mxu0 %v13270_v48  ;;  %v2102_v48 = vld [vmem:[#allocation2 + $0x49] sm:$0xff] }
  0xbb   : > { %11662 = vmatprep.subr.bf16.mxu0 %v13272_v17  ;;  %v14529_v49 = vpack.c.bf16 %v2103_v24, %v2102_v48  ;;  %v3987_v48 = vld [vmem:[#allocation2 + $0xa0] sm:$0xff]  ;;  %v2323_v50 = vld [vmem:[#allocation2 + $0x6f] sm:$0xff] }
  0xbd   : > { %11865 = vmatpush3.bf16.msra.mxu1 %v13267_v14  ;;  %11647 = vmatmul.mubr.msk.bf16.vlgmr.msra.gmra.mrb[0].mxu0 %vm16462_vm8, %v14499_v15  ;;  %v13276_v14 = vld [vmem:[%s16363_s2 + $0x190] sm:$0xff]  }
  0xbe   : > { %11866 = vmatprep.subr.bf16.mxu1 %v13269_v39  ;;  %11663 = vmatpush3.bf16.msra.mxu0 %v13272_v17  ;;  %v13273_v17 = vld [vmem:[%s16363_s2 + $0x100] sm:$0xff]  }
  0xbf   : > { %11664 = vmatprep.subr.bf16.mxu0 %v13274_v23  ;;  %11650 = vmatprep.mubr.msk.bf16.mxu0 %vm16463_vm1, %v14507_v35 }
  0xc0   : > { %11851 = vmatmul.mubr.msk.bf16.gmra.mrb[28].mxu1 %vm14239_vm7, %v14509_v4 }
  0xc1   : > { %11867 = vmatpush3.bf16.msra.mxu1 %v13269_v39  ;;  %11870 = vmatprep.mubr.msk.bf16.mxu1 %vm13635_vm2, %v14295_v1  ;;  %v13275_v1 = vld [vmem:[%s16363_s2 + $0x108] sm:$0xff]  }
  0xc2   : > { %11868 = vmatprep.subr.bf16.mxu1 %v13271_v2  ;;  %11665 = vmatpush3.bf16.msra.mxu0 %v13274_v23  ;;  %v13282_v39 = vld [vmem:[%s16363_s2 + $0x1a8] sm:$0xff]  }
  0xc3   : > { %11666 = vmatprep.subr.bf16.mxu0 %v13276_v14  ;;  %v3783_v23 = vld [vmem:[#allocation2 + $0x107] sm:$0xff] }
  0xc5   : > { %11869 = vmatpush3.bf16.msra.mxu1 %v13271_v2  ;;  %11651 = vmatmul.mubr.msk.bf16.gmra.mrb[4].mxu0 %vm14132_vm14, %v14529_v49  ;;  %v3784_v2 = vld [vmem:[#allocation2 + $0x10f] sm:$0xff] }
  0xc6   : > { %11886 = vmatprep.subr.bf16.mxu1 %v13273_v17  ;;  %11667 = vmatpush3.bf16.msra.mxu0 %v13276_v14  ;;  %v14611_v24 = vpack.c.bf16 %v3784_v2, %v3783_v23  ;;  %v3993_v23 = vld [vmem:[#allocation2 + $0xd0] sm:$0xff]  ;;  %v2326_v2 = vld [vmem:[#allocation2 + $0x87] sm:$0xff] }
  0xc7   : > { %11668 = vmatprep.subr.bf16.mxu0 %v13278_v31  ;;  %11654 = vmatprep.mubr.msk.bf16.mxu0 %vm14154_vm3, %v14537_v5 }
  0xc8   : > { %11871 = vmatmul.mubr.msk.bf16.vlgmr.msra.gmra.mrb[16].mxu1 %vm13762_vm4, %v14300_v25  ;;  %v13279_v25 = vld [vmem:[%s16363_s2 + $0x118] sm:$0xff]  }
  0xc9   : > { %11887 = vmatpush3.bf16.msra.mxu1 %v13273_v17  ;;  %11874 = vmatprep.mubr.msk.bf16.mxu1 %vm13800_vm10, %v14323_v32  ;;  %v13284_v32 = vld [vmem:[%s16363_s2 + $0x1b0] sm:$0xff]   ;;  %v3988_v17 = vld [vmem:[#allocation2 + $0xa8] sm:$0xff] }
  0xca   : > { %11888 = vmatprep.subr.bf16.mxu1 %v13275_v1  ;;  %11669 = vmatpush3.bf16.msra.mxu0 %v13278_v31  ;;  %v3989_v31 = vld [vmem:[#allocation2 + $0xb0] sm:$0xff] }
  0xcb   : > { %11670 = vmatprep.subr.bf16.mxu0 %v13280_v51 }
  0xcd   : > { %11889 = vmatpush3.bf16.msra.mxu1 %v13275_v1  ;;  %11655 = vmatmul.mubr.msk.bf16.gmra.mrb[8].mxu0 %vm16464_vm5, %v14176_v40  ;;  %v13281_v40 = vld [vmem:[%s16363_s2 + $0x120] sm:$0xff]  }
  0xce   : > { %11890 = vmatprep.subr.bf16.mxu1 %v13277_v11  ;;  %11671 = vmatpush3.bf16.msra.mxu0 %v13280_v51  ;;  %v13289_v1 = vld [vmem:[%s16363_s2 + $0x140] sm:$0xff]  }
  0xcf   : > { %11672 = vmatprep.subr.bf16.mxu0 %v13282_v39  ;;  %11658 = vmatprep.mubr.msk.bf16.mxu0 %vm14209_vm12, %v14229_v3  ;;  %v13286_v3 = vld [vmem:[%s16363_s2 + $0x1b8] sm:$0xff]   ;;  %v3991_v51 = vld [vmem:[#allocation2 + $0xc0] sm:$0xff] }
  0xd0   : > { %11875 = vmatmul.mubr.msk.bf16.gmra.mrb[20].mxu1 %vm13821_vm15, %v14331_v29  ;;  %v13283_v29 = vld [vmem:[%s16363_s2 + $0x128] sm:$0xff]  }
  0xd1   : > { %11891 = vmatpush3.bf16.msra.mxu1 %v13277_v11  ;;  %11878 = vmatprep.mubr.msk.bf16.mxu1 %vm13854_vm6, %v14351_v36  ;;  %v13288_v36 = vld [vmem:[%s16363_s2 + $0x1c0] sm:$0xff]   ;;  %v13294_v11 = vld [vmem:[%s16363_s2 + $0x1d8] sm:$0xff]  }
  0xd2   : > { %11892 = vmatprep.subr.bf16.mxu1 %v13279_v25  ;;  %11673 = vmatpush3.bf16.msra.mxu0 %v13282_v39 }
  0xd3   : > { %11674 = vmatprep.subr.bf16.mxu0 %v13284_v32 }
  0xd5   : > { %11893 = vmatpush3.bf16.msra.mxu1 %v13279_v25  ;;  %11659 = vmatmul.mubr.msk.bf16.gmra.mrb[12].mxu0 %vm14239_vm7, %v14389_v53  ;;  %v13285_v53 = vld [vmem:[%s16363_s2 + $0x130] sm:$0xff]   ;;  %v14637_v25 = vpack.c.bf16 %v3989_v31, %v3988_v17  ;;  %v13295_v31 = vld [vmem:[%s16363_s2 + $0x158] sm:$0xff]  }
  0xd6   : > { %11894 = vmatprep.subr.bf16.mxu1 %v13281_v40  ;;  %11675 = vmatpush3.bf16.msra.mxu0 %v13284_v32  ;;  %v13291_v32 = vld [vmem:[%s16363_s2 + $0x148] sm:$0xff]  }
  0xd7   : > { %11676 = vmatprep.subr.bf16.mxu0 %v13286_v3  ;;  %11678 = vmatprep.mubr.msk.bf16.mxu0 %vm13635_vm2, %v14265_v27  ;;  %v3986_v27 = vld [vmem:[#allocation2 + $0x98] sm:$0xff] }
  0xd8   : > { %11879 = vmatmul.mubr.msk.bf16.gmra.mrb[24].mxu1 %vm13924_vm0, %v14360_v58  ;;  %v13290_v58 = vld [vmem:[%s16363_s2 + $0x1c8] sm:$0xff]   ;;  %v14613_v14 = vpack.c.bf16 %v3987_v48, %v3986_v27 }
  0xd9   : > { %11895 = vmatpush3.bf16.msra.mxu1 %v13281_v40  ;;  %11882 = vmatprep.mubr.msk.bf16.mxu1 %vm13966_vm9, %v14383_v28  ;;  %v13287_v28 = vld [vmem:[%s16363_s2 + $0x138] sm:$0xff]   ;;  %v2327_v27 = vld [vmem:[#allocation2 + $0x8f] sm:$0xff] }
  0xda   : > { %11896 = vmatprep.subr.bf16.mxu1 %v13283_v29  ;;  %11677 = vmatpush3.bf16.msra.mxu0 %v13286_v3  ;;  %v2324_v40 = vld [vmem:[#allocation2 + $0x77] sm:$0xff] }
  0xdb   : > { %11694 = vmatprep.subr.bf16.mxu0 %v13288_v36 }
  0xdd   : > { %11897 = vmatpush3.bf16.msra.mxu1 %v13283_v29  ;;  %11679 = vmatmul.mubr.msk.bf16.vlgmr.msra.gmra.mrb[0].mxu0 %vm13762_vm4, %v14269_v56  ;;  %v2322_v56 = vld [vmem:[#allocation2 + $0x67] sm:$0xff]  ;;  %v2325_v29 = vld [vmem:[#allocation2 + $0x7f] sm:$0xff] }
  0xde   : > { %11898 = vmatprep.subr.bf16.mxu1 %v13285_v53  ;;  %11695 = vmatpush3.bf16.msra.mxu0 %v13288_v36  ;;  %v9740_v39 = vpack.c.bf16 %v2323_v50, %v2322_v56  ;;  %v13296_v36 = vld [vmem:[%s16363_s2 + $0x1e0] sm:$0xff]   ;;  %v9743_v48 = vpack.c.bf16 %v2325_v29, %v2324_v40  ;;  %v9746_v56 = vpack.c.bf16 %v2327_v27, %v2326_v2  ;;  %v3998_v40 = vld [vmem:[#allocation2 + $0xf8] sm:$0xff]  ;;  %v13299_v2 = vld [vmem:[%s16363_s2 + $0x168] sm:$0xff]  }
  0xdf   : > { %11696 = vmatprep.subr.bf16.mxu0 %v13290_v58  ;;  %11682 = vmatprep.mubr.msk.bf16.mxu0 %vm13800_vm10, %v14285_v61  ;;  %v3990_v61 = vld [vmem:[#allocation2 + $0xb8] sm:$0xff]  ;;  %v3999_v29 = vld [vmem:[#allocation2 + $0x100] sm:$0xff] }
  0xe0   : > { %11883 = vmatmul.mubr.msk.bf16.gmra.mrb[28].mxu1 %vm16465_vm13, %v14611_v24  ;;  %v14642_v3 = vpack.c.bf16 %v3991_v51, %v3990_v61  ;;  %v2329_v61 = vld [vmem:[#allocation2 + $0x9f] sm:$0xff]  ;;  %v3996_v51 = vld [vmem:[#allocation2 + $0xe8] sm:$0xff]  ;;  %v14687_v27 = vpack.c.bf16 %v3999_v29, %v3998_v40  ;;  %v13317_v40 = vld [vmem:[%s16363_s2 + $0x1b0] sm:$0xff]  }
  0xe1   : > { %11899 = vmatpush3.bf16.msra.mxu1 %v13285_v53  ;;  %11902 = vmatprep.mubr.bf16.mxu1 %v14613_v14  ;;  %v3992_v53 = vld [vmem:[#allocation2 + $0xc8] sm:$0xff] }
  0xe2   : > { %11900 = vmatprep.subr.bf16.mxu1 %v13287_v28  ;;  %11697 = vmatpush3.bf16.msra.mxu0 %v13290_v58  ;;  %v3994_v58 = vld [vmem:[#allocation2 + $0xd8] sm:$0xff]  ;;  %v14660_v50 = vpack.c.bf16 %v3993_v23, %v3992_v53  ;;  %v4404_v29 = vld [vmem:[#allocation2 + $0xa7] sm:$0xff] }
  0xe3   : > { %11698 = vmatprep.subr.bf16.mxu0 %v13292_v47  ;;  %v13302_v53 = vld [vmem:[%s16363_s2 + $0x1f8] sm:$0xff]  }
  0xe5   : > { %11901 = vmatpush3.bf16.msra.mxu1 %v13287_v28  ;;  %11683 = vmatmul.mubr.msk.bf16.gmra.mrb[4].mxu0 %vm13821_vm15, %v14290_v10  ;;  %v13293_v10 = vld [vmem:[%s16363_s2 + $0x150] sm:$0xff]   ;;  %v3995_v28 = vld [vmem:[#allocation2 + $0xe0] sm:$0xff] }
  0xe6   : > { %11918 = vmatprep.subr.bf16.mxu1 %v13289_v1  ;;  %11699 = vmatpush3.bf16.msra.mxu0 %v13292_v47  ;;  %v13298_v47 = vld [vmem:[%s16363_s2 + $0x1e8] sm:$0xff]   ;;  %v14662_v17 = vpack.c.bf16 %v3995_v28, %v3994_v58  ;;  %v13308_v28 = vld [vmem:[%s16363_s2 + $0x210] sm:$0xff]  }
  0xe7   : > { %11700 = vmatprep.subr.bf16.mxu0 %v13294_v11  ;;  %11686 = vmatprep.mubr.msk.bf16.mxu0 %vm13854_vm6, %v9740_v39  ;;  %v13300_v39 = vld [vmem:[%s16363_s2 + $0x1f0] sm:$0xff]   ;;  %v13306_v58 = vld [vmem:[%s16363_s2 + $0x208] sm:$0xff]  }
  0xe8   : > { %11903 = vmatmul.mubr.bf16.vlgmr.msra.gmra.mrb[16].mxu1 %v14637_v25 }
  0xe9   : > { %11919 = vmatpush3.bf16.msra.mxu1 %v13289_v1  ;;  %11906 = vmatprep.mubr.bf16.mxu1 %v14642_v3  ;;  %v2328_v1 = vld [vmem:[#allocation2 + $0x97] sm:$0xff] }
  0xea   : > { %11920 = vmatprep.subr.bf16.mxu1 %v13291_v32  ;;  %11701 = vmatpush3.bf16.msra.mxu0 %v13294_v11  ;;  %v3997_v11 = vld [vmem:[#allocation2 + $0xf0] sm:$0xff] }
  0xeb   : > { %11702 = vmatprep.subr.bf16.mxu0 %v13296_v36  ;;  %v14682_v23 = vpack.c.bf16 %v3997_v11, %v3996_v51  ;;  %v13316_v51 = vld [vmem:[%s16363_s2 + $0x230] sm:$0xff]   ;;  %v13313_v11 = vld [vmem:[%s16363_s2 + $0x1a0] sm:$0xff]  }
  0xed   : > { %11921 = vmatpush3.bf16.msra.mxu1 %v13291_v32  ;;  %11687 = vmatmul.mubr.msk.bf16.gmra.mrb[8].mxu0 %vm13924_vm0, %v9743_v48  ;;  %v13297_v32 = vld [vmem:[%s16363_s2 + $0x160] sm:$0xff]   ;;  %v13301_v48 = vld [vmem:[%s16363_s2 + $0x170] sm:$0xff]  }
  0xee   : > { %11922 = vmatprep.subr.bf16.mxu1 %v13293_v10  ;;  %11703 = vmatpush3.bf16.msra.mxu0 %v13296_v36  ;;  %v9749_v36 = vpack.c.bf16 %v2329_v61, %v2328_v1 }
  0xef   : > { %11704 = vmatprep.subr.bf16.mxu0 %v13298_v47  ;;  %11690 = vmatprep.mubr.msk.bf16.mxu0 %vm13966_vm9, %v9746_v56 }
  0xf0   : > { %11907 = vmatmul.mubr.bf16.gmra.mrb[20].mxu1 %v14660_v50 }
  0xf1   : > { %11923 = vmatpush3.bf16.msra.mxu1 %v13293_v10  ;;  %11910 = vmatprep.mubr.bf16.mxu1 %v14662_v17  ;;  %v13304_v10 = vld [vmem:[%s16363_s2 + $0x200] sm:$0xff]  }
  0xf2   : > { %11924 = vmatprep.subr.bf16.mxu1 %v13295_v31  ;;  %11705 = vmatpush3.bf16.msra.mxu0 %v13298_v47 }
  0xf3   : > { %11706 = vmatprep.subr.bf16.mxu0 %v13300_v39 }
  0xf5   : > { %11925 = vmatpush3.bf16.msra.mxu1 %v13295_v31  ;;  %11691 = vmatmul.mubr.msk.bf16.gmra.mrb[12].mxu0 %vm16465_vm13, %v9749_v36 }
  0xf6   : > { %11926 = vmatprep.subr.bf16.mxu1 %v13297_v32  ;;  %11707 = vmatpush3.bf16.msra.mxu0 %v13300_v39  ;;  %v4201_v39 = vld [vmem:[#allocation2 + $0x109] sm:$0xff] }
  0xf7   : > { %11708 = vmatprep.subr.bf16.mxu0 %v13302_v53  ;;  %11710 = vmatprep.mubr.bf16.mxu0 %v14376_v46  ;;  %v13303_v46 = vld [vmem:[%s16363_s2 + $0x178] sm:$0xff]  }
  0xf8   : > { %11911 = vmatmul.mubr.bf16.gmra.mrb[24].mxu1 %v14682_v23 }
  0xf9   : > { %11927 = vmatpush3.bf16.msra.mxu1 %v13297_v32  ;;  %11914 = vmatprep.mubr.bf16.mxu1 %v14687_v27 }
  0xfa   : > { %11928 = vmatprep.subr.bf16.mxu1 %v13299_v2  ;;  %11709 = vmatpush3.bf16.msra.mxu0 %v13302_v53 }
  0xfb   : > { %11726 = vmatprep.subr.bf16.mxu0 %v13304_v10 }
  0xfd   : > { %11929 = vmatpush3.bf16.msra.mxu1 %v13299_v2  ;;  %11711 = vmatmul.mubr.bf16.vlgmr.msra.gmra.mrb[0].mxu0 %v14381_v19 }
  0xfe   : > { %11930 = vmatprep.subr.bf16.mxu1 %v13301_v48  ;;  %11727 = vmatpush3.bf16.msra.mxu0 %v13304_v10  ;;  %v13319_v10 = vld [vmem:[%s16363_s2 + $0x1b8] sm:$0xff]  }
  0xff   : > { %11728 = vmatprep.subr.bf16.mxu0 %v13306_v58  ;;  %11714 = vmatprep.mubr.bf16.mxu0 %v14406_v0  ;;  %v13305_v0 = vld [vmem:[%s16363_s2 + $0x180] sm:$0xff]  }
 0x100   : > { %11915 = vmatmul.mubr.bf16.gmra.mrb[28].mxu1 %v4009_v42 }
 0x101   : > { %11931 = vmatpush3.bf16.msra.mxu1 %v13301_v48  ;;  %11934 = vmatprep.mubr.msk.bf16.mxu1 %vm16461_vm11, %v14416_v55  ;;  %v13312_v55 = vld [vmem:[%s16363_s2 + $0x220] sm:$0xff]  }
 0x102   : > { %v14711_v47 = vpop.f32.mrb[0].mxu1  ;;  %11932 = vmatprep.subr.bf16.mxu1 %v13303_v46  ;;  %11729 = vmatpush3.bf16.msra.mxu0 %v13306_v58  ;;  %v4406_v58 = vld [vmem:[#allocation2 + $0xb7] sm:$0xff] }
 0x103   : > { %v14716_v56 = vpop.f32.mrb[1].mxu1  ;;  %11730 = vmatprep.subr.bf16.mxu0 %v13308_v28 }
 0x104   : > { %v14721_v19 = vpop.f32.mrb[2].mxu1 }
 0x105   : > { %v14726_v31 = vpop.f32.mrb[3].mxu1  ;;  %11933 = vmatpush3.bf16.msra.mxu1 %v13303_v46  ;;  %11715 = vmatmul.mubr.bf16.gmra.mrb[4].mxu0 %v14413_v44  ;;  %v13309_v44 = vld [vmem:[%s16363_s2 + $0x190] sm:$0xff]   ;;  %v4407_v46 = vld [vmem:[#allocation2 + $0xbf] sm:$0xff] }
 0x106   : > { %11950 = vmatprep.subr.bf16.mxu1 %v13305_v0  ;;  %11731 = vmatpush3.bf16.msra.mxu0 %v13308_v28 }
 0x107   : > { %11732 = vmatprep.subr.bf16.mxu0 %v13310_v59  ;;  %11718 = vmatprep.mubr.bf16.mxu0 %v14438_v26 }
 0x108   : > { %11935 = vmatmul.mubr.msk.bf16.vlgmr.msra.gmra.mrb[16].mxu1 %vm16462_vm8, %v14421_v52  ;;  %v13314_v52 = vld [vmem:[%s16363_s2 + $0x228] sm:$0xff]  }
 0x109   : > { %11951 = vmatpush3.bf16.msra.mxu1 %v13305_v0  ;;  %11938 = vmatprep.mubr.msk.bf16.mxu1 %vm16463_vm1, %v14447_v37  ;;  %v13311_v37 = vld [vmem:[%s16363_s2 + $0x198] sm:$0xff]  }
 0x10a   : > { %v14745_v42 = vpop.f32.mrb[4].mxu1  ;;  %11952 = vmatprep.subr.bf16.mxu1 %v13307_v12  ;;  %11733 = vmatpush3.bf16.msra.mxu0 %v13310_v59  ;;  %v2743_v0 = vld [vmem:[#allocation2 + $0x71] sm:$0xff]  ;;  %v4408_v59 = vld [vmem:[#allocation2 + $0xc7] sm:$0xff] }
 0x10b   : > { %v14750_v1 = vpop.f32.mrb[5].mxu1  ;;  %11734 = vmatprep.subr.bf16.mxu0 %v13312_v55 }
 0x10c   : > { %v14755_v26 = vpop.f32.mrb[6].mxu1 }
 0x10d   : > { %v14760_v61 = vpop.f32.mrb[7].mxu1  ;;  %11953 = vmatpush3.bf16.msra.mxu1 %v13307_v12  ;;  %11719 = vmatmul.mubr.bf16.gmra.mrb[8].mxu0 %v14444_v20  ;;  %v13318_v20 = vld [vmem:[%s16363_s2 + $0x238] sm:$0xff]  }
 0x10e   : > { %11954 = vmatprep.subr.bf16.mxu1 %v13309_v44  ;;  %11735 = vmatpush3.bf16.msra.mxu0 %v13312_v55  ;;  %v4409_v55 = vld [vmem:[#allocation2 + $0xcf] sm:$0xff] }
 0x10f   : > { %11736 = vmatprep.subr.bf16.mxu0 %v13314_v52  ;;  %11722 = vmatprep.mubr.bf16.mxu0 %v14466_v57 }
 0x110   : > { %11939 = vmatmul.mubr.msk.bf16.gmra.mrb[20].mxu1 %vm14132_vm14, %v14452_v30  ;;  %v13315_v30 = vld [vmem:[%s16363_s2 + $0x1a8] sm:$0xff]  }
 0x111   : > { %11955 = vmatpush3.bf16.msra.mxu1 %v13309_v44  ;;  %11942 = vmatprep.mubr.msk.bf16.mxu1 %vm14154_vm3, %v14475_v62  ;;  %v4202_v62 = vld [vmem:[#allocation2 + $0x111] sm:$0xff] }
 0x112   : > { %11956 = vmatprep.subr.bf16.mxu1 %v13311_v37  ;;  %11737 = vmatpush3.bf16.msra.mxu0 %v13314_v52  ;;  %v14809_v2 = vpack.c.bf16 %v4202_v62, %v4201_v39  ;;  %v2745_v39 = vld [vmem:[#allocation2 + $0x81] sm:$0xff]  ;;  %v10079_v62 = vpack.c.bf16 %v4409_v55, %v4408_v59  ;;  %v13323_v59 = vld [vmem:[%s16363_s2 + $0x1d8] sm:$0xff]  }
 0x113   : > { %11738 = vmatprep.subr.bf16.mxu0 %v13316_v51  ;;  %v2749_v55 = vld [vmem:[#allocation2 + $0xa1] sm:$0xff] }
 0x115   : > { %11957 = vmatpush3.bf16.msra.mxu1 %v13311_v37  ;;  %11723 = vmatmul.mubr.bf16.gmra.mrb[12].mxu0 %v14613_v14  ;;  %v14783_v57 = vpop.f32.mrb[8].mxu1  ;;  %v13336_v14 = vld [vmem:[%s16367_s6] sm:$0xff]  }
 0x116   : > { %11958 = vmatprep.subr.bf16.mxu1 %v13313_v11  ;;  %11739 = vmatpush3.bf16.msra.mxu0 %v13316_v51  ;;  %v14788_v32 = vpop.f32.mrb[9].mxu1  ;;  %v13339_v51 = vld [vmem:[%s16367_s6 + $0x18] sm:$0xff]  }
 0x117   : > { %11740 = vmatprep.subr.bf16.mxu0 %v13318_v20  ;;  %11742 = vmatprep.mubr.msk.bf16.mxu0 %vm16461_vm11, %v14499_v15  ;;  %v14799_v36 = vpop.f32.mrb[10].mxu1  ;;  %v4405_v15 = vld [vmem:[#allocation2 + $0xaf] sm:$0xff] }
 0x118   : > { %11943 = vmatmul.mubr.msk.bf16.gmra.mrb[24].mxu1 %vm16464_vm5, %v14480_v45  ;;  %v14804_v53 = vpop.f32.mrb[11].mxu1  ;;  %v13337_v45 = vld [vmem:[%s16367_s6 + $0x8] sm:$0xff]   ;;  %v10073_v48 = vpack.c.bf16 %v4405_v15, %v4404_v29  ;;  %v13340_v29 = vld [vmem:[%s16367_s6 + $0x20] sm:$0xff]   ;;  %v4410_v15 = vld [vmem:[#allocation2 + $0xd7] sm:$0xff] }
 0x119   : > { %11959 = vmatpush3.bf16.msra.mxu1 %v13313_v11  ;;  %11946 = vmatprep.mubr.msk.bf16.mxu1 %vm14209_vm12, %v14509_v4  ;;  %v2742_v4 = vld [vmem:[#allocation2 + $0x69] sm:$0xff]  ;;  %v10076_v11 = vpack.c.bf16 %v4407_v46, %v4406_v58 }
 0x11a   : > { %11960 = vmatprep.subr.bf16.mxu1 %v13315_v30  ;;  %11741 = vmatpush3.bf16.msra.mxu0 %v13318_v20  ;;  %v9812_v37 = vpack.c.bf16 %v2743_v0, %v2742_v4  ;;  %v13321_v20 = vld [vmem:[%s16363_s2 + $0x1c8] sm:$0xff]  }
 0x11b   : > { %12046 = vmatprep.subr.bf16.mxu0 %v13336_v14  ;;  %v13341_v46 = vld [vmem:[%s16367_s6 + $0x28] sm:$0xff]  }
 0x11d   : > { %11961 = vmatpush3.bf16.msra.mxu1 %v13315_v30  ;;  %11743 = vmatmul.mubr.msk.bf16.vlgmr.msra.gmra.mrb[0].mxu0 %vm16462_vm8, %v14507_v35  ;;  %v13320_v35 = vld [vmem:[%s16363_s2 + $0x1c0] sm:$0xff]  }
 0x11e   : > { %11962 = vmatprep.subr.bf16.mxu1 %v13317_v40  ;;  %11746 = vmatprep.mubr.msk.bf16.mxu0 %vm16463_vm1, %v14529_v49  ;;  %v14820_v28 = vpop.f32.mrb[12].mxu1  ;;  %v13338_v49 = vld [vmem:[%s16367_s6 + $0x10] sm:$0xff]   ;;  %v2744_v30 = vld [vmem:[#allocation2 + $0x79] sm:$0xff] }
 0x11f   : > { %12047 = vmatpush3.bf16.msra.mxu0 %v13336_v14  ;;  %v14828_v12 = vpop.f32.mrb[13].mxu1  ;;  %v2746_v14 = vld [vmem:[#allocation2 + $0x89] sm:$0xff]  ;;  %v9815_v4 = vpack.c.bf16 %v2745_v39, %v2744_v30  ;;  %v4414_v30 = vld [vmem:[#allocation2 + $0xf7] sm:$0xff]  ;;  %v4415_v39 = vld [vmem:[#allocation2 + $0xff] sm:$0xff] }
 0x120   : > { %11947 = vmatmul.mubr.msk.bf16.gmra.mrb[28].mxu1 %vm14239_vm7, %v14809_v2  ;;  %12048 = vmatprep.subr.bf16.mxu0 %v13337_v45  ;;  %v14835_v44 = vpop.f32.mrb[14].mxu1 }
 0x121   : > { %11963 = vmatpush3.bf16.msra.mxu1 %v13317_v40  ;;  %11966 = vmatprep.mubr.msk.bf16.mxu1 %vm13635_vm2, %v10073_v48  ;;  %v14837_v52 = vpop.f32.mrb[15].mxu1  ;;  %v2747_v40 = vld [vmem:[#allocation2 + $0x91] sm:$0xff] }
 0x122   : > { %11964 = vmatprep.subr.bf16.mxu1 %v13319_v10  ;;  %v4413_v48 = vld [vmem:[#allocation2 + $0xef] sm:$0xff]  ;;  %v9818_v58 = vpack.c.bf16 %v2747_v40, %v2746_v14  ;;  %v13343_v14 = vld [vmem:[%s16367_s6 + $0x38] sm:$0xff]  }
 0x123   : > { %12049 = vmatpush3.bf16.msra.mxu0 %v13337_v45  ;;  %v4411_v45 = vld [vmem:[#allocation2 + $0xdf] sm:$0xff] }
 0x124   : > { %12050 = vmatprep.subr.bf16.mxu0 %v13338_v49  ;;  %v10082_v0 = vpack.c.bf16 %v4411_v45, %v4410_v15  ;;  %v13325_v15 = vld [vmem:[%s16363_s2 + $0x1e8] sm:$0xff]   ;;  %v5233_v45 = vld [vmem:[%s13621_s18 + $0x10] sm:$0xff] }
 0x125   : > { %11965 = vmatpush3.bf16.msra.mxu1 %v13319_v10  ;;  %11747 = vmatmul.mubr.msk.bf16.gmra.mrb[4].mxu0 %vm14132_vm14, %v14537_v5  ;;  %v13322_v5 = vld [vmem:[%s16363_s2 + $0x1d0] sm:$0xff]   ;;  %v4412_v10 = vld [vmem:[#allocation2 + $0xe7] sm:$0xff] }
 0x126   : > { %11982 = vmatprep.subr.bf16.mxu1 %v13320_v35  ;;  %11750 = vmatprep.mubr.msk.bf16.mxu0 %vm14154_vm3, %v9812_v37  ;;  %v5231_v37 = vld [vmem:[%s13621_s18] sm:$0xff] }
 0x127   : > { %12051 = vmatpush3.bf16.msra.mxu0 %v13338_v49  ;;  %v2748_v49 = vld [vmem:[#allocation2 + $0x99] sm:$0xff] }
 0x128   : > { %11967 = vmatmul.mubr.msk.bf16.vlgmr.msra.gmra.mrb[16].mxu1 %vm13762_vm4, %v10076_v11  ;;  %12052 = vmatprep.subr.bf16.mxu0 %v13339_v51  ;;  %v5232_v11 = vld [vmem:[%s13621_s18 + $0x8] sm:$0xff] }
 0x129   : > { %11983 = vmatpush3.bf16.msra.mxu1 %v13320_v35  ;;  %11970 = vmatprep.mubr.msk.bf16.mxu1 %vm13800_vm10, %v10079_v62  ;;  %v10085_v35 = vpack.c.bf16 %v4413_v48, %v4412_v10  ;;  %v9821_v62 = vpack.c.bf16 %v2749_v55, %v2748_v49  ;;  %v5263_v40 = vpack.c.bf16 %v5232_v11, %v5231_v37  ;;  %v4418_v10 = vld [vmem:[#allocation2 + $0x117] sm:$0xff]  ;;  %v4419_v48 = vld [vmem:[#allocation2 + $0x11f] sm:$0xff]  ;;  %v4633_v55 = vld [vmem:[#allocation2 + $0x108] sm:$0xff] }
 0x12a   : > { %11984 = vmatprep.subr.bf16.mxu1 %v13321_v20  ;;  %v13330_v49 = vld [vmem:[%s16363_s2 + $0x210] sm:$0xff]  }
 0x12b   : > { %12053 = vmatpush3.bf16.msra.mxu0 %v13339_v51  ;;  %v13342_v51 = vld [vmem:[%s16367_s6 + $0x30] sm:$0xff]  }
 0x12c   : > { %12054 = vmatprep.subr.bf16.mxu0 %v13340_v29  ;;  %v4822_v11 = vld [vmem:[#allocation2 + $0xa9] sm:$0xff] }
 0x12d   : > { %11985 = vmatpush3.bf16.msra.mxu1 %v13321_v20  ;;  %11751 = vmatmul.mubr.msk.bf16.gmra.mrb[8].mxu0 %vm16464_vm5, %v9815_v4  ;;  %v13324_v20 = vld [vmem:[%s16363_s2 + $0x1e0] sm:$0xff]   ;;  %v13326_v4 = vld [vmem:[%s16363_s2 + $0x1f0] sm:$0xff]  }
 0x12e   : > { %11986 = vmatprep.subr.bf16.mxu1 %v13322_v5  ;;  %11754 = vmatprep.mubr.msk.bf16.mxu0 %vm14209_vm12, %v9818_v58 }
 0x12f   : > { %12055 = vmatpush3.bf16.msra.mxu0 %v13340_v29  ;;  %v10088_v29 = vpack.c.bf16 %v4415_v39, %v4414_v30  ;;  %v13335_v39 = vld [vmem:[%s16363_s2 + $0x238] sm:$0xff]  }
 0x130   : > { %11971 = vmatmul.mubr.msk.bf16.gmra.mrb[20].mxu1 %vm13821_vm15, %v10082_v0  ;;  %12056 = vmatprep.subr.bf16.mxu0 %v13341_v46  ;;  %v13327_v0 = vld [vmem:[%s16363_s2 + $0x1f8] sm:$0xff]  }
 0x131   : > { %11987 = vmatpush3.bf16.msra.mxu1 %v13322_v5  ;;  %11974 = vmatprep.mubr.msk.bf16.mxu1 %vm13854_vm6, %v10085_v35  ;;  %v5234_v5 = vld [vmem:[%s13621_s18 + $0x18] sm:$0xff]  ;;  %v13488_v35 = vld [vmem:[#allocation2 + $0x110] sm:$0xff] }
 0x132   : > { %11988 = vmatprep.subr.bf16.mxu1 %v13323_v59  ;;  %v5264_v58 = vpack.c.bf16 %v5234_v5, %v5233_v45  ;;  %v4643_v37 = vpack.c.bf16 %v13488_v35, %v4633_v55  ;;  %v4828_v45 = vld [vmem:[#allocation2 + $0xd9] sm:$0xff]  ;;  %v4829_v5 = vld [vmem:[#allocation2 + $0xe1] sm:$0xff] }
 0x133   : > { %12057 = vmatpush3.bf16.msra.mxu0 %v13341_v46  ;;  %v10094_v46 = vpack.c.bf16 %v4419_v48, %v4418_v10  ;;  %v4830_v10 = vld [vmem:[#allocation2 + $0xe9] sm:$0xff]  ;;  %v4831_v48 = vld [vmem:[#allocation2 + $0xf1] sm:$0xff] }
 0x134   : > { %12058 = vmatprep.subr.bf16.mxu0 %v13342_v51  ;;  %v5238_v35 = vld [vmem:[%s13621_s18 + $0x38] sm:$0xff] }
 0x135   : > { %11989 = vmatpush3.bf16.msra.mxu1 %v13323_v59  ;;  %11755 = vmatmul.mubr.msk.bf16.gmra.mrb[12].mxu0 %vm14239_vm7, %v9821_v62  ;;  %v13328_v59 = vld [vmem:[%s16363_s2 + $0x200] sm:$0xff]  }
 0x136   : > { %11990 = vmatprep.subr.bf16.mxu1 %v13324_v20  ;;  %12062 = vmatprep.mubr.bf16.mxu0 %v5263_v40  ;;  %v4825_v62 = vld [vmem:[#allocation2 + $0xc1] sm:$0xff]  ;;  %v4827_v40 = vld [vmem:[#allocation2 + $0xd1] sm:$0xff] }
 0x137   : > { %12059 = vmatpush3.bf16.msra.mxu0 %v13342_v51  ;;  %v4823_v51 = vld [vmem:[#allocation2 + $0xb1] sm:$0xff] }
 0x138   : > { %11975 = vmatmul.mubr.msk.bf16.gmra.mrb[24].mxu1 %vm13924_vm0, %v10088_v29  ;;  %12060 = vmatprep.subr.bf16.mxu0 %v13343_v14 }
 0x139   : > { %11991 = vmatpush3.bf16.msra.mxu1 %v13324_v20  ;;  %11978 = vmatprep.mubr.msk.bf16.mxu1 %vm13966_vm9, %v14611_v24  ;;  %v13329_v24 = vld [vmem:[%s16363_s2 + $0x208] sm:$0xff]   ;;  %v10145_v20 = vpack.c.bf16 %v4823_v51, %v4822_v11  ;;  %v13346_v51 = vld [vmem:[%s16365_s4 + $0x50] sm:$0xff]  }
 0x13a   : > { %11992 = vmatprep.subr.bf16.mxu1 %v13325_v15  ;;  %v4837_v11 = vld [vmem:[#allocation2 + $0x121] sm:$0xff] }
 0x13b   : > { %12061 = vmatpush3.bf16.msra.mxu0 %v13343_v14  ;;  %v4826_v14 = vld [vmem:[#allocation2 + $0xc9] sm:$0xff] }
 0x13d   : > { %11993 = vmatpush3.bf16.msra.mxu1 %v13325_v15  ;;  %v10151_v15 = vpack.c.bf16 %v4827_v40, %v4826_v14  ;;  %v5242_v14 = vld [vmem:[%s13621_s18 + $0x58] sm:$0xff] }
 0x13e   : > { %11994 = vmatprep.subr.bf16.mxu1 %v13326_v4  ;;  %12063 = vmatmul.mubr.bf16.vlgmr.msra.gmra.mrb[16].mxu0 %v5264_v58  ;;  %v10157_v58 = vpack.c.bf16 %v4831_v48, %v4830_v10  ;;  %v5245_v48 = vld [vmem:[%s13621_s18 + $0x70] sm:$0xff] }
 0x140   : > { %11979 = vmatmul.mubr.msk.bf16.gmra.mrb[28].mxu1 %vm16465_vm13, %v10094_v46  ;;  %v4832_v46 = vld [vmem:[#allocation2 + $0xf9] sm:$0xff] }
 0x141   : > { %11995 = vmatpush3.bf16.msra.mxu1 %v13326_v4  ;;  %11998 = vmatprep.mubr.bf16.mxu1 %v14637_v25  ;;  %v13331_v25 = vld [vmem:[%s16363_s2 + $0x218] sm:$0xff]   ;;  %v10154_v4 = vpack.c.bf16 %v4829_v5, %v4828_v45  ;;  %v5243_v45 = vld [vmem:[%s13621_s18 + $0x60] sm:$0xff]  ;;  %v5244_v5 = vld [vmem:[%s13621_s18 + $0x68] sm:$0xff] }
 0x142   : > { %11996 = vmatprep.subr.bf16.mxu1 %v13327_v0  ;;  %v5269_v10 = vpack.c.bf16 %v5244_v5, %v5243_v45  ;;  %v13358_v5 = vld [vmem:[%s16365_s4 + $0x50] sm:$0xff]  }
 0x145   : > { %11997 = vmatpush3.bf16.msra.mxu1 %v13327_v0  ;;  %v4833_v0 = vld [vmem:[#allocation2 + $0x101] sm:$0xff] }
 0x146   : > { %12014 = vmatprep.subr.bf16.mxu1 %v13328_v59 }
 0x148   : > { %11999 = vmatmul.mubr.bf16.vlgmr.msra.gmra.mrb[16].mxu1 %v14642_v3  ;;  %v13332_v3 = vld [vmem:[%s16363_s2 + $0x220] sm:$0xff]  }
 0x149   : > { %12015 = vmatpush3.bf16.msra.mxu1 %v13328_v59  ;;  %12002 = vmatprep.mubr.bf16.mxu1 %v14660_v50  ;;  %v13333_v50 = vld [vmem:[%s16363_s2 + $0x228] sm:$0xff]   ;;  %v13344_v59 = vld [vmem:[%s16365_s4 + $0x40] sm:$0xff]  }
 0x14a   : > { %12016 = vmatprep.subr.bf16.mxu1 %v13329_v24 }
 0x14d   : > { %12017 = vmatpush3.bf16.msra.mxu1 %v13329_v24  ;;  %v10160_v24 = vpack.c.bf16 %v4833_v0, %v4832_v46  ;;  %v13351_v46 = vld [vmem:[%s16365_s4 + $0x78] sm:$0xff]   ;;  %v5247_v0 = vld [vmem:[%s13621_s18 + $0x80] sm:$0xff] }
 0x14e   : > { %12018 = vmatprep.subr.bf16.mxu1 %v13330_v49 }
 0x150   : > { %12003 = vmatmul.mubr.bf16.gmra.mrb[20].mxu1 %v14662_v17  ;;  %v13334_v17 = vld [vmem:[%s16363_s2 + $0x230] sm:$0xff]  }
 0x151   : > { %12019 = vmatpush3.bf16.msra.mxu1 %v13330_v49  ;;  %12006 = vmatprep.mubr.bf16.mxu1 %v14682_v23  ;;  %v13489_v23 = vld [vmem:[#allocation2 + $0x8] sm:$0xff] }
 0x152   : > { %12020 = vmatprep.subr.bf16.mxu1 %v13331_v25  ;;  %v4644_v30 = vpack.c.bf16 %v13489_v23, %v13489_v23  ;;  %v13345_v49 = vld [vmem:[%s16365_s4 + $0x48] sm:$0xff]  }
 0x155   : > { %12021 = vmatpush3.bf16.msra.mxu1 %v13331_v25  ;;  %v5235_v25 = vld [vmem:[%s13621_s18 + $0x20] sm:$0xff] }
 0x156   : > { %12022 = vmatprep.subr.bf16.mxu1 %v13332_v3 }
 0x158   : > { %12007 = vmatmul.mubr.bf16.gmra.mrb[24].mxu1 %v14687_v27  ;;  %v4824_v27 = vld [vmem:[#allocation2 + $0xb9] sm:$0xff] }
 0x159   : > { %12023 = vmatpush3.bf16.msra.mxu1 %v13332_v3  ;;  %12010 = vmatprep.mubr.bf16.mxu1 %v4643_v37  ;;  %v10148_v29 = vpack.c.bf16 %v4825_v62, %v4824_v27  ;;  %v5236_v3 = vld [vmem:[%s13621_s18 + $0x28] sm:$0xff]  ;;  %v5241_v62 = vld [vmem:[%s13621_s18 + $0x50] sm:$0xff] }
 0x15a   : > { %12024 = vmatprep.subr.bf16.mxu1 %v13333_v50  ;;  %v5265_v55 = vpack.c.bf16 %v5236_v3, %v5235_v25  ;;  %v5240_v27 = vld [vmem:[%s13621_s18 + $0x48] sm:$0xff]  ;;  %v5268_v40 = vpack.c.bf16 %v5242_v14, %v5241_v62  ;;  %v5250_v25 = vld [vmem:[%s13621_s18 + $0x98] sm:$0xff]  ;;  %v13352_v14 = vld [vmem:[%s16365_s4 + $0x40] sm:$0xff]  }
 0x15b   : > { %12382 = vmatprep.subr.bf16.mxu0 %v13352_v14 }
 0x15c   : > { %12066 = vmatprep.mubr.bf16.mxu0 %v5265_v55  ;;  %v14995_v55 = vld [vmem:[%s16365_s4] sm:$0xff]   ;;  %12383 = vmatpush3.bf16.msra.mxu0 %v13352_v14  ;;  %v3084_v14 = vsub.s32 7, %v13587_v9 }
 0x15d   : > { %12025 = vmatpush3.bf16.msra.mxu1 %v13333_v50  ;;  %v5237_v50 = vld [vmem:[%s13621_s18 + $0x30] sm:$0xff] }
 0x15e   : > { %12026 = vmatprep.subr.bf16.mxu1 %v13334_v17  ;;  %v5266_v37 = vpack.c.bf16 %v5238_v35, %v5237_v50  ;;  %v5251_v50 = vld [vmem:[%s13621_s18 + $0xa0] sm:$0xff]  ;;  %v5252_v35 = vld [vmem:[%s13621_s18 + $0xa8] sm:$0xff] }
 0x160   : > { %12011 = vmatmul.mubr.bf16.gmra.mrb[28].mxu1 %v4644_v30  ;;  %12067 = vmatmul.mubr.bf16.gmra.mrb[20].mxu0 %v5266_v37  ;;  %v5273_v37 = vpack.c.bf16 %v5252_v35, %v5251_v50 }
 0x161   : > { %12027 = vmatpush3.bf16.msra.mxu1 %v13334_v17  ;;  %12030 = vmatprep.mubr.msk.bf16.mxu1 %vm16461_vm11, %v10145_v20  ;;  %v4836_v17 = vld [vmem:[#allocation2 + $0x119] sm:$0xff] }
 0x162   : > { %12028 = vmatprep.subr.bf16.mxu1 %v13335_v39  ;;  %v10166_v23 = vpack.c.bf16 %v4837_v11, %v4836_v17  ;;  %v5239_v20 = vld [vmem:[%s13621_s18 + $0x40] sm:$0xff]  ;;  %v5253_v17 = vld [vmem:[%s13621_s18 + $0xb0] sm:$0xff]  ;;  %v5254_v11 = vld [vmem:[%s13621_s18 + $0xb8] sm:$0xff] }
 0x165   : > { %12029 = vmatpush3.bf16.msra.mxu1 %v13335_v39  ;;  %v13347_v39 = vld [vmem:[%s16365_s4 + $0x58] sm:$0xff]  }
 0x166   : > { %12094 = vmatprep.subr.bf16.mxu1 %v13344_v59 }
 0x168   : > { %12031 = vmatmul.mubr.msk.bf16.vlgmr.msra.gmra.mrb[16].mxu1 %vm16462_vm8, %v10148_v29  ;;  %v13348_v29 = vld [vmem:[%s16365_s4 + $0x60] sm:$0xff]  }
 0x169   : > { %12034 = vmatprep.mubr.msk.bf16.mxu1 %vm16463_vm1, %v10151_v15  ;;  %12095 = vmatpush3.bf16.msra.mxu1 %v13344_v59  ;;  %v13349_v15 = vld [vmem:[%s16365_s4 + $0x68] sm:$0xff]  }
 0x16a   : > { %12096 = vmatprep.subr.bf16.mxu1 %v13345_v49  ;;  %v5248_v59 = vld [vmem:[%s13621_s18 + $0x88] sm:$0xff] }
 0x16d   : > { %12097 = vmatpush3.bf16.msra.mxu1 %v13345_v49  ;;  %v5249_v49 = vld [vmem:[%s13621_s18 + $0x90] sm:$0xff] }
 0x16e   : > { %12098 = vmatprep.subr.bf16.mxu1 %v13346_v51  ;;  %v5272_v3 = vpack.c.bf16 %v5250_v25, %v5249_v49  ;;  %v2976_v49 = vsub.s32 4, %v13587_v9  ;;  %v2996_v25 = vsub.s32 5, %v13587_v9 }
 0x170   : > { %12035 = vmatmul.mubr.msk.bf16.gmra.mrb[20].mxu1 %vm14132_vm14, %v10154_v4  ;;  %v5246_v4 = vld [vmem:[%s13621_s18 + $0x78] sm:$0xff] }
 0x171   : > { %12038 = vmatprep.mubr.msk.bf16.mxu1 %vm14154_vm3, %v10157_v58  ;;  %12099 = vmatpush3.bf16.msra.mxu1 %v13346_v51  ;;  %v5270_v58 = vpack.c.bf16 %v5246_v4, %v5245_v48  ;;  %v5274_v51 = vpack.c.bf16 %v5254_v11, %v5253_v17  ;;  %v5262_v48 = vld [vmem:[%s13621_s18 + $0xf8] sm:$0xff] }
 0x172   : > { %12100 = vmatprep.subr.bf16.mxu1 %v13347_v39 }
 0x175   : > { %12101 = vmatpush3.bf16.msra.mxu1 %v13347_v39  ;;  %v5256_v39 = vld [vmem:[%s13621_s18 + $0xc8] sm:$0xff] }
 0x176   : > { %12102 = vmatprep.subr.bf16.mxu1 %v13348_v29 }
 0x178   : > { %12039 = vmatmul.mubr.msk.bf16.gmra.mrb[24].mxu1 %vm16464_vm5, %v10160_v24  ;;  %v5271_v24 = vpack.c.bf16 %v5248_v59, %v5247_v0  ;;  %v13370_v0 = vld [vmem:[%s16365_s4 + $0x70] sm:$0xff]   ;;  %v13373_v59 = vld [vmem:[%s16365_s4 + $0x78] sm:$0xff]  }
 0x179   : > { %12042 = vmatprep.mubr.msk.bf16.mxu1 %vm14209_vm12, %v14809_v2  ;;  %v5267_v2 = vpack.c.bf16 %v5240_v27, %v5239_v20  ;;  %12103 = vmatpush3.bf16.msra.mxu1 %v13348_v29  ;;  %v5257_v27 = vld [vmem:[%s13621_s18 + $0xd0] sm:$0xff]  ;;  %v5259_v29 = vld [vmem:[%s13621_s18 + $0xe0] sm:$0xff] }
 0x17a   : > { %12104 = vmatprep.subr.bf16.mxu1 %v13349_v15 }
 0x17b   : > { %12070 = vmatprep.mubr.bf16.mxu0 %v5267_v2  ;;  %v5258_v2 = vld [vmem:[%s13621_s18 + $0xd8] sm:$0xff] }
 0x17c   : > { %12071 = vmatmul.mubr.bf16.gmra.mrb[24].mxu0 %v5268_v40  ;;  %v5276_v62 = vpack.c.bf16 %v5258_v2, %v5257_v27  ;;  %v13355_v40 = vld [vmem:[%s16365_s4 + $0x48] sm:$0xff]  }
 0x17d   : > { %12074 = vmatprep.mubr.bf16.mxu0 %v5269_v10  ;;  %12105 = vmatpush3.bf16.msra.mxu1 %v13349_v15  ;;  %v5260_v15 = vld [vmem:[%s13621_s18 + $0xe8] sm:$0xff]  ;;  %v5261_v10 = vld [vmem:[%s13621_s18 + $0xf0] sm:$0xff] }
 0x17e   : > { %v5277_v45 = vpack.c.bf16 %v5260_v15, %v5259_v29  ;;  %12384 = vmatprep.subr.bf16.mxu0 %v13355_v40  ;;  %v5278_v4 = vpack.c.bf16 %v5262_v48, %v5261_v10 }
 0x17f   : > { %12385 = vmatpush3.bf16.msra.mxu0 %v13355_v40 }
 0x180   : > { %12043 = vmatmul.mubr.msk.bf16.gmra.mrb[28].mxu1 %vm14239_vm7, %v10166_v23  ;;  %v5255_v23 = vld [vmem:[%s13621_s18 + $0xc0] sm:$0xff]  ;;  %12386 = vmatprep.subr.bf16.mxu0 %v13358_v5 }
 0x181   : > { %12110 = vmatprep.mubr.bf16.mxu1 %v4644_v30  ;;  %v13350_v30 = vld [vmem:[%s16365_s4 + $0x70] sm:$0xff]   ;;  %v5275_v20 = vpack.c.bf16 %v5256_v39, %v5255_v23 }
 0x182   : > { %12106 = vmatprep.subr.bf16.mxu1 %v13350_v30 }
 0x183   : > { %12107 = vmatpush3.bf16.msra.mxu1 %v13350_v30  ;;  %12387 = vmatpush3.bf16.msra.mxu0 %v13358_v5  ;;  %v13364_v30 = vld [vmem:[%s16365_s4 + $0x60] sm:$0xff]  }
 0x184   : > { %12075 = vmatmul.mubr.bf16.gmra.mrb[28].mxu0 %v5270_v58  ;;  %12108 = vmatprep.subr.bf16.mxu1 %v13351_v46  ;;  %v13361_v58 = vld [vmem:[%s16365_s4 + $0x58] sm:$0xff]  }
 0x185   : > { %12078 = vmatprep.mubr.bf16.mxu0 %v5271_v24  ;;  %12388 = vmatprep.subr.bf16.mxu0 %v13361_v58  ;;  %v13376_v24 = vld [vmem:[%s16365_s4] sm:$0xff]  }
 0x187   : > { %12109 = vmatpush3.bf16.msra.mxu1 %v13351_v46  ;;  %12389 = vmatpush3.bf16.msra.mxu0 %v13361_v58  ;;  %v13367_v46 = vld [vmem:[%s16365_s4 + $0x68] sm:$0xff]  }
 0x188   : > { %12126 = vmatprep.subr.bf16.mxu1 %v14995_v55  ;;  %12390 = vmatprep.subr.bf16.mxu0 %v13364_v30 }
 0x18b   : > { %12391 = vmatpush3.bf16.msra.mxu0 %v13364_v30 }
 0x18c   : > { %12079 = vmatmul.mubr.bf16.gmra.mrb[32].mxu0 %v5272_v3  ;;  %12392 = vmatprep.subr.bf16.mxu0 %v13367_v46  ;;  %v15042_v3 = vld [vmem:[%s16364_s3] ss:$0 sm:$0xff] }
 0x18d   : > { %12082 = vmatprep.mubr.bf16.mxu0 %v5273_v37  ;;  %v13490_v37 = vld [vmem:[%s13626_s21] sm:$0xff] }
 0x18e   : > { %v15046_v17 = vrot.slane %v13490_v37, %v2976_v49  ;;  %v15065_v48 = vrot.slane %v13490_v37, %v3084_v14 }
 0x18f   : > { %12393 = vmatpush3.bf16.msra.mxu0 %v13367_v46 }
 0x190   : > { %12394 = vmatprep.subr.bf16.mxu0 %v13370_v0 }
 0x193   : > { %12395 = vmatpush3.bf16.msra.mxu0 %v13370_v0 }
 0x194   : > { %12083 = vmatmul.mubr.bf16.gmra.mrb[36].mxu0 %v5274_v51  ;;  %12396 = vmatprep.subr.bf16.mxu0 %v13373_v59 }
 0x195   : > { %12086 = vmatprep.mubr.bf16.mxu0 %v5275_v20  ;;  %v15050_v20 = vrot.slane %v13490_v37, %v2996_v25 }
 0x197   : > { %12397 = vmatpush3.bf16.msra.mxu0 %v13373_v59 }
 0x198   : > { %12414 = vmatprep.subr.bf16.mxu0 %v13376_v24 }
 0x19c   : > { %12087 = vmatmul.mubr.bf16.gmra.mrb[40].mxu0 %v5276_v62  ;;  %v3064_v62 = vsub.s32 6, %v13587_v9 }
 0x19d   : > { %12090 = vmatprep.mubr.bf16.mxu0 %v5277_v45 }
 0x19e   : > { %v15063_v10 = vrot.slane %v13490_v37, %v3064_v62 }
 0x1a4   : > { %12091 = vmatmul.mubr.bf16.gmra.mrb[44].mxu0 %v5278_v4 }
 0x1f0   : > { %v11744_v50 = vpop.f32.mrb[0].mxu0 }
 0x1f1   : > { %v12670_v35 = vadd.f32 %v11744_v50, %v14711_v47  ;;  %v2873_v11 = vpop.f32.mrb[1].mxu0 }
 0x1f2   : > { %v12671_v51 = vadd.f32 %v2873_v11, %v14716_v56  ;;  %v11745_v23 = vpop.f32.mrb[2].mxu0 }
 0x1f3   : > { %v2960_v39 = vadd.f32 %v12670_v35, %v15042_v3  ;;  %v12672_v27 = vadd.f32 %v11745_v23, %v14721_v19  ;;  %v2876_v2 = vpop.f32.mrb[3].mxu0 }
 0x1f4   : > { %v2958_v47 = vadd.f32 %v12671_v51, %v15042_v3  ;;  %v12673_v40 = vadd.f32 %v2876_v2, %v14726_v31 }
 0x1f5   : > { %v2980_v29 = vmul.f32 %v15046_v17, %v2960_v39  ;;  %v2961_v56 = vadd.f32 %v12672_v27, %v15042_v3 }
 0x1f6   : > { %v2978_v15 = vmul.f32 %v15046_v17, %v2958_v47  ;;  %v2959_v45 = vadd.f32 %v12673_v40, %v15042_v3 }
 0x1f7   : > { %v3000_v5 = vadd.f32 %v15050_v20, %v2980_v29  ;;  %v2981_v19 = vmul.f32 %v15046_v17, %v2961_v56 }
 0x1f8   : > { %v2998_v9 = vadd.f32 %v15050_v20, %v2978_v15  ;;  %v2979_v31 = vmul.f32 %v15046_v17, %v2959_v45  ;;  %v11748_v4 = vpop.f32.mrb[4].mxu0 }
 0x1f9   : > { %vm3016_vm7 = vcmp.gt.f32.partialorder %v3000_v5, 0.0  ;;  %v3032_v58 = vmul.f32 0.2, %v3000_v5  ;;  %v3001_v30 = vadd.f32 %v15050_v20, %v2981_v19  ;;  %v12674_v46 = vadd.f32 %v11748_v4, %v14745_v42  ;;  %v2889_v0 = vpop.f32.mrb[5].mxu0 }
 0x1fa   : > { %vm3014_vm12 = vcmp.gt.f32.partialorder %v2998_v9, 0.0  ;;  %v3030_v59 = vmul.f32 0.2, %v2998_v9  ;;  %v2999_v24 = vadd.f32 %v15050_v20, %v2979_v31  ;;  %v12675_v49 = vadd.f32 %v2889_v0, %v14750_v1  ;;  %v11749_v25 = vpop.f32.mrb[6].mxu0 }
 0x1fb   : > { %v3048_v50 = vsel %vm3016_vm7, %v3000_v5, %v3032_v58  ;;  %vm3017_vm5 = vcmp.gt.f32.partialorder %v3001_v30, 0.0  ;;  %v3033_v35 = vmul.f32 0.2, %v3001_v30  ;;  %v2964_v37 = vadd.f32 %v12674_v46, %v15042_v3  ;;  %v2892_v11 = vpop.f32.mrb[7].mxu0 }
 0x1fc   : > { %v3068_v51 = vmul.f32 %v15063_v10, %v3048_v50  ;;  %v3046_v23 = vsel %vm3014_vm12, %v2998_v9, %v3030_v59  ;;  %vm3015_vm3 = vcmp.gt.f32.partialorder %v2999_v24, 0.0  ;;  %v3031_v39 = vmul.f32 0.2, %v2999_v24 }
 0x1fd   : > { %v3066_v42 = vmul.f32 %v15063_v10, %v3046_v23  ;;  %v3049_v27 = vsel %vm3017_vm5, %v3001_v30, %v3033_v35  ;;  %v2984_v2 = vmul.f32 %v15046_v17, %v2964_v37  ;;  %v2962_v62 = vadd.f32 %v12675_v49, %v15042_v3 }
 0x1fe   : > { %v3088_v1 = vadd.f32 %v15065_v48, %v3068_v51  ;;  %v3069_v14 = vmul.f32 %v15063_v10, %v3049_v27  ;;  %v3047_v47 = vsel %vm3015_vm3, %v2999_v24, %v3031_v39  ;;  %v12676_v40 = vadd.f32 %v11749_v25, %v14755_v26 }
 0x1ff   : > { %v3086_v29 = vadd.f32 %v15065_v48, %v3066_v42  ;;  %v3067_v56 = vmul.f32 %v15063_v10, %v3047_v47  ;;  %v3004_v15 = vadd.f32 %v15050_v20, %v2984_v2  ;;  %v2982_v45 = vmul.f32 %v15046_v17, %v2962_v62 }
 0x200   : > { %vm3104_vm12 = vcmp.gt.f32.partialorder %v3088_v1, 0.0  ;;  %v3120_v5 = vmul.f32 0.2, %v3088_v1  ;;  %v3089_v19 = vadd.f32 %v15065_v48, %v3069_v14  ;;  %v2965_v9 = vadd.f32 %v12676_v40, %v15042_v3  ;;  %v11752_v31 = vpop.f32.mrb[8].mxu0 }
 0x201   : > { %vm3102_vm7 = vcmp.gt.f32.partialorder %v3086_v29, 0.0  ;;  %v3118_v4 = vmul.f32 0.2, %v3086_v29  ;;  %v3087_v58 = vadd.f32 %v15065_v48, %v3067_v56  ;;  %vm3020_vm3 = vcmp.gt.f32.partialorder %v3004_v15, 0.0  ;;  %v2905_v26 = vpop.f32.mrb[9].mxu0 }
 0x202   : > { %v15088_v30 = vsel %vm3104_vm12, %v3088_v1, %v3120_v5  ;;  %vm3105_vm5 = vcmp.gt.f32.partialorder %v3089_v19, 0.0  ;;  %v3121_v46 = vmul.f32 0.2, %v3089_v19  ;;  %v3036_v0 = vmul.f32 0.2, %v3004_v15  ;;  %v11753_v59 = vpop.f32.mrb[10].mxu0 }
 0x203   : > { %3152 = vst [vmem:[#allocation3 + $0x28] sm:$0xff] %v15088_v30  ;;  %v15091_v24 = vsel %vm3102_vm7, %v3086_v29, %v3118_v4  ;;  %vm3103_vm14 = vcmp.gt.f32.partialorder %v3087_v58, 0.0  ;;  %v3119_v49 = vmul.f32 0.2, %v3087_v58  ;;  %v3002_v25 = vadd.f32 %v15050_v20, %v2982_v45  ;;  %v2908_v50 = vpop.f32.mrb[11].mxu0 }
 0x204   : > { %3150 = vst [vmem:[#allocation3 + $0x18] sm:$0xff] %v15091_v24  ;;  %v15095_v35 = vsel %vm3105_vm5, %v3089_v19, %v3121_v46  ;;  %v3052_v37 = vsel %vm3020_vm3, %v3004_v15, %v3036_v0  ;;  %v2985_v51 = vmul.f32 %v15046_v17, %v2965_v9  ;;  %v12677_v23 = vadd.f32 %v2892_v11, %v14760_v61 }
 0x205   : > { %3153 = vst [vmem:[#allocation3 + $0x30] sm:$0xff] %v15095_v35  ;;  %v15100_v39 = vsel %vm3103_vm14, %v3087_v58, %v3119_v49  ;;  %v3072_v42 = vmul.f32 %v15063_v10, %v3052_v37  ;;  %vm3018_vm12 = vcmp.gt.f32.partialorder %v3002_v25, 0.0  ;;  %v3034_v27 = vmul.f32 0.2, %v3002_v25 }
 0x206   : > { %3151 = vst [vmem:[#allocation3 + $0x20] sm:$0xff] %v15100_v39  ;;  %v3005_v2 = vadd.f32 %v15050_v20, %v2985_v51  ;;  %v2963_v62 = vadd.f32 %v12677_v23, %v15042_v3  ;;  %v12678_v1 = vadd.f32 %v11752_v31, %v14783_v57  ;;  %v12679_v14 = vadd.f32 %v2905_v26, %v14788_v32 }
 0x207   : > { %v3092_v61 = vadd.f32 %v15065_v48, %v3072_v42  ;;  %v3050_v11 = vsel %vm3018_vm12, %v3002_v25, %v3034_v27  ;;  %v12680_v47 = vadd.f32 %v11753_v59, %v14799_v36  ;;  %v12681_v40 = vadd.f32 %v2908_v50, %v14804_v53 }
 0x208   : > { %v3070_v29 = vmul.f32 %v15063_v10, %v3050_v11  ;;  %vm3021_vm14 = vcmp.gt.f32.partialorder %v3005_v2, 0.0  ;;  %v3037_v56 = vmul.f32 0.2, %v3005_v2  ;;  %v2983_v15 = vmul.f32 %v15046_v17, %v2963_v62  ;;  %v11756_v45 = vpop.f32.mrb[12].mxu0 }
 0x209   : > { %vm3108_vm7 = vcmp.gt.f32.partialorder %v3092_v61, 0.0  ;;  %v3124_v5 = vmul.f32 0.2, %v3092_v61  ;;  %v2968_v57 = vadd.f32 %v12678_v1, %v15042_v3  ;;  %v2966_v32 = vadd.f32 %v12679_v14, %v15042_v3  ;;  %v2921_v19 = vpop.f32.mrb[13].mxu0 }
 0x20a   : > { %v3090_v9 = vadd.f32 %v15065_v48, %v3070_v29  ;;  %v3053_v31 = vsel %vm3021_vm14, %v3005_v2, %v3037_v56  ;;  %v3003_v36 = vadd.f32 %v15050_v20, %v2983_v15  ;;  %v2969_v53 = vadd.f32 %v12680_v47, %v15042_v3  ;;  %v15118_v4 = vpop.f32.mrb[14].mxu0 }
 0x20b   : > { %v15120_v58 = vsel %vm3108_vm7, %v3092_v61, %v3124_v5  ;;  %v3073_v26 = vmul.f32 %v15063_v10, %v3053_v31  ;;  %v2988_v46 = vmul.f32 %v15046_v17, %v2968_v57  ;;  %v2986_v0 = vmul.f32 %v15046_v17, %v2966_v32  ;;  %v15125_v59 = vpop.f32.mrb[15].mxu0 }
 0x20c   : > { %3156 = vst [vmem:[#allocation3 + $0x48] sm:$0xff] %v15120_v58  ;;  %vm3106_vm3 = vcmp.gt.f32.partialorder %v3090_v9, 0.0  ;;  %v3122_v49 = vmul.f32 0.2, %v3090_v9  ;;  %vm3019_vm5 = vcmp.gt.f32.partialorder %v3003_v36, 0.0  ;;  %v2989_v23 = vmul.f32 %v15046_v17, %v2969_v53 }
 0x20d   : > { %v3035_v25 = vmul.f32 0.2, %v3003_v36  ;;  %v3093_v50 = vadd.f32 %v15065_v48, %v3073_v26  ;;  %v3008_v37 = vadd.f32 %v15050_v20, %v2988_v46  ;;  %v3006_v51 = vadd.f32 %v15050_v20, %v2986_v0 }
 0x20e   : > { %v15132_v42 = vsel %vm3106_vm3, %v3090_v9, %v3122_v49  ;;  %v2967_v2 = vadd.f32 %v12681_v40, %v15042_v3  ;;  %v12682_v62 = vadd.f32 %v11756_v45, %v14820_v28  ;;  %v3009_v47 = vadd.f32 %v15050_v20, %v2989_v23 }
 0x20f   : > { %v3051_v27 = vsel %vm3019_vm5, %v3003_v36, %v3035_v25  ;;  %3154 = vst [vmem:[#allocation3 + $0x38] sm:$0xff] %v15132_v42  ;;  %vm3109_vm12 = vcmp.gt.f32.partialorder %v3093_v50, 0.0  ;;  %v3125_v1 = vmul.f32 0.2, %v3093_v50  ;;  %vm3024_vm14 = vcmp.gt.f32.partialorder %v3008_v37, 0.0 }
 0x210   : > { %v3071_v14 = vmul.f32 %v15063_v10, %v3051_v27  ;;  %v3040_v61 = vmul.f32 0.2, %v3008_v37  ;;  %vm3022_vm7 = vcmp.gt.f32.partialorder %v3006_v51, 0.0  ;;  %v3038_v11 = vmul.f32 0.2, %v3006_v51 }
 0x211   : > { %v15139_v29 = vsel %vm3109_vm12, %v3093_v50, %v3125_v1  ;;  %v2987_v40 = vmul.f32 %v15046_v17, %v2967_v2  ;;  %v2972_v28 = vadd.f32 %v12682_v62, %v15042_v3  ;;  %vm3025_vm3 = vcmp.gt.f32.partialorder %v3009_v47, 0.0 }
 0x212   : > { %v3091_v56 = vadd.f32 %v15065_v48, %v3071_v14  ;;  %3157 = vst [vmem:[#allocation3 + $0x50] sm:$0xff] %v15139_v29  ;;  %v3056_v15 = vsel %vm3024_vm14, %v3008_v37, %v3040_v61  ;;  %v3054_v45 = vsel %vm3022_vm7, %v3006_v51, %v3038_v11  ;;  %v3041_v5 = vmul.f32 0.2, %v3009_v47 }
 0x213   : > { %v3076_v32 = vmul.f32 %v15063_v10, %v3056_v15  ;;  %v3074_v9 = vmul.f32 %v15063_v10, %v3054_v45  ;;  %v3007_v36 = vadd.f32 %v15050_v20, %v2987_v40  ;;  %v2992_v53 = vmul.f32 %v15046_v17, %v2972_v28 }
 0x214   : > { %vm3107_vm5 = vcmp.gt.f32.partialorder %v3091_v56, 0.0  ;;  %v3123_v57 = vmul.f32 0.2, %v3091_v56  ;;  %v3057_v31 = vsel %vm3025_vm3, %v3009_v47, %v3041_v5  ;;  %v12683_v26 = vadd.f32 %v2921_v19, %v14828_v12 }
 0x215   : > { %v3096_v0 = vadd.f32 %v15065_v48, %v3076_v32  ;;  %v3094_v49 = vadd.f32 %v15065_v48, %v3074_v9  ;;  %v3077_v25 = vmul.f32 %v15063_v10, %v3057_v31  ;;  %vm3023_vm12 = vcmp.gt.f32.partialorder %v3007_v36, 0.0 }
 0x216   : > { %v15150_v46 = vsel %vm3107_vm5, %v3091_v56, %v3123_v57  ;;  %v3039_v50 = vmul.f32 0.2, %v3007_v36  ;;  %v3012_v37 = vadd.f32 %v15050_v20, %v2992_v53  ;;  %v2970_v51 = vadd.f32 %v12683_v26, %v15042_v3 }
 0x217   : > { %3155 = vst [vmem:[#allocation3 + $0x40] sm:$0xff] %v15150_v46  ;;  %vm3112_vm14 = vcmp.gt.f32.partialorder %v3096_v0, 0.0  ;;  %v3128_v23 = vmul.f32 0.2, %v3096_v0  ;;  %vm3110_vm7 = vcmp.gt.f32.partialorder %v3094_v49, 0.0  ;;  %v3097_v19 = vadd.f32 %v15065_v48, %v3077_v25 }
 0x218   : > { %v3126_v12 = vmul.f32 0.2, %v3094_v49  ;;  %v3055_v27 = vsel %vm3023_vm12, %v3007_v36, %v3039_v50  ;;  %vm3028_vm3 = vcmp.gt.f32.partialorder %v3012_v37, 0.0  ;;  %v3044_v2 = vmul.f32 0.2, %v3012_v37 }
 0x219   : > { %v15159_v62 = vsel %vm3112_vm14, %v3096_v0, %v3128_v23  ;;  %v3075_v14 = vmul.f32 %v15063_v10, %v3055_v27  ;;  %v2990_v61 = vmul.f32 %v15046_v17, %v2970_v51  ;;  %vm3113_vm5 = vcmp.gt.f32.partialorder %v3097_v19, 0.0  ;;  %v13357_v23 = vld [vmem:[%s16365_s4 + $0x18] sm:$0xff]  }
 0x21a   : > { %v15161_v1 = vsel %vm3110_vm7, %v3094_v49, %v3126_v12  ;;  %3160 = vst [vmem:[#allocation3 + $0x68] sm:$0xff] %v15159_v62  ;;  %v3129_v11 = vmul.f32 0.2, %v3097_v19  ;;  %v3060_v47 = vsel %vm3028_vm3, %v3012_v37, %v3044_v2  ;;  %v12684_v56 = vadd.f32 %v15118_v4, %v14835_v44  ;;  %v13354_v44 = vld [vmem:[%s16365_s4 + $0x8] sm:$0xff]  }
 0x21b   : > { %3158 = vst [vmem:[#allocation3 + $0x58] sm:$0xff] %v15161_v1  ;;  %v3095_v40 = vadd.f32 %v15065_v48, %v3075_v14  ;;  %v3080_v28 = vmul.f32 %v15063_v10, %v3060_v47  ;;  %v3010_v15 = vadd.f32 %v15050_v20, %v2990_v61  ;;  %v12685_v45 = vadd.f32 %v15125_v59, %v14837_v52  ;;  %v13359_v14 = vld [vmem:[%s16365_s4 + $0x20] sm:$0xff]  }
 0x21c   : > { %v15174_v5 = vsel %vm3113_vm5, %v3097_v19, %v3129_v11  ;;  %v2973_v57 = vadd.f32 %v12684_v56, %v15042_v3  ;;  %v5586_v32 = vpack.c.bf16 %v15100_v39, %v15091_v24  ;;  %v5587_v9 = vpack.c.bf16 %v15095_v35, %v15088_v30 }
 0x21d   : > { %3161 = vst [vmem:[#allocation3 + $0x70] sm:$0xff] %v15174_v5  ;;  %vm3111_vm12 = vcmp.gt.f32.partialorder %v3095_v40, 0.0  ;;  %v3127_v4 = vmul.f32 0.2, %v3095_v40  ;;  %v3100_v52 = vadd.f32 %v15065_v48, %v3080_v28  ;;  %vm3026_vm14 = vcmp.gt.f32.partialorder %v3010_v15, 0.0 }
 0x21e   : > { %v3042_v59 = vmul.f32 0.2, %v3010_v15  ;;  %v2993_v31 = vmul.f32 %v15046_v17, %v2973_v57  ;;  %v2971_v36 = vadd.f32 %v12685_v45, %v15042_v3  ;;  %12111 = vmatmul.mubr.bf16.vlgmr.msra.gmra.mrb[32].mxu1 %v5586_v32  ;;  %v5588_v30 = vpack.c.bf16 %v15150_v46, %v15132_v42  ;;  %v13356_v42 = vld [vmem:[%s16365_s4 + $0x10] sm:$0xff]   ;;  %v5514_v32 = vld [vmem:[#allocation3 + $0xf] sm:$0xff] }
 0x21f   : > { %v3143_v24 = vsel %vm3111_vm12, %v3095_v40, %v3127_v4  ;;  %vm3116_vm7 = vcmp.gt.f32.partialorder %v3100_v52, 0.0  ;;  %v3132_v35 = vmul.f32 0.2, %v3100_v52  ;;  %12114 = vmatprep.mubr.bf16.mxu1 %v5587_v9  ;;  %12127 = vmatpush3.bf16.msra.mxu1 %v14995_v55  ;;  %v5589_v39 = vpack.c.bf16 %v15139_v29, %v15120_v58  ;;  %v13360_v40 = vld [vmem:[%s16365_s4 + $0x28] sm:$0xff]   ;;  %v5513_v57 = vld [vmem:[#allocation3 + $0x7] sm:$0xff]  ;;  %v13365_v4 = vld [vmem:[%s16365_s4 + $0x80] sm:$0xff]  }
 0x220   : > { %3159 = vst [vmem:[#allocation3 + $0x60] sm:$0xff] %v3143_v24  ;;  %v3058_v53 = vsel %vm3026_vm14, %v3010_v15, %v3042_v59  ;;  %v3013_v26 = vadd.f32 %v15050_v20, %v2993_v31  ;;  %v2991_v0 = vmul.f32 %v15046_v17, %v2971_v36  ;;  %12128 = vmatprep.subr.bf16.mxu1 %v13354_v44  ;;  %v5516_v59 = vld [vmem:[#allocation3 + $0x1f] sm:$0xff]  ;;  %v15228_v31 = vld [vmem:[#allocation3 + $0x9] sm:$0xff] }
 0x221   : > { %v5590_v46 = vpack.c.bf16 %v3143_v24, %v15161_v1  ;;  %v3148_v49 = vsel %vm3116_vm7, %v3100_v52, %v3132_v35  ;;  %v3078_v25 = vmul.f32 %v15063_v10, %v3058_v53  ;;  %v5591_v55 = vpack.c.bf16 %v15174_v5, %v15159_v62  ;;  %v13362_v5 = vld [vmem:[%s16365_s4 + $0x30] sm:$0xff]   ;;  %v5515_v52 = vld [vmem:[#allocation3 + $0x17] sm:$0xff] }
 0x222   : > { %3164 = vst [vmem:[#allocation3 + $0x88] sm:$0xff] %v3148_v49  ;;  %vm3029_vm3 = vcmp.gt.f32.partialorder %v3013_v26, 0.0  ;;  %v3045_v58 = vmul.f32 0.2, %v3013_v26  ;;  %v3011_v29 = vadd.f32 %v15050_v20, %v2991_v0  ;;  %v10210_v9 = vpack.c.bf16 %v5514_v32, %v5513_v57  ;;  %v5517_v36 = vld [vmem:[#allocation3 + $0x27] sm:$0xff]  ;;  %v13366_v24 = vld [vmem:[%s16365_s4 + $0x88] sm:$0xff]  }
 0x223   : > { %v3098_v50 = vadd.f32 %v15065_v48, %v3078_v25  ;;  %12129 = vmatpush3.bf16.msra.mxu1 %v13354_v44  ;;  %v13363_v44 = vld [vmem:[%s16365_s4 + $0x38] sm:$0xff]   ;;  %v5520_v35 = vld [vmem:[#allocation3 + $0x3f] sm:$0xff]  ;;  %v15233_v0 = vld [vmem:[#allocation3 + $0x11] sm:$0xff] }
 0x224   : > { %v3061_v37 = vsel %vm3029_vm3, %v3013_v26, %v3045_v58  ;;  %vm3027_vm5 = vcmp.gt.f32.partialorder %v3011_v29, 0.0  ;;  %v3043_v51 = vmul.f32 0.2, %v3011_v29  ;;  %12130 = vmatprep.subr.bf16.mxu1 %v13356_v42  ;;  %v5521_v53 = vld [vmem:[#allocation3 + $0x47] sm:$0xff]  ;;  %v5522_v26 = vld [vmem:[#allocation3 + $0x4f] sm:$0xff]  ;;  %v5519_v25 = vld [vmem:[#allocation3 + $0x37] sm:$0xff] }
 0x225   : > { %vm3114_vm12 = vcmp.gt.f32.partialorder %v3098_v50, 0.0  ;;  %v3130_v12 = vmul.f32 0.2, %v3098_v50  ;;  %v3081_v19 = vmul.f32 %v15063_v10, %v3061_v37  ;;  %v5903_v58 = vld [vmem:[#allocation3 + $0x21] sm:$0xff] }
 0x226   : > { %v3059_v27 = vsel %vm3027_vm5, %v3011_v29, %v3043_v51  ;;  %12115 = vmatmul.mubr.bf16.gmra.mrb[36].mxu1 %v5588_v30  ;;  %v5518_v30 = vld [vmem:[#allocation3 + $0x2f] sm:$0xff]  ;;  %v15241_v51 = vpack.c.bf16 %v5520_v35, %v5519_v25 }
 0x227   : > { %v3146_v2 = vsel %vm3114_vm12, %v3098_v50, %v3130_v12  ;;  %v3101_v62 = vadd.f32 %v15065_v48, %v3081_v19  ;;  %v3079_v1 = vmul.f32 %v15063_v10, %v3059_v27  ;;  %12118 = vmatprep.mubr.bf16.mxu1 %v5589_v39  ;;  %12131 = vmatpush3.bf16.msra.mxu1 %v13356_v42  ;;  %v5906_v12 = vld [vmem:[#allocation3 + $0x39] sm:$0xff]  ;;  %v5907_v19 = vld [vmem:[#allocation3 + $0x41] sm:$0xff] }
 0x228   : > { %3162 = vst [vmem:[#allocation3 + $0x78] sm:$0xff] %v3146_v2  ;;  %12132 = vmatprep.subr.bf16.mxu1 %v13357_v23  ;;  %v15239_v50 = vpack.c.bf16 %v5518_v30, %v5517_v36  ;;  %v5908_v36 = vld [vmem:[#allocation3 + $0x49] sm:$0xff] }
 0x229   : > { %vm3117_vm14 = vcmp.gt.f32.partialorder %v3101_v62, 0.0  ;;  %v3133_v61 = vmul.f32 0.2, %v3101_v62  ;;  %v3099_v11 = vadd.f32 %v15065_v48, %v3079_v1  ;;  %v13368_v1 = vld [vmem:[%s16365_s4 + $0x90] sm:$0xff]  }
 0x22b   : > { %v3149_v47 = vsel %vm3117_vm14, %v3101_v62, %v3133_v61  ;;  %vm3115_vm7 = vcmp.gt.f32.partialorder %v3099_v11, 0.0  ;;  %v3131_v56 = vmul.f32 0.2, %v3099_v11  ;;  %12133 = vmatpush3.bf16.msra.mxu1 %v13357_v23  ;;  %v5905_v23 = vld [vmem:[#allocation3 + $0x31] sm:$0xff]  ;;  %v5524_v61 = vld [vmem:[#allocation3 + $0x5f] sm:$0xff] }
 0x22c   : > { %3165 = vst [vmem:[#allocation3 + $0x90] sm:$0xff] %v3149_v47  ;;  %12134 = vmatprep.subr.bf16.mxu1 %v13359_v14  ;;  %v7537_v28 = vpack.c.bf16 %v3149_v47, %v3148_v49  ;;  %v5909_v47 = vld [vmem:[#allocation3 + $0x51] sm:$0xff] }
 0x22d   : > { %v3147_v15 = vsel %vm3115_vm7, %v3099_v11, %v3131_v56  ;;  %v10258_v11 = vpack.c.bf16 %v15233_v0, %v15228_v31  ;;  %v13377_v31 = vld [vmem:[%s16365_s4 + $0xc0] sm:$0xff]  }
 0x22e   : > { %3163 = vst [vmem:[#allocation3 + $0x80] sm:$0xff] %v3147_v15  ;;  %12119 = vmatmul.mubr.bf16.gmra.mrb[40].mxu1 %v5590_v46  ;;  %12398 = vmatprep.mubr.bf16.mxu0 %v7537_v28  ;;  %v5592_v45 = vpack.c.bf16 %v3147_v15, %v3146_v2  ;;  %v15236_v46 = vpack.c.bf16 %v5516_v59, %v5515_v52  ;;  %v5525_v28 = vld [vmem:[#allocation3 + $0x67] sm:$0xff]  ;;  %v5526_v15 = vld [vmem:[#allocation3 + $0x6f] sm:$0xff] }
 0x22f   : > { %12122 = vmatprep.mubr.bf16.mxu1 %v5591_v55  ;;  %12135 = vmatpush3.bf16.msra.mxu1 %v13359_v14  ;;  %v5902_v55 = vld [vmem:[#allocation3 + $0x19] sm:$0xff]  ;;  %v15251_v14 = vpack.c.bf16 %v5522_v26, %v5521_v53  ;;  %v15266_v59 = vpack.c.bf16 %v5907_v19, %v5906_v12 }
 0x230   : > { %12136 = vmatprep.subr.bf16.mxu1 %v13360_v40 }
 0x233   : > { %12137 = vmatpush3.bf16.msra.mxu1 %v13360_v40 }
 0x234   : > { %12138 = vmatprep.subr.bf16.mxu1 %v13362_v5 }
 0x236   : > { %12123 = vmatmul.mubr.bf16.gmra.mrb[44].mxu1 %v5592_v45  ;;  %v15260_v45 = vpack.c.bf16 %v5903_v58, %v5902_v55 }
 0x237   : > { %12139 = vmatpush3.bf16.msra.mxu1 %v13362_v5  ;;  %12142 = vmatprep.mubr.msk.bf16.mxu1 %vm13635_vm2, %v10210_v9  ;;  %v5904_v5 = vld [vmem:[#allocation3 + $0x29] sm:$0xff]  ;;  %v5523_v9 = vld [vmem:[#allocation3 + $0x57] sm:$0xff] }
 0x238   : > { %12140 = vmatprep.subr.bf16.mxu1 %v13363_v44  ;;  %v15264_v52 = vpack.c.bf16 %v5905_v23, %v5904_v5  ;;  %v15270_v35 = vpack.c.bf16 %v5524_v61, %v5523_v9 }
 0x23b   : > { %12141 = vmatpush3.bf16.msra.mxu1 %v13363_v44  ;;  %v12032_v39 = vpop.f32.mrb[16].mxu1  ;;  %v5528_v44 = vld [vmem:[#allocation3 + $0x7f] sm:$0xff] }
 0x23c   : > { %v5041_v42 = vadd.f32 %v12032_v39, %v15042_v3  ;;  %12158 = vmatprep.subr.bf16.mxu1 %v13365_v4  ;;  %v4960_v49 = vpop.f32.mrb[17].mxu1  ;;  %v15272_v39 = vpack.c.bf16 %v5909_v47, %v5908_v36 }
 0x23d   : > { %v5039_v29 = vadd.f32 %v15042_v3, %v4960_v49  ;;  %v12033_v37 = vpop.f32.mrb[18].mxu1  ;;  %v5527_v49 = vld [vmem:[#allocation3 + $0x77] sm:$0xff] }
 0x23e   : > { %v5057_v27 = vmul.f32 %v5041_v42, %v15046_v17  ;;  %12143 = vmatmul.mubr.msk.bf16.vlgmr.msra.gmra.mrb[32].mxu1 %vm13762_vm4, %v15236_v46  ;;  %v5042_v2 = vadd.f32 %v12033_v37, %v15042_v3  ;;  %v4963_v62 = vpop.f32.mrb[19].mxu1  ;;  %v15275_v42 = vpack.c.bf16 %v5526_v15, %v5525_v28 }
 0x23f   : > { %v5055_v56 = vmul.f32 %v5039_v29, %v15046_v17  ;;  %12146 = vmatprep.mubr.msk.bf16.mxu1 %vm13800_vm10, %v15239_v50  ;;  %12159 = vmatpush3.bf16.msra.mxu1 %v13365_v4  ;;  %v5040_v40 = vadd.f32 %v15042_v3, %v4963_v62  ;;  %v15278_v29 = vpack.c.bf16 %v5528_v44, %v5527_v49 }
 0x240   : > { %v5073_v57 = vadd.f32 %v5057_v27, %v15050_v20  ;;  %v5058_v32 = vmul.f32 %v5042_v2, %v15046_v17  ;;  %12160 = vmatprep.subr.bf16.mxu1 %v13366_v24  ;;  %v13369_v27 = vld [vmem:[%s16365_s4 + $0x98] sm:$0xff]  }
 0x241   : > { %v5071_v4 = vadd.f32 %v5055_v56, %v15050_v20  ;;  %v5056_v30 = vmul.f32 %v5040_v40, %v15046_v17 }
 0x242   : > { %vm5089_vm3 = vcmp.gt.f32.partialorder %v5073_v57, 0.0  ;;  %v5105_v53 = vmul.f32 0.2, %v5073_v57  ;;  %v5074_v26 = vadd.f32 %v5058_v32, %v15050_v20 }
 0x243   : > { %vm5087_vm5 = vcmp.gt.f32.partialorder %v5071_v4, 0.0  ;;  %v5103_v25 = vmul.f32 0.2, %v5071_v4  ;;  %v5072_v55 = vadd.f32 %v5056_v30, %v15050_v20  ;;  %12161 = vmatpush3.bf16.msra.mxu1 %v13366_v24  ;;  %v12036_v58 = vpop.f32.mrb[20].mxu1  ;;  %v13371_v30 = vld [vmem:[%s16365_s4 + $0xa0] sm:$0xff]  }
 0x244   : > { %v5121_v37 = vsel %vm5089_vm3, %v5073_v57, %v5105_v53  ;;  %vm5090_vm12 = vcmp.gt.f32.partialorder %v5074_v26, 0.0  ;;  %v5106_v23 = vmul.f32 0.2, %v5074_v26  ;;  %v5045_v12 = vadd.f32 %v12036_v58, %v15042_v3  ;;  %12162 = vmatprep.subr.bf16.mxu1 %v13368_v1  ;;  %v4976_v19 = vpop.f32.mrb[21].mxu1 }
 0x245   : > { %v5137_v2 = vmul.f32 %v5121_v37, %v15063_v10  ;;  %v5119_v62 = vsel %vm5087_vm5, %v5071_v4, %v5103_v25  ;;  %vm5088_vm14 = vcmp.gt.f32.partialorder %v5072_v55, 0.0  ;;  %v5104_v61 = vmul.f32 0.2, %v5072_v55  ;;  %v12037_v24 = vpop.f32.mrb[22].mxu1 }
 0x246   : > { %v5135_v47 = vmul.f32 %v5119_v62, %v15063_v10  ;;  %v5122_v56 = vsel %vm5090_vm12, %v5074_v26, %v5106_v23  ;;  %v5061_v40 = vmul.f32 %v5045_v12, %v15046_v17  ;;  %12147 = vmatmul.mubr.msk.bf16.gmra.mrb[36].mxu1 %vm13821_vm15, %v15241_v51  ;;  %v5043_v28 = vadd.f32 %v15042_v3, %v4976_v19  ;;  %v4979_v15 = vpop.f32.mrb[23].mxu1 }
 0x247   : > { %v5153_v5 = vadd.f32 %v5137_v2, %v15065_v48  ;;  %v5138_v57 = vmul.f32 %v5122_v56, %v15063_v10  ;;  %v5120_v32 = vsel %vm5088_vm14, %v5072_v55, %v5104_v61  ;;  %12150 = vmatprep.mubr.msk.bf16.mxu1 %vm13854_vm6, %v15251_v14  ;;  %12163 = vmatpush3.bf16.msra.mxu1 %v13368_v1 }
 0x248   : > { %v5151_v9 = vadd.f32 %v5135_v47, %v15065_v48  ;;  %v5136_v44 = vmul.f32 %v5120_v32, %v15063_v10  ;;  %v5077_v36 = vadd.f32 %v5061_v40, %v15050_v20  ;;  %v5059_v4 = vmul.f32 %v5043_v28, %v15046_v17  ;;  %12164 = vmatprep.subr.bf16.mxu1 %v13369_v27  ;;  %v13372_v40 = vld [vmem:[%s16365_s4 + $0xa8] sm:$0xff]  }
 0x249   : > { %vm5169_vm7 = vcmp.gt.f32.partialorder %v5153_v5, 0.0  ;;  %v5185_v53 = vmul.f32 0.2, %v5153_v5  ;;  %v5154_v26 = vadd.f32 %v5138_v57, %v15065_v48  ;;  %v5046_v49 = vadd.f32 %v12037_v24, %v15042_v3 }
 0x24a   : > { %vm5167_vm3 = vcmp.gt.f32.partialorder %v5151_v9, 0.0  ;;  %v5183_v1 = vmul.f32 0.2, %v5151_v9  ;;  %v5152_v25 = vadd.f32 %v5136_v44, %v15065_v48  ;;  %vm5093_vm5 = vcmp.gt.f32.partialorder %v5077_v36, 0.0 }
 0x24b   : > { %v15306_v55 = vsel %vm5169_vm7, %v5153_v5, %v5185_v53  ;;  %vm5170_vm12 = vcmp.gt.f32.partialorder %v5154_v26, 0.0  ;;  %v5186_v58 = vmul.f32 0.2, %v5154_v26  ;;  %v5109_v37 = vmul.f32 0.2, %v5077_v36  ;;  %12165 = vmatpush3.bf16.msra.mxu1 %v13369_v27  ;;  %v12040_v23 = vpop.f32.mrb[24].mxu1 }
 0x24c   : > { %5217 = vst [vmem:[#allocation3 + $0xa8] sm:$0xff] %v15306_v55  ;;  %v15309_v12 = vsel %vm5167_vm3, %v5151_v9, %v5183_v1  ;;  %vm5168_vm14 = vcmp.gt.f32.partialorder %v5152_v25, 0.0  ;;  %v5184_v19 = vmul.f32 0.2, %v5152_v25  ;;  %v5075_v2 = vadd.f32 %v5059_v4, %v15050_v20  ;;  %12166 = vmatprep.subr.bf16.mxu1 %v13371_v30  ;;  %v4992_v62 = vpop.f32.mrb[25].mxu1 }
 0x24d   : > { %5215 = vst [vmem:[#allocation3 + $0x98] sm:$0xff] %v15309_v12  ;;  %v15313_v61 = vsel %vm5170_vm12, %v5154_v26, %v5186_v58  ;;  %v5125_v24 = vsel %vm5093_vm5, %v5077_v36, %v5109_v37  ;;  %v5062_v47 = vmul.f32 %v5046_v49, %v15046_v17  ;;  %v5044_v27 = vadd.f32 %v15042_v3, %v4979_v15  ;;  %v12041_v56 = vpop.f32.mrb[26].mxu1  ;;  %v13374_v37 = vld [vmem:[%s16365_s4 + $0xb0] sm:$0xff]  }
 0x24e   : > { %5218 = vst [vmem:[#allocation3 + $0xb0] sm:$0xff] %v15313_v61  ;;  %v15322_v28 = vsel %vm5168_vm14, %v5152_v25, %v5184_v19  ;;  %v5141_v5 = vmul.f32 %v5125_v24, %v15063_v10  ;;  %vm5091_vm7 = vcmp.gt.f32.partialorder %v5075_v2, 0.0  ;;  %v5107_v57 = vmul.f32 0.2, %v5075_v2  ;;  %12151 = vmatmul.mubr.msk.bf16.gmra.mrb[40].mxu1 %vm13924_vm0, %v15270_v35  ;;  %v4995_v32 = vpop.f32.mrb[27].mxu1 }
 0x24f   : > { %5216 = vst [vmem:[#allocation3 + $0xa0] sm:$0xff] %v15322_v28  ;;  %v5078_v15 = vadd.f32 %v5062_v47, %v15050_v20  ;;  %v5060_v9 = vmul.f32 %v5044_v27, %v15046_v17  ;;  %v5049_v44 = vadd.f32 %v12040_v23, %v15042_v3  ;;  %v5047_v36 = vadd.f32 %v15042_v3, %v4992_v62 }
 0x250   : > { %12154 = vmatprep.mubr.msk.bf16.mxu1 %vm13966_vm9, %v15275_v42  ;;  %v5157_v4 = vadd.f32 %v5141_v5, %v15065_v48  ;;  %v5123_v53 = vsel %vm5091_vm7, %v5075_v2, %v5107_v57  ;;  %12167 = vmatpush3.bf16.msra.mxu1 %v13371_v30  ;;  %v5050_v26 = vadd.f32 %v12041_v56, %v15042_v3 }
 0x251   : > { %v5048_v49 = vadd.f32 %v15042_v3, %v4995_v32  ;;  %v5139_v1 = vmul.f32 %v5123_v53, %v15063_v10  ;;  %vm5094_vm3 = vcmp.gt.f32.partialorder %v5078_v15, 0.0  ;;  %v5110_v25 = vmul.f32 0.2, %v5078_v15  ;;  %12168 = vmatprep.subr.bf16.mxu1 %v13372_v40 }
 0x252   : > { %v5076_v58 = vadd.f32 %v5060_v9, %v15050_v20  ;;  %vm5173_vm5 = vcmp.gt.f32.partialorder %v5157_v4, 0.0  ;;  %v5189_v23 = vmul.f32 0.2, %v5157_v4  ;;  %v5065_v19 = vmul.f32 %v5049_v44, %v15046_v17 }
 0x253   : > { %v5063_v30 = vmul.f32 %v5047_v36, %v15046_v17  ;;  %v5155_v2 = vadd.f32 %v5139_v1, %v15065_v48  ;;  %v5126_v62 = vsel %vm5094_vm3, %v5078_v15, %v5110_v25  ;;  %v12044_v47 = vpop.f32.mrb[28].mxu1  ;;  %v5066_v15 = vmul.f32 %v5050_v26, %v15046_v17 }
 0x254   : > { %vm5092_vm12 = vcmp.gt.f32.partialorder %v5076_v58, 0.0  ;;  %v5108_v24 = vmul.f32 0.2, %v5076_v58  ;;  %v15347_v27 = vsel %vm5173_vm5, %v5157_v4, %v5189_v23  ;;  %v5142_v56 = vmul.f32 %v5126_v62, %v15063_v10  ;;  %12169 = vmatpush3.bf16.msra.mxu1 %v13372_v40  ;;  %v5008_v32 = vpop.f32.mrb[29].mxu1  ;;  %v13375_v4 = vld [vmem:[%s16365_s4 + $0xb8] sm:$0xff]  }
 0x255   : > { %v5081_v5 = vadd.f32 %v5065_v19, %v15050_v20  ;;  %v5079_v57 = vadd.f32 %v5063_v30, %v15050_v20  ;;  %5221 = vst [vmem:[#allocation3 + $0xc8] sm:$0xff] %v15347_v27  ;;  %vm5171_vm14 = vcmp.gt.f32.partialorder %v5155_v2, 0.0  ;;  %v5187_v9 = vmul.f32 0.2, %v5155_v2  ;;  %12170 = vmatprep.subr.bf16.mxu1 %v13374_v37  ;;  %v15354_v36 = vpop.f32.mrb[30].mxu1 }
 0x256   : > { %v5124_v44 = vsel %vm5092_vm12, %v5076_v58, %v5108_v24  ;;  %v5158_v53 = vadd.f32 %v5142_v56, %v15065_v48  ;;  %12155 = vmatmul.mubr.msk.bf16.gmra.mrb[44].mxu1 %vm16465_vm13, %v15278_v29  ;;  %v15364_v25 = vpop.f32.mrb[31].mxu1  ;;  %v5082_v23 = vadd.f32 %v5066_v15, %v15050_v20 }
 0x257   : > { %v5140_v1 = vmul.f32 %v5124_v44, %v15063_v10  ;;  %vm5097_vm7 = vcmp.gt.f32.partialorder %v5081_v5, 0.0  ;;  %v5113_v40 = vmul.f32 0.2, %v5081_v5  ;;  %v15366_v26 = vsel %vm5171_vm14, %v5155_v2, %v5187_v9  ;;  %12174 = vmatprep.mubr.msk.bf16.mxu1 %vm16461_vm11, %v10258_v11 }
 0x258   : > { %vm5095_vm3 = vcmp.gt.f32.partialorder %v5079_v57, 0.0  ;;  %v5111_v58 = vmul.f32 0.2, %v5079_v57  ;;  %5219 = vst [vmem:[#allocation3 + $0xb8] sm:$0xff] %v15366_v26  ;;  %vm5174_vm5 = vcmp.gt.f32.partialorder %v5158_v53, 0.0  ;;  %12171 = vmatpush3.bf16.msra.mxu1 %v13374_v37  ;;  %vm5098_vm12 = vcmp.gt.f32.partialorder %v5082_v23, 0.0 }
 0x259   : > { %v5190_v19 = vmul.f32 0.2, %v5158_v53  ;;  %v5156_v30 = vadd.f32 %v5140_v1, %v15065_v48  ;;  %v5129_v62 = vsel %vm5097_vm7, %v5081_v5, %v5113_v40  ;;  %v5114_v56 = vmul.f32 0.2, %v5082_v23  ;;  %12172 = vmatprep.subr.bf16.mxu1 %v13375_v4 }
 0x25a   : > { %v5145_v2 = vmul.f32 %v5129_v62, %v15063_v10  ;;  %v5127_v24 = vsel %vm5095_vm3, %v5079_v57, %v5111_v58  ;;  %v5064_v57 = vmul.f32 %v5048_v49, %v15046_v17  ;;  %v5053_v44 = vadd.f32 %v12044_v47, %v15042_v3  ;;  %v13379_v49 = vld [vmem:[%s16365_s4 + $0xc8] sm:$0xff]  }
 0x25b   : > { %v15380_v0 = vsel %vm5174_vm5, %v5158_v53, %v5190_v19  ;;  %vm5172_vm14 = vcmp.gt.f32.partialorder %v5156_v30, 0.0  ;;  %v5188_v11 = vmul.f32 0.2, %v5156_v30  ;;  %v5143_v9 = vmul.f32 %v5127_v24, %v15063_v10 }
 0x25c   : > { %5222 = vst [vmem:[#allocation3 + $0xd0] sm:$0xff] %v15380_v0  ;;  %v5161_v37 = vadd.f32 %v5145_v2, %v15065_v48  ;;  %v5130_v5 = vsel %vm5098_vm12, %v5082_v23, %v5114_v56  ;;  %v5051_v40 = vadd.f32 %v15042_v3, %v5008_v32  ;;  %12173 = vmatpush3.bf16.msra.mxu1 %v13375_v4 }
 0x25d   : > { %v15387_v15 = vsel %vm5172_vm14, %v5156_v30, %v5188_v11  ;;  %v5159_v1 = vadd.f32 %v5143_v9, %v15065_v48  ;;  %v5146_v53 = vmul.f32 %v5130_v5, %v15063_v10  ;;  %v5080_v19 = vadd.f32 %v5064_v57, %v15050_v20  ;;  %12190 = vmatprep.subr.bf16.mxu1 %v13377_v31 }
 0x25e   : > { %5220 = vst [vmem:[#allocation3 + $0xc0] sm:$0xff] %v15387_v15  ;;  %vm5177_vm7 = vcmp.gt.f32.partialorder %v5161_v37, 0.0  ;;  %v5193_v58 = vmul.f32 0.2, %v5161_v37  ;;  %v5069_v23 = vmul.f32 %v5053_v44, %v15046_v17  ;;  %v5067_v32 = vmul.f32 %v5051_v40, %v15046_v17  ;;  %v13491_v40 = vld [vmem:[%s16364_s3] ss:$0 sm:$0xff] }
 0x25f   : > { %vm5175_vm3 = vcmp.gt.f32.partialorder %v5159_v1, 0.0  ;;  %v5191_v47 = vmul.f32 0.2, %v5159_v1  ;;  %v5162_v30 = vadd.f32 %v5146_v53, %v15065_v48  ;;  %vm5096_vm5 = vcmp.gt.f32.partialorder %v5080_v19, 0.0  ;;  %12175 = vmatmul.mubr.msk.bf16.vlgmr.msra.gmra.mrb[32].mxu1 %vm16462_vm8, %v15260_v45  ;;  %v8705_v22 = vld [vmem:[#allocation3 + $0xb7] sm:$0xff] }
 0x260   : > { %v15400_v4 = vsel %vm5177_vm7, %v5161_v37, %v5193_v58  ;;  %v5112_v62 = vmul.f32 0.2, %v5080_v19  ;;  %v5085_v2 = vadd.f32 %v5069_v23, %v15050_v20  ;;  %v5083_v11 = vadd.f32 %v5067_v32, %v15050_v20  ;;  %12178 = vmatprep.mubr.msk.bf16.mxu1 %vm16463_vm1, %v15264_v52  ;;  %12191 = vmatpush3.bf16.msra.mxu1 %v13377_v31 }
 0x261   : > { %5225 = vst [vmem:[#allocation3 + $0xe8] sm:$0xff] %v15400_v4  ;;  %v15407_v24 = vsel %vm5175_vm3, %v5159_v1, %v5191_v47  ;;  %vm5178_vm12 = vcmp.gt.f32.partialorder %v5162_v30, 0.0  ;;  %v5194_v56 = vmul.f32 0.2, %v5162_v30  ;;  %v5054_v5 = vadd.f32 %v15354_v36, %v15042_v3  ;;  %12192 = vmatprep.subr.bf16.mxu1 %v13379_v49  ;;  %v13378_v36 = vld [vmem:[%s16365_s4 + $0x8] sm:$0xff]  }
 0x262   : > { %5223 = vst [vmem:[#allocation3 + $0xd8] sm:$0xff] %v15407_v24  ;;  %v5128_v9 = vsel %vm5096_vm5, %v5080_v19, %v5112_v62  ;;  %vm5101_vm14 = vcmp.gt.f32.partialorder %v5085_v2, 0.0  ;;  %v5117_v37 = vmul.f32 0.2, %v5085_v2  ;;  %vm5099_vm7 = vcmp.gt.f32.partialorder %v5083_v11, 0.0 }
 0x263   : > { %v15416_v57 = vsel %vm5178_vm12, %v5162_v30, %v5194_v56  ;;  %v5144_v44 = vmul.f32 %v5128_v9, %v15063_v10  ;;  %v5115_v1 = vmul.f32 0.2, %v5083_v11  ;;  %v5070_v31 = vmul.f32 %v5054_v5, %v15046_v17 }
 0x264   : > { %5226 = vst [vmem:[#allocation3 + $0xf0] sm:$0xff] %v15416_v57  ;;  %v5133_v53 = vsel %vm5101_vm14, %v5085_v2, %v5117_v37  ;;  %v5052_v58 = vadd.f32 %v13491_v40, %v15364_v25  ;;  %v7538_v3 = vpack.c.bf16 %v15322_v28, %v15309_v12  ;;  %v7539_v30 = vpack.c.bf16 %v15313_v61, %v15306_v55  ;;  %v13381_v25 = vld [vmem:[%s16365_s4 + $0xd0] sm:$0xff]   ;;  %v13492_v55 = vld [vmem:[%s16365_s4] sm:$0xff]  }
 0x265   : > { %v5160_v19 = vadd.f32 %v5144_v44, %v15065_v48  ;;  %v5149_v23 = vmul.f32 %v5133_v53, %v15063_v10  ;;  %v5131_v47 = vsel %vm5099_vm7, %v5083_v11, %v5115_v1  ;;  %12193 = vmatpush3.bf16.msra.mxu1 %v13379_v49  ;;  %v5086_v12 = vadd.f32 %v5070_v31, %v15050_v20  ;;  %v13380_v11 = vld [vmem:[%s16365_s4 + $0x10] sm:$0xff]  }
 0x266   : > { %v5147_v32 = vmul.f32 %v5131_v47, %v15063_v10  ;;  %v5068_v28 = vmul.f32 %v5052_v58, %v15046_v17  ;;  %12399 = vmatmul.mubr.bf16.vlgmr.msra.gmra.mrb[48].mxu0 %v7538_v3  ;;  %v7540_v62 = vpack.c.bf16 %v15387_v15, %v15366_v26  ;;  %v7541_v61 = vpack.c.bf16 %v15380_v0, %v15347_v27  ;;  %v13383_v17 = vld [vmem:[%s16365_s4 + $0xd8] sm:$0xff]   ;;  %v5910_v31 = vld [vmem:[#allocation3 + $0x59] sm:$0xff] }
 0x267   : > { %vm5176_vm3 = vcmp.gt.f32.partialorder %v5160_v19, 0.0  ;;  %v5192_v2 = vmul.f32 0.2, %v5160_v19  ;;  %v5165_v56 = vadd.f32 %v5149_v23, %v15065_v48  ;;  %12402 = vmatprep.mubr.bf16.mxu0 %v7539_v30  ;;  %12415 = vmatpush3.bf16.msra.mxu0 %v13492_v55  ;;  %vm5102_vm5 = vcmp.gt.f32.partialorder %v5086_v12, 0.0  ;;  %v5911_v40 = vld [vmem:[#allocation3 + $0x61] sm:$0xff]  ;;  %v5912_v47 = vld [vmem:[#allocation3 + $0x69] sm:$0xff] }
 0x268   : > { %v5163_v49 = vadd.f32 %v5147_v32, %v15065_v48  ;;  %v5118_v26 = vmul.f32 0.2, %v5086_v12  ;;  %v5084_v15 = vadd.f32 %v5068_v28, %v15050_v20  ;;  %12416 = vmatprep.subr.bf16.mxu0 %v13378_v36  ;;  %vm16466_vm12 = vnez %v16447_v43  ;;  %12194 = vmatprep.subr.bf16.mxu1 %v13381_v25  ;;  %v13387_v32 = vld [vmem:[%s16365_s4 + $0xe8] sm:$0xff]   ;;  %v16198_v43 = vld [vmem:[%s16366_s5] ss:$0 sm:$0xff] }
 0x269   : > { %12179 = vmatmul.mubr.msk.bf16.gmra.mrb[36].mxu1 %vm16466_vm12, %v15266_v59  ;;  %v5208_v27 = vsel %vm5176_vm3, %v5160_v19, %v5192_v2  ;;  %vm5181_vm14 = vcmp.gt.f32.partialorder %v5165_v56, 0.0  ;;  %v5197_v0 = vmul.f32 0.2, %v5165_v56  ;;  %vm16467_vm7 = vnez %v16450_v13  ;;  %v5915_v2 = vld [vmem:[#allocation3 + $0x81] sm:$0xff]  ;;  %v13386_v55 = vld [vmem:[%s16365_s4 + $0x28] sm:$0xff]  }
 0x26a   : > { %12182 = vmatprep.mubr.msk.bf16.mxu1 %vm16467_vm7, %v15272_v39  ;;  %v7543_v20 = vpack.c.bf16 %v15416_v57, %v15400_v4  ;;  %5224 = vst [vmem:[#allocation3 + $0xe0] sm:$0xff] %v5208_v27  ;;  %vm5179_vm1 = vcmp.gt.f32.partialorder %v5163_v49, 0.0  ;;  %v5195_v9 = vmul.f32 0.2, %v5163_v49  ;;  %v5134_v37 = vsel %vm5102_vm5, %v5086_v12, %v5118_v26  ;;  %12195 = vmatpush3.bf16.msra.mxu1 %v13381_v25  ;;  %v13382_v4 = vld [vmem:[%s16365_s4 + $0x18] sm:$0xff]   ;;  %v5913_v57 = vld [vmem:[#allocation3 + $0x71] sm:$0xff] }
 0x26b   : > { %vm5100_vm8 = vcmp.gt.f32.partialorder %v5084_v15, 0.0  ;;  %v5213_v5 = vsel %vm5181_vm14, %v5165_v56, %v5197_v0  ;;  %v5150_v44 = vmul.f32 %v5134_v37, %v15063_v10  ;;  %v5116_v1 = vmul.f32 0.2, %v5084_v15  ;;  %12417 = vmatpush3.bf16.msra.mxu0 %v13378_v36  ;;  %12196 = vmatprep.subr.bf16.mxu1 %v13383_v17  ;;  %v15504_v26 = vpop.f32.mrb[16].mxu0  ;;  %v7466_v37 = vld [vmem:[#allocation3 + $0x8f] sm:$0xff]  ;;  %v8709_v60 = vld [vmem:[#allocation3 + $0xd7] sm:$0xff] }
 0x26c   : > { %v7542_v53 = vpack.c.bf16 %v5208_v27, %v15407_v24  ;;  %5229 = vst [vmem:[#allocation3 + $0x108] sm:$0xff] %v5213_v5  ;;  %v15466_v58 = vsel %vm5179_vm1, %v5163_v49, %v5195_v9  ;;  %12418 = vmatprep.subr.bf16.mxu0 %v13380_v11  ;;  %v13385_v24 = vld [vmem:[%s16365_s4 + $0xe0] sm:$0xff]   ;;  %v15478_v23 = vpack.c.bf16 %v5911_v40, %v5910_v31  ;;  %v13388_v27 = vld [vmem:[%s16365_s4 + $0x30] sm:$0xff]   ;;  %v13390_v5 = vld [vmem:[%s16365_s4 + $0x38] sm:$0xff]  }
 0x26d   : > { %5227 = vst [vmem:[#allocation3 + $0xf8] sm:$0xff] %v15466_v58  ;;  %v5166_v3 = vadd.f32 %v5150_v44, %v15065_v48  ;;  %v5132_v36 = vsel %vm5100_vm8, %v5084_v15, %v5116_v1  ;;  %v15480_v25 = vpack.c.bf16 %v5913_v57, %v5912_v47  ;;  %vm16468_vm8 = vnez %v16452_v8  ;;  %v13391_v15 = vld [vmem:[%s16365_s4 + $0xf8] sm:$0xff]   ;;  %v13393_v44 = vld [vmem:[%s16365_s4 + $0x100] sm:$0xff]   ;;  %v13394_v47 = vld [vmem:[%s16365_s4 + $0x88] sm:$0xff]  }
 0x26e   : > { %v5148_v19 = vmul.f32 %v5132_v36, %v15063_v10  ;;  %12403 = vmatmul.mubr.bf16.gmra.mrb[52].mxu0 %v7540_v62  ;;  %12197 = vmatpush3.bf16.msra.mxu1 %v13383_v17  ;;  %v13384_v10 = vld [vmem:[%s16365_s4 + $0x20] sm:$0xff]   ;;  %vm16469_vm3 = vnez %v16454_v18  ;;  %v13389_v17 = vld [vmem:[%s16365_s4 + $0xf0] sm:$0xff]   ;;  %vm16470_vm14 = vnez %v16459_v38  ;;  %v16200_v8 = vstv %s5511_s27 }
 0x26f   : > { %vm5182_vm1 = vcmp.gt.f32.partialorder %v5166_v3, 0.0  ;;  %v5198_v30 = vmul.f32 0.2, %v5166_v3  ;;  %12406 = vmatprep.mubr.bf16.mxu0 %v7541_v61  ;;  %12419 = vmatpush3.bf16.msra.mxu0 %v13380_v11  ;;  %v15509_v11 = vpop.f32.mrb[17].mxu0  ;;  %v7465_v9 = vld [vmem:[#allocation3 + $0x87] sm:$0xff]  ;;  %v13392_v40 = vld [vmem:[%s16365_s4 + $0x80] sm:$0xff]  }
 0x270   : > { %v5164_v12 = vadd.f32 %v5148_v19, %v15065_v48  ;;  %12420 = vmatprep.subr.bf16.mxu0 %v13382_v4  ;;  %12198 = vmatprep.subr.bf16.mxu1 %v13385_v24  ;;  %v5914_v48 = vld [vmem:[#allocation3 + $0x79] sm:$0xff]  ;;  %v15517_v0 = vpop.f32.mrb[18].mxu0  ;;  %v15530_v1 = vpack.c.bf16 %v7466_v37, %v7465_v9  ;;  %v7470_v36 = vld [vmem:[#allocation3 + $0xaf] sm:$0xff] }
 0x271   : > { %12183 = vmatmul.mubr.msk.bf16.gmra.mrb[40].mxu1 %vm16468_vm8, %v15478_v23  ;;  %v5214_v28 = vsel %vm5182_vm1, %v5166_v3, %v5198_v30  ;;  %v15502_v49 = vpack.c.bf16 %v5915_v2, %v5914_v48  ;;  %v7469_v3 = vld [vmem:[#allocation3 + $0xa7] sm:$0xff]  ;;  %v13400_v37 = vld [vmem:[%s16365_s4 + $0xa0] sm:$0xff]   ;;  %vm16488_vm1 = vnez %v16437_v7  ;;  %v9135_v7 = vld [vmem:[#allocation3 + $0x119] sm:$0xff] }
 0x272   : > { %12186 = vmatprep.mubr.msk.bf16.mxu1 %vm16469_vm3, %v15480_v25  ;;  %5230 = vst [vmem:[#allocation3 + $0x110] sm:$0xff] %v5214_v28  ;;  %vm5180_vm5 = vcmp.gt.f32.partialorder %v5164_v12, 0.0  ;;  %v5196_v62 = vmul.f32 0.2, %v5164_v12  ;;  %12199 = vmatpush3.bf16.msra.mxu1 %v13385_v24  ;;  %v7467_v24 = vld [vmem:[#allocation3 + $0x97] sm:$0xff]  ;;  %v15563_v30 = vpack.c.bf16 %v7470_v36, %v7469_v3  ;;  %v7473_v2 = vld [vmem:[#allocation3 + $0xc7] sm:$0xff] }
 0x273   : > { %12421 = vmatpush3.bf16.msra.mxu0 %v13382_v4  ;;  %12200 = vmatprep.subr.bf16.mxu1 %v13387_v32  ;;  %v7468_v4 = vld [vmem:[#allocation3 + $0x9f] sm:$0xff]  ;;  %v7475_v3 = vld [vmem:[#allocation3 + $0xd7] sm:$0xff]  ;;  %v9129_v63 = vld [vmem:[#allocation3 + $0xe9] sm:$0xff] }
 0x274   : > { %v5212_v56 = vsel %vm5180_vm5, %v5164_v12, %v5196_v62  ;;  %12422 = vmatprep.subr.bf16.mxu0 %v13384_v10  ;;  %v15555_v19 = vpack.c.bf16 %v7468_v4, %v7467_v24  ;;  %v7472_v62 = vld [vmem:[#allocation3 + $0xbf] sm:$0xff]  ;;  %v7478_v4 = vld [vmem:[#allocation3 + $0xef] sm:$0xff]  ;;  %vm16489_vm5 = vnez %v16441_v34  ;;  %v8713_v54 = vld [vmem:[#allocation3 + $0xf7] sm:$0xff] }
 0x275   : > { %5228 = vst [vmem:[#allocation3 + $0x100] sm:$0xff] %v5212_v56  ;;  %v7544_v61 = vpack.c.bf16 %v5212_v56, %v15466_v58  ;;  %v7474_v56 = vld [vmem:[#allocation3 + $0xcf] sm:$0xff]  ;;  %v13402_v24 = vld [vmem:[%s16365_s4 + $0xa8] sm:$0xff]   ;;  %v9136_v34 = vld [vmem:[#allocation3 + $0x121] sm:$0xff] }
 0x276   : > { %12407 = vmatmul.mubr.bf16.gmra.mrb[56].mxu0 %v7542_v53  ;;  %12201 = vmatpush3.bf16.msra.mxu1 %v13387_v32  ;;  %v13395_v53 = vld [vmem:[%s16365_s4 + $0x108] sm:$0xff]   ;;  %v13399_v32 = vld [vmem:[%s16365_s4 + $0x118] sm:$0xff]   ;;  %v16207_v38 = vld [vmem:[%s16368_s7] ss:$0 sm:$0xff] }
 0x277   : > { %12410 = vmatprep.mubr.bf16.mxu0 %v7543_v20  ;;  %12423 = vmatpush3.bf16.msra.mxu0 %v13384_v10  ;;  %v15522_v20 = vpop.f32.mrb[19].mxu0  ;;  %v13396_v10 = vld [vmem:[%s16365_s4 + $0x90] sm:$0xff]  }
 0x278   : > { %12424 = vmatprep.subr.bf16.mxu0 %v13386_v55  ;;  %12202 = vmatprep.subr.bf16.mxu1 %v13389_v17 }
 0x279   : > { %12187 = vmatmul.mubr.msk.bf16.gmra.mrb[44].mxu1 %vm16470_vm14, %v15502_v49 }
 0x27a   : > { %12206 = vmatprep.mubr.msk.bf16.mxu1 %vm13635_vm2, %v15236_v46  ;;  %12203 = vmatpush3.bf16.msra.mxu1 %v13389_v17  ;;  %v15532_v46 = vpop.f32.mrb[20].mxu0  ;;  %v13398_v17 = vld [vmem:[%s16365_s4 + $0x98] sm:$0xff]  }
 0x27b   : > { %12425 = vmatpush3.bf16.msra.mxu0 %v13386_v55  ;;  %12204 = vmatprep.subr.bf16.mxu1 %v13391_v15  ;;  %v15540_v31 = vpop.f32.mrb[21].mxu0  ;;  %v7471_v55 = vld [vmem:[#allocation3 + $0xb7] sm:$0xff] }
 0x27c   : > { %12426 = vmatprep.subr.bf16.mxu0 %v13388_v27  ;;  %v15545_v58 = vpop.f32.mrb[22].mxu0 }
 0x27d   : > { %v15550_v57 = vpop.f32.mrb[23].mxu0 }
 0x27e   : > { %12411 = vmatmul.mubr.bf16.gmra.mrb[60].mxu0 %v7544_v61  ;;  %12205 = vmatpush3.bf16.msra.mxu1 %v13391_v15  ;;  %16471 = vst [vmem:[#allocation5_spill] sm:$0xff] %v15550_v57  ;;  %v15591_v61 = vpack.c.bf16 %v7472_v62, %v7471_v55  ;;  %v15599_v15 = vpack.c.bf16 %v7474_v56, %v7473_v2  ;;  %v13407_v62 = vld [vmem:[%s16365_s4 + $0x138] sm:$0xff]   ;;  %v13404_v55 = vld [vmem:[%s16365_s4 + $0xb0] sm:$0xff]  }
 0x27f   : > { %12427 = vmatpush3.bf16.msra.mxu0 %v13388_v27  ;;  %12430 = vmatprep.mubr.msk.bf16.mxu0 %vm13635_vm2, %v15530_v1  ;;  %v13403_v27 = vld [vmem:[%s16365_s4 + $0x128] sm:$0xff]  }
 0x280   : > { %12428 = vmatprep.subr.bf16.mxu0 %v13390_v5  ;;  %12222 = vmatprep.subr.bf16.mxu1 %v13393_v44 }
 0x281   : > { %12207 = vmatmul.mubr.msk.bf16.vlgmr.msra.gmra.mrb[32].mxu1 %vm13762_vm4, %v15239_v50  ;;  %v13397_v50 = vld [vmem:[%s16365_s4 + $0x110] sm:$0xff]  }
 0x282   : > { %12210 = vmatprep.mubr.msk.bf16.mxu1 %vm13800_vm10, %v15241_v51  ;;  %12223 = vmatpush3.bf16.msra.mxu1 %v13393_v44  ;;  %v15568_v51 = vpop.f32.mrb[24].mxu0  ;;  %v7476_v44 = vld [vmem:[#allocation3 + $0xdf] sm:$0xff] }
 0x283   : > { %12429 = vmatpush3.bf16.msra.mxu0 %v13390_v5  ;;  %12224 = vmatprep.subr.bf16.mxu1 %v13395_v53  ;;  %16472 = vst [vmem:[#allocation6_spill] sm:$0xff] %v15568_v51  ;;  %v15576_v12 = vpop.f32.mrb[25].mxu0  ;;  %v15627_v36 = vpack.c.bf16 %v7476_v44, %v7475_v3  ;;  %v7864_v51 = vld [vmem:[#allocation3 + $0xf1] sm:$0xff] }
 0x284   : > { %12446 = vmatprep.subr.bf16.mxu0 %v13392_v40  ;;  %16473 = vst [vmem:[#allocation7_spill] sm:$0xff] %v15576_v12  ;;  %v15581_v28 = vpop.f32.mrb[26].mxu0  ;;  %v7862_v12 = vld [vmem:[#allocation3 + $0xe1] sm:$0xff] }
 0x285   : > { %16474 = vst [vmem:[#allocation8_spill] sm:$0xff] %v15581_v28  ;;  %v15586_v48 = vpop.f32.mrb[27].mxu0 }
 0x286   : > { %12431 = vmatmul.mubr.msk.bf16.vlgmr.msra.gmra.mrb[48].mxu0 %vm13762_vm4, %v15555_v19  ;;  %12225 = vmatpush3.bf16.msra.mxu1 %v13395_v53  ;;  %16475 = vst [vmem:[#allocation9_spill] sm:$0xff] %v15586_v48 }
 0x287   : > { %12434 = vmatprep.mubr.msk.bf16.mxu0 %vm13800_vm10, %v15563_v30  ;;  %12447 = vmatpush3.bf16.msra.mxu0 %v13392_v40  ;;  %v7477_v40 = vld [vmem:[#allocation3 + $0xe7] sm:$0xff] }
 0x288   : > { %12448 = vmatprep.subr.bf16.mxu0 %v13394_v47  ;;  %12226 = vmatprep.subr.bf16.mxu1 %v13397_v50 }
 0x289   : > { %12211 = vmatmul.mubr.msk.bf16.gmra.mrb[36].mxu1 %vm13821_vm15, %v15251_v14  ;;  %v13401_v14 = vld [vmem:[%s16365_s4 + $0x120] sm:$0xff]  }
 0x28a   : > { %12214 = vmatprep.mubr.msk.bf16.mxu1 %vm13854_vm6, %v15270_v35  ;;  %12227 = vmatpush3.bf16.msra.mxu1 %v13397_v50  ;;  %v15604_v35 = vpop.f32.mrb[28].mxu0  ;;  %v6337_v50 = vld [vmem:[#allocation3 + $0x20] sm:$0xff] }
 0x28b   : > { %12449 = vmatpush3.bf16.msra.mxu0 %v13394_v47  ;;  %12228 = vmatprep.subr.bf16.mxu1 %v13399_v32  ;;  %16476 = vst [vmem:[#allocation10_spill] sm:$0xff] %v15604_v35  ;;  %v15612_v9 = vpop.f32.mrb[29].mxu0  ;;  %v15635_v47 = vpack.c.bf16 %v7478_v4, %v7477_v40  ;;  %v7852_v4 = vld [vmem:[#allocation3 + $0x91] sm:$0xff] }
 0x28c   : > { %12450 = vmatprep.subr.bf16.mxu0 %v13396_v10  ;;  %16477 = vst [vmem:[#allocation11_spill] sm:$0xff] %v15612_v9  ;;  %v15617_v5 = vpop.f32.mrb[30].mxu0  ;;  %v7858_v9 = vld [vmem:[#allocation3 + $0xc1] sm:$0xff]  ;;  %v7860_v35 = vld [vmem:[#allocation3 + $0xd1] sm:$0xff] }
 0x28d   : > { %16478 = vst [vmem:[#allocation12_spill] sm:$0xff] %v15617_v5  ;;  %v15622_v53 = vpop.f32.mrb[31].mxu0 }
 0x28e   : > { %12435 = vmatmul.mubr.msk.bf16.gmra.mrb[52].mxu0 %vm13821_vm15, %v15591_v61  ;;  %12229 = vmatpush3.bf16.msra.mxu1 %v13399_v32  ;;  %16479 = vst [vmem:[#allocation13_spill] sm:$0xff] %v15622_v53  ;;  %v12080_v32 = vpop.f32.mrb[32].mxu0 }
 0x28f   : > { %12438 = vmatprep.mubr.msk.bf16.mxu0 %vm13854_vm6, %v15599_v15  ;;  %12451 = vmatpush3.bf16.msra.mxu0 %v13396_v10  ;;  %v6336_v10 = vld [vmem:[#allocation3 + $0x18] sm:$0xff]  ;;  %v5448_v56 = vpop.f32.mrb[33].mxu0 }
 0x290   : > { %12452 = vmatprep.subr.bf16.mxu0 %v13398_v17  ;;  %12230 = vmatprep.subr.bf16.mxu1 %v13401_v14 }
 0x291   : > { %12215 = vmatmul.mubr.msk.bf16.gmra.mrb[40].mxu1 %vm13924_vm0, %v15275_v42  ;;  %v13405_v42 = vld [vmem:[%s16365_s4 + $0x130] sm:$0xff]  }
 0x292   : > { %12218 = vmatprep.mubr.msk.bf16.mxu1 %vm13966_vm9, %v15278_v29  ;;  %12231 = vmatpush3.bf16.msra.mxu1 %v13401_v14  ;;  %v15643_v29 = vld [vmem:[%s16368_s7] ss:$0 sm:$0xff] }
 0x293   : > { %12453 = vmatpush3.bf16.msra.mxu0 %v13398_v17  ;;  %12232 = vmatprep.subr.bf16.mxu1 %v13403_v27  ;;  %v15652_v2 = vadd.f32 %v12080_v32, %v15643_v29  ;;  %v6352_v17 = vpack.c.bf16 %v6337_v50, %v6336_v10  ;;  %v15658_v14 = vadd.f32 %v15643_v29, %v5448_v56  ;;  %v7479_v50 = vld [vmem:[#allocation3 + $0xf7] sm:$0xff]  ;;  %v7851_v56 = vld [vmem:[#allocation3 + $0x89] sm:$0xff] }
 0x294   : > { %12454 = vmatprep.subr.bf16.mxu0 %v13400_v37  ;;  %v6339_v32 = vld [vmem:[#allocation3 + $0x30] sm:$0xff] }
 0x295   : > { %16480 = vst [vmem:[#allocation14_spill] sm:$0xff] %v15652_v2  ;;  %16481 = vst [vmem:[#allocation15_spill] sm:$0xff] %v15658_v14  ;;  %v7854_v14 = vld [vmem:[#allocation3 + $0xa1] sm:$0xff]  ;;  %v7856_v2 = vld [vmem:[#allocation3 + $0xb1] sm:$0xff] }
 0x296   : > { %12439 = vmatmul.mubr.msk.bf16.gmra.mrb[56].mxu0 %vm13924_vm0, %v15627_v36  ;;  %12233 = vmatpush3.bf16.msra.mxu1 %v13403_v27  ;;  %v12081_v27 = vpop.f32.mrb[34].mxu0 }
 0x297   : > { %12442 = vmatprep.mubr.msk.bf16.mxu0 %vm13966_vm9, %v15635_v47  ;;  %12455 = vmatpush3.bf16.msra.mxu0 %v13400_v37  ;;  %v7480_v37 = vld [vmem:[#allocation3 + $0xff] sm:$0xff]  ;;  %v15664_v44 = vadd.f32 %v12081_v27, %v15643_v29  ;;  %v5451_v40 = vpop.f32.mrb[35].mxu0 }
 0x298   : > { %12456 = vmatprep.subr.bf16.mxu0 %v13402_v24  ;;  %12234 = vmatprep.subr.bf16.mxu1 %v13405_v42  ;;  %v15667_v3 = vadd.f32 %v15643_v29, %v5451_v40  ;;  %v15669_v10 = vpack.c.bf16 %v7480_v37, %v7479_v50  ;;  %v6341_v27 = vld [vmem:[#allocation3 + $0x40] sm:$0xff]  ;;  %v12084_v37 = vpop.f32.mrb[36].mxu0  ;;  %v6340_v50 = vld [vmem:[#allocation3 + $0x38] sm:$0xff] }
 0x299   : > { %12219 = vmatmul.mubr.msk.bf16.gmra.mrb[44].mxu1 %vm16465_vm13, %v15530_v1  ;;  %16482 = vst [vmem:[#allocation16_spill] sm:$0xff] %v15664_v44  ;;  %v13406_v1 = vld [vmem:[%s16365_s4 + $0xb8] sm:$0xff]   ;;  %v7853_v44 = vld [vmem:[#allocation3 + $0x99] sm:$0xff] }
 0x29a   : > { %12235 = vmatpush3.bf16.msra.mxu1 %v13405_v42  ;;  %12238 = vmatprep.mubr.bf16.mxu1 %v6352_v17  ;;  %16483 = vst [vmem:[#allocation17_spill] sm:$0xff] %v15667_v3  ;;  %v13409_v42 = vld [vmem:[%s16365_s4 + $0x140] sm:$0xff]   ;;  %v15677_v17 = vpack.c.bf16 %v7852_v4, %v7851_v56  ;;  %v13411_v4 = vld [vmem:[%s16365_s4 + $0x148] sm:$0xff]   ;;  %v15691_v56 = vadd.f32 %v12084_v37, %v15643_v29  ;;  %v5464_v3 = vpop.f32.mrb[37].mxu0 }
 0x29b   : > { %12457 = vmatpush3.bf16.msra.mxu0 %v13402_v24  ;;  %12236 = vmatprep.subr.bf16.mxu1 %v13407_v62  ;;  %v6338_v24 = vld [vmem:[#allocation3 + $0x28] sm:$0xff] }
 0x29c   : > { %12458 = vmatprep.subr.bf16.mxu0 %v13404_v55  ;;  %v15685_v40 = vpack.c.bf16 %v6339_v32, %v6338_v24  ;;  %16484 = vst [vmem:[#allocation18_spill] sm:$0xff] %v15691_v56  ;;  %v15699_v32 = vadd.f32 %v15643_v29, %v5464_v3  ;;  %v12085_v24 = vpop.f32.mrb[38].mxu0  ;;  %v6343_v3 = vld [vmem:[#allocation3 + $0x50] sm:$0xff] }
 0x29d   : > { %v15703_v37 = vadd.f32 %v12085_v24, %v15643_v29  ;;  %v5467_v56 = vpop.f32.mrb[39].mxu0  ;;  %v13410_v24 = vld [vmem:[%s16365_s4 + $0xc8] sm:$0xff]  }
 0x29e   : > { %12443 = vmatmul.mubr.msk.bf16.gmra.mrb[60].mxu0 %vm16465_vm13, %v15669_v10  ;;  %12237 = vmatpush3.bf16.msra.mxu1 %v13407_v62  ;;  %v13408_v62 = vld [vmem:[%s16365_s4 + $0xc0] sm:$0xff]   ;;  %16485 = vst [vmem:[#allocation19_spill] sm:$0xff] %v15699_v32  ;;  %v15707_v53 = vadd.f32 %v15643_v29, %v5467_v56  ;;  %v6344_v56 = vld [vmem:[#allocation3 + $0x58] sm:$0xff] }
 0x29f   : > { %12459 = vmatpush3.bf16.msra.mxu0 %v13404_v55  ;;  %12462 = vmatprep.mubr.msk.bf16.mxu0 %vm16461_vm11, %v15677_v17  ;;  %v15696_v55 = vpack.c.bf16 %v6341_v27, %v6340_v50  ;;  %16486 = vst [vmem:[#allocation20_spill] sm:$0xff] %v15703_v37  ;;  %v15709_v27 = vpack.c.bf16 %v7854_v14, %v7853_v44  ;;  %v7855_v50 = vld [vmem:[#allocation3 + $0xa9] sm:$0xff]  ;;  %v13413_v37 = vld [vmem:[%s16365_s4 + $0x150] sm:$0xff]   ;;  %v12088_v44 = vpop.f32.mrb[40].mxu0 }
 0x2a0   : > { %12460 = vmatprep.subr.bf16.mxu0 %v13406_v1  ;;  %12254 = vmatprep.subr.bf16.mxu1 %v13409_v42  ;;  %16487 = vst [vmem:[#allocation21_spill] sm:$0xff] %v15707_v53  ;;  %v15717_v32 = vpack.c.bf16 %v7856_v2, %v7855_v50  ;;  %v6342_v14 = vld [vmem:[#allocation3 + $0x48] sm:$0xff]  ;;  %v15731_v50 = vadd.f32 %v12088_v44, %v15643_v29  ;;  %v5480_v53 = vpop.f32.mrb[41].mxu0 }
 0x2a1   : > { %12239 = vmatmul.mubr.bf16.vlgmr.msra.gmra.mrb[32].mxu1 %v15685_v40  ;;  %v13415_v2 = vld [vmem:[%s16365_s4 + $0x158] sm:$0xff]  }
 0x2a2   : > { %12242 = vmatprep.mubr.bf16.mxu1 %v15696_v55  ;;  %12255 = vmatpush3.bf16.msra.mxu1 %v13409_v42  ;;  %v6345_v42 = vld [vmem:[#allocation3 + $0x60] sm:$0xff]  ;;  %16490 = vst [vmem:[#allocation22_spill] sm:$0xff] %v15731_v50 }
 0x2a3   : > { %12461 = vmatpush3.bf16.msra.mxu0 %v13406_v1  ;;  %12256 = vmatprep.subr.bf16.mxu1 %v13411_v4  ;;  %v15725_v1 = vpack.c.bf16 %v6343_v3, %v6342_v14  ;;  %v15736_v5 = vpack.c.bf16 %v6345_v42, %v6344_v56  ;;  %v12089_v3 = vpop.f32.mrb[42].mxu0  ;;  %v7857_v14 = vld [vmem:[#allocation3 + $0xb9] sm:$0xff]  ;;  %v7859_v56 = vld [vmem:[#allocation3 + $0xc9] sm:$0xff] }
 0x2a4   : > { %12478 = vmatprep.subr.bf16.mxu0 %v13408_v62  ;;  %v15743_v44 = vadd.f32 %v12089_v3, %v15643_v29  ;;  %v5483_v50 = vpop.f32.mrb[43].mxu0  ;;  %v15749_v42 = vpack.c.bf16 %v7858_v9, %v7857_v14  ;;  %v13414_v3 = vld [vmem:[%s16365_s4 + $0xd8] sm:$0xff]   ;;  %v6348_v14 = vld [vmem:[#allocation3 + $0x78] sm:$0xff] }
 0x2a5   : > { %v15747_v48 = vadd.f32 %v15643_v29, %v5483_v50  ;;  %v6346_v9 = vld [vmem:[#allocation3 + $0x68] sm:$0xff] }
 0x2a6   : > { %12463 = vmatmul.mubr.msk.bf16.vlgmr.msra.gmra.mrb[48].mxu0 %vm16488_vm1, %v15709_v27  ;;  %12257 = vmatpush3.bf16.msra.mxu1 %v13411_v4  ;;  %v13412_v4 = vld [vmem:[%s16365_s4 + $0xd0] sm:$0xff]   ;;  %16492 = vst [vmem:[#allocation24_spill] sm:$0xff] %v15743_v44  ;;  %v13417_v44 = vld [vmem:[%s16365_s4 + $0x160] sm:$0xff]  }
 0x2a7   : > { %12466 = vmatprep.mubr.msk.bf16.mxu0 %vm16489_vm5, %v15717_v32  ;;  %12479 = vmatpush3.bf16.msra.mxu0 %v13408_v62  ;;  %v15739_v62 = vadd.f32 %v15643_v29, %v5480_v53  ;;  %16493 = vst [vmem:[#allocation25_spill] sm:$0xff] %v15747_v48  ;;  %v6347_v53 = vld [vmem:[#allocation3 + $0x70] sm:$0xff] }
 0x2a8   : > { %12480 = vmatprep.subr.bf16.mxu0 %v13410_v24  ;;  %12258 = vmatprep.subr.bf16.mxu1 %v13413_v37  ;;  %v15765_v50 = vpack.c.bf16 %v6347_v53, %v6346_v9  ;;  %v7861_v9 = vld [vmem:[#allocation3 + $0xd9] sm:$0xff] }
 0x2a9   : > { %16491 = vst [vmem:[#allocation23_spill] sm:$0xff] %v15739_v62  ;;  %12243 = vmatmul.mubr.bf16.gmra.mrb[36].mxu1 %v15725_v1  ;;  %v15757_v62 = vpack.c.bf16 %v7860_v35, %v7859_v56  ;;  %v13419_v35 = vld [vmem:[%s16365_s4 + $0x168] sm:$0xff]  }
 0x2aa   : > { %12246 = vmatprep.mubr.bf16.mxu1 %v15736_v5  ;;  %12259 = vmatpush3.bf16.msra.mxu1 %v13413_v37  ;;  %v6349_v37 = vld [vmem:[#allocation3 + $0x80] sm:$0xff] }
 0x2ab   : > { %12481 = vmatpush3.bf16.msra.mxu0 %v13410_v24  ;;  %12260 = vmatprep.subr.bf16.mxu1 %v13415_v2  ;;  %v12092_v24 = vpop.f32.mrb[44].mxu0  ;;  %v15776_v28 = vpack.c.bf16 %v6349_v37, %v6348_v14  ;;  %v15789_v37 = vpack.c.bf16 %v7862_v12, %v7861_v9  ;;  %v7863_v14 = vld [vmem:[#allocation3 + $0xe9] sm:$0xff] }
 0x2ac   : > { %12482 = vmatprep.subr.bf16.mxu0 %v13412_v4  ;;  %v15771_v56 = vadd.f32 %v12092_v24, %v15643_v29  ;;  %v5496_v48 = vpop.f32.mrb[45].mxu0  ;;  %v13425_v9 = vld [vmem:[%s16365_s4 + $0x180] sm:$0xff]  }
 0x2ad   : > { %v12093_v53 = vpop.f32.mrb[46].mxu0 }
 0x2ae   : > { %12467 = vmatmul.mubr.msk.bf16.gmra.mrb[52].mxu0 %vm16466_vm12, %v15749_v42  ;;  %12261 = vmatpush3.bf16.msra.mxu1 %v13415_v2  ;;  %16494 = vst [vmem:[#allocation26_spill] sm:$0xff] %v15771_v56  ;;  %v13416_v2 = vld [vmem:[%s16365_s4 + $0xe0] sm:$0xff]   ;;  %v15783_v24 = vadd.f32 %v12093_v53, %v15643_v29  ;;  %v5499_v56 = vpop.f32.mrb[47].mxu0  ;;  %v13418_v53 = vld [vmem:[%s16365_s4 + $0xe8] sm:$0xff]  }
 0x2af   : > { %12470 = vmatprep.mubr.msk.bf16.mxu0 %vm16467_vm7, %v15757_v62  ;;  %12483 = vmatpush3.bf16.msra.mxu0 %v13412_v4  ;;  %v15779_v4 = vadd.f32 %v15643_v29, %v5496_v48  ;;  %v15787_v57 = vadd.f32 %v15643_v29, %v5499_v56  ;;  %v6351_v48 = vld [vmem:[#allocation3 + $0x90] sm:$0xff]  ;;  %v6350_v29 = vld [vmem:[#allocation3 + $0x88] sm:$0xff] }
 0x2b0   : > { %12484 = vmatprep.subr.bf16.mxu0 %v13414_v3  ;;  %12262 = vmatprep.subr.bf16.mxu1 %v13417_v44  ;;  %16496 = vst [vmem:[#allocation28_spill] sm:$0xff] %v15783_v24  ;;  %v13421_v24 = vld [vmem:[%s16365_s4 + $0x170] sm:$0xff]   ;;  %v15805_v12 = vpack.c.bf16 %v6351_v48, %v6350_v29 }
 0x2b1   : > { %16495 = vst [vmem:[#allocation27_spill] sm:$0xff] %v15779_v4  ;;  %12247 = vmatmul.mubr.bf16.gmra.mrb[40].mxu1 %v15765_v50  ;;  %v15797_v4 = vpack.c.bf16 %v7864_v51, %v7863_v14  ;;  %v13420_v51 = vld [vmem:[%s16365_s4 + $0xf0] sm:$0xff]  }
 0x2b2   : > { %12250 = vmatprep.mubr.bf16.mxu1 %v15776_v28  ;;  %12263 = vmatpush3.bf16.msra.mxu1 %v13417_v44  ;;  %v13423_v44 = vld [vmem:[%s16365_s4 + $0x178] sm:$0xff]   ;;  %v13429_v48 = vld [vmem:[%s16365_s4 + $0x190] sm:$0xff]  }
 0x2b3   : > { %12485 = vmatpush3.bf16.msra.mxu0 %v13414_v3  ;;  %12264 = vmatprep.subr.bf16.mxu1 %v13419_v35  ;;  %v7865_v3 = vld [vmem:[#allocation3 + $0xf9] sm:$0xff]  ;;  %v6756_v14 = vld [vmem:[#allocation3 + $0x27] sm:$0xff] }
 0x2b4   : > { %12486 = vmatprep.subr.bf16.mxu0 %v13416_v2 }
 0x2b6   : > { %12471 = vmatmul.mubr.msk.bf16.gmra.mrb[56].mxu0 %vm16468_vm8, %v15789_v37  ;;  %12265 = vmatpush3.bf16.msra.mxu1 %v13419_v35  ;;  %v7866_v35 = vld [vmem:[#allocation3 + $0x101] sm:$0xff] }
 0x2b7   : > { %12474 = vmatprep.mubr.msk.bf16.mxu0 %vm16469_vm3, %v15797_v4  ;;  %12487 = vmatpush3.bf16.msra.mxu0 %v13416_v2  ;;  %v15817_v56 = vpack.c.bf16 %v7866_v35, %v7865_v3  ;;  %v13422_v2 = vld [vmem:[%s16365_s4 + $0xf8] sm:$0xff]   ;;  %v8285_v35 = vld [vmem:[#allocation3 + $0x98] sm:$0xff] }
 0x2b8   : > { %12488 = vmatprep.subr.bf16.mxu0 %v13418_v53  ;;  %12266 = vmatprep.subr.bf16.mxu1 %v13421_v24 }
 0x2b9   : > { %12251 = vmatmul.mubr.bf16.gmra.mrb[44].mxu1 %v15805_v12 }
 0x2ba   : > { %12267 = vmatpush3.bf16.msra.mxu1 %v13421_v24  ;;  %12270 = vmatprep.mubr.msk.bf16.mxu1 %vm16461_vm11, %v15260_v45  ;;  %v13427_v45 = vld [vmem:[%s16365_s4 + $0x188] sm:$0xff]   ;;  %v13424_v24 = vld [vmem:[%s16365_s4 + $0x100] sm:$0xff]  }
 0x2bb   : > { %12489 = vmatpush3.bf16.msra.mxu0 %v13418_v53  ;;  %12268 = vmatprep.subr.bf16.mxu1 %v13423_v44  ;;  %v6757_v53 = vld [vmem:[#allocation3 + $0x2f] sm:$0xff] }
 0x2bc   : > { %12490 = vmatprep.subr.bf16.mxu0 %v13420_v51  ;;  %v10426_v29 = vpack.c.bf16 %v6757_v53, %v6756_v14  ;;  %v8289_v14 = vld [vmem:[#allocation3 + $0xb8] sm:$0xff] }
 0x2bd   : > { %v13442_v53 = vld [vmem:[%s16365_s4 + $0x148] sm:$0xff]  }
 0x2be   : > { %12475 = vmatmul.mubr.msk.bf16.gmra.mrb[60].mxu0 %vm16470_vm14, %v15817_v56  ;;  %12269 = vmatpush3.bf16.msra.mxu1 %v13423_v44  ;;  %v8082_v44 = vld [vmem:[#allocation3 + $0x107] sm:$0xff] }
 0x2bf   : > { %12491 = vmatpush3.bf16.msra.mxu0 %v13420_v51  ;;  %12494 = vmatprep.mubr.msk.bf16.mxu0 %vm13635_vm2, %v15555_v19  ;;  %v13426_v19 = vld [vmem:[%s16365_s4 + $0x108] sm:$0xff]   ;;  %v8083_v51 = vld [vmem:[#allocation3 + $0x10f] sm:$0xff] }
 0x2c0   : > { %12492 = vmatprep.subr.bf16.mxu0 %v13422_v2  ;;  %12286 = vmatprep.subr.bf16.mxu1 %v13425_v9  ;;  %v15914_v3 = vpack.c.bf16 %v8083_v51, %v8082_v44  ;;  %v6765_v44 = vld [vmem:[#allocation3 + $0x6f] sm:$0xff]  ;;  %v6762_v51 = vld [vmem:[#allocation3 + $0x57] sm:$0xff] }
 0x2c1   : > { %12271 = vmatmul.mubr.msk.bf16.vlgmr.msra.gmra.mrb[32].mxu1 %vm16488_vm1, %v15264_v52  ;;  %v13431_v52 = vld [vmem:[%s16365_s4 + $0x198] sm:$0xff]  }
 0x2c2   : > { %12274 = vmatprep.mubr.msk.bf16.mxu1 %vm16489_vm5, %v15266_v59  ;;  %12287 = vmatpush3.bf16.msra.mxu1 %v13425_v9  ;;  %v13428_v59 = vld [vmem:[%s16365_s4 + $0x110] sm:$0xff]  }
 0x2c3   : > { %12493 = vmatpush3.bf16.msra.mxu0 %v13422_v2  ;;  %12288 = vmatprep.subr.bf16.mxu1 %v13427_v45  ;;  %v13438_v2 = vld [vmem:[%s16365_s4 + $0x138] sm:$0xff]  }
 0x2c4   : > { %12510 = vmatprep.subr.bf16.mxu0 %v13424_v24 }
 0x2c6   : > { %12495 = vmatmul.mubr.msk.bf16.vlgmr.msra.gmra.mrb[48].mxu0 %vm13762_vm4, %v15563_v30  ;;  %12289 = vmatpush3.bf16.msra.mxu1 %v13427_v45  ;;  %v13430_v30 = vld [vmem:[%s16365_s4 + $0x118] sm:$0xff]  }
 0x2c7   : > { %12498 = vmatprep.mubr.msk.bf16.mxu0 %vm13800_vm10, %v15591_v61  ;;  %12511 = vmatpush3.bf16.msra.mxu0 %v13424_v24  ;;  %v13433_v61 = vld [vmem:[%s16365_s4 + $0x1a0] sm:$0xff]   ;;  %v6760_v45 = vld [vmem:[#allocation3 + $0x47] sm:$0xff] }
 0x2c8   : > { %12512 = vmatprep.subr.bf16.mxu0 %v13426_v19  ;;  %12290 = vmatprep.subr.bf16.mxu1 %v13429_v48  ;;  %v6761_v24 = vld [vmem:[#allocation3 + $0x4f] sm:$0xff] }
 0x2c9   : > { %12275 = vmatmul.mubr.msk.bf16.gmra.mrb[36].mxu1 %vm16466_vm12, %v15272_v39  ;;  %v13435_v39 = vld [vmem:[%s16365_s4 + $0x1a8] sm:$0xff]  }
 0x2ca   : > { %12278 = vmatprep.mubr.msk.bf16.mxu1 %vm16467_vm7, %v15478_v23  ;;  %12291 = vmatpush3.bf16.msra.mxu1 %v13429_v48  ;;  %v13432_v23 = vld [vmem:[%s16365_s4 + $0x120] sm:$0xff]  }
 0x2cb   : > { %12513 = vmatpush3.bf16.msra.mxu0 %v13426_v19  ;;  %12292 = vmatprep.subr.bf16.mxu1 %v13431_v52  ;;  %v6758_v19 = vld [vmem:[#allocation3 + $0x37] sm:$0xff] }
 0x2cc   : > { %12514 = vmatprep.subr.bf16.mxu0 %v13428_v59 }
 0x2ce   : > { %12499 = vmatmul.mubr.msk.bf16.gmra.mrb[52].mxu0 %vm13821_vm15, %v15599_v15  ;;  %12293 = vmatpush3.bf16.msra.mxu1 %v13431_v52  ;;  %v13434_v15 = vld [vmem:[%s16365_s4 + $0x128] sm:$0xff]  }
 0x2cf   : > { %12502 = vmatprep.mubr.msk.bf16.mxu0 %vm13854_vm6, %v15627_v36  ;;  %12515 = vmatpush3.bf16.msra.mxu0 %v13428_v59  ;;  %v13437_v36 = vld [vmem:[%s16365_s4 + $0x1b0] sm:$0xff]   ;;  %v13443_v52 = vld [vmem:[%s16365_s4 + $0x1c8] sm:$0xff]   ;;  %v13440_v59 = vld [vmem:[%s16365_s4 + $0x140] sm:$0xff]  }
 0x2d0   : > { %12516 = vmatprep.subr.bf16.mxu0 %v13430_v30  ;;  %12294 = vmatprep.subr.bf16.mxu1 %v13433_v61 }
 0x2d1   : > { %12279 = vmatmul.mubr.msk.bf16.gmra.mrb[40].mxu1 %vm16468_vm8, %v15480_v25  ;;  %v13439_v25 = vld [vmem:[%s16365_s4 + $0x1b8] sm:$0xff]  }
 0x2d2   : > { %12282 = vmatprep.mubr.msk.bf16.mxu1 %vm16469_vm3, %v15502_v49  ;;  %12295 = vmatpush3.bf16.msra.mxu1 %v13433_v61  ;;  %v13436_v49 = vld [vmem:[%s16365_s4 + $0x130] sm:$0xff]   ;;  %v8288_v61 = vld [vmem:[#allocation3 + $0xb0] sm:$0xff] }
 0x2d3   : > { %12517 = vmatpush3.bf16.msra.mxu0 %v13430_v30  ;;  %12296 = vmatprep.subr.bf16.mxu1 %v13435_v39  ;;  %v10432_v30 = vpack.c.bf16 %v6761_v24, %v6760_v45  ;;  %v8294_v45 = vld [vmem:[#allocation3 + $0xe0] sm:$0xff]  ;;  %v8291_v24 = vld [vmem:[#allocation3 + $0xc8] sm:$0xff] }
 0x2d4   : > { %12518 = vmatprep.subr.bf16.mxu0 %v13432_v23 }
 0x2d6   : > { %12503 = vmatmul.mubr.msk.bf16.gmra.mrb[56].mxu0 %vm13924_vm0, %v15635_v47  ;;  %12297 = vmatpush3.bf16.msra.mxu1 %v13435_v39  ;;  %v8286_v47 = vld [vmem:[#allocation3 + $0xa0] sm:$0xff] }
 0x2d7   : > { %12506 = vmatprep.mubr.msk.bf16.mxu0 %vm13966_vm9, %v15669_v10  ;;  %12519 = vmatpush3.bf16.msra.mxu0 %v13432_v23  ;;  %v6759_v10 = vld [vmem:[#allocation3 + $0x3f] sm:$0xff]  ;;  %v15922_v9 = vpack.c.bf16 %v8286_v47, %v8285_v35  ;;  %v8287_v23 = vld [vmem:[#allocation3 + $0xa8] sm:$0xff] }
 0x2d8   : > { %12520 = vmatprep.subr.bf16.mxu0 %v13434_v15  ;;  %12298 = vmatprep.subr.bf16.mxu1 %v13437_v36  ;;  %v10429_v48 = vpack.c.bf16 %v6759_v10, %v6758_v19  ;;  %v8290_v39 = vld [vmem:[#allocation3 + $0xc0] sm:$0xff]  ;;  %v13447_v10 = vld [vmem:[%s16365_s4 + $0x1d8] sm:$0xff]  }
 0x2d9   : > { %12283 = vmatmul.mubr.msk.bf16.gmra.mrb[44].mxu1 %vm16470_vm14, %v15677_v17  ;;  %v13441_v17 = vld [vmem:[%s16365_s4 + $0x1c0] sm:$0xff]   ;;  %v13444_v35 = vld [vmem:[%s16365_s4 + $0x150] sm:$0xff]  }
 0x2da   : > { %12299 = vmatpush3.bf16.msra.mxu1 %v13437_v36  ;;  %12302 = vmatprep.mubr.msk.bf16.mxu1 %vm13635_vm2, %v10426_v29  ;;  %v15938_v36 = vpack.c.bf16 %v8288_v61, %v8287_v23  ;;  %v6764_v29 = vld [vmem:[#allocation3 + $0x67] sm:$0xff]  ;;  %v6767_v19 = vld [vmem:[#allocation3 + $0x7f] sm:$0xff]  ;;  %v6769_v23 = vld [vmem:[#allocation3 + $0x8f] sm:$0xff] }
 0x2db   : > { %12521 = vmatpush3.bf16.msra.mxu0 %v13434_v15  ;;  %12300 = vmatprep.subr.bf16.mxu1 %v13439_v25  ;;  %v6763_v15 = vld [vmem:[#allocation3 + $0x5f] sm:$0xff] }
 0x2dc   : > { %12522 = vmatprep.subr.bf16.mxu0 %v13436_v49  ;;  %v10435_v47 = vpack.c.bf16 %v6763_v15, %v6762_v51  ;;  %v6766_v15 = vld [vmem:[#allocation3 + $0x77] sm:$0xff]  ;;  %v8298_v51 = vld [vmem:[#allocation3 + $0x100] sm:$0xff] }
 0x2de   : > { %12507 = vmatmul.mubr.msk.bf16.gmra.mrb[60].mxu0 %vm16465_vm13, %v15914_v3  ;;  %12301 = vmatpush3.bf16.msra.mxu1 %v13439_v25  ;;  %v13445_v25 = vld [vmem:[%s16365_s4 + $0x1d0] sm:$0xff]  }
 0x2df   : > { %12523 = vmatpush3.bf16.msra.mxu0 %v13436_v49  ;;  %12526 = vmatprep.mubr.bf16.mxu0 %v15922_v9  ;;  %v15946_v49 = vpack.c.bf16 %v8290_v39, %v8289_v14  ;;  %v6768_v39 = vld [vmem:[#allocation3 + $0x87] sm:$0xff]  ;;  %v10441_v14 = vpack.c.bf16 %v6767_v19, %v6766_v15  ;;  %v6770_v19 = vld [vmem:[#allocation3 + $0x97] sm:$0xff] }
 0x2e0   : > { %12524 = vmatprep.subr.bf16.mxu0 %v13438_v2  ;;  %12318 = vmatprep.subr.bf16.mxu1 %v13441_v17 }
 0x2e1   : > { %12303 = vmatmul.mubr.msk.bf16.vlgmr.msra.gmra.mrb[32].mxu1 %vm13762_vm4, %v10429_v48 }
 0x2e2   : > { %12306 = vmatprep.mubr.msk.bf16.mxu1 %vm13800_vm10, %v10432_v30  ;;  %12319 = vmatpush3.bf16.msra.mxu1 %v13441_v17  ;;  %v8292_v17 = vld [vmem:[#allocation3 + $0xd0] sm:$0xff] }
 0x2e3   : > { %12525 = vmatpush3.bf16.msra.mxu0 %v13438_v2  ;;  %12320 = vmatprep.subr.bf16.mxu1 %v13443_v52  ;;  %v10438_v2 = vpack.c.bf16 %v6765_v44, %v6764_v29  ;;  %v15960_v48 = vpack.c.bf16 %v8292_v17, %v8291_v24  ;;  %v13449_v30 = vld [vmem:[%s16365_s4 + $0x1e0] sm:$0xff]   ;;  %v10444_v29 = vpack.c.bf16 %v6769_v23, %v6768_v39  ;;  %v13450_v17 = vld [vmem:[%s16365_s4 + $0x168] sm:$0xff]   ;;  %v8299_v23 = vld [vmem:[#allocation3 + $0x108] sm:$0xff] }
 0x2e4   : > { %12542 = vmatprep.subr.bf16.mxu0 %v13440_v59  ;;  %v8296_v44 = vld [vmem:[#allocation3 + $0xf0] sm:$0xff] }
 0x2e5   : > { %v8300_v39 = vld [vmem:[#allocation3 + $0x110] sm:$0xff] }
 0x2e6   : > { %12527 = vmatmul.mubr.bf16.vlgmr.msra.gmra.mrb[48].mxu0 %v15938_v36  ;;  %12321 = vmatpush3.bf16.msra.mxu1 %v13443_v52  ;;  %v8293_v52 = vld [vmem:[#allocation3 + $0xd8] sm:$0xff]  ;;  %v16003_v15 = vpack.c.bf16 %v8300_v39, %v8299_v23  ;;  %v7180_v39 = vld [vmem:[#allocation3 + $0x49] sm:$0xff] }
 0x2e7   : > { %12530 = vmatprep.mubr.bf16.mxu0 %v15946_v49  ;;  %12543 = vmatpush3.bf16.msra.mxu0 %v13440_v59  ;;  %v13446_v59 = vld [vmem:[%s16365_s4 + $0x158] sm:$0xff]   ;;  %v15968_v61 = vpack.c.bf16 %v8294_v45, %v8293_v52  ;;  %v13453_v45 = vld [vmem:[%s16365_s4 + $0x1f0] sm:$0xff]   ;;  %v13472_v23 = vld [vmem:[%s16365_s4 + $0x1c0] sm:$0xff]  }
 0x2e8   : > { %12544 = vmatprep.subr.bf16.mxu0 %v13442_v53  ;;  %12322 = vmatprep.subr.bf16.mxu1 %v13445_v25 }
 0x2e9   : > { %12307 = vmatmul.mubr.msk.bf16.gmra.mrb[36].mxu1 %vm13821_vm15, %v10435_v47  ;;  %v8295_v47 = vld [vmem:[#allocation3 + $0xe8] sm:$0xff] }
 0x2ea   : > { %12310 = vmatprep.mubr.msk.bf16.mxu1 %vm13854_vm6, %v10438_v2  ;;  %12323 = vmatpush3.bf16.msra.mxu1 %v13445_v25  ;;  %v13448_v25 = vld [vmem:[%s16365_s4 + $0x160] sm:$0xff]   ;;  %v8297_v2 = vld [vmem:[#allocation3 + $0xf8] sm:$0xff] }
 0x2eb   : > { %12545 = vmatpush3.bf16.msra.mxu0 %v13442_v53  ;;  %12324 = vmatprep.subr.bf16.mxu1 %v13447_v10  ;;  %v13451_v53 = vld [vmem:[%s16365_s4 + $0x1e8] sm:$0xff]   ;;  %v15990_v24 = vpack.c.bf16 %v8298_v51, %v8297_v2  ;;  %v13468_v51 = vld [vmem:[%s16365_s4 + $0x1b0] sm:$0xff]  }
 0x2ec   : > { %12546 = vmatprep.subr.bf16.mxu0 %v13444_v35  ;;  %v8703_v2 = vld [vmem:[#allocation3 + $0xa7] sm:$0xff] }
 0x2ee   : > { %12531 = vmatmul.mubr.bf16.gmra.mrb[52].mxu0 %v15960_v48  ;;  %12325 = vmatpush3.bf16.msra.mxu1 %v13447_v10  ;;  %v6771_v10 = vld [vmem:[#allocation3 + $0x9f] sm:$0xff] }
 0x2ef   : > { %12534 = vmatprep.mubr.bf16.mxu0 %v15968_v61  ;;  %12547 = vmatpush3.bf16.msra.mxu0 %v13444_v35  ;;  %v15982_v35 = vpack.c.bf16 %v8296_v44, %v8295_v47  ;;  %v10447_v52 = vpack.c.bf16 %v6771_v10, %v6770_v19  ;;  %v7177_v44 = vld [vmem:[#allocation3 + $0x31] sm:$0xff]  ;;  %v8500_v10 = vld [vmem:[#allocation3 + $0x109] sm:$0xff]  ;;  %v7178_v19 = vld [vmem:[#allocation3 + $0x39] sm:$0xff] }
 0x2f0   : > { %12548 = vmatprep.subr.bf16.mxu0 %v13446_v59  ;;  %12326 = vmatprep.subr.bf16.mxu1 %v13449_v30 }
 0x2f1   : > { %12311 = vmatmul.mubr.msk.bf16.gmra.mrb[40].mxu1 %vm13924_vm0, %v10441_v14  ;;  %v13454_v14 = vld [vmem:[%s16365_s4 + $0x178] sm:$0xff]  }
 0x2f2   : > { %12314 = vmatprep.mubr.msk.bf16.mxu1 %vm13966_vm9, %v10444_v29  ;;  %12327 = vmatpush3.bf16.msra.mxu1 %v13449_v30  ;;  %v13452_v30 = vld [vmem:[%s16365_s4 + $0x170] sm:$0xff]  }
 0x2f3   : > { %12549 = vmatpush3.bf16.msra.mxu0 %v13446_v59  ;;  %12328 = vmatprep.subr.bf16.mxu1 %v13451_v53  ;;  %v13455_v59 = vld [vmem:[%s16365_s4 + $0x1f8] sm:$0xff]   ;;  %v13461_v29 = vld [vmem:[%s16365_s4 + $0x210] sm:$0xff]  }
 0x2f4   : > { %12550 = vmatprep.subr.bf16.mxu0 %v13448_v25 }
 0x2f6   : > { %12535 = vmatmul.mubr.bf16.gmra.mrb[56].mxu0 %v15982_v35  ;;  %12329 = vmatpush3.bf16.msra.mxu1 %v13451_v53  ;;  %v13457_v53 = vld [vmem:[%s16365_s4 + $0x200] sm:$0xff]  }
 0x2f7   : > { %12538 = vmatprep.mubr.bf16.mxu0 %v15990_v24  ;;  %12551 = vmatpush3.bf16.msra.mxu0 %v13448_v25  ;;  %v13456_v25 = vld [vmem:[%s16365_s4 + $0x180] sm:$0xff]  }
 0x2f8   : > { %12552 = vmatprep.subr.bf16.mxu0 %v13450_v17  ;;  %12330 = vmatprep.subr.bf16.mxu1 %v13453_v45 }
 0x2f9   : > { %12315 = vmatmul.mubr.msk.bf16.gmra.mrb[44].mxu1 %vm16465_vm13, %v10447_v52  ;;  %v7179_v52 = vld [vmem:[#allocation3 + $0x41] sm:$0xff] }
 0x2fa   : > { %12331 = vmatpush3.bf16.msra.mxu1 %v13453_v45  ;;  %12334 = vmatprep.mubr.bf16.mxu1 %v15685_v40  ;;  %v13459_v40 = vld [vmem:[%s16365_s4 + $0x208] sm:$0xff]   ;;  %v13470_v45 = vld [vmem:[%s16365_s4 + $0x1b8] sm:$0xff]  }
 0x2fb   : > { %12553 = vmatpush3.bf16.msra.mxu0 %v13450_v17  ;;  %12332 = vmatprep.subr.bf16.mxu1 %v13455_v59  ;;  %v8704_v17 = vld [vmem:[#allocation3 + $0xaf] sm:$0xff] }
 0x2fc   : > { %12554 = vmatprep.subr.bf16.mxu0 %v13452_v30 }
 0x2fe   : > { %12539 = vmatmul.mubr.bf16.gmra.mrb[60].mxu0 %v16003_v15  ;;  %12333 = vmatpush3.bf16.msra.mxu1 %v13455_v59  ;;  %v10771_v59 = vpack.c.bf16 %v8704_v17, %v8703_v2  ;;  %v7189_v2 = vld [vmem:[#allocation3 + $0x91] sm:$0xff] }
 0x2ff   : > { %12555 = vmatpush3.bf16.msra.mxu0 %v13452_v30  ;;  %12558 = vmatprep.mubr.msk.bf16.mxu0 %vm16461_vm11, %v15709_v27  ;;  %v13458_v27 = vld [vmem:[%s16365_s4 + $0x188] sm:$0xff]  }
 0x300   : > { %12556 = vmatprep.subr.bf16.mxu0 %v13454_v14  ;;  %12350 = vmatprep.subr.bf16.mxu1 %v13457_v53  ;;  %v7181_v30 = vld [vmem:[#allocation3 + $0x51] sm:$0xff] }
 0x301   : > { %12335 = vmatmul.mubr.bf16.vlgmr.msra.gmra.mrb[32].mxu1 %v15696_v55  ;;  %v13463_v55 = vld [vmem:[%s16365_s4 + $0x218] sm:$0xff]  }
 0x302   : > { %12338 = vmatprep.mubr.bf16.mxu1 %v15725_v1  ;;  %12351 = vmatpush3.bf16.msra.mxu1 %v13457_v53  ;;  %v13460_v1 = vld [vmem:[%s16365_s4 + $0x190] sm:$0xff]  }
 0x303   : > { %12557 = vmatpush3.bf16.msra.mxu0 %v13454_v14  ;;  %12352 = vmatprep.subr.bf16.mxu1 %v13459_v40  ;;  %v10504_v14 = vpack.c.bf16 %v7181_v30, %v7180_v39  ;;  %v8706_v53 = vld [vmem:[#allocation3 + $0xbf] sm:$0xff] }
 0x304   : > { %12574 = vmatprep.subr.bf16.mxu0 %v13456_v25  ;;  %v13477_v30 = vld [vmem:[%s16365_s4 + $0x1e8] sm:$0xff]   ;;  %v7191_v39 = vld [vmem:[#allocation3 + $0xa1] sm:$0xff] }
 0x306   : > { %12559 = vmatmul.mubr.msk.bf16.vlgmr.msra.gmra.mrb[48].mxu0 %vm16488_vm1, %v15717_v32  ;;  %12353 = vmatpush3.bf16.msra.mxu1 %v13459_v40  ;;  %v13462_v32 = vld [vmem:[%s16365_s4 + $0x198] sm:$0xff]  }
 0x307   : > { %12562 = vmatprep.mubr.msk.bf16.mxu0 %vm16489_vm5, %v15749_v42  ;;  %12575 = vmatpush3.bf16.msra.mxu0 %v13456_v25  ;;  %v13465_v42 = vld [vmem:[%s16365_s4 + $0x220] sm:$0xff]   ;;  %v8707_v40 = vld [vmem:[#allocation3 + $0xc7] sm:$0xff] }
 0x308   : > { %12576 = vmatprep.subr.bf16.mxu0 %v13458_v27  ;;  %12354 = vmatprep.subr.bf16.mxu1 %v13461_v29  ;;  %v8708_v25 = vld [vmem:[#allocation3 + $0xcf] sm:$0xff] }
 0x309   : > { %12339 = vmatmul.mubr.bf16.gmra.mrb[36].mxu1 %v15736_v5  ;;  %v13467_v5 = vld [vmem:[%s16365_s4 + $0x228] sm:$0xff]  }
 0x30a   : > { %12342 = vmatprep.mubr.bf16.mxu1 %v15765_v50  ;;  %12355 = vmatpush3.bf16.msra.mxu1 %v13461_v29  ;;  %v13464_v50 = vld [vmem:[%s16365_s4 + $0x1a0] sm:$0xff]   ;;  %v13473_v29 = vld [vmem:[%s16365_s4 + $0x1c8] sm:$0xff]  }
 0x30b   : > { %12577 = vmatpush3.bf16.msra.mxu0 %v13458_v27  ;;  %12356 = vmatprep.subr.bf16.mxu1 %v13463_v55  ;;  %v10774_v27 = vpack.c.bf16 %v8706_v53, %v8705_v22  ;;  %v8717_v53 = vld [vmem:[#allocation3 + $0x117] sm:$0xff] }
 0x30c   : > { %12578 = vmatprep.subr.bf16.mxu0 %v13460_v1 }
 0x30e   : > { %12563 = vmatmul.mubr.msk.bf16.gmra.mrb[52].mxu0 %vm16466_vm12, %v15757_v62  ;;  %12357 = vmatpush3.bf16.msra.mxu1 %v13463_v55  ;;  %v13466_v62 = vld [vmem:[%s16365_s4 + $0x1a8] sm:$0xff]  }
 0x30f   : > { %12566 = vmatprep.mubr.msk.bf16.mxu0 %vm16467_vm7, %v15789_v37  ;;  %12579 = vmatpush3.bf16.msra.mxu0 %v13460_v1  ;;  %v13469_v37 = vld [vmem:[%s16365_s4 + $0x230] sm:$0xff]  }
 0x310   : > { %12580 = vmatprep.subr.bf16.mxu0 %v13462_v32  ;;  %12358 = vmatprep.subr.bf16.mxu1 %v13465_v42  ;;  %v7182_v55 = vld [vmem:[#allocation3 + $0x59] sm:$0xff]  ;;  %v7183_v1 = vld [vmem:[#allocation3 + $0x61] sm:$0xff] }
 0x311   : > { %12343 = vmatmul.mubr.bf16.gmra.mrb[40].mxu1 %v15776_v28  ;;  %v7176_v28 = vld [vmem:[#allocation3 + $0x29] sm:$0xff] }
 0x312   : > { %12346 = vmatprep.mubr.bf16.mxu1 %v15805_v12  ;;  %12359 = vmatpush3.bf16.msra.mxu1 %v13465_v42  ;;  %v13471_v12 = vld [vmem:[%s16365_s4 + $0x238] sm:$0xff]   ;;  %v10498_v47 = vpack.c.bf16 %v7177_v44, %v7176_v28  ;;  %v7185_v42 = vld [vmem:[#allocation3 + $0x71] sm:$0xff]  ;;  %v8710_v44 = vld [vmem:[#allocation3 + $0xdf] sm:$0xff] }
 0x313   : > { %12581 = vmatpush3.bf16.msra.mxu0 %v13462_v32  ;;  %12360 = vmatprep.subr.bf16.mxu1 %v13467_v5  ;;  %v10777_v32 = vpack.c.bf16 %v8708_v25, %v8707_v40  ;;  %v8711_v28 = vld [vmem:[#allocation3 + $0xe7] sm:$0xff]  ;;  %v10780_v33 = vpack.c.bf16 %v8710_v44, %v8709_v60  ;;  %v8718_v40 = vld [vmem:[#allocation3 + $0x11f] sm:$0xff]  ;;  %v9130_v44 = vld [vmem:[#allocation3 + $0xf1] sm:$0xff] }
 0x314   : > { %12582 = vmatprep.subr.bf16.mxu0 %v13464_v50  ;;  %v10792_v25 = vpack.c.bf16 %v8718_v40, %v8717_v53  ;;  %v9131_v60 = vld [vmem:[#allocation3 + $0xf9] sm:$0xff] }
 0x316   : > { %12567 = vmatmul.mubr.msk.bf16.gmra.mrb[56].mxu0 %vm16468_vm8, %v15797_v4  ;;  %12361 = vmatpush3.bf16.msra.mxu1 %v13467_v5  ;;  %v8501_v4 = vld [vmem:[#allocation3 + $0x111] sm:$0xff]  ;;  %v10507_v5 = vpack.c.bf16 %v7183_v1, %v7182_v55  ;;  %v13487_v55 = vld [vmem:[%s16365_s4 + $0x238] sm:$0xff]  }
 0x317   : > { %12570 = vmatprep.mubr.msk.bf16.mxu0 %vm16469_vm3, %v15817_v56  ;;  %12583 = vmatpush3.bf16.msra.mxu0 %v13464_v50  ;;  %v16084_v56 = vpack.c.bf16 %v8501_v4, %v8500_v10  ;;  %v7184_v50 = vld [vmem:[#allocation3 + $0x69] sm:$0xff]  ;;  %v7187_v10 = vld [vmem:[#allocation3 + $0x81] sm:$0xff] }
 0x318   : > { %12584 = vmatprep.subr.bf16.mxu0 %v13466_v62  ;;  %12362 = vmatprep.subr.bf16.mxu1 %v13469_v37 }
 0x319   : > { %12347 = vmatmul.mubr.bf16.gmra.mrb[44].mxu1 %v15922_v9  ;;  %v10501_v9 = vpack.c.bf16 %v7179_v52, %v7178_v19  ;;  %v13476_v19 = vld [vmem:[%s16365_s4 + $0x1e0] sm:$0xff]  }
 0x31a   : > { %12363 = vmatpush3.bf16.msra.mxu1 %v13469_v37  ;;  %12366 = vmatprep.mubr.msk.bf16.mxu1 %vm16461_vm11, %v10498_v47  ;;  %v10510_v37 = vpack.c.bf16 %v7185_v42, %v7184_v50  ;;  %v7186_v47 = vld [vmem:[#allocation3 + $0x79] sm:$0xff] }
 0x31b   : > { %12585 = vmatpush3.bf16.msra.mxu0 %v13466_v62  ;;  %12364 = vmatprep.subr.bf16.mxu1 %v13471_v12  ;;  %v13474_v62 = vld [vmem:[%s16365_s4 + $0x1d0] sm:$0xff]   ;;  %v10513_v17 = vpack.c.bf16 %v7187_v10, %v7186_v47  ;;  %v10864_v47 = vpack.c.bf16 %v9136_v34, %v9135_v7 }
 0x31c   : > { %12586 = vmatprep.subr.bf16.mxu0 %v13468_v51 }
 0x31e   : > { %12571 = vmatmul.mubr.msk.bf16.gmra.mrb[60].mxu0 %vm16470_vm14, %v16084_v56  ;;  %12365 = vmatpush3.bf16.msra.mxu1 %v13471_v12  ;;  %v8712_v12 = vld [vmem:[#allocation3 + $0xef] sm:$0xff] }
 0x31f   : > { %12587 = vmatpush3.bf16.msra.mxu0 %v13468_v51  ;;  %12590 = vmatprep.mubr.msk.bf16.mxu0 %vm13635_vm2, %v10771_v59  ;;  %v13475_v51 = vld [vmem:[%s16365_s4 + $0x1d8] sm:$0xff]   ;;  %v10783_v4 = vpack.c.bf16 %v8712_v12, %v8711_v28  ;;  %v8714_v59 = vld [vmem:[#allocation3 + $0xff] sm:$0xff]  ;;  %v10855_v12 = vpack.c.bf16 %v9130_v44, %v9129_v63 }
 0x320   : > { %12588 = vmatprep.subr.bf16.mxu0 %v13470_v45  ;;  %v10786_v21 = vpack.c.bf16 %v8714_v59, %v8713_v54  ;;  %v5396_v54 = vadd.f32 %v16207_v38, %v15517_v0 }
 0x321   : > { %12367 = vmatmul.mubr.msk.bf16.vlgmr.msra.gmra.mrb[32].mxu1 %vm16488_vm1, %v10501_v9  ;;  %v7190_v9 = vld [vmem:[#allocation3 + $0x99] sm:$0xff] }
 0x322   : > { %12370 = vmatprep.mubr.msk.bf16.mxu1 %vm16489_vm5, %v10504_v14  ;;  %v13478_v14 = vld [vmem:[%s16365_s4 + $0x1f0] sm:$0xff]  }
 0x323   : > { %12589 = vmatpush3.bf16.msra.mxu0 %v13470_v45  ;;  %v7188_v45 = vld [vmem:[#allocation3 + $0x89] sm:$0xff] }
 0x324   : > { %12606 = vmatprep.subr.bf16.mxu0 %v13472_v23  ;;  %v10516_v52 = vpack.c.bf16 %v7189_v2, %v7188_v45  ;;  %v5393_v2 = vadd.f32 %v16207_v38, %v15504_v26 }
 0x326   : > { %12591 = vmatmul.mubr.msk.bf16.vlgmr.msra.gmra.mrb[48].mxu0 %vm13762_vm4, %v10774_v27  ;;  %v9122_v27 = vld [vmem:[#allocation3 + $0xb1] sm:$0xff] }
 0x327   : > { %12594 = vmatprep.mubr.msk.bf16.mxu0 %vm13800_vm10, %v10777_v32  ;;  %12607 = vmatpush3.bf16.msra.mxu0 %v13472_v23  ;;  %v10519_v23 = vpack.c.bf16 %v7191_v39, %v7190_v9  ;;  %v9126_v32 = vld [vmem:[#allocation3 + $0xd1] sm:$0xff] }
 0x328   : > { %12608 = vmatprep.subr.bf16.mxu0 %v13473_v29 }
 0x329   : > { %12371 = vmatmul.mubr.msk.bf16.gmra.mrb[36].mxu1 %vm16466_vm12, %v10507_v5  ;;  %v9125_v5 = vld [vmem:[#allocation3 + $0xc9] sm:$0xff] }
 0x32a   : > { %12374 = vmatprep.mubr.msk.bf16.mxu1 %vm16467_vm7, %v10510_v37  ;;  %v10849_v50 = vpack.c.bf16 %v9126_v32, %v9125_v5  ;;  %v9128_v37 = vld [vmem:[#allocation3 + $0xe1] sm:$0xff]  ;;  %v16498_v5 = vld [vmem:[#allocation6_spill] sm:$0xff] }
 0x32b   : > { %12609 = vmatpush3.bf16.msra.mxu0 %v13473_v29  ;;  %v9121_v29 = vld [vmem:[#allocation3 + $0xa9] sm:$0xff] }
 0x32c   : > { %12610 = vmatprep.subr.bf16.mxu0 %v13474_v62  ;;  %v10843_v1 = vpack.c.bf16 %v9122_v27, %v9121_v29 }
 0x32e   : > { %12595 = vmatmul.mubr.msk.bf16.gmra.mrb[52].mxu0 %vm13821_vm15, %v10780_v33  ;;  %v9132_v33 = vld [vmem:[#allocation3 + $0x101] sm:$0xff] }
 0x32f   : > { %12598 = vmatprep.mubr.msk.bf16.mxu0 %vm13854_vm6, %v10783_v4  ;;  %12611 = vmatpush3.bf16.msra.mxu0 %v13474_v62  ;;  %v9127_v62 = vld [vmem:[#allocation3 + $0xd9] sm:$0xff] }
 0x330   : > { %12612 = vmatprep.subr.bf16.mxu0 %v13475_v51  ;;  %v10852_v28 = vpack.c.bf16 %v9128_v37, %v9127_v62 }
 0x331   : > { %12375 = vmatmul.mubr.msk.bf16.gmra.mrb[40].mxu1 %vm16468_vm8, %v10513_v17 }
 0x332   : > { %12378 = vmatprep.mubr.msk.bf16.mxu1 %vm16469_vm3, %v10516_v52  ;;  %v5385_v52 = vadd.f32 %v16207_v38, %v15509_v11 }
 0x333   : > { %12613 = vmatpush3.bf16.msra.mxu0 %v13475_v51  ;;  %v10858_v51 = vpack.c.bf16 %v9132_v33, %v9131_v60  ;;  %v16500_v33 = vld [vmem:[#allocation8_spill] sm:$0xff] }
 0x334   : > { %12614 = vmatprep.subr.bf16.mxu0 %v13476_v19 }
 0x336   : > { %12599 = vmatmul.mubr.msk.bf16.gmra.mrb[56].mxu0 %vm13924_vm0, %v10786_v21 }
 0x337   : > { %12602 = vmatprep.mubr.msk.bf16.mxu0 %vm13966_vm9, %v15914_v3  ;;  %12615 = vmatpush3.bf16.msra.mxu0 %v13476_v19  ;;  %v13481_v3 = vld [vmem:[%s16365_s4 + $0x208] sm:$0xff]  }
 0x338   : > { %12616 = vmatprep.subr.bf16.mxu0 %v13477_v30 }
 0x339   : > { %12379 = vmatmul.mubr.msk.bf16.gmra.mrb[44].mxu1 %vm16470_vm14, %v10519_v23 }
 0x33b   : > { %12617 = vmatpush3.bf16.msra.mxu0 %v13477_v30  ;;  %v5388_v30 = vadd.f32 %v16207_v38, %v15522_v20  ;;  %v5409_v20 = vadd.f32 %v16207_v38, %v15532_v46 }
 0x33c   : > { %12618 = vmatprep.subr.bf16.mxu0 %v13478_v14 }
 0x33e   : > { %12603 = vmatmul.mubr.msk.bf16.gmra.mrb[60].mxu0 %vm16465_vm13, %v10792_v25 }
 0x33f   : > { %12619 = vmatpush3.bf16.msra.mxu0 %v13478_v14  ;;  %12622 = vmatprep.mubr.bf16.mxu0 %v15938_v36  ;;  %v13483_v36 = vld [vmem:[%s16365_s4 + $0x218] sm:$0xff]  }
 0x340   : > { %12620 = vmatprep.subr.bf16.mxu0 %v13479_v6 }
 0x343   : > { %12621 = vmatpush3.bf16.msra.mxu0 %v13479_v6 }
 0x344   : > { %12638 = vmatprep.subr.bf16.mxu0 %v13480_v41 }
 0x346   : > { %12623 = vmatmul.mubr.bf16.vlgmr.msra.gmra.mrb[48].mxu0 %v15946_v49  ;;  %v13484_v49 = vld [vmem:[%s16365_s4 + $0x220] sm:$0xff]  }
 0x347   : > { %12626 = vmatprep.mubr.bf16.mxu0 %v15960_v48  ;;  %12639 = vmatpush3.bf16.msra.mxu0 %v13480_v41  ;;  %v13485_v48 = vld [vmem:[%s16365_s4 + $0x228] sm:$0xff]  }
 0x348   : > { %12640 = vmatprep.subr.bf16.mxu0 %v13481_v3 }
 0x34b   : > { %12641 = vmatpush3.bf16.msra.mxu0 %v13481_v3 }
 0x34c   : > { %12642 = vmatprep.subr.bf16.mxu0 %v13482_v16 }
 0x34e   : > { %12627 = vmatmul.mubr.bf16.gmra.mrb[52].mxu0 %v15968_v61  ;;  %v13486_v61 = vld [vmem:[%s16365_s4 + $0x230] sm:$0xff]  }
 0x34f   : > { %12630 = vmatprep.mubr.bf16.mxu0 %v15982_v35  ;;  %12643 = vmatpush3.bf16.msra.mxu0 %v13482_v16  ;;  %v13493_v35 = vld [vmem:[#allocation2 + $0x8] sm:$0xff] }
 0x350   : > { %12644 = vmatprep.subr.bf16.mxu0 %v13483_v36  ;;  %v8943_v22 = vpack.c.bf16 %v13493_v35, %v13493_v35 }
 0x353   : > { %12645 = vmatpush3.bf16.msra.mxu0 %v13483_v36  ;;  %v5401_v36 = vadd.f32 %v16207_v38, %v15540_v31 }
 0x354   : > { %12646 = vmatprep.subr.bf16.mxu0 %v13484_v49 }
 0x356   : > { %12631 = vmatmul.mubr.bf16.gmra.mrb[56].mxu0 %v15990_v24  ;;  %v9123_v24 = vld [vmem:[#allocation3 + $0xb9] sm:$0xff] }
 0x357   : > { %12634 = vmatprep.mubr.bf16.mxu0 %v16003_v15  ;;  %12647 = vmatpush3.bf16.msra.mxu0 %v13484_v49  ;;  %v9124_v15 = vld [vmem:[#allocation3 + $0xc1] sm:$0xff] }
 0x358   : > { %12648 = vmatprep.subr.bf16.mxu0 %v13485_v48  ;;  %v10846_v42 = vpack.c.bf16 %v9124_v15, %v9123_v24 }
 0x35b   : > { %12649 = vmatpush3.bf16.msra.mxu0 %v13485_v48 }
 0x35c   : > { %12650 = vmatprep.subr.bf16.mxu0 %v13486_v61 }
 0x35e   : > { %12635 = vmatmul.mubr.bf16.gmra.mrb[60].mxu0 %v8943_v22  ;;  %v16497_v22 = vld [vmem:[#allocation5_spill] sm:$0xff] }
 0x35f   : > { %12651 = vmatpush3.bf16.msra.mxu0 %v13486_v61  ;;  %12654 = vmatprep.mubr.msk.bf16.mxu0 %vm16461_vm11, %v10843_v1  ;;  %v5412_v61 = vadd.f32 %v16207_v38, %v15545_v58  ;;  %v5404_v27 = vadd.f32 %v16207_v38, %v16497_v22 }
 0x360   : > { %12652 = vmatprep.subr.bf16.mxu0 %v13487_v55 }
 0x363   : > { %12653 = vmatpush3.bf16.msra.mxu0 %v13487_v55 }
 0x366   : > { %12655 = vmatmul.mubr.msk.bf16.vlgmr.msra.gmra.mrb[48].mxu0 %vm16488_vm1, %v10846_v42 }
 0x367   : > { %12658 = vmatprep.mubr.msk.bf16.mxu0 %vm16489_vm5, %v10849_v50  ;;  %v5425_v50 = vadd.f32 %v16207_v38, %v16498_v5  ;;  %v16509_v5 = vld [vmem:[#allocation17_spill] sm:$0xff] }
 0x36e   : > { %12659 = vmatmul.mubr.msk.bf16.gmra.mrb[52].mxu0 %vm16466_vm12, %v10852_v28  ;;  %v16499_v28 = vld [vmem:[#allocation7_spill] sm:$0xff] }
 0x36f   : > { %12662 = vmatprep.mubr.msk.bf16.mxu0 %vm16467_vm7, %v10855_v12  ;;  %v5417_v63 = vadd.f32 %v16207_v38, %v16499_v28 }
 0x376   : > { %12663 = vmatmul.mubr.msk.bf16.gmra.mrb[56].mxu0 %vm16468_vm8, %v10858_v51  ;;  %v5428_v51 = vadd.f32 %v16207_v38, %v16500_v33 }
 0x377   : > { %12666 = vmatprep.mubr.msk.bf16.mxu0 %vm16469_vm3, %v16084_v56 }
 0x37e   : > { %12667 = vmatmul.mubr.msk.bf16.gmra.mrb[60].mxu0 %vm16470_vm14, %v10864_v47  ;;  %v16501_v47 = vld [vmem:[#allocation9_spill] sm:$0xff] }
 0x3f4   : > { %v12368_v13 = vpop.f32.mrb[32].mxu1 }
 0x3f5   : > { %v7402_v10 = vadd.f32 %v12368_v13, %v16198_v43  ;;  %v7315_v18 = vpop.f32.mrb[33].mxu1  ;;  %v5420_v13 = vadd.f32 %v16207_v38, %v16501_v47 }
 0x3f6   : > { %v7400_v56 = vadd.f32 %v16198_v43, %v7315_v18  ;;  %v12369_v4 = vpop.f32.mrb[34].mxu1 }
 0x3f7   : > { %v7419_v17 = vmul.f32 %v16200_v8, %v7402_v10  ;;  %v7403_v45 = vadd.f32 %v12369_v4, %v16198_v43  ;;  %v7318_v19 = vpop.f32.mrb[35].mxu1 }
 0x3f8   : > { %v7417_v59 = vmul.f32 %v16200_v8, %v7400_v56  ;;  %v7401_v26 = vadd.f32 %v16198_v43, %v7318_v19 }
 0x3f9   : > { %v7435_v21 = vadd.f32 %v7419_v17, %v5393_v2  ;;  %v7420_v11 = vmul.f32 %v16200_v8, %v7403_v45 }
 0x3fa   : > { %v7433_v9 = vadd.f32 %v7417_v59, %v5385_v52  ;;  %v7418_v39 = vmul.f32 %v16200_v8, %v7401_v26  ;;  %v16502_v59 = vld [vmem:[#allocation10_spill] sm:$0xff] }
 0x3fb   : > { %7451 = vst [vmem:[%s16220_s15 + $0x10] sm:$0xff] %v7435_v21  ;;  %v7436_v23 = vadd.f32 %v7420_v11, %v5396_v54  ;;  %v5441_v26 = vadd.f32 %v16207_v38, %v16502_v59 }
 0x3fc   : > { %7449 = vst [vmem:[%s16220_s15] sm:$0xff] %v7433_v9  ;;  %v7434_v14 = vadd.f32 %v7418_v39, %v5388_v30  ;;  %v12372_v53 = vpop.f32.mrb[36].mxu1  ;;  %v16503_v30 = vld [vmem:[#allocation11_spill] sm:$0xff] }
 0x3fd   : > { %7452 = vst [vmem:[%s16220_s15 + $0x18] sm:$0xff] %v7436_v23  ;;  %v7406_v40 = vadd.f32 %v12372_v53, %v16198_v43  ;;  %v7331_v25 = vpop.f32.mrb[37].mxu1  ;;  %v5433_v9 = vadd.f32 %v16207_v38, %v16503_v30 }
 0x3fe   : > { %7450 = vst [vmem:[%s16220_s15 + $0x8] sm:$0xff] %v7434_v14  ;;  %v7404_v0 = vadd.f32 %v16198_v43, %v7331_v25  ;;  %v12373_v6 = vpop.f32.mrb[38].mxu1  ;;  %v16504_v14 = vld [vmem:[#allocation12_spill] sm:$0xff] }
 0x3ff   : > { %v7423_v41 = vmul.f32 %v16200_v8, %v7406_v40  ;;  %v7407_v3 = vadd.f32 %v12373_v6, %v16198_v43  ;;  %v7334_v16 = vpop.f32.mrb[39].mxu1  ;;  %v5444_v53 = vadd.f32 %v16207_v38, %v16504_v14 }
 0x400   : > { %v7421_v49 = vmul.f32 %v16200_v8, %v7404_v0  ;;  %v7405_v48 = vadd.f32 %v16198_v43, %v7334_v16  ;;  %v16505_v0 = vld [vmem:[#allocation13_spill] sm:$0xff] }
 0x401   : > { %v7439_v35 = vadd.f32 %v7423_v41, %v5409_v20  ;;  %v7424_v46 = vmul.f32 %v16200_v8, %v7407_v3  ;;  %v5436_v6 = vadd.f32 %v16207_v38, %v16505_v0 }
 0x402   : > { %v7437_v29 = vadd.f32 %v7421_v49, %v5401_v36  ;;  %v7422_v55 = vmul.f32 %v16200_v8, %v7405_v48 }
 0x403   : > { %7455 = vst [vmem:[%s16220_s15 + $0x30] sm:$0xff] %v7439_v35  ;;  %v7440_v1 = vadd.f32 %v7424_v46, %v5412_v61 }
 0x404   : > { %7453 = vst [vmem:[%s16220_s15 + $0x20] sm:$0xff] %v7437_v29  ;;  %v7438_v31 = vadd.f32 %v7422_v55, %v5404_v27  ;;  %v12376_v24 = vpop.f32.mrb[40].mxu1  ;;  %v16506_v55 = vld [vmem:[#allocation14_spill] sm:$0xff] }
 0x405   : > { %7456 = vst [vmem:[%s16220_s15 + $0x38] sm:$0xff] %v7440_v1  ;;  %v7410_v15 = vadd.f32 %v12376_v24, %v16198_v43  ;;  %v7347_v32 = vpop.f32.mrb[41].mxu1  ;;  %v16507_v24 = vld [vmem:[#allocation15_spill] sm:$0xff] }
 0x406   : > { %7454 = vst [vmem:[%s16220_s15 + $0x28] sm:$0xff] %v7438_v31  ;;  %v7408_v58 = vadd.f32 %v16198_v43, %v7347_v32  ;;  %v12377_v42 = vpop.f32.mrb[42].mxu1 }
 0x407   : > { %v7427_v62 = vmul.f32 %v16200_v8, %v7410_v15  ;;  %v7411_v37 = vadd.f32 %v12377_v42, %v16198_v43  ;;  %v7350_v44 = vpop.f32.mrb[43].mxu1 }
 0x408   : > { %v7425_v12 = vmul.f32 %v16200_v8, %v7408_v58  ;;  %v7409_v60 = vadd.f32 %v16198_v43, %v7350_v44  ;;  %v16508_v58 = vld [vmem:[#allocation16_spill] sm:$0xff] }
 0x409   : > { %v7443_v7 = vadd.f32 %v7427_v62, %v5425_v50  ;;  %v7428_v34 = vmul.f32 %v16200_v8, %v7411_v37 }
 0x40a   : > { %v7441_v10 = vadd.f32 %v7425_v12, %v5417_v63  ;;  %v7426_v18 = vmul.f32 %v16200_v8, %v7409_v60 }
 0x40b   : > { %7459 = vst [vmem:[%s16220_s15 + $0x50] sm:$0xff] %v7443_v7  ;;  %v7444_v56 = vadd.f32 %v7428_v34, %v5428_v51  ;;  %v16510_v34 = vld [vmem:[#allocation18_spill] sm:$0xff] }
 0x40c   : > { %7457 = vst [vmem:[%s16220_s15 + $0x40] sm:$0xff] %v7441_v10  ;;  %v7442_v4 = vadd.f32 %v7426_v18, %v5420_v13  ;;  %v12380_v2 = vpop.f32.mrb[44].mxu1  ;;  %v16511_v10 = vld [vmem:[#allocation19_spill] sm:$0xff] }
 0x40d   : > { %7460 = vst [vmem:[%s16220_s15 + $0x58] sm:$0xff] %v7444_v56  ;;  %v7414_v17 = vadd.f32 %v12380_v2, %v16198_v43  ;;  %v7363_v45 = vpop.f32.mrb[45].mxu1 }
 0x40e   : > { %7458 = vst [vmem:[%s16220_s15 + $0x48] sm:$0xff] %v7442_v4  ;;  %v7412_v19 = vadd.f32 %v16198_v43, %v7363_v45  ;;  %v12381_v52 = vpop.f32.mrb[46].mxu1  ;;  %v16512_v4 = vld [vmem:[#allocation20_spill] sm:$0xff] }
 0x40f   : > { %v7431_v54 = vmul.f32 %v16200_v8, %v7414_v17  ;;  %v7415_v21 = vadd.f32 %v12381_v52, %v16198_v43  ;;  %v7366_v11 = vpop.f32.mrb[47].mxu1  ;;  %v16513_v17 = vld [vmem:[#allocation21_spill] sm:$0xff] }
 0x410   : > { %v7429_v39 = vmul.f32 %v16200_v8, %v7412_v19  ;;  %v7413_v23 = vadd.f32 %v16198_v43, %v7366_v11 }
 0x411   : > { %v7447_v40 = vadd.f32 %v7431_v54, %v5441_v26  ;;  %v7432_v25 = vmul.f32 %v16200_v8, %v7415_v21 }
 0x412   : > { %v7445_v20 = vadd.f32 %v7429_v39, %v5433_v9  ;;  %v7430_v41 = vmul.f32 %v16200_v8, %v7413_v23  ;;  %v16514_v23 = vld [vmem:[#allocation22_spill] sm:$0xff] }
 0x413   : > { %7463 = vst [vmem:[%s16220_s15 + $0x70] sm:$0xff] %v7447_v40  ;;  %v7448_v3 = vadd.f32 %v7432_v25, %v5444_v53  ;;  %v16515_v40 = vld [vmem:[#allocation23_spill] sm:$0xff] }
 0x414   : > { %7461 = vst [vmem:[%s16220_s15 + $0x60] sm:$0xff] %v7445_v20  ;;  %v7446_v16 = vadd.f32 %v7430_v41, %v5436_v6  ;;  %v16516_v6 = vld [vmem:[#allocation24_spill] sm:$0xff]  ;;  %v16517_v41 = vld [vmem:[#allocation25_spill] sm:$0xff] }
 0x415   : > { %7464 = vst [vmem:[%s16220_s15 + $0x78] sm:$0xff] %v7448_v3 }
 0x416   : > { %7462 = vst [vmem:[%s16220_s15 + $0x68] sm:$0xff] %v7446_v16 }
 0x439   : > { %v12656_v36 = vpop.f32.mrb[48].mxu0 }
 0x43a   : > { %v9340_v49 = vadd.f32 %v12656_v36, %v16198_v43  ;;  %v9259_v48 = vpop.f32.mrb[49].mxu0 }
 0x43b   : > { %v9338_v61 = vadd.f32 %v16198_v43, %v9259_v48  ;;  %v12657_v35 = vpop.f32.mrb[50].mxu0 }
 0x43c   : > { %v9356_v38 = vmul.f32 %v9340_v49, %v16200_v8  ;;  %v9341_v46 = vadd.f32 %v12657_v35, %v16198_v43  ;;  %v9262_v22 = vpop.f32.mrb[51].mxu0 }
 0x43d   : > { %v9354_v27 = vmul.f32 %v9338_v61, %v16200_v8  ;;  %v9339_v29 = vadd.f32 %v16198_v43, %v9262_v22 }
 0x43e   : > { %v9372_v1 = vadd.f32 %v9356_v38, %v16506_v55  ;;  %v9357_v31 = vmul.f32 %v9341_v46, %v16200_v8 }
 0x43f   : > { %v9370_v15 = vadd.f32 %v9354_v27, %v16507_v24  ;;  %v9355_v32 = vmul.f32 %v9339_v29, %v16200_v8  ;;  %v16518_v29 = vld [vmem:[#allocation26_spill] sm:$0xff] }
 0x440   : > { %9388 = vst [vmem:[%s16220_s15 + $0x90] sm:$0xff] %v9372_v1  ;;  %v9373_v42 = vadd.f32 %v9357_v31, %v16508_v58  ;;  %v16519_v31 = vld [vmem:[#allocation27_spill] sm:$0xff] }
 0x441   : > { %9386 = vst [vmem:[%s16220_s15 + $0x80] sm:$0xff] %v9370_v15  ;;  %v9371_v50 = vadd.f32 %v9355_v32, %v16509_v5  ;;  %v12660_v62 = vpop.f32.mrb[52].mxu0  ;;  %v16520_v32 = vld [vmem:[#allocation28_spill] sm:$0xff] }
 0x442   : > { %9389 = vst [vmem:[%s16220_s15 + $0x98] sm:$0xff] %v9373_v42  ;;  %v9344_v37 = vadd.f32 %v12660_v62, %v16198_v43  ;;  %v9275_v44 = vpop.f32.mrb[53].mxu0 }
 0x443   : > { %9387 = vst [vmem:[%s16220_s15 + $0x88] sm:$0xff] %v9371_v50  ;;  %v9342_v28 = vadd.f32 %v16198_v43, %v9275_v44  ;;  %v12661_v63 = vpop.f32.mrb[54].mxu0 }
 0x444   : > { %v9360_v12 = vmul.f32 %v9344_v37, %v16200_v8  ;;  %v9345_v60 = vadd.f32 %v12661_v63, %v16198_v43  ;;  %v9278_v33 = vpop.f32.mrb[55].mxu0 }
 0x445   : > { %v9358_v51 = vmul.f32 %v9342_v28, %v16200_v8  ;;  %v9343_v7 = vadd.f32 %v16198_v43, %v9278_v33 }
 0x446   : > { %v9376_v47 = vadd.f32 %v9360_v12, %v16510_v34  ;;  %v9361_v13 = vmul.f32 %v9345_v60, %v16200_v8 }
 0x447   : > { %v9374_v18 = vadd.f32 %v9358_v51, %v16511_v10  ;;  %v9359_v56 = vmul.f32 %v9343_v7, %v16200_v8 }
 0x448   : > { %9392 = vst [vmem:[%s16220_s15 + $0xb0] sm:$0xff] %v9376_v47  ;;  %v9377_v2 = vadd.f32 %v9361_v13, %v16512_v4 }
 0x449   : > { %9390 = vst [vmem:[%s16220_s15 + $0xa0] sm:$0xff] %v9374_v18  ;;  %v9375_v45 = vadd.f32 %v9359_v56, %v16513_v17  ;;  %v12664_v19 = vpop.f32.mrb[56].mxu0 }
 0x44a   : > { %9393 = vst [vmem:[%s16220_s15 + $0xb8] sm:$0xff] %v9377_v2  ;;  %v9348_v52 = vadd.f32 %v12664_v19, %v16198_v43  ;;  %v9291_v59 = vpop.f32.mrb[57].mxu0 }
 0x44b   : > { %9391 = vst [vmem:[%s16220_s15 + $0xa8] sm:$0xff] %v9375_v45  ;;  %v9346_v26 = vadd.f32 %v16198_v43, %v9291_v59  ;;  %v12665_v54 = vpop.f32.mrb[58].mxu0 }
 0x44c   : > { %v9364_v21 = vmul.f32 %v9348_v52, %v16200_v8  ;;  %v9349_v11 = vadd.f32 %v12665_v54, %v16198_v43  ;;  %v9294_v30 = vpop.f32.mrb[59].mxu0 }
 0x44d   : > { %v9362_v9 = vmul.f32 %v9346_v26, %v16200_v8  ;;  %v9347_v39 = vadd.f32 %v16198_v43, %v9294_v30 }
 0x44e   : > { %v9380_v14 = vadd.f32 %v9364_v21, %v16514_v23  ;;  %v9365_v53 = vmul.f32 %v9349_v11, %v16200_v8 }
 0x44f   : > { %v9378_v25 = vadd.f32 %v9362_v9, %v16515_v40  ;;  %v9363_v0 = vmul.f32 %v9347_v39, %v16200_v8 }
 0x450   : > { %9396 = vst [vmem:[%s16220_s15 + $0xd0] sm:$0xff] %v9380_v14  ;;  %v9381_v20 = vadd.f32 %v9365_v53, %v16516_v6 }
 0x451   : > { %9394 = vst [vmem:[%s16220_s15 + $0xc0] sm:$0xff] %v9378_v25  ;;  %v9379_v3 = vadd.f32 %v9363_v0, %v16517_v41  ;;  %v12668_v16 = vpop.f32.mrb[60].mxu0 }
 0x452   : > { %9397 = vst [vmem:[%s16220_s15 + $0xd8] sm:$0xff] %v9381_v20  ;;  %v9352_v36 = vadd.f32 %v12668_v16, %v16198_v43  ;;  %v9307_v49 = vpop.f32.mrb[61].mxu0 }
 0x453   : > { %9395 = vst [vmem:[%s16220_s15 + $0xc8] sm:$0xff] %v9379_v3  ;;  %v9350_v48 = vadd.f32 %v16198_v43, %v9307_v49  ;;  %v12669_v61 = vpop.f32.mrb[62].mxu0 }
 0x454   : > { %v9368_v35 = vmul.f32 %v9352_v36, %v16200_v8  ;;  %v9353_v38 = vadd.f32 %v12669_v61, %v16198_v43  ;;  %v9310_v46 = vpop.f32.mrb[63].mxu0 }
 0x455   : > { %v9366_v22 = vmul.f32 %v9350_v48, %v16200_v8  ;;  %v9351_v27 = vadd.f32 %v16198_v43, %v9310_v46 }
 0x456   : > { %v9384_v55 = vadd.f32 %v9368_v35, %v16518_v29  ;;  %v9369_v1 = vmul.f32 %v9353_v38, %v16200_v8 }
 0x457   : > { %v9382_v24 = vadd.f32 %v9366_v22, %v16519_v31  ;;  %v9367_v15 = vmul.f32 %v9351_v27, %v16200_v8 }
 0x458   : > { %9400 = vst [vmem:[%s16220_s15 + $0xf0] sm:$0xff] %v9384_v55  ;;  %v9385_v58 = vadd.f32 %v9369_v1, %v16520_v32 }
 0x459   : > { %9398 = vst [vmem:[%s16220_s15 + $0xe0] sm:$0xff] %v9382_v24  ;;  %v9383_v42 = vadd.f32 %v9367_v15, %v15787_v57 }
 0x45a   : > { %9401 = vst [vmem:[%s16220_s15 + $0xf8] sm:$0xff] %v9385_v58 }
 0x45b   : > { %9399 = vst [vmem:[%s16220_s15 + $0xe8] sm:$0xff] %v9383_v42 }
 0x45c PF: > { %s20_s11 = sadd.s32 1, %s13501_s11  }
 0x45d   : > { %p17_p4 = scmp.ge.s32.totalorder %s20_s11, 4  }
 0x45f   :  { %19 = sbr.rel (!%p17_p4) target bundleno = 2 (0x2), region = 105 }

</bundles_post_ra>
